<compile_context>
chip_gen: v6e
topology: v6e:2x2x1
jax: 0.10.0
libtpu: 0.0.40
codegen_flags: <defaults>
</compile_context>

<pallas_src>
import functools

import numpy as np
import jax
import jax.numpy as jnp
from jax.experimental import pallas as pl
from jax.experimental.pallas import tpu as pltpu


def build_meet_convolve_tensor(signal_dim, kernel_dim, kernel_loc):
    """Same semantics as the PyTorch helper: M[i, j, k] = 1 iff i == min(j, k + loc)."""
    M = np.zeros((signal_dim, signal_dim, kernel_dim), dtype=np.float32)
    for i in range(signal_dim):
        for j in range(i, signal_dim):
            for k in range(kernel_dim):
                if i == min(j, k + kernel_loc):
                    M[i, j, k] = 1.0
    return jnp.asarray(M)


def _meet_conv2d_kernel(x_ref, u_ref, b_ref, o_ref):
    # x_ref : (TM, F*Sx*Sy)      flattened (f, i, j) per batch row
    # u_ref : (F*Sx*Sy, G*Sx*Sy) combined conv_x (x) conv_y (x) W operator
    # b_ref : (1, G*Sx*Sy)       bias broadcast over (x, y), per column (g, x, y)
    # o_ref : (TM, G*Sx*Sy)
    acc = jnp.dot(x_ref[...], u_ref[...], preferred_element_type=jnp.float32)
    o_ref[...] = (acc + b_ref[...]).astype(o_ref.dtype)


def meet_conv2d(x_nchw, conv_x, conv_y, weights, bias, *, row_tile=128):
    """x_nchw: (M, F, Sx, Sy) -> (M, G, Sx, Sy), matching the PyTorch module."""
    M, F, Sx, Sy = x_nchw.shape
    Kx, Ky, _F, G = weights.shape
    K = F * Sx * Sy          # contraction length (lane-dense, multiple of 128 here)
    N = G * Sx * Sy          # output columns   (lane-dense, multiple of 128 here)

    # ---- Wrapper-side precompute (glue): fold the structural tensors + weights
    # into one operator.  conv_x/conv_y are fixed buffers; U only changes when
    # the weights change.
    U = jnp.einsum('ixa,jyb,abfg->fijgxy', conv_x, conv_y, weights)
    U = U.reshape(K, N).astype(jnp.float32)

    # Bias per output column (g, x, y): depends only on g.
    bias_row = jnp.broadcast_to(bias.reshape(G, 1), (G, Sx * Sy)).reshape(1, N)
    bias_row = bias_row.astype(jnp.float32)

    # Fold batch into matmul rows.
    Xf = x_nchw.reshape(M, K).astype(jnp.float32)

    # Row tiling over the batch (one step for small M; "parallel" for v7x 2 TCs).
    TM = M if M <= row_tile else row_tile
    Mp = pl.cdiv(M, TM) * TM
    if Mp != M:
        Xf = jnp.pad(Xf, ((0, Mp - M), (0, 0)))

    out_flat = pl.pallas_call(
        _meet_conv2d_kernel,
        out_shape=jax.ShapeDtypeStruct((Mp, N), jnp.float32),
        grid=(Mp // TM,),
        in_specs=[
            pl.BlockSpec((TM, K), lambda i: (i, 0)),   # X row tile
            pl.BlockSpec((K, N), lambda i: (0, 0)),    # operator, resident
            pl.BlockSpec((1, N), lambda i: (0, 0)),    # bias row, resident
        ],
        out_specs=pl.BlockSpec((TM, N), lambda i: (i, 0)),
        compiler_params=pltpu.CompilerParams(
            dimension_semantics=("parallel",),
            # 8 MB f32 operator is double-buffered by the pipeline; raise the
            # scoped limit above v5e's 16 MiB default, still < v7x's 64 MiB.
            vmem_limit_bytes=48 * 1024 * 1024,
        ),
    )(Xf, U, bias_row)

    return out_flat[:M].reshape(M, G, Sx, Sy)   # NCHW, same as PyTorch


if __name__ == "__main__":
    # Module hyper-parameters (small, consistent with the forward).
    signal_dim = (16, 16)
    kernel_dim = (3, 3)
    kernel_loc = (0, 0)
    in_features = 4
    out_features = 8
    batch = 2

    conv_x = build_meet_convolve_tensor(signal_dim[0], kernel_dim[0], kernel_loc[0])
    conv_y = build_meet_convolve_tensor(signal_dim[1], kernel_dim[1], kernel_loc[1])

    key = jax.random.PRNGKey(0)
    kw, kx = jax.random.split(key)

    # Deterministic kaiming_normal_-style init for weights (fan_in = dim1 * prod(dims[2:])),
    # zeros for bias, matching initialize_weights().
    fan_in = kernel_dim[1] * in_features * out_features
    std = float(np.sqrt(2.0 / fan_in))
    weights = jax.random.normal(
        kw, (kernel_dim[0], kernel_dim[1], in_features, out_features), jnp.float32) * std
    bias = jnp.zeros((out_features, 1, 1), jnp.float32)

    X = jax.random.normal(
        kx, (batch, in_features, signal_dim[0], signal_dim[1]), jnp.float32)

    y = meet_conv2d(X, conv_x, conv_y, weights, bias)
    y = jax.block_until_ready(y)

    # Pure-JAX reference of the PyTorch forward for self-validation.
    ref = jnp.einsum('ixa,jyb,mfij,abfg->mgxy', conv_x, conv_y, X, weights) + bias
    np.testing.assert_allclose(np.asarray(y), np.asarray(ref), rtol=1e-4, atol=1e-4)

    print("KERNEL_OK")
</pallas_src>

<mosaic_0001>
module attributes {stable_mosaic.version = 11 : i64} {
  func.func @_meet_conv2d_kernel(%arg0: i32, %arg1: memref<2x1024xf32, #tpu.memory_space<vmem>>, %arg2: memref<1024x2048xf32, #tpu.memory_space<vmem>>, %arg3: memref<1x2048xf32, #tpu.memory_space<vmem>>, %arg4: memref<2x2048xf32, #tpu.memory_space<vmem>>) attributes {dimension_semantics = [#tpu.dimension_semantics<parallel>], iteration_bounds = array<i64: 1>, scalar_prefetch = 0 : i64, scratch_operands = 0 : i64, tpu.core_type = #tpu.core_type<tc>, window_params = [{transform_indices = @transform_0, window_bounds = array<i64: 2, 1024>}, {pipeline_mode = #tpu.pipeline_mode<synchronous>, transform_indices = @transform_1, window_bounds = array<i64: 1024, 2048>}, {pipeline_mode = #tpu.pipeline_mode<synchronous>, transform_indices = @transform_2, window_bounds = array<i64: 1, 2048>}, {transform_indices = @transform_3, window_bounds = array<i64: 2, 2048>}]} {
    %c0 = arith.constant 0 : index
    %c0_0 = arith.constant 0 : index
    %0 = vector.load %arg1[%c0, %c0_0] : memref<2x1024xf32, #tpu.memory_space<vmem>>, vector<2x1024xf32>
    %c0_1 = arith.constant 0 : index
    %c0_2 = arith.constant 0 : index
    %1 = vector.load %arg2[%c0_1, %c0_2] : memref<1024x2048xf32, #tpu.memory_space<vmem>>, vector<1024x2048xf32>
    %cst = arith.constant dense<0.000000e+00> : vector<2x2048xf32>
    %2 = tpu.matmul %0, %1, %cst {dimension_numbers = #tpu.dot_dimension_numbers<[1], [0], [0], [1], [0, 0, 1, 1], [], []>} : vector<2x1024xf32>, vector<1024x2048xf32>, vector<2x2048xf32> -> vector<2x2048xf32>
    %c0_3 = arith.constant 0 : index
    %c0_4 = arith.constant 0 : index
    %3 = vector.load %arg3[%c0_3, %c0_4] : memref<1x2048xf32, #tpu.memory_space<vmem>>, vector<1x2048xf32>
    %4 = vector.broadcast %3 : vector<1x2048xf32> to vector<2x2048xf32>
    %5 = arith.addf %2, %4 : vector<2x2048xf32>
    %c0_5 = arith.constant 0 : index
    %c0_6 = arith.constant 0 : index
    %6 = vector.load %arg4[%c0_5, %c0_6] : memref<2x2048xf32, #tpu.memory_space<vmem>>, vector<2x2048xf32>
    tpu.vector_store %arg4[%c0_5, %c0_6], %5 {strides = array<i32>} : memref<2x2048xf32, #tpu.memory_space<vmem>>, vector<2x2048xf32>,
    return
  }
  func.func @transform_0(%arg0: i32) -> (i32, i32) {
    %c0_i32 = arith.constant 0 : i32
    %c0_i32_0 = arith.constant 0 : i32
    return %arg0, %c0_i32 : i32, i32
  }
  func.func @transform_1(%arg0: i32) -> (i32, i32) {
    %c0_i32 = arith.constant 0 : i32
    %c0_i32_0 = arith.constant 0 : i32
    %c0_i32_1 = arith.constant 0 : i32
    return %c0_i32, %c0_i32_0 : i32, i32
  }
  func.func @transform_2(%arg0: i32) -> (i32, i32) {
    %c0_i32 = arith.constant 0 : i32
    %c0_i32_0 = arith.constant 0 : i32
    %c0_i32_1 = arith.constant 0 : i32
    return %c0_i32, %c0_i32_0 : i32, i32
  }
  func.func @transform_3(%arg0: i32) -> (i32, i32) {
    %c0_i32 = arith.constant 0 : i32
    %c0_i32_0 = arith.constant 0 : i32
    return %arg0, %c0_i32 : i32, i32
  }
}

</mosaic_0001>

<bundles_post_ra>
// kernel: tpu_custom_call.1
= control target key start
LH: loop header
LB: loop body
LE: loop exit
PB: predicated region body
PF: predicated region fallthrough
CT: control target
= control target key end

     0   :  { %8 = vsyncpa [#allocation3], 0  ;;  %s4936_s0 = inlined_call_operand.hbm [shape: f32[2,1024], index: 0, kind: input, shape index: {}]   ;;  %s4937_s1 = inlined_call_operand.hbm [shape: f32[1024,2048], index: 1, kind: input, shape index: {}]   ;;  %s4938_s2 = inlined_call_operand.hbm [shape: f32[1,2048], index: 2, kind: input, shape index: {}]   ;;  %s4939_s3 = inlined_call_operand.hbm [shape: f32[2,2048], index: 3, kind: output, shape index: {}]  }
   0x1   :  { %9 = vsyncpa [#allocation6], 0 }
   0x2   :  { %10 = vsyncpa [#allocation4], 0  ;;  %s4706_s12 = smov [#allocation5]  }
   0x3   :  { %s26_s13 = sshll.u32 %s4706_s12, 4  ;;  %s27_s13 = int_to_ptr.vmem [resolvable:$true] %s26_s13 }
   0x4   :  { %s4628_s14 = scalar_lea.vmem %s27_s13, 262144  ;;  %p4633_p1 = scmp.lt.s32.totalorder %s27_s13, %s27_s13 }
   0x5   :  { %p4629_p0 = scmp.ne.s32.totalorder %s27_s13, %s4628_s14  ;;  %p4634_p2 = scmp.lt.s32.totalorder %s4628_s14, %s4628_s14 }
   0x7   :  { %p4635_p3 = por %p4634_p2, %p4633_p1 }
   0x9   :  { %p4636_p4 = pnand %p4635_p3, %p4629_p0 }
   0xb   :  { %4639 = shalt.err (!%p4636_p4)
}
   0xc   :  { %s4707_s15 = smov 2048   ;;  %s4708_s16 = smov 128  }
   0xd   :  { %32 = dma.hbm_to_vmem [thread:$0]  %s4937_s1, 262144, %s27_s13, [#allocation6], %s4707_s15, %s4707_s15, %s4708_s16  }
   0xe   :  { %s4709_s19 = smov [#allocation2]   ;;  %s4710_s21 = smov [#allocation7]  }
   0xf   :  { %s17_s20 = sshll.u32 %s4709_s19, 4  ;;  %s39_s22 = sshll.u32 %s4710_s21, 4  ;;  %s18_s20 = int_to_ptr.vmem [resolvable:$true] %s17_s20  ;;  %s40_s22 = int_to_ptr.vmem [resolvable:$true] %s39_s22 }
  0x10   :  { %s4648_s23 = scalar_lea.vmem %s18_s20, 256  ;;  %p4653_p6 = scmp.lt.s32.totalorder %s18_s20, %s18_s20 }
  0x11   :  { %p4649_p5 = scmp.ne.s32.totalorder %s18_s20, %s4648_s23  ;;  %p4654_p7 = scmp.lt.s32.totalorder %s4648_s23, %s4648_s23 }
  0x13   :  { %p4655_p8 = por %p4654_p7, %p4653_p6 }
  0x15   :  { %p4656_p9 = pnand %p4655_p8, %p4649_p5 }
  0x17   :  { %4659 = shalt.err (!%p4656_p9)
}
  0x18   :  { %20 = dma.hbm_to_vmem [thread:$0]  %s4936_s0, 256, %s18_s20, [#allocation3]  }
  0x19   :  { %s4668_s26 = scalar_lea.vmem %s40_s22, 256  ;;  %p4673_p11 = scmp.lt.s32.totalorder %s40_s22, %s40_s22 }
  0x1a   :  { %p4669_p10 = scmp.ne.s32.totalorder %s40_s22, %s4668_s26  ;;  %p4674_p12 = scmp.lt.s32.totalorder %s4668_s26, %s4668_s26 }
  0x1c   :  { %p4675_p13 = por %p4674_p12, %p4673_p11 }
  0x1e   :  { %p4676_p0 = pnand %p4675_p13, %p4669_p10 }
  0x20   :  { %4679 = shalt.err (!%p4676_p0)
}
  0x21   :  { %42 = dma.hbm_to_vmem [thread:$0]  %s4938_s2, 256, %s40_s22, [#allocation6]  }
  0x22   :  { %4700 = dma.done.wait [#allocation3], 256  }
  0x23   :  { %4701 = vsyncadd [#allocation3], 4294967040 }
  0x24   :  { %4702 = dma.done.wait [#allocation6], 262400  }
  0x25   :  { %4703 = vsyncadd [#allocation6], 4294704896  ;;  %v295_v0 = vld [vmem:[#allocation5 + $0x788] sm:$0xff]  ;;  %v294_v2 = vld [vmem:[#allocation5 + $0x780] sm:$0xff]  ;;  %s4712_s0 = smov [#allocation8]  }
  0x26   :  { %v807_v1 = vld [vmem:[#allocation5 + $0x1788] sm:$0xff]  ;;  %2230 = vmatprep.subr.mxu0 %v295_v0  ;;  %v806_v3 = vld [vmem:[#allocation5 + $0x1780] sm:$0xff]  ;;  %s4600_s2 = sshll.u32 %s4712_s0, 4  ;;  %s4601_s2 = int_to_ptr.vmem [resolvable:$true] %s4600_s2 }
  0x27   :  { %2301 = vmatprep.subr.mxu1 %v807_v1  ;;  %v279_v4 = vld [vmem:[#allocation5 + $0x708] sm:$0xff]  ;;  %2231 = vmatpush1.msra.mxu0 %v294_v2  ;;  %v278_v6 = vld [vmem:[#allocation5 + $0x700] sm:$0xff]  ;;  %s4680_s28 = scalar_lea.vmem %s4601_s2, 512  ;;  %p4685_p2 = scmp.lt.s32.totalorder %s4601_s2, %s4601_s2 }
  0x28   :  { %v791_v5 = vld [vmem:[#allocation5 + $0x1708] sm:$0xff]  ;;  %2302 = vmatpush1.msra.mxu1 %v806_v3  ;;  %v790_v7 = vld [vmem:[#allocation5 + $0x1700] sm:$0xff]  ;;  %2232 = vmatprep.subr.mxu0 %v279_v4  ;;  %p4681_p1 = scmp.ne.s32.totalorder %s4601_s2, %s4680_s28  ;;  %p4686_p3 = scmp.lt.s32.totalorder %s4680_s28, %s4680_s28 }
  0x29   :  { %v263_v8 = vld [vmem:[#allocation5 + $0x688] sm:$0xff]  ;;  %2303 = vmatprep.subr.mxu1 %v791_v5  ;;  %v262_v10 = vld [vmem:[#allocation5 + $0x680] sm:$0xff]  ;;  %2233 = vmatpush1.msra.mxu0 %v278_v6 }
  0x2a   :  { %v775_v9 = vld [vmem:[#allocation5 + $0x1688] sm:$0xff]  ;;  %v774_v11 = vld [vmem:[#allocation5 + $0x1680] sm:$0xff]  ;;  %2304 = vmatpush1.msra.mxu1 %v790_v7  ;;  %2234 = vmatprep.subr.mxu0 %v263_v8  ;;  %p4687_p4 = por %p4686_p3, %p4685_p2 }
  0x2b   :  { %v247_v12 = vld [vmem:[#allocation5 + $0x608] sm:$0xff]  ;;  %2305 = vmatprep.subr.mxu1 %v775_v9  ;;  %v246_v14 = vld [vmem:[#allocation5 + $0x600] sm:$0xff]  ;;  %2235 = vmatpush1.msra.mxu0 %v262_v10 }
  0x2c   :  { %v759_v13 = vld [vmem:[#allocation5 + $0x1608] sm:$0xff]  ;;  %v758_v15 = vld [vmem:[#allocation5 + $0x1600] sm:$0xff]  ;;  %2306 = vmatpush1.msra.mxu1 %v774_v11  ;;  %2236 = vmatprep.subr.mxu0 %v247_v12  ;;  %p4688_p5 = pnand %p4687_p4, %p4681_p1 }
  0x2d   :  { %v231_v16 = vld [vmem:[#allocation5 + $0x588] sm:$0xff]  ;;  %2307 = vmatprep.subr.mxu1 %v759_v13  ;;  %v230_v18 = vld [vmem:[#allocation5 + $0x580] sm:$0xff]  ;;  %2237 = vmatpush1.msra.mxu0 %v246_v14 }
  0x2e   :  { %v743_v17 = vld [vmem:[#allocation5 + $0x1588] sm:$0xff]  ;;  %v742_v19 = vld [vmem:[#allocation5 + $0x1580] sm:$0xff]  ;;  %2308 = vmatpush1.msra.mxu1 %v758_v15  ;;  %2238 = vmatprep.subr.mxu0 %v231_v16 }
  0x2f   :  { %v215_v20 = vld [vmem:[#allocation5 + $0x508] sm:$0xff]  ;;  %2309 = vmatprep.subr.mxu1 %v743_v17  ;;  %v214_v22 = vld [vmem:[#allocation5 + $0x500] sm:$0xff]  ;;  %2239 = vmatpush1.msra.mxu0 %v230_v18 }
  0x30   :  { %v727_v21 = vld [vmem:[#allocation5 + $0x1508] sm:$0xff]  ;;  %v726_v23 = vld [vmem:[#allocation5 + $0x1500] sm:$0xff]  ;;  %2310 = vmatpush1.msra.mxu1 %v742_v19  ;;  %2240 = vmatprep.subr.mxu0 %v215_v20 }
  0x31   :  { %v199_v24 = vld [vmem:[#allocation5 + $0x488] sm:$0xff]  ;;  %2311 = vmatprep.subr.mxu1 %v727_v21  ;;  %v198_v26 = vld [vmem:[#allocation5 + $0x480] sm:$0xff]  ;;  %2241 = vmatpush1.msra.mxu0 %v214_v22 }
  0x32   :  { %v711_v25 = vld [vmem:[#allocation5 + $0x1488] sm:$0xff]  ;;  %v710_v27 = vld [vmem:[#allocation5 + $0x1480] sm:$0xff]  ;;  %2312 = vmatpush1.msra.mxu1 %v726_v23  ;;  %2242 = vmatprep.subr.mxu0 %v199_v24 }
  0x33   :  { %v183_v28 = vld [vmem:[#allocation5 + $0x408] sm:$0xff]  ;;  %2313 = vmatprep.subr.mxu1 %v711_v25  ;;  %v182_v30 = vld [vmem:[#allocation5 + $0x400] sm:$0xff]  ;;  %2243 = vmatpush1.msra.mxu0 %v198_v26 }
  0x34   :  { %v695_v29 = vld [vmem:[#allocation5 + $0x1408] sm:$0xff]  ;;  %v694_v31 = vld [vmem:[#allocation5 + $0x1400] sm:$0xff]  ;;  %2314 = vmatpush1.msra.mxu1 %v710_v27  ;;  %2244 = vmatprep.subr.mxu0 %v183_v28 }
  0x35   :  { %v167_v32 = vld [vmem:[#allocation5 + $0x388] sm:$0xff]  ;;  %2315 = vmatprep.subr.mxu1 %v695_v29  ;;  %v166_v34 = vld [vmem:[#allocation5 + $0x380] sm:$0xff]  ;;  %2245 = vmatpush1.msra.mxu0 %v182_v30  ;;  %v2106_v30 = vlaneseq }
  0x36   :  { %v679_v33 = vld [vmem:[#allocation5 + $0x1388] sm:$0xff]  ;;  %v678_v35 = vld [vmem:[#allocation5 + $0x1380] sm:$0xff]  ;;  %2316 = vmatpush1.msra.mxu1 %v694_v31  ;;  %2246 = vmatprep.subr.mxu0 %v167_v32  ;;  %v4711_v31 = vmov 1983009808  }
  0x37   :  { %v151_v36 = vld [vmem:[#allocation5 + $0x308] sm:$0xff]  ;;  %2317 = vmatprep.subr.mxu1 %v679_v33  ;;  %v150_v38 = vld [vmem:[#allocation5 + $0x300] sm:$0xff]  ;;  %2247 = vmatpush1.msra.mxu0 %v166_v34  ;;  %v2190_v32 = vunpack.c.l.s4 %v4711_v31 }
  0x38   :  { %v663_v37 = vld [vmem:[#allocation5 + $0x1308] sm:$0xff]  ;;  %v662_v39 = vld [vmem:[#allocation5 + $0x1300] sm:$0xff]  ;;  %2318 = vmatpush1.msra.mxu1 %v678_v35  ;;  %2248 = vmatprep.subr.mxu0 %v151_v36 }
  0x39   :  { %v135_v40 = vld [vmem:[#allocation5 + $0x288] sm:$0xff]  ;;  %2319 = vmatprep.subr.mxu1 %v663_v37  ;;  %v134_v42 = vld [vmem:[#allocation5 + $0x280] sm:$0xff]  ;;  %2249 = vmatpush1.msra.mxu0 %v150_v38 }
  0x3a   :  { %v647_v41 = vld [vmem:[#allocation5 + $0x1288] sm:$0xff]  ;;  %v646_v43 = vld [vmem:[#allocation5 + $0x1280] sm:$0xff]  ;;  %2320 = vmatpush1.msra.mxu1 %v662_v39  ;;  %2250 = vmatprep.subr.mxu0 %v135_v40 }
  0x3b   :  { %v119_v44 = vld [vmem:[#allocation5 + $0x208] sm:$0xff]  ;;  %2321 = vmatprep.subr.mxu1 %v647_v41  ;;  %v118_v46 = vld [vmem:[#allocation5 + $0x200] sm:$0xff]  ;;  %2251 = vmatpush1.msra.mxu0 %v134_v42  ;;  %v4742_v41 = vshrl.u32 %v2106_v30, 7  ;;  %v2191_v42 = vunpack.c.0.s8 %v2190_v32 }
  0x3c   :  { %v631_v45 = vld [vmem:[#allocation5 + $0x1208] sm:$0xff]  ;;  %v630_v47 = vld [vmem:[#allocation5 + $0x1200] sm:$0xff]  ;;  %2322 = vmatpush1.msra.mxu1 %v646_v43  ;;  %2252 = vmatprep.subr.mxu0 %v119_v44 }
  0x3d   :  { %v103_v48 = vld [vmem:[#allocation5 + $0x188] sm:$0xff]  ;;  %2323 = vmatprep.subr.mxu1 %v631_v45  ;;  %v102_v50 = vld [vmem:[#allocation5 + $0x180] sm:$0xff]  ;;  %2253 = vmatpush1.msra.mxu0 %v118_v46 }
  0x3e   :  { %v615_v49 = vld [vmem:[#allocation5 + $0x1188] sm:$0xff]  ;;  %v614_v51 = vld [vmem:[#allocation5 + $0x1180] sm:$0xff]  ;;  %2324 = vmatpush1.msra.mxu1 %v630_v47  ;;  %2254 = vmatprep.subr.mxu0 %v103_v48 }
  0x3f   :  { %v87_v52 = vld [vmem:[#allocation5 + $0x108] sm:$0xff]  ;;  %2325 = vmatprep.subr.mxu1 %v615_v49  ;;  %v86_v54 = vld [vmem:[#allocation5 + $0x100] sm:$0xff]  ;;  %2255 = vmatpush1.msra.mxu0 %v102_v50  ;;  %v52_v49 = vld [vmem:[#allocation2] sm:$0xff] }
  0x40   :  { %v599_v53 = vld [vmem:[#allocation5 + $0x1108] sm:$0xff]  ;;  %v598_v55 = vld [vmem:[#allocation5 + $0x1100] sm:$0xff]  ;;  %2326 = vmatpush1.msra.mxu1 %v614_v51  ;;  %2256 = vmatprep.subr.mxu0 %v87_v52  ;;  %v4745_v52 = vsub.s32 %v2191_v42, %v4742_v41 }
  0x41   :  { %v71_v56 = vld [vmem:[#allocation5 + $0x88] sm:$0xff]  ;;  %2327 = vmatprep.subr.mxu1 %v599_v53  ;;  %v70_v58 = vld [vmem:[#allocation5 + $0x80] sm:$0xff]  ;;  %2257 = vmatpush1.msra.mxu0 %v86_v54 }
  0x42   :  { %v583_v57 = vld [vmem:[#allocation5 + $0x1088] sm:$0xff]  ;;  %v582_v59 = vld [vmem:[#allocation5 + $0x1080] sm:$0xff]  ;;  %2328 = vmatpush1.msra.mxu1 %v598_v55  ;;  %2258 = vmatprep.subr.mxu0 %v71_v56 }
  0x43   :  { %v55_v60 = vld [vmem:[#allocation5 + $0x8] sm:$0xff]  ;;  %2329 = vmatprep.subr.mxu1 %v583_v57  ;;  %v54_v62 = vld [vmem:[#allocation5] sm:$0xff]  ;;  %2259 = vmatpush1.msra.mxu0 %v70_v58  ;;  %v2188_v57 = vcombine.high %v52_v49, %v52_v49 }
  0x44   :  { %v567_v61 = vld [vmem:[#allocation5 + $0x1008] sm:$0xff]  ;;  %v566_v63 = vld [vmem:[#allocation5 + $0x1000] sm:$0xff]  ;;  %2330 = vmatpush1.msra.mxu1 %v582_v59  ;;  %2260 = vmatprep.subr.mxu0 %v55_v60 }
  0x45   :  { %v551_v0 = vld [vmem:[#allocation5 + $0xf88] sm:$0xff]  ;;  %2331 = vmatprep.subr.mxu1 %v567_v61  ;;  %v550_v2 = vld [vmem:[#allocation5 + $0xf80] sm:$0xff]  ;;  %2261 = vmatpush1.msra.mxu0 %v54_v62  ;;  %v4748_v62 = vrot.slane %v52_v49, %v4745_v52 }
  0x46   :  { %v1063_v1 = vld [vmem:[#allocation5 + $0x1f88] sm:$0xff]  ;;  %v1062_v3 = vld [vmem:[#allocation5 + $0x1f80] sm:$0xff]  ;;  %2332 = vmatpush1.msra.mxu1 %v566_v63  ;;  %2262 = vmatprep.subr.mxu0 %v551_v0 }
  0x47   :  { %v535_v4 = vld [vmem:[#allocation5 + $0xf08] sm:$0xff]  ;;  %2333 = vmatprep.subr.mxu1 %v1063_v1  ;;  %v534_v6 = vld [vmem:[#allocation5 + $0xf00] sm:$0xff]  ;;  %2263 = vmatpush2.msra.mxu0 %v550_v2 }
  0x48   :  { %v1047_v5 = vld [vmem:[#allocation5 + $0x1f08] sm:$0xff]  ;;  %v1046_v7 = vld [vmem:[#allocation5 + $0x1f00] sm:$0xff]  ;;  %2334 = vmatpush2.msra.mxu1 %v1062_v3  ;;  %2264 = vmatprep.subr.mxu0 %v535_v4  ;;  %v4751_v3 = vrot.slane %v2188_v57, %v4745_v52 }
  0x49   :  { %v519_v8 = vld [vmem:[#allocation5 + $0xe88] sm:$0xff]  ;;  %2335 = vmatprep.subr.mxu1 %v1047_v5  ;;  %v518_v10 = vld [vmem:[#allocation5 + $0xe80] sm:$0xff]  ;;  %2265 = vmatpush2.msra.mxu0 %v534_v6 }
  0x4a   :  { %v1031_v9 = vld [vmem:[#allocation5 + $0x1e88] sm:$0xff]  ;;  %v1030_v11 = vld [vmem:[#allocation5 + $0x1e80] sm:$0xff]  ;;  %2336 = vmatpush2.msra.mxu1 %v1046_v7  ;;  %2266 = vmatprep.subr.mxu0 %v519_v8  ;;  %v4755_v8 = vcombine.high %v4748_v62, %v4748_v62 }
  0x4b   :  { %v503_v12 = vld [vmem:[#allocation5 + $0xe08] sm:$0xff]  ;;  %2337 = vmatprep.subr.mxu1 %v1031_v9  ;;  %v502_v14 = vld [vmem:[#allocation5 + $0xe00] sm:$0xff]  ;;  %2267 = vmatpush2.msra.mxu0 %v518_v10 }
  0x4c   :  { %v1015_v13 = vld [vmem:[#allocation5 + $0x1e08] sm:$0xff]  ;;  %v1014_v15 = vld [vmem:[#allocation5 + $0x1e00] sm:$0xff]  ;;  %2338 = vmatpush2.msra.mxu1 %v1030_v11  ;;  %2268 = vmatprep.subr.mxu0 %v503_v12  ;;  %v4759_v11 = vcombine.high %v4751_v3, %v4751_v3 }
  0x4d   :  { %v487_v16 = vld [vmem:[#allocation5 + $0xd88] sm:$0xff]  ;;  %2339 = vmatprep.subr.mxu1 %v1015_v13  ;;  %v486_v18 = vld [vmem:[#allocation5 + $0xd80] sm:$0xff]  ;;  %2269 = vmatpush2.msra.mxu0 %v502_v14 }
  0x4e   :  { %v999_v17 = vld [vmem:[#allocation5 + $0x1d88] sm:$0xff]  ;;  %v998_v19 = vld [vmem:[#allocation5 + $0x1d80] sm:$0xff]  ;;  %2340 = vmatpush2.msra.mxu1 %v1014_v15  ;;  %2270 = vmatprep.subr.mxu0 %v487_v16 }
  0x4f   :  { %v471_v20 = vld [vmem:[#allocation5 + $0xd08] sm:$0xff]  ;;  %2341 = vmatprep.subr.mxu1 %v999_v17  ;;  %v470_v22 = vld [vmem:[#allocation5 + $0xd00] sm:$0xff]  ;;  %2271 = vmatpush2.msra.mxu0 %v486_v18 }
  0x50   :  { %v983_v21 = vld [vmem:[#allocation5 + $0x1d08] sm:$0xff]  ;;  %v982_v23 = vld [vmem:[#allocation5 + $0x1d00] sm:$0xff]  ;;  %2342 = vmatpush2.msra.mxu1 %v998_v19  ;;  %2272 = vmatprep.subr.mxu0 %v471_v20 }
  0x51   :  { %v455_v24 = vld [vmem:[#allocation5 + $0xc88] sm:$0xff]  ;;  %2343 = vmatprep.subr.mxu1 %v983_v21  ;;  %v454_v26 = vld [vmem:[#allocation5 + $0xc80] sm:$0xff]  ;;  %2273 = vmatpush2.msra.mxu0 %v470_v22 }
  0x52   :  { %v967_v25 = vld [vmem:[#allocation5 + $0x1c88] sm:$0xff]  ;;  %v966_v27 = vld [vmem:[#allocation5 + $0x1c80] sm:$0xff]  ;;  %2344 = vmatpush2.msra.mxu1 %v982_v23  ;;  %2274 = vmatprep.subr.mxu0 %v455_v24 }
  0x53   :  { %v439_v28 = vld [vmem:[#allocation5 + $0xc08] sm:$0xff]  ;;  %2345 = vmatprep.subr.mxu1 %v967_v25  ;;  %v438_v33 = vld [vmem:[#allocation5 + $0xc00] sm:$0xff]  ;;  %2275 = vmatpush2.msra.mxu0 %v454_v26 }
  0x54   :  { %v951_v29 = vld [vmem:[#allocation5 + $0x1c08] sm:$0xff]  ;;  %v950_v34 = vld [vmem:[#allocation5 + $0x1c00] sm:$0xff]  ;;  %2346 = vmatpush2.msra.mxu1 %v966_v27  ;;  %2276 = vmatprep.subr.mxu0 %v439_v28 }
  0x55   :  { %v423_v35 = vld [vmem:[#allocation5 + $0xb88] sm:$0xff]  ;;  %2347 = vmatprep.subr.mxu1 %v951_v29  ;;  %v422_v37 = vld [vmem:[#allocation5 + $0xb80] sm:$0xff]  ;;  %2277 = vmatpush2.msra.mxu0 %v438_v33 }
  0x56   :  { %v935_v36 = vld [vmem:[#allocation5 + $0x1b88] sm:$0xff]  ;;  %v934_v38 = vld [vmem:[#allocation5 + $0x1b80] sm:$0xff]  ;;  %2348 = vmatpush2.msra.mxu1 %v950_v34  ;;  %2278 = vmatprep.subr.mxu0 %v423_v35 }
  0x57   :  { %v407_v39 = vld [vmem:[#allocation5 + $0xb08] sm:$0xff]  ;;  %2349 = vmatprep.subr.mxu1 %v935_v36  ;;  %v406_v43 = vld [vmem:[#allocation5 + $0xb00] sm:$0xff]  ;;  %2279 = vmatpush2.msra.mxu0 %v422_v37 }
  0x58   :  { %v919_v40 = vld [vmem:[#allocation5 + $0x1b08] sm:$0xff]  ;;  %v918_v44 = vld [vmem:[#allocation5 + $0x1b00] sm:$0xff]  ;;  %2350 = vmatpush2.msra.mxu1 %v934_v38  ;;  %2280 = vmatprep.subr.mxu0 %v407_v39 }
  0x59   :  { %v391_v45 = vld [vmem:[#allocation5 + $0xa88] sm:$0xff]  ;;  %2351 = vmatprep.subr.mxu1 %v919_v40  ;;  %v390_v47 = vld [vmem:[#allocation5 + $0xa80] sm:$0xff]  ;;  %2281 = vmatpush2.msra.mxu0 %v406_v43 }
  0x5a   :  { %v903_v46 = vld [vmem:[#allocation5 + $0x1a88] sm:$0xff]  ;;  %v902_v48 = vld [vmem:[#allocation5 + $0x1a80] sm:$0xff]  ;;  %2352 = vmatpush2.msra.mxu1 %v918_v44  ;;  %2282 = vmatprep.subr.mxu0 %v391_v45 }
  0x5b   :  { %v375_v50 = vld [vmem:[#allocation5 + $0xa08] sm:$0xff]  ;;  %2353 = vmatprep.subr.mxu1 %v903_v46  ;;  %v374_v53 = vld [vmem:[#allocation5 + $0xa00] sm:$0xff]  ;;  %2283 = vmatpush2.msra.mxu0 %v390_v47 }
  0x5c   :  { %v887_v51 = vld [vmem:[#allocation5 + $0x1a08] sm:$0xff]  ;;  %v886_v54 = vld [vmem:[#allocation5 + $0x1a00] sm:$0xff]  ;;  %2354 = vmatpush2.msra.mxu1 %v902_v48  ;;  %2284 = vmatprep.subr.mxu0 %v375_v50 }
  0x5d   :  { %v359_v55 = vld [vmem:[#allocation5 + $0x988] sm:$0xff]  ;;  %2355 = vmatprep.subr.mxu1 %v887_v51  ;;  %v358_v58 = vld [vmem:[#allocation5 + $0x980] sm:$0xff]  ;;  %2285 = vmatpush2.msra.mxu0 %v374_v53 }
  0x5e   :  { %v871_v56 = vld [vmem:[#allocation5 + $0x1988] sm:$0xff]  ;;  %v870_v59 = vld [vmem:[#allocation5 + $0x1980] sm:$0xff]  ;;  %2356 = vmatpush2.msra.mxu1 %v886_v54  ;;  %2286 = vmatprep.subr.mxu0 %v359_v55 }
  0x5f   :  { %v343_v60 = vld [vmem:[#allocation5 + $0x908] sm:$0xff]  ;;  %2357 = vmatprep.subr.mxu1 %v871_v56  ;;  %v342_v63 = vld [vmem:[#allocation5 + $0x900] sm:$0xff]  ;;  %2287 = vmatpush2.msra.mxu0 %v358_v58 }
  0x60   :  { %v855_v61 = vld [vmem:[#allocation5 + $0x1908] sm:$0xff]  ;;  %v854_v0 = vld [vmem:[#allocation5 + $0x1900] sm:$0xff]  ;;  %2358 = vmatpush2.msra.mxu1 %v870_v59  ;;  %2288 = vmatprep.subr.mxu0 %v343_v60 }
  0x61   :  { %v327_v1 = vld [vmem:[#allocation5 + $0x888] sm:$0xff]  ;;  %2359 = vmatprep.subr.mxu1 %v855_v61  ;;  %v326_v4 = vld [vmem:[#allocation5 + $0x880] sm:$0xff]  ;;  %2289 = vmatpush2.msra.mxu0 %v342_v63 }
  0x62   :  { %v839_v2 = vld [vmem:[#allocation5 + $0x1888] sm:$0xff]  ;;  %v838_v5 = vld [vmem:[#allocation5 + $0x1880] sm:$0xff]  ;;  %2360 = vmatpush2.msra.mxu1 %v854_v0  ;;  %2290 = vmatprep.subr.mxu0 %v327_v1 }
  0x63   :  { %v311_v6 = vld [vmem:[#allocation5 + $0x808] sm:$0xff]  ;;  %2361 = vmatprep.subr.mxu1 %v839_v2  ;;  %v310_v9 = vld [vmem:[#allocation5 + $0x800] sm:$0xff]  ;;  %2291 = vmatpush2.msra.mxu0 %v326_v4 }
  0x64   :  { %v823_v7 = vld [vmem:[#allocation5 + $0x1808] sm:$0xff]  ;;  %2362 = vmatpush2.msra.mxu1 %v838_v5  ;;  %v822_v10 = vld [vmem:[#allocation5 + $0x1800] sm:$0xff]  ;;  %2292 = vmatprep.subr.mxu0 %v311_v6 }
  0x65   :  { %2363 = vmatprep.subr.mxu1 %v823_v7  ;;  %v1319_v12 = vld [vmem:[#allocation5 + $0x2788] sm:$0xff]  ;;  %2293 = vmatpush2.msra.mxu0 %v310_v9  ;;  %v1318_v14 = vld [vmem:[#allocation5 + $0x2780] sm:$0xff] }
  0x66   :  { %2294 = vmatprep.mubr.f32.mxu0 %v4755_v8  ;;  %v1831_v13 = vld [vmem:[#allocation5 + $0x3788] sm:$0xff]  ;;  %2364 = vmatpush2.msra.mxu1 %v822_v10  ;;  %v1830_v15 = vld [vmem:[#allocation5 + $0x3780] sm:$0xff] }
  0x67   :  { %2295 = vmatmul.mubr.f32.vlgmr.msra.gmra.mxu0 %v4748_v62  ;;  %2365 = vmatprep.mubr.f32.mxu1 %v4759_v11  ;;  %v1303_v16 = vld [vmem:[#allocation5 + $0x2708] sm:$0xff]  ;;  %v1302_v18 = vld [vmem:[#allocation5 + $0x2700] sm:$0xff] }
  0x68   :  { %2372 = vmatprep.subr.mxu0 %v1319_v12  ;;  %v1815_v17 = vld [vmem:[#allocation5 + $0x3708] sm:$0xff]  ;;  %2443 = vmatprep.subr.mxu1 %v1831_v13  ;;  %v1814_v19 = vld [vmem:[#allocation5 + $0x3700] sm:$0xff] }
  0x69   :  { %2366 = vmatmul.mubr.f32.vlgmr.msra.gmra.mxu1 %v4751_v3  ;;  %2373 = vmatpush1.msra.mxu0 %v1318_v14  ;;  %v1287_v20 = vld [vmem:[#allocation5 + $0x2688] sm:$0xff]  ;;  %v1286_v22 = vld [vmem:[#allocation5 + $0x2680] sm:$0xff] }
  0x6a   :  { %2444 = vmatpush1.msra.mxu1 %v1830_v15  ;;  %v1799_v21 = vld [vmem:[#allocation5 + $0x3688] sm:$0xff]  ;;  %2374 = vmatprep.subr.mxu0 %v1303_v16  ;;  %v1798_v23 = vld [vmem:[#allocation5 + $0x3680] sm:$0xff] }
  0x6b   :  { %2445 = vmatprep.subr.mxu1 %v1815_v17  ;;  %2375 = vmatpush1.msra.mxu0 %v1302_v18  ;;  %v1271_v24 = vld [vmem:[#allocation5 + $0x2608] sm:$0xff]  ;;  %v1270_v26 = vld [vmem:[#allocation5 + $0x2600] sm:$0xff] }
  0x6c   :  { %2446 = vmatpush1.msra.mxu1 %v1814_v19  ;;  %v1783_v25 = vld [vmem:[#allocation5 + $0x3608] sm:$0xff]  ;;  %2376 = vmatprep.subr.mxu0 %v1287_v20  ;;  %v1782_v27 = vld [vmem:[#allocation5 + $0x3600] sm:$0xff] }
  0x6d   :  { %2447 = vmatprep.subr.mxu1 %v1799_v21  ;;  %2377 = vmatpush1.msra.mxu0 %v1286_v22  ;;  %v1255_v28 = vld [vmem:[#allocation5 + $0x2588] sm:$0xff]  ;;  %v1254_v30 = vld [vmem:[#allocation5 + $0x2580] sm:$0xff] }
  0x6e   :  { %2448 = vmatpush1.msra.mxu1 %v1798_v23  ;;  %v1767_v29 = vld [vmem:[#allocation5 + $0x3588] sm:$0xff]  ;;  %2378 = vmatprep.subr.mxu0 %v1271_v24  ;;  %v1766_v31 = vld [vmem:[#allocation5 + $0x3580] sm:$0xff] }
  0x6f   :  { %2449 = vmatprep.subr.mxu1 %v1783_v25  ;;  %2379 = vmatpush1.msra.mxu0 %v1270_v26  ;;  %v1239_v32 = vld [vmem:[#allocation5 + $0x2508] sm:$0xff]  ;;  %v1238_v34 = vld [vmem:[#allocation5 + $0x2500] sm:$0xff] }
  0x70   :  { %2450 = vmatpush1.msra.mxu1 %v1782_v27  ;;  %v1751_v33 = vld [vmem:[#allocation5 + $0x3508] sm:$0xff]  ;;  %2380 = vmatprep.subr.mxu0 %v1255_v28  ;;  %v1750_v35 = vld [vmem:[#allocation5 + $0x3500] sm:$0xff] }
  0x71   :  { %2451 = vmatprep.subr.mxu1 %v1767_v29  ;;  %2381 = vmatpush1.msra.mxu0 %v1254_v30  ;;  %v1223_v36 = vld [vmem:[#allocation5 + $0x2488] sm:$0xff]  ;;  %v1222_v38 = vld [vmem:[#allocation5 + $0x2480] sm:$0xff] }
  0x72   :  { %2452 = vmatpush1.msra.mxu1 %v1766_v31  ;;  %v1735_v37 = vld [vmem:[#allocation5 + $0x3488] sm:$0xff]  ;;  %2382 = vmatprep.subr.mxu0 %v1239_v32  ;;  %v1734_v39 = vld [vmem:[#allocation5 + $0x3480] sm:$0xff] }
  0x73   :  { %2453 = vmatprep.subr.mxu1 %v1751_v33  ;;  %2383 = vmatpush1.msra.mxu0 %v1238_v34  ;;  %v1207_v40 = vld [vmem:[#allocation5 + $0x2408] sm:$0xff]  ;;  %v1206_v43 = vld [vmem:[#allocation5 + $0x2400] sm:$0xff] }
  0x74   :  { %2454 = vmatpush1.msra.mxu1 %v1750_v35  ;;  %v1719_v42 = vld [vmem:[#allocation5 + $0x3408] sm:$0xff]  ;;  %2384 = vmatprep.subr.mxu0 %v1223_v36  ;;  %v1718_v44 = vld [vmem:[#allocation5 + $0x3400] sm:$0xff] }
  0x75   :  { %2455 = vmatprep.subr.mxu1 %v1735_v37  ;;  %2385 = vmatpush1.msra.mxu0 %v1222_v38  ;;  %v1191_v45 = vld [vmem:[#allocation5 + $0x2388] sm:$0xff]  ;;  %v1190_v47 = vld [vmem:[#allocation5 + $0x2380] sm:$0xff] }
  0x76   :  { %2456 = vmatpush1.msra.mxu1 %v1734_v39  ;;  %v1703_v46 = vld [vmem:[#allocation5 + $0x3388] sm:$0xff]  ;;  %2386 = vmatprep.subr.mxu0 %v1207_v40  ;;  %v1702_v48 = vld [vmem:[#allocation5 + $0x3380] sm:$0xff] }
  0x77   :  { %2457 = vmatprep.subr.mxu1 %v1719_v42  ;;  %2387 = vmatpush1.msra.mxu0 %v1206_v43  ;;  %v1175_v49 = vld [vmem:[#allocation5 + $0x2308] sm:$0xff]  ;;  %v1174_v51 = vld [vmem:[#allocation5 + $0x2300] sm:$0xff] }
  0x78   :  { %2458 = vmatpush1.msra.mxu1 %v1718_v44  ;;  %v1687_v50 = vld [vmem:[#allocation5 + $0x3308] sm:$0xff]  ;;  %2388 = vmatprep.subr.mxu0 %v1191_v45  ;;  %v1686_v53 = vld [vmem:[#allocation5 + $0x3300] sm:$0xff] }
  0x79   :  { %2459 = vmatprep.subr.mxu1 %v1703_v46  ;;  %2389 = vmatpush1.msra.mxu0 %v1190_v47  ;;  %v1159_v54 = vld [vmem:[#allocation5 + $0x2288] sm:$0xff]  ;;  %v1158_v56 = vld [vmem:[#allocation5 + $0x2280] sm:$0xff] }
  0x7a   :  { %2460 = vmatpush1.msra.mxu1 %v1702_v48  ;;  %v1671_v55 = vld [vmem:[#allocation5 + $0x3288] sm:$0xff]  ;;  %2390 = vmatprep.subr.mxu0 %v1175_v49  ;;  %v1670_v57 = vld [vmem:[#allocation5 + $0x3280] sm:$0xff] }
  0x7b   :  { %2461 = vmatprep.subr.mxu1 %v1687_v50  ;;  %2391 = vmatpush1.msra.mxu0 %v1174_v51  ;;  %v1143_v58 = vld [vmem:[#allocation5 + $0x2208] sm:$0xff]  ;;  %v1142_v60 = vld [vmem:[#allocation5 + $0x2200] sm:$0xff] }
  0x7c   :  { %2462 = vmatpush1.msra.mxu1 %v1686_v53  ;;  %v1655_v59 = vld [vmem:[#allocation5 + $0x3208] sm:$0xff]  ;;  %2392 = vmatprep.subr.mxu0 %v1159_v54  ;;  %v1654_v61 = vld [vmem:[#allocation5 + $0x3200] sm:$0xff] }
  0x7d   :  { %2463 = vmatprep.subr.mxu1 %v1671_v55  ;;  %2393 = vmatpush1.msra.mxu0 %v1158_v56  ;;  %v1127_v63 = vld [vmem:[#allocation5 + $0x2188] sm:$0xff]  ;;  %v1126_v1 = vld [vmem:[#allocation5 + $0x2180] sm:$0xff] }
  0x7e   :  { %2464 = vmatpush1.msra.mxu1 %v1670_v57  ;;  %v1639_v0 = vld [vmem:[#allocation5 + $0x3188] sm:$0xff]  ;;  %2394 = vmatprep.subr.mxu0 %v1143_v58  ;;  %v1638_v2 = vld [vmem:[#allocation5 + $0x3180] sm:$0xff] }
  0x7f   :  { %2465 = vmatprep.subr.mxu1 %v1655_v59  ;;  %2395 = vmatpush1.msra.mxu0 %v1142_v60  ;;  %v1111_v4 = vld [vmem:[#allocation5 + $0x2108] sm:$0xff]  ;;  %v1110_v6 = vld [vmem:[#allocation5 + $0x2100] sm:$0xff] }
  0x80   :  { %2466 = vmatpush1.msra.mxu1 %v1654_v61  ;;  %v1623_v5 = vld [vmem:[#allocation5 + $0x3108] sm:$0xff]  ;;  %2396 = vmatprep.subr.mxu0 %v1127_v63  ;;  %v1622_v7 = vld [vmem:[#allocation5 + $0x3100] sm:$0xff] }
  0x81   :  { %2467 = vmatprep.subr.mxu1 %v1639_v0  ;;  %2397 = vmatpush1.msra.mxu0 %v1126_v1  ;;  %v1095_v9 = vld [vmem:[#allocation5 + $0x2088] sm:$0xff]  ;;  %v1094_v12 = vld [vmem:[#allocation5 + $0x2080] sm:$0xff]  ;;  %v53_v1 = vld [vmem:[#allocation2 + $0x8] sm:$0xff] }
  0x82   :  { %2468 = vmatpush1.msra.mxu1 %v1638_v2  ;;  %v1607_v10 = vld [vmem:[#allocation5 + $0x3088] sm:$0xff]  ;;  %2398 = vmatprep.subr.mxu0 %v1111_v4  ;;  %v1606_v13 = vld [vmem:[#allocation5 + $0x3080] sm:$0xff] }
  0x83   :  { %2469 = vmatprep.subr.mxu1 %v1623_v5  ;;  %2399 = vmatpush1.msra.mxu0 %v1110_v6  ;;  %v1079_v14 = vld [vmem:[#allocation5 + $0x2008] sm:$0xff]  ;;  %v1078_v16 = vld [vmem:[#allocation5 + $0x2000] sm:$0xff] }
  0x84   :  { %2470 = vmatpush1.msra.mxu1 %v1622_v7  ;;  %v1591_v15 = vld [vmem:[#allocation5 + $0x3008] sm:$0xff]  ;;  %2400 = vmatprep.subr.mxu0 %v1095_v9  ;;  %v1590_v17 = vld [vmem:[#allocation5 + $0x3000] sm:$0xff] }
  0x85   :  { %2471 = vmatprep.subr.mxu1 %v1607_v10  ;;  %2401 = vmatpush1.msra.mxu0 %v1094_v12  ;;  %v1575_v18 = vld [vmem:[#allocation5 + $0x2f88] sm:$0xff]  ;;  %v1574_v20 = vld [vmem:[#allocation5 + $0x2f80] sm:$0xff]  ;;  %v2205_v10 = vcombine.high %v53_v1, %v53_v1 }
  0x86   :  { %2472 = vmatpush1.msra.mxu1 %v1606_v13  ;;  %v2087_v19 = vld [vmem:[#allocation5 + $0x3f88] sm:$0xff]  ;;  %2402 = vmatprep.subr.mxu0 %v1079_v14  ;;  %v2086_v21 = vld [vmem:[#allocation5 + $0x3f80] sm:$0xff] }
  0x87   :  { %2473 = vmatprep.subr.mxu1 %v1591_v15  ;;  %2403 = vmatpush1.msra.mxu0 %v1078_v16  ;;  %v1559_v22 = vld [vmem:[#allocation5 + $0x2f08] sm:$0xff]  ;;  %v1558_v24 = vld [vmem:[#allocation5 + $0x2f00] sm:$0xff]  ;;  %v4766_v16 = vrot.slane %v53_v1, %v4745_v52  ;;  %v169_v1 = vld [vmem:[#allocation5 + $0x398] sm:$0xff] }
  0x88   :  { %2474 = vmatpush1.msra.mxu1 %v1590_v17  ;;  %v2071_v23 = vld [vmem:[#allocation5 + $0x3f08] sm:$0xff]  ;;  %2404 = vmatprep.subr.mxu0 %v1575_v18  ;;  %v2070_v25 = vld [vmem:[#allocation5 + $0x3f00] sm:$0xff] }
  0x89   :  { %2475 = vmatprep.subr.mxu1 %v2087_v19  ;;  %2405 = vmatpush2.msra.mxu0 %v1574_v20  ;;  %v1543_v26 = vld [vmem:[#allocation5 + $0x2e88] sm:$0xff]  ;;  %v1542_v28 = vld [vmem:[#allocation5 + $0x2e80] sm:$0xff] }
  0x8a   :  { %2476 = vmatpush2.msra.mxu1 %v2086_v21  ;;  %v2055_v27 = vld [vmem:[#allocation5 + $0x3e88] sm:$0xff]  ;;  %2406 = vmatprep.subr.mxu0 %v1559_v22  ;;  %v2054_v29 = vld [vmem:[#allocation5 + $0x3e80] sm:$0xff]  ;;  %v4769_v21 = vrot.slane %v2205_v10, %v4745_v52  ;;  %v664_v10 = vld [vmem:[#allocation5 + $0x1310] sm:$0xff] }
  0x8b   :  { %2477 = vmatprep.subr.mxu1 %v2071_v23  ;;  %2407 = vmatpush2.msra.mxu0 %v1558_v24  ;;  %v1527_v30 = vld [vmem:[#allocation5 + $0x2e08] sm:$0xff]  ;;  %v1526_v32 = vld [vmem:[#allocation5 + $0x2e00] sm:$0xff] }
  0x8c   :  { %2478 = vmatpush2.msra.mxu1 %v2070_v25  ;;  %v2039_v31 = vld [vmem:[#allocation5 + $0x3e08] sm:$0xff]  ;;  %2408 = vmatprep.subr.mxu0 %v1543_v26  ;;  %v2038_v33 = vld [vmem:[#allocation5 + $0x3e00] sm:$0xff]  ;;  %v4773_v26 = vcombine.high %v4766_v16, %v4766_v16 }
  0x8d   :  { %2479 = vmatprep.subr.mxu1 %v2055_v27  ;;  %2409 = vmatpush2.msra.mxu0 %v1542_v28  ;;  %v1511_v34 = vld [vmem:[#allocation5 + $0x2d88] sm:$0xff]  ;;  %v1510_v36 = vld [vmem:[#allocation5 + $0x2d80] sm:$0xff] }
  0x8e   :  { %2480 = vmatpush2.msra.mxu1 %v2054_v29  ;;  %v2023_v35 = vld [vmem:[#allocation5 + $0x3d88] sm:$0xff]  ;;  %2410 = vmatprep.subr.mxu0 %v1527_v30  ;;  %v2022_v37 = vld [vmem:[#allocation5 + $0x3d80] sm:$0xff]  ;;  %v4777_v29 = vcombine.high %v4769_v21, %v4769_v21  ;;  %v297_v30 = vld [vmem:[#allocation5 + $0x798] sm:$0xff] }
  0x8f   :  { %2481 = vmatprep.subr.mxu1 %v2039_v31  ;;  %2411 = vmatpush2.msra.mxu0 %v1526_v32  ;;  %v1495_v38 = vld [vmem:[#allocation5 + $0x2d08] sm:$0xff]  ;;  %v1494_v40 = vld [vmem:[#allocation5 + $0x2d00] sm:$0xff]  ;;  %v809_v31 = vld [vmem:[#allocation5 + $0x1798] sm:$0xff] }
  0x90   :  { %2482 = vmatpush2.msra.mxu1 %v2038_v33  ;;  %v2007_v39 = vld [vmem:[#allocation5 + $0x3d08] sm:$0xff]  ;;  %2412 = vmatprep.subr.mxu0 %v1511_v34  ;;  %v2006_v42 = vld [vmem:[#allocation5 + $0x3d00] sm:$0xff]  ;;  %v296_v32 = vld [vmem:[#allocation5 + $0x790] sm:$0xff] }
  0x91   :  { %2483 = vmatprep.subr.mxu1 %v2023_v35  ;;  %2413 = vmatpush2.msra.mxu0 %v1510_v36  ;;  %v1479_v43 = vld [vmem:[#allocation5 + $0x2c88] sm:$0xff]  ;;  %v1478_v45 = vld [vmem:[#allocation5 + $0x2c80] sm:$0xff]  ;;  %v808_v33 = vld [vmem:[#allocation5 + $0x1790] sm:$0xff] }
  0x92   :  { %2484 = vmatpush2.msra.mxu1 %v2022_v37  ;;  %v1991_v44 = vld [vmem:[#allocation5 + $0x3c88] sm:$0xff]  ;;  %2414 = vmatprep.subr.mxu0 %v1495_v38  ;;  %v1990_v46 = vld [vmem:[#allocation5 + $0x3c80] sm:$0xff]  ;;  %v281_v34 = vld [vmem:[#allocation5 + $0x718] sm:$0xff] }
  0x93   :  { %2485 = vmatprep.subr.mxu1 %v2007_v39  ;;  %2415 = vmatpush2.msra.mxu0 %v1494_v40  ;;  %v1463_v47 = vld [vmem:[#allocation5 + $0x2c08] sm:$0xff]  ;;  %v1462_v49 = vld [vmem:[#allocation5 + $0x2c00] sm:$0xff]  ;;  %v793_v35 = vld [vmem:[#allocation5 + $0x1718] sm:$0xff] }
  0x94   :  { %2486 = vmatpush2.msra.mxu1 %v2006_v42  ;;  %v1975_v48 = vld [vmem:[#allocation5 + $0x3c08] sm:$0xff]  ;;  %2416 = vmatprep.subr.mxu0 %v1479_v43  ;;  %v1974_v50 = vld [vmem:[#allocation5 + $0x3c00] sm:$0xff]  ;;  %v280_v36 = vld [vmem:[#allocation5 + $0x710] sm:$0xff] }
  0x95   :  { %2487 = vmatprep.subr.mxu1 %v1991_v44  ;;  %2417 = vmatpush2.msra.mxu0 %v1478_v45  ;;  %v1447_v51 = vld [vmem:[#allocation5 + $0x2b88] sm:$0xff]  ;;  %v1446_v54 = vld [vmem:[#allocation5 + $0x2b80] sm:$0xff]  ;;  %v792_v37 = vld [vmem:[#allocation5 + $0x1710] sm:$0xff] }
  0x96   :  { %2488 = vmatpush2.msra.mxu1 %v1990_v46  ;;  %v1959_v53 = vld [vmem:[#allocation5 + $0x3b88] sm:$0xff]  ;;  %2418 = vmatprep.subr.mxu0 %v1463_v47  ;;  %v1958_v55 = vld [vmem:[#allocation5 + $0x3b80] sm:$0xff]  ;;  %v265_v38 = vld [vmem:[#allocation5 + $0x698] sm:$0xff] }
  0x97   :  { %2489 = vmatprep.subr.mxu1 %v1975_v48  ;;  %2419 = vmatpush2.msra.mxu0 %v1462_v49  ;;  %v1431_v56 = vld [vmem:[#allocation5 + $0x2b08] sm:$0xff]  ;;  %v1430_v58 = vld [vmem:[#allocation5 + $0x2b00] sm:$0xff]  ;;  %v777_v39 = vld [vmem:[#allocation5 + $0x1698] sm:$0xff] }
  0x98   :  { %2490 = vmatpush2.msra.mxu1 %v1974_v50  ;;  %v1943_v57 = vld [vmem:[#allocation5 + $0x3b08] sm:$0xff]  ;;  %2420 = vmatprep.subr.mxu0 %v1447_v51  ;;  %v1942_v59 = vld [vmem:[#allocation5 + $0x3b00] sm:$0xff]  ;;  %v264_v40 = vld [vmem:[#allocation5 + $0x690] sm:$0xff] }
  0x99   :  { %2491 = vmatprep.subr.mxu1 %v1959_v53  ;;  %2421 = vmatpush2.msra.mxu0 %v1446_v54  ;;  %v1415_v60 = vld [vmem:[#allocation5 + $0x2a88] sm:$0xff]  ;;  %v1414_v63 = vld [vmem:[#allocation5 + $0x2a80] sm:$0xff]  ;;  %v776_v42 = vld [vmem:[#allocation5 + $0x1690] sm:$0xff] }
  0x9a   :  { %2492 = vmatpush2.msra.mxu1 %v1958_v55  ;;  %v1927_v61 = vld [vmem:[#allocation5 + $0x3a88] sm:$0xff]  ;;  %2422 = vmatprep.subr.mxu0 %v1431_v56  ;;  %v1926_v0 = vld [vmem:[#allocation5 + $0x3a80] sm:$0xff]  ;;  %v249_v43 = vld [vmem:[#allocation5 + $0x618] sm:$0xff] }
  0x9b   :  { %2493 = vmatprep.subr.mxu1 %v1943_v57  ;;  %2423 = vmatpush2.msra.mxu0 %v1430_v58  ;;  %v1399_v2 = vld [vmem:[#allocation5 + $0x2a08] sm:$0xff]  ;;  %v1398_v5 = vld [vmem:[#allocation5 + $0x2a00] sm:$0xff]  ;;  %v761_v44 = vld [vmem:[#allocation5 + $0x1618] sm:$0xff] }
  0x9c   :  { %2494 = vmatpush2.msra.mxu1 %v1942_v59  ;;  %v1911_v4 = vld [vmem:[#allocation5 + $0x3a08] sm:$0xff]  ;;  %2424 = vmatprep.subr.mxu0 %v1415_v60  ;;  %v1910_v6 = vld [vmem:[#allocation5 + $0x3a00] sm:$0xff]  ;;  %v248_v45 = vld [vmem:[#allocation5 + $0x610] sm:$0xff] }
  0x9d   :  { %2495 = vmatprep.subr.mxu1 %v1927_v61  ;;  %2425 = vmatpush2.msra.mxu0 %v1414_v63  ;;  %v1383_v7 = vld [vmem:[#allocation5 + $0x2988] sm:$0xff]  ;;  %v1382_v12 = vld [vmem:[#allocation5 + $0x2980] sm:$0xff]  ;;  %v760_v46 = vld [vmem:[#allocation5 + $0x1610] sm:$0xff] }
  0x9e   :  { %2496 = vmatpush2.msra.mxu1 %v1926_v0  ;;  %v1895_v9 = vld [vmem:[#allocation5 + $0x3988] sm:$0xff]  ;;  %2426 = vmatprep.subr.mxu0 %v1399_v2  ;;  %v1894_v13 = vld [vmem:[#allocation5 + $0x3980] sm:$0xff]  ;;  %v233_v47 = vld [vmem:[#allocation5 + $0x598] sm:$0xff] }
  0x9f   :  { %2497 = vmatprep.subr.mxu1 %v1911_v4  ;;  %2427 = vmatpush2.msra.mxu0 %v1398_v5  ;;  %v1367_v14 = vld [vmem:[#allocation5 + $0x2908] sm:$0xff]  ;;  %v1366_v17 = vld [vmem:[#allocation5 + $0x2900] sm:$0xff]  ;;  %v745_v48 = vld [vmem:[#allocation5 + $0x1598] sm:$0xff] }
  0xa0   :  { %2498 = vmatpush2.msra.mxu1 %v1910_v6  ;;  %v1879_v15 = vld [vmem:[#allocation5 + $0x3908] sm:$0xff]  ;;  %2428 = vmatprep.subr.mxu0 %v1383_v7  ;;  %v1878_v18 = vld [vmem:[#allocation5 + $0x3900] sm:$0xff]  ;;  %v232_v49 = vld [vmem:[#allocation5 + $0x590] sm:$0xff] }
  0xa1   :  { %2499 = vmatprep.subr.mxu1 %v1895_v9  ;;  %2429 = vmatpush2.msra.mxu0 %v1382_v12  ;;  %v1351_v19 = vld [vmem:[#allocation5 + $0x2888] sm:$0xff]  ;;  %v1350_v22 = vld [vmem:[#allocation5 + $0x2880] sm:$0xff]  ;;  %v744_v50 = vld [vmem:[#allocation5 + $0x1590] sm:$0xff] }
  0xa2   :  { %2500 = vmatpush2.msra.mxu1 %v1894_v13  ;;  %v1863_v20 = vld [vmem:[#allocation5 + $0x3888] sm:$0xff]  ;;  %2430 = vmatprep.subr.mxu0 %v1367_v14  ;;  %v1862_v23 = vld [vmem:[#allocation5 + $0x3880] sm:$0xff]  ;;  %v217_v51 = vld [vmem:[#allocation5 + $0x518] sm:$0xff] }
  0xa3   :  { %2501 = vmatprep.subr.mxu1 %v1879_v15  ;;  %2431 = vmatpush2.msra.mxu0 %v1366_v17  ;;  %v1335_v24 = vld [vmem:[#allocation5 + $0x2808] sm:$0xff]  ;;  %v1334_v27 = vld [vmem:[#allocation5 + $0x2800] sm:$0xff]  ;;  %v729_v53 = vld [vmem:[#allocation5 + $0x1518] sm:$0xff] }
  0xa4   :  { %2502 = vmatpush2.msra.mxu1 %v1878_v18  ;;  %v1847_v25 = vld [vmem:[#allocation5 + $0x3808] sm:$0xff]  ;;  %2432 = vmatprep.subr.mxu0 %v1351_v19  ;;  %v1846_v28 = vld [vmem:[#allocation5 + $0x3800] sm:$0xff]  ;;  %v216_v54 = vld [vmem:[#allocation5 + $0x510] sm:$0xff] }
  0xa5   :  { %2503 = vmatprep.subr.mxu1 %v1863_v20  ;;  %2433 = vmatpush2.msra.mxu0 %v1350_v22  ;;  %v728_v55 = vld [vmem:[#allocation5 + $0x1510] sm:$0xff]  ;;  %v201_v56 = vld [vmem:[#allocation5 + $0x498] sm:$0xff] }
  0xa6   :  { %2504 = vmatpush2.msra.mxu1 %v1862_v23  ;;  %2434 = vmatprep.subr.mxu0 %v1335_v24  ;;  %v713_v57 = vld [vmem:[#allocation5 + $0x1498] sm:$0xff]  ;;  %v200_v58 = vld [vmem:[#allocation5 + $0x490] sm:$0xff] }
  0xa7   :  { %2505 = vmatprep.subr.mxu1 %v1847_v25  ;;  %2435 = vmatpush2.msra.mxu0 %v1334_v27  ;;  %v712_v59 = vld [vmem:[#allocation5 + $0x1490] sm:$0xff]  ;;  %v185_v60 = vld [vmem:[#allocation5 + $0x418] sm:$0xff] }
  0xa8   :  { %2436 = vmatprep.mubr.f32.mxu0 %v4773_v26  ;;  %2506 = vmatpush2.msra.mxu1 %v1846_v28  ;;  %v697_v61 = vld [vmem:[#allocation5 + $0x1418] sm:$0xff]  ;;  %v184_v63 = vld [vmem:[#allocation5 + $0x410] sm:$0xff] }
  0xa9   :  { %2437 = vmatmul.mubr.f32.vlgmr.msra.gmra.mxu0 %v4766_v16  ;;  %2507 = vmatprep.mubr.f32.mxu1 %v4777_v29  ;;  %v696_v0 = vld [vmem:[#allocation5 + $0x1410] sm:$0xff]  ;;  %v681_v2 = vld [vmem:[#allocation5 + $0x1398] sm:$0xff] }
  0xaa   :  { %2514 = vmatprep.subr.mxu0 %v297_v30  ;;  %2585 = vmatprep.subr.mxu1 %v809_v31  ;;  %v168_v4 = vld [vmem:[#allocation5 + $0x390] sm:$0xff]  ;;  %v153_v6 = vld [vmem:[#allocation5 + $0x318] sm:$0xff] }
  0xab   :  { %2508 = vmatmul.mubr.f32.vlgmr.msra.gmra.mxu1 %v4769_v21  ;;  %2515 = vmatpush1.msra.mxu0 %v296_v32  ;;  %v680_v5 = vld [vmem:[#allocation5 + $0x1390] sm:$0xff]  ;;  %v665_v7 = vld [vmem:[#allocation5 + $0x1318] sm:$0xff] }
  0xac   :  { %2586 = vmatpush1.msra.mxu1 %v808_v33  ;;  %2516 = vmatprep.subr.mxu0 %v281_v34  ;;  %v152_v9 = vld [vmem:[#allocation5 + $0x310] sm:$0xff]  ;;  %v137_v12 = vld [vmem:[#allocation5 + $0x298] sm:$0xff] }
  0xad   :  { %2587 = vmatprep.subr.mxu1 %v793_v35  ;;  %2517 = vmatpush1.msra.mxu0 %v280_v36  ;;  %v649_v13 = vld [vmem:[#allocation5 + $0x1298] sm:$0xff]  ;;  %v136_v14 = vld [vmem:[#allocation5 + $0x290] sm:$0xff] }
  0xae   :  { %2588 = vmatpush1.msra.mxu1 %v792_v37  ;;  %2518 = vmatprep.subr.mxu0 %v265_v38  ;;  %v648_v15 = vld [vmem:[#allocation5 + $0x1290] sm:$0xff]  ;;  %v121_v17 = vld [vmem:[#allocation5 + $0x218] sm:$0xff] }
  0xaf   :  { %2589 = vmatprep.subr.mxu1 %v777_v39  ;;  %2519 = vmatpush1.msra.mxu0 %v264_v40  ;;  %v633_v18 = vld [vmem:[#allocation5 + $0x1218] sm:$0xff]  ;;  %v120_v19 = vld [vmem:[#allocation5 + $0x210] sm:$0xff] }
  0xb0   :  { %2590 = vmatpush1.msra.mxu1 %v776_v42  ;;  %2520 = vmatprep.subr.mxu0 %v249_v43  ;;  %v632_v20 = vld [vmem:[#allocation5 + $0x1210] sm:$0xff]  ;;  %v105_v22 = vld [vmem:[#allocation5 + $0x198] sm:$0xff] }
  0xb1   :  { %2591 = vmatprep.subr.mxu1 %v761_v44  ;;  %2521 = vmatpush1.msra.mxu0 %v248_v45  ;;  %v617_v23 = vld [vmem:[#allocation5 + $0x1198] sm:$0xff]  ;;  %v104_v24 = vld [vmem:[#allocation5 + $0x190] sm:$0xff] }
  0xb2   :  { %2592 = vmatpush1.msra.mxu1 %v760_v46  ;;  %2522 = vmatprep.subr.mxu0 %v233_v47  ;;  %v616_v25 = vld [vmem:[#allocation5 + $0x1190] sm:$0xff]  ;;  %v89_v27 = vld [vmem:[#allocation5 + $0x118] sm:$0xff] }
  0xb3   :  { %2593 = vmatprep.subr.mxu1 %v745_v48  ;;  %2523 = vmatpush1.msra.mxu0 %v232_v49  ;;  %v601_v28 = vld [vmem:[#allocation5 + $0x1118] sm:$0xff]  ;;  %v88_v30 = vld [vmem:[#allocation5 + $0x110] sm:$0xff] }
  0xb4   :  { %2594 = vmatpush1.msra.mxu1 %v744_v50  ;;  %2524 = vmatprep.subr.mxu0 %v217_v51  ;;  %v600_v31 = vld [vmem:[#allocation5 + $0x1110] sm:$0xff]  ;;  %v73_v32 = vld [vmem:[#allocation5 + $0x98] sm:$0xff] }
  0xb5   :  { %2595 = vmatprep.subr.mxu1 %v729_v53  ;;  %2525 = vmatpush1.msra.mxu0 %v216_v54  ;;  %v585_v33 = vld [vmem:[#allocation5 + $0x1098] sm:$0xff]  ;;  %v72_v34 = vld [vmem:[#allocation5 + $0x90] sm:$0xff] }
  0xb6   :  { %2596 = vmatpush1.msra.mxu1 %v728_v55  ;;  %2526 = vmatprep.subr.mxu0 %v201_v56  ;;  %v584_v35 = vld [vmem:[#allocation5 + $0x1090] sm:$0xff]  ;;  %v57_v36 = vld [vmem:[#allocation5 + $0x18] sm:$0xff] }
  0xb7   :  { %2597 = vmatprep.subr.mxu1 %v713_v57  ;;  %2527 = vmatpush1.msra.mxu0 %v200_v58  ;;  %v569_v37 = vld [vmem:[#allocation5 + $0x1018] sm:$0xff]  ;;  %v56_v38 = vld [vmem:[#allocation5 + $0x10] sm:$0xff] }
  0xb8   :  { %2598 = vmatpush1.msra.mxu1 %v712_v59  ;;  %2528 = vmatprep.subr.mxu0 %v185_v60  ;;  %v568_v39 = vld [vmem:[#allocation5 + $0x1010] sm:$0xff]  ;;  %v553_v40 = vld [vmem:[#allocation5 + $0xf98] sm:$0xff] }
  0xb9   :  { %2599 = vmatprep.subr.mxu1 %v697_v61  ;;  %2529 = vmatpush1.msra.mxu0 %v184_v63  ;;  %v1065_v42 = vld [vmem:[#allocation5 + $0x1f98] sm:$0xff]  ;;  %v552_v43 = vld [vmem:[#allocation5 + $0xf90] sm:$0xff] }
  0xba   :  { %2600 = vmatpush1.msra.mxu1 %v696_v0  ;;  %2530 = vmatprep.subr.mxu0 %v169_v1  ;;  %v1064_v44 = vld [vmem:[#allocation5 + $0x1f90] sm:$0xff]  ;;  %v537_v45 = vld [vmem:[#allocation5 + $0xf18] sm:$0xff] }
  0xbb   :  { %2601 = vmatprep.subr.mxu1 %v681_v2  ;;  %2531 = vmatpush1.msra.mxu0 %v168_v4  ;;  %v1049_v46 = vld [vmem:[#allocation5 + $0x1f18] sm:$0xff]  ;;  %v536_v47 = vld [vmem:[#allocation5 + $0xf10] sm:$0xff] }
  0xbc   :  { %2602 = vmatpush1.msra.mxu1 %v680_v5  ;;  %2532 = vmatprep.subr.mxu0 %v153_v6  ;;  %v1048_v48 = vld [vmem:[#allocation5 + $0x1f10] sm:$0xff]  ;;  %v521_v49 = vld [vmem:[#allocation5 + $0xe98] sm:$0xff] }
  0xbd   :  { %2603 = vmatprep.subr.mxu1 %v665_v7  ;;  %2533 = vmatpush1.msra.mxu0 %v152_v9  ;;  %v1033_v50 = vld [vmem:[#allocation5 + $0x1e98] sm:$0xff]  ;;  %v520_v51 = vld [vmem:[#allocation5 + $0xe90] sm:$0xff] }
  0xbe   :  { %2604 = vmatpush1.msra.mxu1 %v664_v10  ;;  %2534 = vmatprep.subr.mxu0 %v137_v12  ;;  %v1032_v53 = vld [vmem:[#allocation5 + $0x1e90] sm:$0xff]  ;;  %v505_v54 = vld [vmem:[#allocation5 + $0xe18] sm:$0xff] }
  0xbf   :  { %2605 = vmatprep.subr.mxu1 %v649_v13  ;;  %2535 = vmatpush1.msra.mxu0 %v136_v14  ;;  %v1017_v55 = vld [vmem:[#allocation5 + $0x1e18] sm:$0xff]  ;;  %v504_v56 = vld [vmem:[#allocation5 + $0xe10] sm:$0xff] }
  0xc0   :  { %2606 = vmatpush1.msra.mxu1 %v648_v15  ;;  %2536 = vmatprep.subr.mxu0 %v121_v17  ;;  %v1016_v57 = vld [vmem:[#allocation5 + $0x1e10] sm:$0xff]  ;;  %v489_v58 = vld [vmem:[#allocation5 + $0xd98] sm:$0xff] }
  0xc1   :  { %2607 = vmatprep.subr.mxu1 %v633_v18  ;;  %2537 = vmatpush1.msra.mxu0 %v120_v19  ;;  %v1001_v59 = vld [vmem:[#allocation5 + $0x1d98] sm:$0xff]  ;;  %v488_v60 = vld [vmem:[#allocation5 + $0xd90] sm:$0xff] }
  0xc2   :  { %2608 = vmatpush1.msra.mxu1 %v632_v20  ;;  %2538 = vmatprep.subr.mxu0 %v105_v22  ;;  %v1000_v61 = vld [vmem:[#allocation5 + $0x1d90] sm:$0xff]  ;;  %v473_v63 = vld [vmem:[#allocation5 + $0xd18] sm:$0xff] }
  0xc3   :  { %2609 = vmatprep.subr.mxu1 %v617_v23  ;;  %2539 = vmatpush1.msra.mxu0 %v104_v24  ;;  %v985_v0 = vld [vmem:[#allocation5 + $0x1d18] sm:$0xff]  ;;  %v472_v1 = vld [vmem:[#allocation5 + $0xd10] sm:$0xff] }
  0xc4   :  { %2610 = vmatpush1.msra.mxu1 %v616_v25  ;;  %2540 = vmatprep.subr.mxu0 %v89_v27  ;;  %v984_v2 = vld [vmem:[#allocation5 + $0x1d10] sm:$0xff]  ;;  %v457_v4 = vld [vmem:[#allocation5 + $0xc98] sm:$0xff] }
  0xc5   :  { %2611 = vmatprep.subr.mxu1 %v601_v28  ;;  %2541 = vmatpush1.msra.mxu0 %v88_v30  ;;  %v969_v5 = vld [vmem:[#allocation5 + $0x1c98] sm:$0xff]  ;;  %v456_v6 = vld [vmem:[#allocation5 + $0xc90] sm:$0xff] }
  0xc6   :  { %2612 = vmatpush1.msra.mxu1 %v600_v31  ;;  %2542 = vmatprep.subr.mxu0 %v73_v32  ;;  %v968_v7 = vld [vmem:[#allocation5 + $0x1c90] sm:$0xff]  ;;  %v441_v9 = vld [vmem:[#allocation5 + $0xc18] sm:$0xff] }
  0xc7   :  { %2613 = vmatprep.subr.mxu1 %v585_v33  ;;  %2543 = vmatpush1.msra.mxu0 %v72_v34  ;;  %v953_v10 = vld [vmem:[#allocation5 + $0x1c18] sm:$0xff]  ;;  %v440_v12 = vld [vmem:[#allocation5 + $0xc10] sm:$0xff] }
  0xc8   :  { %2614 = vmatpush1.msra.mxu1 %v584_v35  ;;  %2544 = vmatprep.subr.mxu0 %v57_v36  ;;  %v952_v13 = vld [vmem:[#allocation5 + $0x1c10] sm:$0xff]  ;;  %v425_v14 = vld [vmem:[#allocation5 + $0xb98] sm:$0xff] }
  0xc9   :  { %2615 = vmatprep.subr.mxu1 %v569_v37  ;;  %2545 = vmatpush1.msra.mxu0 %v56_v38  ;;  %v937_v15 = vld [vmem:[#allocation5 + $0x1b98] sm:$0xff]  ;;  %v424_v17 = vld [vmem:[#allocation5 + $0xb90] sm:$0xff] }
  0xca   :  { %2616 = vmatpush1.msra.mxu1 %v568_v39  ;;  %2546 = vmatprep.subr.mxu0 %v553_v40  ;;  %v936_v18 = vld [vmem:[#allocation5 + $0x1b90] sm:$0xff]  ;;  %v409_v19 = vld [vmem:[#allocation5 + $0xb18] sm:$0xff] }
  0xcb   :  { %2617 = vmatprep.subr.mxu1 %v1065_v42  ;;  %2547 = vmatpush2.msra.mxu0 %v552_v43  ;;  %v921_v20 = vld [vmem:[#allocation5 + $0x1b18] sm:$0xff]  ;;  %v408_v22 = vld [vmem:[#allocation5 + $0xb10] sm:$0xff] }
  0xcc   :  { %2618 = vmatpush2.msra.mxu1 %v1064_v44  ;;  %2548 = vmatprep.subr.mxu0 %v537_v45  ;;  %v920_v23 = vld [vmem:[#allocation5 + $0x1b10] sm:$0xff]  ;;  %v393_v24 = vld [vmem:[#allocation5 + $0xa98] sm:$0xff] }
  0xcd   :  { %2619 = vmatprep.subr.mxu1 %v1049_v46  ;;  %2549 = vmatpush2.msra.mxu0 %v536_v47  ;;  %v905_v25 = vld [vmem:[#allocation5 + $0x1a98] sm:$0xff]  ;;  %v392_v27 = vld [vmem:[#allocation5 + $0xa90] sm:$0xff] }
  0xce   :  { %2620 = vmatpush2.msra.mxu1 %v1048_v48  ;;  %2550 = vmatprep.subr.mxu0 %v521_v49  ;;  %v904_v28 = vld [vmem:[#allocation5 + $0x1a90] sm:$0xff]  ;;  %v377_v30 = vld [vmem:[#allocation5 + $0xa18] sm:$0xff] }
  0xcf   :  { %2621 = vmatprep.subr.mxu1 %v1033_v50  ;;  %2551 = vmatpush2.msra.mxu0 %v520_v51  ;;  %v889_v31 = vld [vmem:[#allocation5 + $0x1a18] sm:$0xff]  ;;  %v376_v32 = vld [vmem:[#allocation5 + $0xa10] sm:$0xff] }
  0xd0   :  { %2622 = vmatpush2.msra.mxu1 %v1032_v53  ;;  %2552 = vmatprep.subr.mxu0 %v505_v54  ;;  %v888_v33 = vld [vmem:[#allocation5 + $0x1a10] sm:$0xff]  ;;  %v361_v34 = vld [vmem:[#allocation5 + $0x998] sm:$0xff] }
  0xd1   :  { %2623 = vmatprep.subr.mxu1 %v1017_v55  ;;  %2553 = vmatpush2.msra.mxu0 %v504_v56  ;;  %v873_v35 = vld [vmem:[#allocation5 + $0x1998] sm:$0xff]  ;;  %v360_v36 = vld [vmem:[#allocation5 + $0x990] sm:$0xff] }
  0xd2   :  { %2624 = vmatpush2.msra.mxu1 %v1016_v57  ;;  %2554 = vmatprep.subr.mxu0 %v489_v58  ;;  %v872_v37 = vld [vmem:[#allocation5 + $0x1990] sm:$0xff]  ;;  %v345_v38 = vld [vmem:[#allocation5 + $0x918] sm:$0xff] }
  0xd3   :  { %2625 = vmatprep.subr.mxu1 %v1001_v59  ;;  %2555 = vmatpush2.msra.mxu0 %v488_v60  ;;  %v857_v39 = vld [vmem:[#allocation5 + $0x1918] sm:$0xff]  ;;  %v344_v40 = vld [vmem:[#allocation5 + $0x910] sm:$0xff] }
  0xd4   :  { %2626 = vmatpush2.msra.mxu1 %v1000_v61  ;;  %2556 = vmatprep.subr.mxu0 %v473_v63  ;;  %v856_v42 = vld [vmem:[#allocation5 + $0x1910] sm:$0xff]  ;;  %v329_v43 = vld [vmem:[#allocation5 + $0x898] sm:$0xff] }
  0xd5   :  { %2627 = vmatprep.subr.mxu1 %v985_v0  ;;  %2557 = vmatpush2.msra.mxu0 %v472_v1  ;;  %v841_v44 = vld [vmem:[#allocation5 + $0x1898] sm:$0xff]  ;;  %v328_v45 = vld [vmem:[#allocation5 + $0x890] sm:$0xff] }
  0xd6   :  { %2628 = vmatpush2.msra.mxu1 %v984_v2  ;;  %2558 = vmatprep.subr.mxu0 %v457_v4  ;;  %v840_v46 = vld [vmem:[#allocation5 + $0x1890] sm:$0xff]  ;;  %v313_v47 = vld [vmem:[#allocation5 + $0x818] sm:$0xff] }
  0xd7   :  { %2629 = vmatprep.subr.mxu1 %v969_v5  ;;  %2559 = vmatpush2.msra.mxu0 %v456_v6  ;;  %v825_v48 = vld [vmem:[#allocation5 + $0x1818] sm:$0xff]  ;;  %v312_v49 = vld [vmem:[#allocation5 + $0x810] sm:$0xff] }
  0xd8   :  { %2630 = vmatpush2.msra.mxu1 %v968_v7  ;;  %2560 = vmatprep.subr.mxu0 %v441_v9  ;;  %v824_v50 = vld [vmem:[#allocation5 + $0x1810] sm:$0xff]  ;;  %v1321_v51 = vld [vmem:[#allocation5 + $0x2798] sm:$0xff] }
  0xd9   :  { %2631 = vmatprep.subr.mxu1 %v953_v10  ;;  %2561 = vmatpush2.msra.mxu0 %v440_v12  ;;  %v1833_v53 = vld [vmem:[#allocation5 + $0x3798] sm:$0xff]  ;;  %v1320_v54 = vld [vmem:[#allocation5 + $0x2790] sm:$0xff] }
  0xda   :  { %2632 = vmatpush2.msra.mxu1 %v952_v13  ;;  %2562 = vmatprep.subr.mxu0 %v425_v14  ;;  %v1832_v55 = vld [vmem:[#allocation5 + $0x3790] sm:$0xff]  ;;  %v1305_v56 = vld [vmem:[#allocation5 + $0x2718] sm:$0xff] }
  0xdb   :  { %2633 = vmatprep.subr.mxu1 %v937_v15  ;;  %2563 = vmatpush2.msra.mxu0 %v424_v17  ;;  %v1817_v57 = vld [vmem:[#allocation5 + $0x3718] sm:$0xff]  ;;  %v1304_v58 = vld [vmem:[#allocation5 + $0x2710] sm:$0xff] }
  0xdc   :  { %2634 = vmatpush2.msra.mxu1 %v936_v18  ;;  %2564 = vmatprep.subr.mxu0 %v409_v19  ;;  %v1816_v59 = vld [vmem:[#allocation5 + $0x3710] sm:$0xff]  ;;  %v1289_v60 = vld [vmem:[#allocation5 + $0x2698] sm:$0xff] }
  0xdd   :  { %2635 = vmatprep.subr.mxu1 %v921_v20  ;;  %2565 = vmatpush2.msra.mxu0 %v408_v22  ;;  %v1801_v61 = vld [vmem:[#allocation5 + $0x3698] sm:$0xff]  ;;  %v1288_v63 = vld [vmem:[#allocation5 + $0x2690] sm:$0xff] }
  0xde   :  { %2636 = vmatpush2.msra.mxu1 %v920_v23  ;;  %2566 = vmatprep.subr.mxu0 %v393_v24  ;;  %v1800_v0 = vld [vmem:[#allocation5 + $0x3690] sm:$0xff]  ;;  %v1273_v1 = vld [vmem:[#allocation5 + $0x2618] sm:$0xff] }
  0xdf   :  { %2637 = vmatprep.subr.mxu1 %v905_v25  ;;  %2567 = vmatpush2.msra.mxu0 %v392_v27  ;;  %v1785_v2 = vld [vmem:[#allocation5 + $0x3618] sm:$0xff]  ;;  %v1272_v4 = vld [vmem:[#allocation5 + $0x2610] sm:$0xff] }
  0xe0   :  { %2638 = vmatpush2.msra.mxu1 %v904_v28  ;;  %2568 = vmatprep.subr.mxu0 %v377_v30  ;;  %v1784_v5 = vld [vmem:[#allocation5 + $0x3610] sm:$0xff]  ;;  %v1257_v6 = vld [vmem:[#allocation5 + $0x2598] sm:$0xff] }
  0xe1   :  { %2639 = vmatprep.subr.mxu1 %v889_v31  ;;  %2569 = vmatpush2.msra.mxu0 %v376_v32  ;;  %v1769_v7 = vld [vmem:[#allocation5 + $0x3598] sm:$0xff]  ;;  %v1256_v9 = vld [vmem:[#allocation5 + $0x2590] sm:$0xff] }
  0xe2   :  { %2640 = vmatpush2.msra.mxu1 %v888_v33  ;;  %2570 = vmatprep.subr.mxu0 %v361_v34  ;;  %v1768_v10 = vld [vmem:[#allocation5 + $0x3590] sm:$0xff]  ;;  %v1241_v12 = vld [vmem:[#allocation5 + $0x2518] sm:$0xff] }
  0xe3   :  { %2641 = vmatprep.subr.mxu1 %v873_v35  ;;  %2571 = vmatpush2.msra.mxu0 %v360_v36  ;;  %v1753_v13 = vld [vmem:[#allocation5 + $0x3518] sm:$0xff]  ;;  %v1240_v14 = vld [vmem:[#allocation5 + $0x2510] sm:$0xff] }
  0xe4   :  { %2642 = vmatpush2.msra.mxu1 %v872_v37  ;;  %2572 = vmatprep.subr.mxu0 %v345_v38  ;;  %v1752_v15 = vld [vmem:[#allocation5 + $0x3510] sm:$0xff]  ;;  %v1225_v17 = vld [vmem:[#allocation5 + $0x2498] sm:$0xff] }
  0xe5   :  { %2643 = vmatprep.subr.mxu1 %v857_v39  ;;  %2573 = vmatpush2.msra.mxu0 %v344_v40  ;;  %v1737_v18 = vld [vmem:[#allocation5 + $0x3498] sm:$0xff]  ;;  %v1224_v19 = vld [vmem:[#allocation5 + $0x2490] sm:$0xff] }
  0xe6   :  { %2644 = vmatpush2.msra.mxu1 %v856_v42  ;;  %2574 = vmatprep.subr.mxu0 %v329_v43  ;;  %v1736_v20 = vld [vmem:[#allocation5 + $0x3490] sm:$0xff]  ;;  %v1209_v22 = vld [vmem:[#allocation5 + $0x2418] sm:$0xff] }
  0xe7   :  { %2645 = vmatprep.subr.mxu1 %v841_v44  ;;  %2575 = vmatpush2.msra.mxu0 %v328_v45  ;;  %v1721_v23 = vld [vmem:[#allocation5 + $0x3418] sm:$0xff]  ;;  %v1208_v24 = vld [vmem:[#allocation5 + $0x2410] sm:$0xff] }
  0xe8   :  { %2646 = vmatpush2.msra.mxu1 %v840_v46  ;;  %2576 = vmatprep.subr.mxu0 %v313_v47  ;;  %v1720_v25 = vld [vmem:[#allocation5 + $0x3410] sm:$0xff]  ;;  %v1193_v27 = vld [vmem:[#allocation5 + $0x2398] sm:$0xff] }
  0xe9   :  { %2647 = vmatprep.subr.mxu1 %v825_v48  ;;  %2577 = vmatpush2.msra.mxu0 %v312_v49  ;;  %v1705_v28 = vld [vmem:[#allocation5 + $0x3398] sm:$0xff]  ;;  %v1192_v30 = vld [vmem:[#allocation5 + $0x2390] sm:$0xff] }
  0xea   :  { %2578 = vmatprep.mubr.f32.mxu0 %v4755_v8  ;;  %2648 = vmatpush2.msra.mxu1 %v824_v50  ;;  %v1704_v31 = vld [vmem:[#allocation5 + $0x3390] sm:$0xff]  ;;  %v1177_v32 = vld [vmem:[#allocation5 + $0x2318] sm:$0xff] }
  0xeb   :  { %2579 = vmatmul.mubr.f32.vlgmr.msra.gmra.mxu0 %v4748_v62  ;;  %2649 = vmatprep.mubr.f32.mxu1 %v4759_v11  ;;  %v1689_v33 = vld [vmem:[#allocation5 + $0x3318] sm:$0xff]  ;;  %v1176_v34 = vld [vmem:[#allocation5 + $0x2310] sm:$0xff] }
  0xec   :  { %2656 = vmatprep.subr.mxu0 %v1321_v51  ;;  %2727 = vmatprep.subr.mxu1 %v1833_v53  ;;  %v1688_v35 = vld [vmem:[#allocation5 + $0x3310] sm:$0xff]  ;;  %v1161_v36 = vld [vmem:[#allocation5 + $0x2298] sm:$0xff] }
  0xed   :  { %2650 = vmatmul.mubr.f32.vlgmr.msra.gmra.mxu1 %v4751_v3  ;;  %2657 = vmatpush1.msra.mxu0 %v1320_v54  ;;  %v1673_v37 = vld [vmem:[#allocation5 + $0x3298] sm:$0xff]  ;;  %v1160_v38 = vld [vmem:[#allocation5 + $0x2290] sm:$0xff] }
  0xee   :  { %2728 = vmatpush1.msra.mxu1 %v1832_v55  ;;  %2658 = vmatprep.subr.mxu0 %v1305_v56  ;;  %v1672_v39 = vld [vmem:[#allocation5 + $0x3290] sm:$0xff]  ;;  %v1145_v40 = vld [vmem:[#allocation5 + $0x2218] sm:$0xff] }
  0xef   :  { %2729 = vmatprep.subr.mxu1 %v1817_v57  ;;  %2659 = vmatpush1.msra.mxu0 %v1304_v58  ;;  %v1657_v42 = vld [vmem:[#allocation5 + $0x3218] sm:$0xff]  ;;  %v1144_v43 = vld [vmem:[#allocation5 + $0x2210] sm:$0xff] }
  0xf0   :  { %2730 = vmatpush1.msra.mxu1 %v1816_v59  ;;  %2660 = vmatprep.subr.mxu0 %v1289_v60  ;;  %v1656_v44 = vld [vmem:[#allocation5 + $0x3210] sm:$0xff]  ;;  %v1129_v45 = vld [vmem:[#allocation5 + $0x2198] sm:$0xff] }
  0xf1   :  { %2731 = vmatprep.subr.mxu1 %v1801_v61  ;;  %2661 = vmatpush1.msra.mxu0 %v1288_v63  ;;  %v1641_v46 = vld [vmem:[#allocation5 + $0x3198] sm:$0xff]  ;;  %v1128_v47 = vld [vmem:[#allocation5 + $0x2190] sm:$0xff] }
  0xf2   :  { %2732 = vmatpush1.msra.mxu1 %v1800_v0  ;;  %2662 = vmatprep.subr.mxu0 %v1273_v1  ;;  %v1640_v48 = vld [vmem:[#allocation5 + $0x3190] sm:$0xff]  ;;  %v1113_v49 = vld [vmem:[#allocation5 + $0x2118] sm:$0xff] }
  0xf3   :  { %2733 = vmatprep.subr.mxu1 %v1785_v2  ;;  %2663 = vmatpush1.msra.mxu0 %v1272_v4  ;;  %v1625_v50 = vld [vmem:[#allocation5 + $0x3118] sm:$0xff]  ;;  %v1112_v51 = vld [vmem:[#allocation5 + $0x2110] sm:$0xff] }
  0xf4   :  { %2734 = vmatpush1.msra.mxu1 %v1784_v5  ;;  %2664 = vmatprep.subr.mxu0 %v1257_v6  ;;  %v1624_v53 = vld [vmem:[#allocation5 + $0x3110] sm:$0xff]  ;;  %v1097_v54 = vld [vmem:[#allocation5 + $0x2098] sm:$0xff] }
  0xf5   :  { %2735 = vmatprep.subr.mxu1 %v1769_v7  ;;  %2665 = vmatpush1.msra.mxu0 %v1256_v9  ;;  %v1609_v55 = vld [vmem:[#allocation5 + $0x3098] sm:$0xff]  ;;  %v1096_v56 = vld [vmem:[#allocation5 + $0x2090] sm:$0xff] }
  0xf6   :  { %2736 = vmatpush1.msra.mxu1 %v1768_v10  ;;  %2666 = vmatprep.subr.mxu0 %v1241_v12  ;;  %v1608_v57 = vld [vmem:[#allocation5 + $0x3090] sm:$0xff]  ;;  %v1081_v58 = vld [vmem:[#allocation5 + $0x2018] sm:$0xff] }
  0xf7   :  { %2737 = vmatprep.subr.mxu1 %v1753_v13  ;;  %2667 = vmatpush1.msra.mxu0 %v1240_v14  ;;  %v1593_v59 = vld [vmem:[#allocation5 + $0x3018] sm:$0xff]  ;;  %v1080_v60 = vld [vmem:[#allocation5 + $0x2010] sm:$0xff] }
  0xf8   :  { %2738 = vmatpush1.msra.mxu1 %v1752_v15  ;;  %2668 = vmatprep.subr.mxu0 %v1225_v17  ;;  %v1592_v61 = vld [vmem:[#allocation5 + $0x3010] sm:$0xff]  ;;  %v1577_v63 = vld [vmem:[#allocation5 + $0x2f98] sm:$0xff] }
  0xf9   :  { %2739 = vmatprep.subr.mxu1 %v1737_v18  ;;  %2669 = vmatpush1.msra.mxu0 %v1224_v19  ;;  %v2089_v0 = vld [vmem:[#allocation5 + $0x3f98] sm:$0xff]  ;;  %v1576_v1 = vld [vmem:[#allocation5 + $0x2f90] sm:$0xff] }
  0xfa   :  { %2740 = vmatpush1.msra.mxu1 %v1736_v20  ;;  %2670 = vmatprep.subr.mxu0 %v1209_v22  ;;  %v2088_v2 = vld [vmem:[#allocation5 + $0x3f90] sm:$0xff]  ;;  %v1561_v4 = vld [vmem:[#allocation5 + $0x2f18] sm:$0xff] }
  0xfb   :  { %2741 = vmatprep.subr.mxu1 %v1721_v23  ;;  %2671 = vmatpush1.msra.mxu0 %v1208_v24  ;;  %v2073_v5 = vld [vmem:[#allocation5 + $0x3f18] sm:$0xff]  ;;  %v1560_v6 = vld [vmem:[#allocation5 + $0x2f10] sm:$0xff] }
  0xfc   :  { %2742 = vmatpush1.msra.mxu1 %v1720_v25  ;;  %2672 = vmatprep.subr.mxu0 %v1193_v27  ;;  %v2072_v7 = vld [vmem:[#allocation5 + $0x3f10] sm:$0xff]  ;;  %v1545_v9 = vld [vmem:[#allocation5 + $0x2e98] sm:$0xff] }
  0xfd   :  { %2743 = vmatprep.subr.mxu1 %v1705_v28  ;;  %2673 = vmatpush1.msra.mxu0 %v1192_v30  ;;  %v2057_v10 = vld [vmem:[#allocation5 + $0x3e98] sm:$0xff]  ;;  %v1544_v12 = vld [vmem:[#allocation5 + $0x2e90] sm:$0xff] }
  0xfe   :  { %2744 = vmatpush1.msra.mxu1 %v1704_v31  ;;  %2674 = vmatprep.subr.mxu0 %v1177_v32  ;;  %v2056_v13 = vld [vmem:[#allocation5 + $0x3e90] sm:$0xff]  ;;  %v1529_v14 = vld [vmem:[#allocation5 + $0x2e18] sm:$0xff] }
  0xff   :  { %2745 = vmatprep.subr.mxu1 %v1689_v33  ;;  %2675 = vmatpush1.msra.mxu0 %v1176_v34  ;;  %v2041_v15 = vld [vmem:[#allocation5 + $0x3e18] sm:$0xff]  ;;  %v1528_v17 = vld [vmem:[#allocation5 + $0x2e10] sm:$0xff] }
 0x100   :  { %2746 = vmatpush1.msra.mxu1 %v1688_v35  ;;  %2676 = vmatprep.subr.mxu0 %v1161_v36  ;;  %v2040_v18 = vld [vmem:[#allocation5 + $0x3e10] sm:$0xff]  ;;  %v1513_v19 = vld [vmem:[#allocation5 + $0x2d98] sm:$0xff] }
 0x101   :  { %2747 = vmatprep.subr.mxu1 %v1673_v37  ;;  %2677 = vmatpush1.msra.mxu0 %v1160_v38  ;;  %v2025_v20 = vld [vmem:[#allocation5 + $0x3d98] sm:$0xff]  ;;  %v1512_v22 = vld [vmem:[#allocation5 + $0x2d90] sm:$0xff] }
 0x102   :  { %2748 = vmatpush1.msra.mxu1 %v1672_v39  ;;  %2678 = vmatprep.subr.mxu0 %v1145_v40  ;;  %v2024_v23 = vld [vmem:[#allocation5 + $0x3d90] sm:$0xff]  ;;  %v1497_v24 = vld [vmem:[#allocation5 + $0x2d18] sm:$0xff] }
 0x103   :  { %2749 = vmatprep.subr.mxu1 %v1657_v42  ;;  %2679 = vmatpush1.msra.mxu0 %v1144_v43  ;;  %v2009_v25 = vld [vmem:[#allocation5 + $0x3d18] sm:$0xff]  ;;  %v1496_v27 = vld [vmem:[#allocation5 + $0x2d10] sm:$0xff] }
 0x104   :  { %2750 = vmatpush1.msra.mxu1 %v1656_v44  ;;  %2680 = vmatprep.subr.mxu0 %v1129_v45  ;;  %v2008_v28 = vld [vmem:[#allocation5 + $0x3d10] sm:$0xff]  ;;  %v1481_v30 = vld [vmem:[#allocation5 + $0x2c98] sm:$0xff] }
 0x105   :  { %2751 = vmatprep.subr.mxu1 %v1641_v46  ;;  %2681 = vmatpush1.msra.mxu0 %v1128_v47  ;;  %v1993_v31 = vld [vmem:[#allocation5 + $0x3c98] sm:$0xff]  ;;  %v1480_v32 = vld [vmem:[#allocation5 + $0x2c90] sm:$0xff] }
 0x106   :  { %2752 = vmatpush1.msra.mxu1 %v1640_v48  ;;  %2682 = vmatprep.subr.mxu0 %v1113_v49  ;;  %v1992_v33 = vld [vmem:[#allocation5 + $0x3c90] sm:$0xff]  ;;  %v1465_v34 = vld [vmem:[#allocation5 + $0x2c18] sm:$0xff] }
 0x107   :  { %2753 = vmatprep.subr.mxu1 %v1625_v50  ;;  %2683 = vmatpush1.msra.mxu0 %v1112_v51  ;;  %v1977_v35 = vld [vmem:[#allocation5 + $0x3c18] sm:$0xff]  ;;  %v1464_v36 = vld [vmem:[#allocation5 + $0x2c10] sm:$0xff] }
 0x108   :  { %2754 = vmatpush1.msra.mxu1 %v1624_v53  ;;  %2684 = vmatprep.subr.mxu0 %v1097_v54  ;;  %v1976_v37 = vld [vmem:[#allocation5 + $0x3c10] sm:$0xff]  ;;  %v1449_v38 = vld [vmem:[#allocation5 + $0x2b98] sm:$0xff] }
 0x109   :  { %2755 = vmatprep.subr.mxu1 %v1609_v55  ;;  %2685 = vmatpush1.msra.mxu0 %v1096_v56  ;;  %v1961_v39 = vld [vmem:[#allocation5 + $0x3b98] sm:$0xff]  ;;  %v1448_v40 = vld [vmem:[#allocation5 + $0x2b90] sm:$0xff] }
 0x10a   :  { %2756 = vmatpush1.msra.mxu1 %v1608_v57  ;;  %2686 = vmatprep.subr.mxu0 %v1081_v58  ;;  %v1960_v42 = vld [vmem:[#allocation5 + $0x3b90] sm:$0xff]  ;;  %v1433_v43 = vld [vmem:[#allocation5 + $0x2b18] sm:$0xff] }
 0x10b   :  { %2757 = vmatprep.subr.mxu1 %v1593_v59  ;;  %2687 = vmatpush1.msra.mxu0 %v1080_v60  ;;  %v1945_v44 = vld [vmem:[#allocation5 + $0x3b18] sm:$0xff]  ;;  %v1432_v45 = vld [vmem:[#allocation5 + $0x2b10] sm:$0xff] }
 0x10c   :  { %2758 = vmatpush1.msra.mxu1 %v1592_v61  ;;  %2688 = vmatprep.subr.mxu0 %v1577_v63  ;;  %v1944_v46 = vld [vmem:[#allocation5 + $0x3b10] sm:$0xff]  ;;  %v1417_v47 = vld [vmem:[#allocation5 + $0x2a98] sm:$0xff] }
 0x10d   :  { %2759 = vmatprep.subr.mxu1 %v2089_v0  ;;  %2689 = vmatpush2.msra.mxu0 %v1576_v1  ;;  %v1929_v48 = vld [vmem:[#allocation5 + $0x3a98] sm:$0xff]  ;;  %v1416_v49 = vld [vmem:[#allocation5 + $0x2a90] sm:$0xff] }
 0x10e   :  { %2760 = vmatpush2.msra.mxu1 %v2088_v2  ;;  %2690 = vmatprep.subr.mxu0 %v1561_v4  ;;  %v1928_v50 = vld [vmem:[#allocation5 + $0x3a90] sm:$0xff]  ;;  %v1401_v51 = vld [vmem:[#allocation5 + $0x2a18] sm:$0xff] }
 0x10f   :  { %2761 = vmatprep.subr.mxu1 %v2073_v5  ;;  %2691 = vmatpush2.msra.mxu0 %v1560_v6  ;;  %v1913_v53 = vld [vmem:[#allocation5 + $0x3a18] sm:$0xff]  ;;  %v1400_v54 = vld [vmem:[#allocation5 + $0x2a10] sm:$0xff] }
 0x110   :  { %2762 = vmatpush2.msra.mxu1 %v2072_v7  ;;  %2692 = vmatprep.subr.mxu0 %v1545_v9  ;;  %v1912_v55 = vld [vmem:[#allocation5 + $0x3a10] sm:$0xff]  ;;  %v1385_v56 = vld [vmem:[#allocation5 + $0x2998] sm:$0xff] }
 0x111   :  { %2763 = vmatprep.subr.mxu1 %v2057_v10  ;;  %2693 = vmatpush2.msra.mxu0 %v1544_v12  ;;  %v1897_v57 = vld [vmem:[#allocation5 + $0x3998] sm:$0xff]  ;;  %v1384_v58 = vld [vmem:[#allocation5 + $0x2990] sm:$0xff]  ;;  %v299_v12 = vld [vmem:[#allocation5 + $0x7a8] sm:$0xff] }
 0x112   :  { %2764 = vmatpush2.msra.mxu1 %v2056_v13  ;;  %2694 = vmatprep.subr.mxu0 %v1529_v14  ;;  %v1896_v59 = vld [vmem:[#allocation5 + $0x3990] sm:$0xff]  ;;  %v1369_v60 = vld [vmem:[#allocation5 + $0x2918] sm:$0xff]  ;;  %v811_v13 = vld [vmem:[#allocation5 + $0x17a8] sm:$0xff] }
 0x113   :  { %2765 = vmatprep.subr.mxu1 %v2041_v15  ;;  %2695 = vmatpush2.msra.mxu0 %v1528_v17  ;;  %v1881_v61 = vld [vmem:[#allocation5 + $0x3918] sm:$0xff]  ;;  %v1368_v63 = vld [vmem:[#allocation5 + $0x2910] sm:$0xff]  ;;  %v298_v14 = vld [vmem:[#allocation5 + $0x7a0] sm:$0xff] }
 0x114   :  { %2766 = vmatpush2.msra.mxu1 %v2040_v18  ;;  %2696 = vmatprep.subr.mxu0 %v1513_v19  ;;  %v1880_v0 = vld [vmem:[#allocation5 + $0x3910] sm:$0xff]  ;;  %v1353_v1 = vld [vmem:[#allocation5 + $0x2898] sm:$0xff]  ;;  %v810_v15 = vld [vmem:[#allocation5 + $0x17a0] sm:$0xff] }
 0x115   :  { %2767 = vmatprep.subr.mxu1 %v2025_v20  ;;  %2697 = vmatpush2.msra.mxu0 %v1512_v22  ;;  %v1865_v2 = vld [vmem:[#allocation5 + $0x3898] sm:$0xff]  ;;  %v1352_v4 = vld [vmem:[#allocation5 + $0x2890] sm:$0xff]  ;;  %v283_v17 = vld [vmem:[#allocation5 + $0x728] sm:$0xff] }
 0x116   :  { %2768 = vmatpush2.msra.mxu1 %v2024_v23  ;;  %2698 = vmatprep.subr.mxu0 %v1497_v24  ;;  %v1864_v5 = vld [vmem:[#allocation5 + $0x3890] sm:$0xff]  ;;  %v1337_v6 = vld [vmem:[#allocation5 + $0x2818] sm:$0xff]  ;;  %v795_v18 = vld [vmem:[#allocation5 + $0x1728] sm:$0xff] }
 0x117   :  { %2769 = vmatprep.subr.mxu1 %v2009_v25  ;;  %2699 = vmatpush2.msra.mxu0 %v1496_v27  ;;  %v1849_v7 = vld [vmem:[#allocation5 + $0x3818] sm:$0xff]  ;;  %v1336_v9 = vld [vmem:[#allocation5 + $0x2810] sm:$0xff]  ;;  %v282_v19 = vld [vmem:[#allocation5 + $0x720] sm:$0xff] }
 0x118   :  { %2770 = vmatpush2.msra.mxu1 %v2008_v28  ;;  %2700 = vmatprep.subr.mxu0 %v1481_v30  ;;  %v1848_v10 = vld [vmem:[#allocation5 + $0x3810] sm:$0xff]  ;;  %v794_v20 = vld [vmem:[#allocation5 + $0x1720] sm:$0xff]  ;;  %v267_v22 = vld [vmem:[#allocation5 + $0x6a8] sm:$0xff] }
 0x119   :  { %2771 = vmatprep.subr.mxu1 %v1993_v31  ;;  %2701 = vmatpush2.msra.mxu0 %v1480_v32  ;;  %v779_v23 = vld [vmem:[#allocation5 + $0x16a8] sm:$0xff]  ;;  %v266_v24 = vld [vmem:[#allocation5 + $0x6a0] sm:$0xff] }
 0x11a   :  { %2772 = vmatpush2.msra.mxu1 %v1992_v33  ;;  %2702 = vmatprep.subr.mxu0 %v1465_v34  ;;  %v778_v25 = vld [vmem:[#allocation5 + $0x16a0] sm:$0xff]  ;;  %v251_v27 = vld [vmem:[#allocation5 + $0x628] sm:$0xff] }
 0x11b   :  { %2773 = vmatprep.subr.mxu1 %v1977_v35  ;;  %2703 = vmatpush2.msra.mxu0 %v1464_v36  ;;  %v763_v28 = vld [vmem:[#allocation5 + $0x1628] sm:$0xff]  ;;  %v250_v30 = vld [vmem:[#allocation5 + $0x620] sm:$0xff] }
 0x11c   :  { %2774 = vmatpush2.msra.mxu1 %v1976_v37  ;;  %2704 = vmatprep.subr.mxu0 %v1449_v38  ;;  %v762_v31 = vld [vmem:[#allocation5 + $0x1620] sm:$0xff]  ;;  %v235_v32 = vld [vmem:[#allocation5 + $0x5a8] sm:$0xff] }
 0x11d   :  { %2775 = vmatprep.subr.mxu1 %v1961_v39  ;;  %2705 = vmatpush2.msra.mxu0 %v1448_v40  ;;  %v747_v33 = vld [vmem:[#allocation5 + $0x15a8] sm:$0xff]  ;;  %v234_v34 = vld [vmem:[#allocation5 + $0x5a0] sm:$0xff] }
 0x11e   :  { %2776 = vmatpush2.msra.mxu1 %v1960_v42  ;;  %2706 = vmatprep.subr.mxu0 %v1433_v43  ;;  %v746_v35 = vld [vmem:[#allocation5 + $0x15a0] sm:$0xff]  ;;  %v219_v36 = vld [vmem:[#allocation5 + $0x528] sm:$0xff] }
 0x11f   :  { %2777 = vmatprep.subr.mxu1 %v1945_v44  ;;  %2707 = vmatpush2.msra.mxu0 %v1432_v45  ;;  %v731_v37 = vld [vmem:[#allocation5 + $0x1528] sm:$0xff]  ;;  %v218_v38 = vld [vmem:[#allocation5 + $0x520] sm:$0xff] }
 0x120   :  { %2778 = vmatpush2.msra.mxu1 %v1944_v46  ;;  %2708 = vmatprep.subr.mxu0 %v1417_v47  ;;  %v730_v39 = vld [vmem:[#allocation5 + $0x1520] sm:$0xff]  ;;  %v203_v40 = vld [vmem:[#allocation5 + $0x4a8] sm:$0xff] }
 0x121   :  { %2779 = vmatprep.subr.mxu1 %v1929_v48  ;;  %2709 = vmatpush2.msra.mxu0 %v1416_v49  ;;  %v715_v42 = vld [vmem:[#allocation5 + $0x14a8] sm:$0xff]  ;;  %v202_v43 = vld [vmem:[#allocation5 + $0x4a0] sm:$0xff] }
 0x122   :  { %2780 = vmatpush2.msra.mxu1 %v1928_v50  ;;  %2710 = vmatprep.subr.mxu0 %v1401_v51  ;;  %v714_v44 = vld [vmem:[#allocation5 + $0x14a0] sm:$0xff]  ;;  %v187_v45 = vld [vmem:[#allocation5 + $0x428] sm:$0xff] }
 0x123   :  { %2781 = vmatprep.subr.mxu1 %v1913_v53  ;;  %2711 = vmatpush2.msra.mxu0 %v1400_v54  ;;  %v699_v46 = vld [vmem:[#allocation5 + $0x1428] sm:$0xff]  ;;  %v186_v47 = vld [vmem:[#allocation5 + $0x420] sm:$0xff] }
 0x124   :  { %2782 = vmatpush2.msra.mxu1 %v1912_v55  ;;  %2712 = vmatprep.subr.mxu0 %v1385_v56  ;;  %v698_v48 = vld [vmem:[#allocation5 + $0x1420] sm:$0xff]  ;;  %v171_v49 = vld [vmem:[#allocation5 + $0x3a8] sm:$0xff] }
 0x125   :  { %2783 = vmatprep.subr.mxu1 %v1897_v57  ;;  %2713 = vmatpush2.msra.mxu0 %v1384_v58  ;;  %v683_v50 = vld [vmem:[#allocation5 + $0x13a8] sm:$0xff]  ;;  %v170_v51 = vld [vmem:[#allocation5 + $0x3a0] sm:$0xff] }
 0x126   :  { %2784 = vmatpush2.msra.mxu1 %v1896_v59  ;;  %2714 = vmatprep.subr.mxu0 %v1369_v60  ;;  %v682_v53 = vld [vmem:[#allocation5 + $0x13a0] sm:$0xff]  ;;  %v155_v54 = vld [vmem:[#allocation5 + $0x328] sm:$0xff] }
 0x127   :  { %2785 = vmatprep.subr.mxu1 %v1881_v61  ;;  %2715 = vmatpush2.msra.mxu0 %v1368_v63  ;;  %v667_v55 = vld [vmem:[#allocation5 + $0x1328] sm:$0xff]  ;;  %v154_v56 = vld [vmem:[#allocation5 + $0x320] sm:$0xff] }
 0x128   :  { %2786 = vmatpush2.msra.mxu1 %v1880_v0  ;;  %2716 = vmatprep.subr.mxu0 %v1353_v1  ;;  %v666_v57 = vld [vmem:[#allocation5 + $0x1320] sm:$0xff]  ;;  %v139_v58 = vld [vmem:[#allocation5 + $0x2a8] sm:$0xff] }
 0x129   :  { %2787 = vmatprep.subr.mxu1 %v1865_v2  ;;  %2717 = vmatpush2.msra.mxu0 %v1352_v4  ;;  %v651_v59 = vld [vmem:[#allocation5 + $0x12a8] sm:$0xff]  ;;  %v138_v60 = vld [vmem:[#allocation5 + $0x2a0] sm:$0xff] }
 0x12a   :  { %2788 = vmatpush2.msra.mxu1 %v1864_v5  ;;  %2718 = vmatprep.subr.mxu0 %v1337_v6  ;;  %v650_v61 = vld [vmem:[#allocation5 + $0x12a0] sm:$0xff]  ;;  %v123_v63 = vld [vmem:[#allocation5 + $0x228] sm:$0xff] }
 0x12b   :  { %2789 = vmatprep.subr.mxu1 %v1849_v7  ;;  %2719 = vmatpush2.msra.mxu0 %v1336_v9  ;;  %v635_v0 = vld [vmem:[#allocation5 + $0x1228] sm:$0xff]  ;;  %v122_v1 = vld [vmem:[#allocation5 + $0x220] sm:$0xff] }
 0x12c   :  { %2720 = vmatprep.mubr.f32.mxu0 %v4773_v26  ;;  %2790 = vmatpush2.msra.mxu1 %v1848_v10  ;;  %v634_v2 = vld [vmem:[#allocation5 + $0x1220] sm:$0xff]  ;;  %v107_v4 = vld [vmem:[#allocation5 + $0x1a8] sm:$0xff] }
 0x12d   :  { %2721 = vmatmul.mubr.f32.vlgmr.msra.gmra.mxu0 %v4766_v16  ;;  %2791 = vmatprep.mubr.f32.mxu1 %v4777_v29  ;;  %v619_v5 = vld [vmem:[#allocation5 + $0x11a8] sm:$0xff]  ;;  %v106_v6 = vld [vmem:[#allocation5 + $0x1a0] sm:$0xff] }
 0x12e   :  { %2798 = vmatprep.subr.mxu0 %v299_v12  ;;  %2869 = vmatprep.subr.mxu1 %v811_v13  ;;  %v618_v7 = vld [vmem:[#allocation5 + $0x11a0] sm:$0xff]  ;;  %v91_v9 = vld [vmem:[#allocation5 + $0x128] sm:$0xff] }
 0x12f   :  { %2792 = vmatmul.mubr.f32.vlgmr.msra.gmra.mxu1 %v4769_v21  ;;  %2799 = vmatpush1.msra.mxu0 %v298_v14  ;;  %v603_v10 = vld [vmem:[#allocation5 + $0x1128] sm:$0xff]  ;;  %v90_v12 = vld [vmem:[#allocation5 + $0x120] sm:$0xff] }
 0x130   :  { %2870 = vmatpush1.msra.mxu1 %v810_v15  ;;  %2800 = vmatprep.subr.mxu0 %v283_v17  ;;  %v602_v13 = vld [vmem:[#allocation5 + $0x1120] sm:$0xff]  ;;  %v75_v14 = vld [vmem:[#allocation5 + $0xa8] sm:$0xff] }
 0x131   :  { %2871 = vmatprep.subr.mxu1 %v795_v18  ;;  %2801 = vmatpush1.msra.mxu0 %v282_v19  ;;  %v587_v15 = vld [vmem:[#allocation5 + $0x10a8] sm:$0xff]  ;;  %v74_v17 = vld [vmem:[#allocation5 + $0xa0] sm:$0xff] }
 0x132   :  { %2872 = vmatpush1.msra.mxu1 %v794_v20  ;;  %2802 = vmatprep.subr.mxu0 %v267_v22  ;;  %v586_v18 = vld [vmem:[#allocation5 + $0x10a0] sm:$0xff]  ;;  %v59_v19 = vld [vmem:[#allocation5 + $0x28] sm:$0xff] }
 0x133   :  { %2873 = vmatprep.subr.mxu1 %v779_v23  ;;  %2803 = vmatpush1.msra.mxu0 %v266_v24  ;;  %v571_v20 = vld [vmem:[#allocation5 + $0x1028] sm:$0xff]  ;;  %v58_v22 = vld [vmem:[#allocation5 + $0x20] sm:$0xff] }
 0x134   :  { %2874 = vmatpush1.msra.mxu1 %v778_v25  ;;  %2804 = vmatprep.subr.mxu0 %v251_v27  ;;  %v570_v23 = vld [vmem:[#allocation5 + $0x1020] sm:$0xff]  ;;  %v555_v24 = vld [vmem:[#allocation5 + $0xfa8] sm:$0xff] }
 0x135   :  { %2875 = vmatprep.subr.mxu1 %v763_v28  ;;  %2805 = vmatpush1.msra.mxu0 %v250_v30  ;;  %v1067_v25 = vld [vmem:[#allocation5 + $0x1fa8] sm:$0xff]  ;;  %v554_v27 = vld [vmem:[#allocation5 + $0xfa0] sm:$0xff] }
 0x136   :  { %2876 = vmatpush1.msra.mxu1 %v762_v31  ;;  %2806 = vmatprep.subr.mxu0 %v235_v32  ;;  %v1066_v28 = vld [vmem:[#allocation5 + $0x1fa0] sm:$0xff]  ;;  %v539_v30 = vld [vmem:[#allocation5 + $0xf28] sm:$0xff] }
 0x137   :  { %2877 = vmatprep.subr.mxu1 %v747_v33  ;;  %2807 = vmatpush1.msra.mxu0 %v234_v34  ;;  %v1051_v31 = vld [vmem:[#allocation5 + $0x1f28] sm:$0xff]  ;;  %v538_v32 = vld [vmem:[#allocation5 + $0xf20] sm:$0xff] }
 0x138   :  { %2878 = vmatpush1.msra.mxu1 %v746_v35  ;;  %2808 = vmatprep.subr.mxu0 %v219_v36  ;;  %v1050_v33 = vld [vmem:[#allocation5 + $0x1f20] sm:$0xff]  ;;  %v523_v34 = vld [vmem:[#allocation5 + $0xea8] sm:$0xff] }
 0x139   :  { %2879 = vmatprep.subr.mxu1 %v731_v37  ;;  %2809 = vmatpush1.msra.mxu0 %v218_v38  ;;  %v1035_v35 = vld [vmem:[#allocation5 + $0x1ea8] sm:$0xff]  ;;  %v522_v36 = vld [vmem:[#allocation5 + $0xea0] sm:$0xff] }
 0x13a   :  { %2880 = vmatpush1.msra.mxu1 %v730_v39  ;;  %2810 = vmatprep.subr.mxu0 %v203_v40  ;;  %v1034_v37 = vld [vmem:[#allocation5 + $0x1ea0] sm:$0xff]  ;;  %v507_v38 = vld [vmem:[#allocation5 + $0xe28] sm:$0xff] }
 0x13b   :  { %2881 = vmatprep.subr.mxu1 %v715_v42  ;;  %2811 = vmatpush1.msra.mxu0 %v202_v43  ;;  %v1019_v39 = vld [vmem:[#allocation5 + $0x1e28] sm:$0xff]  ;;  %v506_v40 = vld [vmem:[#allocation5 + $0xe20] sm:$0xff] }
 0x13c   :  { %2882 = vmatpush1.msra.mxu1 %v714_v44  ;;  %2812 = vmatprep.subr.mxu0 %v187_v45  ;;  %v1018_v42 = vld [vmem:[#allocation5 + $0x1e20] sm:$0xff]  ;;  %v491_v43 = vld [vmem:[#allocation5 + $0xda8] sm:$0xff] }
 0x13d   :  { %2883 = vmatprep.subr.mxu1 %v699_v46  ;;  %2813 = vmatpush1.msra.mxu0 %v186_v47  ;;  %v1003_v44 = vld [vmem:[#allocation5 + $0x1da8] sm:$0xff]  ;;  %v490_v45 = vld [vmem:[#allocation5 + $0xda0] sm:$0xff] }
 0x13e   :  { %2884 = vmatpush1.msra.mxu1 %v698_v48  ;;  %2814 = vmatprep.subr.mxu0 %v171_v49  ;;  %v1002_v46 = vld [vmem:[#allocation5 + $0x1da0] sm:$0xff]  ;;  %v475_v47 = vld [vmem:[#allocation5 + $0xd28] sm:$0xff] }
 0x13f   :  { %2885 = vmatprep.subr.mxu1 %v683_v50  ;;  %2815 = vmatpush1.msra.mxu0 %v170_v51  ;;  %v987_v48 = vld [vmem:[#allocation5 + $0x1d28] sm:$0xff]  ;;  %v474_v49 = vld [vmem:[#allocation5 + $0xd20] sm:$0xff] }
 0x140   :  { %2886 = vmatpush1.msra.mxu1 %v682_v53  ;;  %2816 = vmatprep.subr.mxu0 %v155_v54  ;;  %v986_v50 = vld [vmem:[#allocation5 + $0x1d20] sm:$0xff]  ;;  %v459_v51 = vld [vmem:[#allocation5 + $0xca8] sm:$0xff] }
 0x141   :  { %2887 = vmatprep.subr.mxu1 %v667_v55  ;;  %2817 = vmatpush1.msra.mxu0 %v154_v56  ;;  %v971_v53 = vld [vmem:[#allocation5 + $0x1ca8] sm:$0xff]  ;;  %v458_v54 = vld [vmem:[#allocation5 + $0xca0] sm:$0xff] }
 0x142   :  { %2888 = vmatpush1.msra.mxu1 %v666_v57  ;;  %2818 = vmatprep.subr.mxu0 %v139_v58  ;;  %v970_v55 = vld [vmem:[#allocation5 + $0x1ca0] sm:$0xff]  ;;  %v443_v56 = vld [vmem:[#allocation5 + $0xc28] sm:$0xff] }
 0x143   :  { %2889 = vmatprep.subr.mxu1 %v651_v59  ;;  %2819 = vmatpush1.msra.mxu0 %v138_v60  ;;  %v955_v57 = vld [vmem:[#allocation5 + $0x1c28] sm:$0xff]  ;;  %v442_v58 = vld [vmem:[#allocation5 + $0xc20] sm:$0xff] }
 0x144   :  { %2890 = vmatpush1.msra.mxu1 %v650_v61  ;;  %2820 = vmatprep.subr.mxu0 %v123_v63  ;;  %v954_v59 = vld [vmem:[#allocation5 + $0x1c20] sm:$0xff]  ;;  %v427_v60 = vld [vmem:[#allocation5 + $0xba8] sm:$0xff] }
 0x145   :  { %2891 = vmatprep.subr.mxu1 %v635_v0  ;;  %2821 = vmatpush1.msra.mxu0 %v122_v1  ;;  %v939_v61 = vld [vmem:[#allocation5 + $0x1ba8] sm:$0xff]  ;;  %v426_v63 = vld [vmem:[#allocation5 + $0xba0] sm:$0xff] }
 0x146   :  { %2892 = vmatpush1.msra.mxu1 %v634_v2  ;;  %2822 = vmatprep.subr.mxu0 %v107_v4  ;;  %v938_v0 = vld [vmem:[#allocation5 + $0x1ba0] sm:$0xff]  ;;  %v411_v1 = vld [vmem:[#allocation5 + $0xb28] sm:$0xff] }
 0x147   :  { %2893 = vmatprep.subr.mxu1 %v619_v5  ;;  %2823 = vmatpush1.msra.mxu0 %v106_v6  ;;  %v923_v2 = vld [vmem:[#allocation5 + $0x1b28] sm:$0xff]  ;;  %v410_v4 = vld [vmem:[#allocation5 + $0xb20] sm:$0xff] }
 0x148   :  { %2894 = vmatpush1.msra.mxu1 %v618_v7  ;;  %2824 = vmatprep.subr.mxu0 %v91_v9  ;;  %v922_v5 = vld [vmem:[#allocation5 + $0x1b20] sm:$0xff]  ;;  %v395_v6 = vld [vmem:[#allocation5 + $0xaa8] sm:$0xff] }
 0x149   :  { %2895 = vmatprep.subr.mxu1 %v603_v10  ;;  %2825 = vmatpush1.msra.mxu0 %v90_v12  ;;  %v907_v7 = vld [vmem:[#allocation5 + $0x1aa8] sm:$0xff]  ;;  %v394_v9 = vld [vmem:[#allocation5 + $0xaa0] sm:$0xff] }
 0x14a   :  { %2896 = vmatpush1.msra.mxu1 %v602_v13  ;;  %2826 = vmatprep.subr.mxu0 %v75_v14  ;;  %v906_v10 = vld [vmem:[#allocation5 + $0x1aa0] sm:$0xff]  ;;  %v379_v12 = vld [vmem:[#allocation5 + $0xa28] sm:$0xff] }
 0x14b   :  { %2897 = vmatprep.subr.mxu1 %v587_v15  ;;  %2827 = vmatpush1.msra.mxu0 %v74_v17  ;;  %v891_v13 = vld [vmem:[#allocation5 + $0x1a28] sm:$0xff]  ;;  %v378_v14 = vld [vmem:[#allocation5 + $0xa20] sm:$0xff] }
 0x14c   :  { %2898 = vmatpush1.msra.mxu1 %v586_v18  ;;  %2828 = vmatprep.subr.mxu0 %v59_v19  ;;  %v890_v15 = vld [vmem:[#allocation5 + $0x1a20] sm:$0xff]  ;;  %v363_v17 = vld [vmem:[#allocation5 + $0x9a8] sm:$0xff] }
 0x14d   :  { %2899 = vmatprep.subr.mxu1 %v571_v20  ;;  %2829 = vmatpush1.msra.mxu0 %v58_v22  ;;  %v875_v18 = vld [vmem:[#allocation5 + $0x19a8] sm:$0xff]  ;;  %v362_v19 = vld [vmem:[#allocation5 + $0x9a0] sm:$0xff] }
 0x14e   :  { %2900 = vmatpush1.msra.mxu1 %v570_v23  ;;  %2830 = vmatprep.subr.mxu0 %v555_v24  ;;  %v874_v20 = vld [vmem:[#allocation5 + $0x19a0] sm:$0xff]  ;;  %v347_v22 = vld [vmem:[#allocation5 + $0x928] sm:$0xff] }
 0x14f   :  { %2901 = vmatprep.subr.mxu1 %v1067_v25  ;;  %2831 = vmatpush2.msra.mxu0 %v554_v27  ;;  %v859_v23 = vld [vmem:[#allocation5 + $0x1928] sm:$0xff]  ;;  %v346_v24 = vld [vmem:[#allocation5 + $0x920] sm:$0xff] }
 0x150   :  { %2902 = vmatpush2.msra.mxu1 %v1066_v28  ;;  %2832 = vmatprep.subr.mxu0 %v539_v30  ;;  %v858_v25 = vld [vmem:[#allocation5 + $0x1920] sm:$0xff]  ;;  %v331_v27 = vld [vmem:[#allocation5 + $0x8a8] sm:$0xff] }
 0x151   :  { %2903 = vmatprep.subr.mxu1 %v1051_v31  ;;  %2833 = vmatpush2.msra.mxu0 %v538_v32  ;;  %v843_v28 = vld [vmem:[#allocation5 + $0x18a8] sm:$0xff]  ;;  %v330_v30 = vld [vmem:[#allocation5 + $0x8a0] sm:$0xff] }
 0x152   :  { %2904 = vmatpush2.msra.mxu1 %v1050_v33  ;;  %2834 = vmatprep.subr.mxu0 %v523_v34  ;;  %v842_v31 = vld [vmem:[#allocation5 + $0x18a0] sm:$0xff]  ;;  %v315_v32 = vld [vmem:[#allocation5 + $0x828] sm:$0xff] }
 0x153   :  { %2905 = vmatprep.subr.mxu1 %v1035_v35  ;;  %2835 = vmatpush2.msra.mxu0 %v522_v36  ;;  %v827_v33 = vld [vmem:[#allocation5 + $0x1828] sm:$0xff]  ;;  %v314_v34 = vld [vmem:[#allocation5 + $0x820] sm:$0xff] }
 0x154   :  { %2906 = vmatpush2.msra.mxu1 %v1034_v37  ;;  %2836 = vmatprep.subr.mxu0 %v507_v38  ;;  %v826_v35 = vld [vmem:[#allocation5 + $0x1820] sm:$0xff]  ;;  %v1323_v36 = vld [vmem:[#allocation5 + $0x27a8] sm:$0xff] }
 0x155   :  { %2907 = vmatprep.subr.mxu1 %v1019_v39  ;;  %2837 = vmatpush2.msra.mxu0 %v506_v40  ;;  %v1835_v37 = vld [vmem:[#allocation5 + $0x37a8] sm:$0xff]  ;;  %v1322_v38 = vld [vmem:[#allocation5 + $0x27a0] sm:$0xff] }
 0x156   :  { %2908 = vmatpush2.msra.mxu1 %v1018_v42  ;;  %2838 = vmatprep.subr.mxu0 %v491_v43  ;;  %v1834_v39 = vld [vmem:[#allocation5 + $0x37a0] sm:$0xff]  ;;  %v1307_v40 = vld [vmem:[#allocation5 + $0x2728] sm:$0xff] }
 0x157   :  { %2909 = vmatprep.subr.mxu1 %v1003_v44  ;;  %2839 = vmatpush2.msra.mxu0 %v490_v45  ;;  %v1819_v42 = vld [vmem:[#allocation5 + $0x3728] sm:$0xff]  ;;  %v1306_v43 = vld [vmem:[#allocation5 + $0x2720] sm:$0xff] }
 0x158   :  { %2910 = vmatpush2.msra.mxu1 %v1002_v46  ;;  %2840 = vmatprep.subr.mxu0 %v475_v47  ;;  %v1818_v44 = vld [vmem:[#allocation5 + $0x3720] sm:$0xff]  ;;  %v1291_v45 = vld [vmem:[#allocation5 + $0x26a8] sm:$0xff] }
 0x159   :  { %2911 = vmatprep.subr.mxu1 %v987_v48  ;;  %2841 = vmatpush2.msra.mxu0 %v474_v49  ;;  %v1803_v46 = vld [vmem:[#allocation5 + $0x36a8] sm:$0xff]  ;;  %v1290_v47 = vld [vmem:[#allocation5 + $0x26a0] sm:$0xff] }
 0x15a   :  { %2912 = vmatpush2.msra.mxu1 %v986_v50  ;;  %2842 = vmatprep.subr.mxu0 %v459_v51  ;;  %v1802_v48 = vld [vmem:[#allocation5 + $0x36a0] sm:$0xff]  ;;  %v1275_v49 = vld [vmem:[#allocation5 + $0x2628] sm:$0xff] }
 0x15b   :  { %2913 = vmatprep.subr.mxu1 %v971_v53  ;;  %2843 = vmatpush2.msra.mxu0 %v458_v54  ;;  %v1787_v50 = vld [vmem:[#allocation5 + $0x3628] sm:$0xff]  ;;  %v1274_v51 = vld [vmem:[#allocation5 + $0x2620] sm:$0xff] }
 0x15c   :  { %2914 = vmatpush2.msra.mxu1 %v970_v55  ;;  %2844 = vmatprep.subr.mxu0 %v443_v56  ;;  %v1786_v53 = vld [vmem:[#allocation5 + $0x3620] sm:$0xff]  ;;  %v1259_v54 = vld [vmem:[#allocation5 + $0x25a8] sm:$0xff] }
 0x15d   :  { %2915 = vmatprep.subr.mxu1 %v955_v57  ;;  %2845 = vmatpush2.msra.mxu0 %v442_v58  ;;  %v1771_v55 = vld [vmem:[#allocation5 + $0x35a8] sm:$0xff]  ;;  %v1258_v56 = vld [vmem:[#allocation5 + $0x25a0] sm:$0xff] }
 0x15e   :  { %2916 = vmatpush2.msra.mxu1 %v954_v59  ;;  %2846 = vmatprep.subr.mxu0 %v427_v60  ;;  %v1770_v57 = vld [vmem:[#allocation5 + $0x35a0] sm:$0xff]  ;;  %v1243_v58 = vld [vmem:[#allocation5 + $0x2528] sm:$0xff] }
 0x15f   :  { %2917 = vmatprep.subr.mxu1 %v939_v61  ;;  %2847 = vmatpush2.msra.mxu0 %v426_v63  ;;  %v1755_v59 = vld [vmem:[#allocation5 + $0x3528] sm:$0xff]  ;;  %v1242_v60 = vld [vmem:[#allocation5 + $0x2520] sm:$0xff] }
 0x160   :  { %2918 = vmatpush2.msra.mxu1 %v938_v0  ;;  %2848 = vmatprep.subr.mxu0 %v411_v1  ;;  %v1754_v61 = vld [vmem:[#allocation5 + $0x3520] sm:$0xff]  ;;  %v1227_v63 = vld [vmem:[#allocation5 + $0x24a8] sm:$0xff] }
 0x161   :  { %2919 = vmatprep.subr.mxu1 %v923_v2  ;;  %2849 = vmatpush2.msra.mxu0 %v410_v4  ;;  %v1739_v0 = vld [vmem:[#allocation5 + $0x34a8] sm:$0xff]  ;;  %v1226_v1 = vld [vmem:[#allocation5 + $0x24a0] sm:$0xff] }
 0x162   :  { %2920 = vmatpush2.msra.mxu1 %v922_v5  ;;  %2850 = vmatprep.subr.mxu0 %v395_v6  ;;  %v1738_v2 = vld [vmem:[#allocation5 + $0x34a0] sm:$0xff]  ;;  %v1211_v4 = vld [vmem:[#allocation5 + $0x2428] sm:$0xff] }
 0x163   :  { %2921 = vmatprep.subr.mxu1 %v907_v7  ;;  %2851 = vmatpush2.msra.mxu0 %v394_v9  ;;  %v1723_v5 = vld [vmem:[#allocation5 + $0x3428] sm:$0xff]  ;;  %v1210_v6 = vld [vmem:[#allocation5 + $0x2420] sm:$0xff] }
 0x164   :  { %2922 = vmatpush2.msra.mxu1 %v906_v10  ;;  %2852 = vmatprep.subr.mxu0 %v379_v12  ;;  %v1722_v7 = vld [vmem:[#allocation5 + $0x3420] sm:$0xff]  ;;  %v1195_v9 = vld [vmem:[#allocation5 + $0x23a8] sm:$0xff] }
 0x165   :  { %2923 = vmatprep.subr.mxu1 %v891_v13  ;;  %2853 = vmatpush2.msra.mxu0 %v378_v14  ;;  %v1707_v10 = vld [vmem:[#allocation5 + $0x33a8] sm:$0xff]  ;;  %v1194_v12 = vld [vmem:[#allocation5 + $0x23a0] sm:$0xff] }
 0x166   :  { %2924 = vmatpush2.msra.mxu1 %v890_v15  ;;  %2854 = vmatprep.subr.mxu0 %v363_v17  ;;  %v1706_v13 = vld [vmem:[#allocation5 + $0x33a0] sm:$0xff]  ;;  %v1179_v14 = vld [vmem:[#allocation5 + $0x2328] sm:$0xff] }
 0x167   :  { %2925 = vmatprep.subr.mxu1 %v875_v18  ;;  %2855 = vmatpush2.msra.mxu0 %v362_v19  ;;  %v1691_v15 = vld [vmem:[#allocation5 + $0x3328] sm:$0xff]  ;;  %v1178_v17 = vld [vmem:[#allocation5 + $0x2320] sm:$0xff] }
 0x168   :  { %2926 = vmatpush2.msra.mxu1 %v874_v20  ;;  %2856 = vmatprep.subr.mxu0 %v347_v22  ;;  %v1690_v18 = vld [vmem:[#allocation5 + $0x3320] sm:$0xff]  ;;  %v1163_v19 = vld [vmem:[#allocation5 + $0x22a8] sm:$0xff] }
 0x169   :  { %2927 = vmatprep.subr.mxu1 %v859_v23  ;;  %2857 = vmatpush2.msra.mxu0 %v346_v24  ;;  %v1675_v20 = vld [vmem:[#allocation5 + $0x32a8] sm:$0xff]  ;;  %v1162_v22 = vld [vmem:[#allocation5 + $0x22a0] sm:$0xff] }
 0x16a   :  { %2928 = vmatpush2.msra.mxu1 %v858_v25  ;;  %2858 = vmatprep.subr.mxu0 %v331_v27  ;;  %v1674_v23 = vld [vmem:[#allocation5 + $0x32a0] sm:$0xff]  ;;  %v1147_v24 = vld [vmem:[#allocation5 + $0x2228] sm:$0xff] }
 0x16b   :  { %2929 = vmatprep.subr.mxu1 %v843_v28  ;;  %2859 = vmatpush2.msra.mxu0 %v330_v30  ;;  %v1659_v25 = vld [vmem:[#allocation5 + $0x3228] sm:$0xff]  ;;  %v1146_v27 = vld [vmem:[#allocation5 + $0x2220] sm:$0xff] }
 0x16c   :  { %2930 = vmatpush2.msra.mxu1 %v842_v31  ;;  %2860 = vmatprep.subr.mxu0 %v315_v32  ;;  %v1658_v28 = vld [vmem:[#allocation5 + $0x3220] sm:$0xff]  ;;  %v1131_v30 = vld [vmem:[#allocation5 + $0x21a8] sm:$0xff] }
 0x16d   :  { %2931 = vmatprep.subr.mxu1 %v827_v33  ;;  %2861 = vmatpush2.msra.mxu0 %v314_v34  ;;  %v1643_v31 = vld [vmem:[#allocation5 + $0x31a8] sm:$0xff]  ;;  %v1130_v32 = vld [vmem:[#allocation5 + $0x21a0] sm:$0xff] }
 0x16e   :  { %2862 = vmatprep.mubr.f32.mxu0 %v4755_v8  ;;  %2932 = vmatpush2.msra.mxu1 %v826_v35  ;;  %v1642_v33 = vld [vmem:[#allocation5 + $0x31a0] sm:$0xff]  ;;  %v1115_v34 = vld [vmem:[#allocation5 + $0x2128] sm:$0xff] }
 0x16f   :  { %2863 = vmatmul.mubr.f32.vlgmr.msra.gmra.mxu0 %v4748_v62  ;;  %2933 = vmatprep.mubr.f32.mxu1 %v4759_v11  ;;  %v1627_v35 = vld [vmem:[#allocation5 + $0x3128] sm:$0xff] }
 0x170   :  { %2940 = vmatprep.subr.mxu0 %v1323_v36  ;;  %3011 = vmatprep.subr.mxu1 %v1835_v37  ;;  %v1114_v36 = vld [vmem:[#allocation5 + $0x2120] sm:$0xff] }
 0x171   :  { %2934 = vmatmul.mubr.f32.vlgmr.msra.gmra.mxu1 %v4751_v3  ;;  %2941 = vmatpush1.msra.mxu0 %v1322_v38  ;;  %v1626_v37 = vld [vmem:[#allocation5 + $0x3120] sm:$0xff]  ;;  %v1099_v38 = vld [vmem:[#allocation5 + $0x20a8] sm:$0xff] }
 0x172   :  { %3012 = vmatpush1.msra.mxu1 %v1834_v39  ;;  %2942 = vmatprep.subr.mxu0 %v1307_v40  ;;  %v1611_v39 = vld [vmem:[#allocation5 + $0x30a8] sm:$0xff]  ;;  %v1098_v40 = vld [vmem:[#allocation5 + $0x20a0] sm:$0xff] }
 0x173   :  { %3013 = vmatprep.subr.mxu1 %v1819_v42  ;;  %2943 = vmatpush1.msra.mxu0 %v1306_v43  ;;  %v1610_v42 = vld [vmem:[#allocation5 + $0x30a0] sm:$0xff]  ;;  %v1083_v43 = vld [vmem:[#allocation5 + $0x2028] sm:$0xff] }
 0x174   :  { %3014 = vmatpush1.msra.mxu1 %v1818_v44  ;;  %2944 = vmatprep.subr.mxu0 %v1291_v45  ;;  %v1595_v44 = vld [vmem:[#allocation5 + $0x3028] sm:$0xff]  ;;  %v1082_v45 = vld [vmem:[#allocation5 + $0x2020] sm:$0xff] }
 0x175   :  { %3015 = vmatprep.subr.mxu1 %v1803_v46  ;;  %2945 = vmatpush1.msra.mxu0 %v1290_v47  ;;  %v1594_v46 = vld [vmem:[#allocation5 + $0x3020] sm:$0xff]  ;;  %v1579_v47 = vld [vmem:[#allocation5 + $0x2fa8] sm:$0xff] }
 0x176   :  { %3016 = vmatpush1.msra.mxu1 %v1802_v48  ;;  %2946 = vmatprep.subr.mxu0 %v1275_v49  ;;  %v2091_v48 = vld [vmem:[#allocation5 + $0x3fa8] sm:$0xff]  ;;  %v1578_v49 = vld [vmem:[#allocation5 + $0x2fa0] sm:$0xff] }
 0x177   :  { %3017 = vmatprep.subr.mxu1 %v1787_v50  ;;  %2947 = vmatpush1.msra.mxu0 %v1274_v51  ;;  %v2090_v50 = vld [vmem:[#allocation5 + $0x3fa0] sm:$0xff]  ;;  %v1563_v51 = vld [vmem:[#allocation5 + $0x2f28] sm:$0xff] }
 0x178   :  { %3018 = vmatpush1.msra.mxu1 %v1786_v53  ;;  %2948 = vmatprep.subr.mxu0 %v1259_v54  ;;  %v2075_v53 = vld [vmem:[#allocation5 + $0x3f28] sm:$0xff]  ;;  %v1562_v54 = vld [vmem:[#allocation5 + $0x2f20] sm:$0xff] }
 0x179   :  { %3019 = vmatprep.subr.mxu1 %v1771_v55  ;;  %2949 = vmatpush1.msra.mxu0 %v1258_v56  ;;  %v2074_v55 = vld [vmem:[#allocation5 + $0x3f20] sm:$0xff]  ;;  %v1547_v56 = vld [vmem:[#allocation5 + $0x2ea8] sm:$0xff] }
 0x17a   :  { %3020 = vmatpush1.msra.mxu1 %v1770_v57  ;;  %2950 = vmatprep.subr.mxu0 %v1243_v58  ;;  %v2059_v57 = vld [vmem:[#allocation5 + $0x3ea8] sm:$0xff]  ;;  %v1546_v58 = vld [vmem:[#allocation5 + $0x2ea0] sm:$0xff] }
 0x17b   :  { %3021 = vmatprep.subr.mxu1 %v1755_v59  ;;  %2951 = vmatpush1.msra.mxu0 %v1242_v60  ;;  %v2058_v59 = vld [vmem:[#allocation5 + $0x3ea0] sm:$0xff]  ;;  %v1531_v60 = vld [vmem:[#allocation5 + $0x2e28] sm:$0xff] }
 0x17c   :  { %3022 = vmatpush1.msra.mxu1 %v1754_v61  ;;  %2952 = vmatprep.subr.mxu0 %v1227_v63  ;;  %v2043_v61 = vld [vmem:[#allocation5 + $0x3e28] sm:$0xff]  ;;  %v1530_v63 = vld [vmem:[#allocation5 + $0x2e20] sm:$0xff] }
 0x17d   :  { %3023 = vmatprep.subr.mxu1 %v1739_v0  ;;  %2953 = vmatpush1.msra.mxu0 %v1226_v1  ;;  %v2042_v0 = vld [vmem:[#allocation5 + $0x3e20] sm:$0xff]  ;;  %v1515_v1 = vld [vmem:[#allocation5 + $0x2da8] sm:$0xff] }
 0x17e   :  { %3024 = vmatpush1.msra.mxu1 %v1738_v2  ;;  %2954 = vmatprep.subr.mxu0 %v1211_v4  ;;  %v2027_v2 = vld [vmem:[#allocation5 + $0x3da8] sm:$0xff]  ;;  %v1514_v4 = vld [vmem:[#allocation5 + $0x2da0] sm:$0xff] }
 0x17f   :  { %3025 = vmatprep.subr.mxu1 %v1723_v5  ;;  %2955 = vmatpush1.msra.mxu0 %v1210_v6  ;;  %v2026_v5 = vld [vmem:[#allocation5 + $0x3da0] sm:$0xff]  ;;  %v1499_v6 = vld [vmem:[#allocation5 + $0x2d28] sm:$0xff] }
 0x180   :  { %3026 = vmatpush1.msra.mxu1 %v1722_v7  ;;  %2956 = vmatprep.subr.mxu0 %v1195_v9  ;;  %v2011_v7 = vld [vmem:[#allocation5 + $0x3d28] sm:$0xff]  ;;  %v1498_v9 = vld [vmem:[#allocation5 + $0x2d20] sm:$0xff] }
 0x181   :  { %3027 = vmatprep.subr.mxu1 %v1707_v10  ;;  %2957 = vmatpush1.msra.mxu0 %v1194_v12  ;;  %v2010_v10 = vld [vmem:[#allocation5 + $0x3d20] sm:$0xff]  ;;  %v1483_v12 = vld [vmem:[#allocation5 + $0x2ca8] sm:$0xff] }
 0x182   :  { %3028 = vmatpush1.msra.mxu1 %v1706_v13  ;;  %2958 = vmatprep.subr.mxu0 %v1179_v14  ;;  %v1995_v13 = vld [vmem:[#allocation5 + $0x3ca8] sm:$0xff]  ;;  %v1482_v14 = vld [vmem:[#allocation5 + $0x2ca0] sm:$0xff] }
 0x183   :  { %3029 = vmatprep.subr.mxu1 %v1691_v15  ;;  %2959 = vmatpush1.msra.mxu0 %v1178_v17  ;;  %v1994_v15 = vld [vmem:[#allocation5 + $0x3ca0] sm:$0xff]  ;;  %v1467_v17 = vld [vmem:[#allocation5 + $0x2c28] sm:$0xff] }
 0x184   :  { %3030 = vmatpush1.msra.mxu1 %v1690_v18  ;;  %2960 = vmatprep.subr.mxu0 %v1163_v19  ;;  %v1979_v18 = vld [vmem:[#allocation5 + $0x3c28] sm:$0xff]  ;;  %v1466_v19 = vld [vmem:[#allocation5 + $0x2c20] sm:$0xff] }
 0x185   :  { %3031 = vmatprep.subr.mxu1 %v1675_v20  ;;  %2961 = vmatpush1.msra.mxu0 %v1162_v22  ;;  %v1978_v20 = vld [vmem:[#allocation5 + $0x3c20] sm:$0xff]  ;;  %v1451_v22 = vld [vmem:[#allocation5 + $0x2ba8] sm:$0xff] }
 0x186   :  { %3032 = vmatpush1.msra.mxu1 %v1674_v23  ;;  %2962 = vmatprep.subr.mxu0 %v1147_v24  ;;  %v1963_v23 = vld [vmem:[#allocation5 + $0x3ba8] sm:$0xff]  ;;  %v1450_v24 = vld [vmem:[#allocation5 + $0x2ba0] sm:$0xff] }
 0x187   :  { %3033 = vmatprep.subr.mxu1 %v1659_v25  ;;  %2963 = vmatpush1.msra.mxu0 %v1146_v27  ;;  %v1962_v25 = vld [vmem:[#allocation5 + $0x3ba0] sm:$0xff]  ;;  %v1435_v27 = vld [vmem:[#allocation5 + $0x2b28] sm:$0xff] }
 0x188   :  { %3034 = vmatpush1.msra.mxu1 %v1658_v28  ;;  %2964 = vmatprep.subr.mxu0 %v1131_v30  ;;  %v1947_v28 = vld [vmem:[#allocation5 + $0x3b28] sm:$0xff]  ;;  %v1434_v30 = vld [vmem:[#allocation5 + $0x2b20] sm:$0xff] }
 0x189   :  { %3035 = vmatprep.subr.mxu1 %v1643_v31  ;;  %2965 = vmatpush1.msra.mxu0 %v1130_v32  ;;  %v1946_v31 = vld [vmem:[#allocation5 + $0x3b20] sm:$0xff]  ;;  %v1419_v32 = vld [vmem:[#allocation5 + $0x2aa8] sm:$0xff] }
 0x18a   :  { %3036 = vmatpush1.msra.mxu1 %v1642_v33  ;;  %2966 = vmatprep.subr.mxu0 %v1115_v34  ;;  %v1931_v33 = vld [vmem:[#allocation5 + $0x3aa8] sm:$0xff]  ;;  %v1418_v34 = vld [vmem:[#allocation5 + $0x2aa0] sm:$0xff] }
 0x18b   :  { %3037 = vmatprep.subr.mxu1 %v1627_v35  ;;  %2967 = vmatpush1.msra.mxu0 %v1114_v36  ;;  %v1930_v35 = vld [vmem:[#allocation5 + $0x3aa0] sm:$0xff]  ;;  %v1403_v36 = vld [vmem:[#allocation5 + $0x2a28] sm:$0xff] }
 0x18c   :  { %3038 = vmatpush1.msra.mxu1 %v1626_v37  ;;  %2968 = vmatprep.subr.mxu0 %v1099_v38  ;;  %v1915_v37 = vld [vmem:[#allocation5 + $0x3a28] sm:$0xff]  ;;  %v1402_v38 = vld [vmem:[#allocation5 + $0x2a20] sm:$0xff] }
 0x18d   :  { %3039 = vmatprep.subr.mxu1 %v1611_v39  ;;  %2969 = vmatpush1.msra.mxu0 %v1098_v40  ;;  %v1914_v39 = vld [vmem:[#allocation5 + $0x3a20] sm:$0xff]  ;;  %v1387_v40 = vld [vmem:[#allocation5 + $0x29a8] sm:$0xff] }
 0x18e   :  { %3040 = vmatpush1.msra.mxu1 %v1610_v42  ;;  %2970 = vmatprep.subr.mxu0 %v1083_v43  ;;  %v1899_v42 = vld [vmem:[#allocation5 + $0x39a8] sm:$0xff]  ;;  %v1386_v43 = vld [vmem:[#allocation5 + $0x29a0] sm:$0xff] }
 0x18f   :  { %3041 = vmatprep.subr.mxu1 %v1595_v44  ;;  %2971 = vmatpush1.msra.mxu0 %v1082_v45  ;;  %v1898_v44 = vld [vmem:[#allocation5 + $0x39a0] sm:$0xff]  ;;  %v1371_v45 = vld [vmem:[#allocation5 + $0x2928] sm:$0xff] }
 0x190   :  { %3042 = vmatpush1.msra.mxu1 %v1594_v46  ;;  %2972 = vmatprep.subr.mxu0 %v1579_v47  ;;  %v1883_v46 = vld [vmem:[#allocation5 + $0x3928] sm:$0xff]  ;;  %v1370_v47 = vld [vmem:[#allocation5 + $0x2920] sm:$0xff] }
 0x191   :  { %3043 = vmatprep.subr.mxu1 %v2091_v48  ;;  %2973 = vmatpush2.msra.mxu0 %v1578_v49  ;;  %v1882_v48 = vld [vmem:[#allocation5 + $0x3920] sm:$0xff]  ;;  %v1355_v49 = vld [vmem:[#allocation5 + $0x28a8] sm:$0xff] }
 0x192   :  { %3044 = vmatpush2.msra.mxu1 %v2090_v50  ;;  %2974 = vmatprep.subr.mxu0 %v1563_v51  ;;  %v1867_v50 = vld [vmem:[#allocation5 + $0x38a8] sm:$0xff]  ;;  %v1354_v51 = vld [vmem:[#allocation5 + $0x28a0] sm:$0xff] }
 0x193   :  { %3045 = vmatprep.subr.mxu1 %v2075_v53  ;;  %2975 = vmatpush2.msra.mxu0 %v1562_v54  ;;  %v1866_v53 = vld [vmem:[#allocation5 + $0x38a0] sm:$0xff]  ;;  %v1339_v54 = vld [vmem:[#allocation5 + $0x2828] sm:$0xff] }
 0x194   :  { %3046 = vmatpush2.msra.mxu1 %v2074_v55  ;;  %2976 = vmatprep.subr.mxu0 %v1547_v56  ;;  %v1851_v55 = vld [vmem:[#allocation5 + $0x3828] sm:$0xff]  ;;  %v1338_v56 = vld [vmem:[#allocation5 + $0x2820] sm:$0xff] }
 0x195   :  { %3047 = vmatprep.subr.mxu1 %v2059_v57  ;;  %2977 = vmatpush2.msra.mxu0 %v1546_v58  ;;  %v1850_v57 = vld [vmem:[#allocation5 + $0x3820] sm:$0xff]  ;;  %v301_v58 = vld [vmem:[#allocation5 + $0x7b8] sm:$0xff] }
 0x196   :  { %3048 = vmatpush2.msra.mxu1 %v2058_v59  ;;  %2978 = vmatprep.subr.mxu0 %v1531_v60  ;;  %v813_v59 = vld [vmem:[#allocation5 + $0x17b8] sm:$0xff]  ;;  %v300_v60 = vld [vmem:[#allocation5 + $0x7b0] sm:$0xff] }
 0x197   :  { %3049 = vmatprep.subr.mxu1 %v2043_v61  ;;  %2979 = vmatpush2.msra.mxu0 %v1530_v63  ;;  %v812_v61 = vld [vmem:[#allocation5 + $0x17b0] sm:$0xff]  ;;  %v285_v63 = vld [vmem:[#allocation5 + $0x738] sm:$0xff] }
 0x198   :  { %3050 = vmatpush2.msra.mxu1 %v2042_v0  ;;  %2980 = vmatprep.subr.mxu0 %v1515_v1  ;;  %v797_v0 = vld [vmem:[#allocation5 + $0x1738] sm:$0xff]  ;;  %v284_v1 = vld [vmem:[#allocation5 + $0x730] sm:$0xff] }
 0x199   :  { %3051 = vmatprep.subr.mxu1 %v2027_v2  ;;  %2981 = vmatpush2.msra.mxu0 %v1514_v4  ;;  %v796_v2 = vld [vmem:[#allocation5 + $0x1730] sm:$0xff]  ;;  %v269_v4 = vld [vmem:[#allocation5 + $0x6b8] sm:$0xff] }
 0x19a   :  { %3052 = vmatpush2.msra.mxu1 %v2026_v5  ;;  %2982 = vmatprep.subr.mxu0 %v1499_v6  ;;  %v781_v5 = vld [vmem:[#allocation5 + $0x16b8] sm:$0xff]  ;;  %v268_v6 = vld [vmem:[#allocation5 + $0x6b0] sm:$0xff] }
 0x19b   :  { %3053 = vmatprep.subr.mxu1 %v2011_v7  ;;  %2983 = vmatpush2.msra.mxu0 %v1498_v9  ;;  %v780_v7 = vld [vmem:[#allocation5 + $0x16b0] sm:$0xff]  ;;  %v253_v9 = vld [vmem:[#allocation5 + $0x638] sm:$0xff] }
 0x19c   :  { %3054 = vmatpush2.msra.mxu1 %v2010_v10  ;;  %2984 = vmatprep.subr.mxu0 %v1483_v12  ;;  %v765_v10 = vld [vmem:[#allocation5 + $0x1638] sm:$0xff]  ;;  %v252_v12 = vld [vmem:[#allocation5 + $0x630] sm:$0xff] }
 0x19d   :  { %3055 = vmatprep.subr.mxu1 %v1995_v13  ;;  %2985 = vmatpush2.msra.mxu0 %v1482_v14  ;;  %v764_v13 = vld [vmem:[#allocation5 + $0x1630] sm:$0xff]  ;;  %v237_v14 = vld [vmem:[#allocation5 + $0x5b8] sm:$0xff] }
 0x19e   :  { %3056 = vmatpush2.msra.mxu1 %v1994_v15  ;;  %2986 = vmatprep.subr.mxu0 %v1467_v17  ;;  %v749_v15 = vld [vmem:[#allocation5 + $0x15b8] sm:$0xff]  ;;  %v236_v17 = vld [vmem:[#allocation5 + $0x5b0] sm:$0xff] }
 0x19f   :  { %3057 = vmatprep.subr.mxu1 %v1979_v18  ;;  %2987 = vmatpush2.msra.mxu0 %v1466_v19  ;;  %v748_v18 = vld [vmem:[#allocation5 + $0x15b0] sm:$0xff]  ;;  %v221_v19 = vld [vmem:[#allocation5 + $0x538] sm:$0xff] }
 0x1a0   :  { %3058 = vmatpush2.msra.mxu1 %v1978_v20  ;;  %2988 = vmatprep.subr.mxu0 %v1451_v22  ;;  %v733_v20 = vld [vmem:[#allocation5 + $0x1538] sm:$0xff]  ;;  %v220_v22 = vld [vmem:[#allocation5 + $0x530] sm:$0xff] }
 0x1a1   :  { %3059 = vmatprep.subr.mxu1 %v1963_v23  ;;  %2989 = vmatpush2.msra.mxu0 %v1450_v24  ;;  %v732_v23 = vld [vmem:[#allocation5 + $0x1530] sm:$0xff]  ;;  %v205_v24 = vld [vmem:[#allocation5 + $0x4b8] sm:$0xff] }
 0x1a2   :  { %3060 = vmatpush2.msra.mxu1 %v1962_v25  ;;  %2990 = vmatprep.subr.mxu0 %v1435_v27  ;;  %v717_v25 = vld [vmem:[#allocation5 + $0x14b8] sm:$0xff]  ;;  %v204_v27 = vld [vmem:[#allocation5 + $0x4b0] sm:$0xff] }
 0x1a3   :  { %3061 = vmatprep.subr.mxu1 %v1947_v28  ;;  %2991 = vmatpush2.msra.mxu0 %v1434_v30  ;;  %v716_v28 = vld [vmem:[#allocation5 + $0x14b0] sm:$0xff]  ;;  %v189_v30 = vld [vmem:[#allocation5 + $0x438] sm:$0xff] }
 0x1a4   :  { %3062 = vmatpush2.msra.mxu1 %v1946_v31  ;;  %2992 = vmatprep.subr.mxu0 %v1419_v32  ;;  %v701_v31 = vld [vmem:[#allocation5 + $0x1438] sm:$0xff]  ;;  %v188_v32 = vld [vmem:[#allocation5 + $0x430] sm:$0xff] }
 0x1a5   :  { %3063 = vmatprep.subr.mxu1 %v1931_v33  ;;  %2993 = vmatpush2.msra.mxu0 %v1418_v34  ;;  %v700_v33 = vld [vmem:[#allocation5 + $0x1430] sm:$0xff]  ;;  %v173_v34 = vld [vmem:[#allocation5 + $0x3b8] sm:$0xff] }
 0x1a6   :  { %3064 = vmatpush2.msra.mxu1 %v1930_v35  ;;  %2994 = vmatprep.subr.mxu0 %v1403_v36  ;;  %v685_v35 = vld [vmem:[#allocation5 + $0x13b8] sm:$0xff]  ;;  %v172_v36 = vld [vmem:[#allocation5 + $0x3b0] sm:$0xff] }
 0x1a7   :  { %3065 = vmatprep.subr.mxu1 %v1915_v37  ;;  %2995 = vmatpush2.msra.mxu0 %v1402_v38  ;;  %v684_v37 = vld [vmem:[#allocation5 + $0x13b0] sm:$0xff]  ;;  %v157_v38 = vld [vmem:[#allocation5 + $0x338] sm:$0xff] }
 0x1a8   :  { %3066 = vmatpush2.msra.mxu1 %v1914_v39  ;;  %2996 = vmatprep.subr.mxu0 %v1387_v40  ;;  %v669_v39 = vld [vmem:[#allocation5 + $0x1338] sm:$0xff]  ;;  %v156_v40 = vld [vmem:[#allocation5 + $0x330] sm:$0xff] }
 0x1a9   :  { %3067 = vmatprep.subr.mxu1 %v1899_v42  ;;  %2997 = vmatpush2.msra.mxu0 %v1386_v43  ;;  %v668_v42 = vld [vmem:[#allocation5 + $0x1330] sm:$0xff]  ;;  %v141_v43 = vld [vmem:[#allocation5 + $0x2b8] sm:$0xff] }
 0x1aa   :  { %3068 = vmatpush2.msra.mxu1 %v1898_v44  ;;  %2998 = vmatprep.subr.mxu0 %v1371_v45  ;;  %v653_v44 = vld [vmem:[#allocation5 + $0x12b8] sm:$0xff]  ;;  %v140_v45 = vld [vmem:[#allocation5 + $0x2b0] sm:$0xff] }
 0x1ab   :  { %3069 = vmatprep.subr.mxu1 %v1883_v46  ;;  %2999 = vmatpush2.msra.mxu0 %v1370_v47  ;;  %v652_v46 = vld [vmem:[#allocation5 + $0x12b0] sm:$0xff]  ;;  %v125_v47 = vld [vmem:[#allocation5 + $0x238] sm:$0xff] }
 0x1ac   :  { %3070 = vmatpush2.msra.mxu1 %v1882_v48  ;;  %3000 = vmatprep.subr.mxu0 %v1355_v49  ;;  %v637_v48 = vld [vmem:[#allocation5 + $0x1238] sm:$0xff]  ;;  %v124_v49 = vld [vmem:[#allocation5 + $0x230] sm:$0xff] }
 0x1ad   :  { %3071 = vmatprep.subr.mxu1 %v1867_v50  ;;  %3001 = vmatpush2.msra.mxu0 %v1354_v51  ;;  %v636_v50 = vld [vmem:[#allocation5 + $0x1230] sm:$0xff]  ;;  %v109_v51 = vld [vmem:[#allocation5 + $0x1b8] sm:$0xff] }
 0x1ae   :  { %3072 = vmatpush2.msra.mxu1 %v1866_v53  ;;  %3002 = vmatprep.subr.mxu0 %v1339_v54  ;;  %v621_v53 = vld [vmem:[#allocation5 + $0x11b8] sm:$0xff]  ;;  %v108_v54 = vld [vmem:[#allocation5 + $0x1b0] sm:$0xff] }
 0x1af   :  { %3073 = vmatprep.subr.mxu1 %v1851_v55  ;;  %3003 = vmatpush2.msra.mxu0 %v1338_v56  ;;  %v620_v55 = vld [vmem:[#allocation5 + $0x11b0] sm:$0xff]  ;;  %v93_v56 = vld [vmem:[#allocation5 + $0x138] sm:$0xff] }
 0x1b0   :  { %3004 = vmatprep.mubr.f32.mxu0 %v4773_v26  ;;  %3074 = vmatpush2.msra.mxu1 %v1850_v57  ;;  %v605_v57 = vld [vmem:[#allocation5 + $0x1138] sm:$0xff] }
 0x1b1   :  { %3005 = vmatmul.mubr.f32.vlgmr.msra.gmra.mxu0 %v4766_v16  ;;  %3075 = vmatprep.mubr.f32.mxu1 %v4777_v29 }
 0x1b2   :  { %3082 = vmatprep.subr.mxu0 %v301_v58  ;;  %3153 = vmatprep.subr.mxu1 %v813_v59  ;;  %v92_v58 = vld [vmem:[#allocation5 + $0x130] sm:$0xff] }
 0x1b3   :  { %3076 = vmatmul.mubr.f32.vlgmr.msra.gmra.mxu1 %v4769_v21  ;;  %3083 = vmatpush1.msra.mxu0 %v300_v60  ;;  %v604_v59 = vld [vmem:[#allocation5 + $0x1130] sm:$0xff]  ;;  %v77_v60 = vld [vmem:[#allocation5 + $0xb8] sm:$0xff] }
 0x1b4   :  { %3154 = vmatpush1.msra.mxu1 %v812_v61  ;;  %3084 = vmatprep.subr.mxu0 %v285_v63  ;;  %v589_v61 = vld [vmem:[#allocation5 + $0x10b8] sm:$0xff]  ;;  %v76_v63 = vld [vmem:[#allocation5 + $0xb0] sm:$0xff] }
 0x1b5   :  { %3155 = vmatprep.subr.mxu1 %v797_v0  ;;  %3085 = vmatpush1.msra.mxu0 %v284_v1  ;;  %v588_v0 = vld [vmem:[#allocation5 + $0x10b0] sm:$0xff]  ;;  %v61_v1 = vld [vmem:[#allocation5 + $0x38] sm:$0xff] }
 0x1b6   :  { %3156 = vmatpush1.msra.mxu1 %v796_v2  ;;  %3086 = vmatprep.subr.mxu0 %v269_v4  ;;  %v573_v2 = vld [vmem:[#allocation5 + $0x1038] sm:$0xff]  ;;  %v60_v4 = vld [vmem:[#allocation5 + $0x30] sm:$0xff] }
 0x1b7   :  { %3157 = vmatprep.subr.mxu1 %v781_v5  ;;  %3087 = vmatpush1.msra.mxu0 %v268_v6  ;;  %v572_v5 = vld [vmem:[#allocation5 + $0x1030] sm:$0xff]  ;;  %v557_v6 = vld [vmem:[#allocation5 + $0xfb8] sm:$0xff] }
 0x1b8   :  { %3158 = vmatpush1.msra.mxu1 %v780_v7  ;;  %3088 = vmatprep.subr.mxu0 %v253_v9  ;;  %v1069_v7 = vld [vmem:[#allocation5 + $0x1fb8] sm:$0xff]  ;;  %v556_v9 = vld [vmem:[#allocation5 + $0xfb0] sm:$0xff] }
 0x1b9   :  { %3159 = vmatprep.subr.mxu1 %v765_v10  ;;  %3089 = vmatpush1.msra.mxu0 %v252_v12  ;;  %v1068_v10 = vld [vmem:[#allocation5 + $0x1fb0] sm:$0xff]  ;;  %v541_v12 = vld [vmem:[#allocation5 + $0xf38] sm:$0xff] }
 0x1ba   :  { %3160 = vmatpush1.msra.mxu1 %v764_v13  ;;  %3090 = vmatprep.subr.mxu0 %v237_v14  ;;  %v1053_v13 = vld [vmem:[#allocation5 + $0x1f38] sm:$0xff]  ;;  %v540_v14 = vld [vmem:[#allocation5 + $0xf30] sm:$0xff] }
 0x1bb   :  { %3161 = vmatprep.subr.mxu1 %v749_v15  ;;  %3091 = vmatpush1.msra.mxu0 %v236_v17  ;;  %v1052_v15 = vld [vmem:[#allocation5 + $0x1f30] sm:$0xff]  ;;  %v525_v17 = vld [vmem:[#allocation5 + $0xeb8] sm:$0xff] }
 0x1bc   :  { %3162 = vmatpush1.msra.mxu1 %v748_v18  ;;  %3092 = vmatprep.subr.mxu0 %v221_v19  ;;  %v1037_v18 = vld [vmem:[#allocation5 + $0x1eb8] sm:$0xff]  ;;  %v524_v19 = vld [vmem:[#allocation5 + $0xeb0] sm:$0xff] }
 0x1bd   :  { %3163 = vmatprep.subr.mxu1 %v733_v20  ;;  %3093 = vmatpush1.msra.mxu0 %v220_v22  ;;  %v1036_v20 = vld [vmem:[#allocation5 + $0x1eb0] sm:$0xff]  ;;  %v509_v22 = vld [vmem:[#allocation5 + $0xe38] sm:$0xff] }
 0x1be   :  { %3164 = vmatpush1.msra.mxu1 %v732_v23  ;;  %3094 = vmatprep.subr.mxu0 %v205_v24  ;;  %v1021_v23 = vld [vmem:[#allocation5 + $0x1e38] sm:$0xff]  ;;  %v4799_v24 = vpop.f32.mrf.mxu0 }
 0x1bf   :  { %3165 = vmatprep.subr.mxu1 %v717_v25  ;;  %3095 = vmatpush1.msra.mxu0 %v204_v27  ;;  %v508_v25 = vld [vmem:[#allocation5 + $0xe30] sm:$0xff] }
 0x1c0   :  { %3166 = vmatpush1.msra.mxu1 %v716_v28  ;;  %3096 = vmatprep.subr.mxu0 %v189_v30  ;;  %v1020_v27 = vld [vmem:[#allocation5 + $0x1e30] sm:$0xff]  ;;  %v493_v28 = vld [vmem:[#allocation5 + $0xdb8] sm:$0xff] }
 0x1c1   :  { %3167 = vmatprep.subr.mxu1 %v701_v31  ;;  %3097 = vmatpush1.msra.mxu0 %v188_v32  ;;  %v1005_v30 = vld [vmem:[#allocation5 + $0x1db8] sm:$0xff]  ;;  %v492_v31 = vld [vmem:[#allocation5 + $0xdb0] sm:$0xff] }
 0x1c2   :  { %3168 = vmatpush1.msra.mxu1 %v700_v33  ;;  %3098 = vmatprep.subr.mxu0 %v173_v34  ;;  %v1004_v32 = vld [vmem:[#allocation5 + $0x1db0] sm:$0xff]  ;;  %v477_v33 = vld [vmem:[#allocation5 + $0xd38] sm:$0xff] }
 0x1c3   :  { %3169 = vmatprep.subr.mxu1 %v685_v35  ;;  %3099 = vmatpush1.msra.mxu0 %v172_v36  ;;  %v989_v34 = vld [vmem:[#allocation5 + $0x1d38] sm:$0xff]  ;;  %v4801_v35 = vpop.f32.mrf.mxu1  ;;  %v2298_v36 = vpop.f32.mrf.mxu0 }
 0x1c4   :  { %3170 = vmatpush1.msra.mxu1 %v684_v37  ;;  %3100 = vmatprep.subr.mxu0 %v157_v38  ;;  %v476_v37 = vld [vmem:[#allocation5 + $0xd30] sm:$0xff] }
 0x1c5   :  { %3171 = vmatprep.subr.mxu1 %v669_v39  ;;  %3101 = vmatpush1.msra.mxu0 %v156_v40  ;;  %v988_v38 = vld [vmem:[#allocation5 + $0x1d30] sm:$0xff]  ;;  %v2112_v39 = vsub.s32 1, %v4742_v41  ;;  %v461_v40 = vld [vmem:[#allocation5 + $0xcb8] sm:$0xff] }
 0x1c6   :  { %3172 = vmatpush1.msra.mxu1 %v668_v42  ;;  %3102 = vmatprep.subr.mxu0 %v141_v43  ;;  %v973_v42 = vld [vmem:[#allocation5 + $0x1cb8] sm:$0xff]  ;;  %v2102_v43 = vld [vmem:[#allocation7] sm:$0xff] }
 0x1c7   :  { %3173 = vmatprep.subr.mxu1 %v653_v44  ;;  %3103 = vmatpush1.msra.mxu0 %v140_v45  ;;  %v4804_v44 = vpop.f32.mrf.mxu0  ;;  %v460_v45 = vld [vmem:[#allocation5 + $0xcb0] sm:$0xff] }
 0x1c8   :  { %3174 = vmatpush1.msra.mxu1 %v652_v46  ;;  %3104 = vmatprep.subr.mxu0 %v125_v47  ;;  %v972_v46 = vld [vmem:[#allocation5 + $0x1cb0] sm:$0xff]  ;;  %v2108_v47 = vsub.s32 0, %v4742_v41 }
 0x1c9   :  { %3175 = vmatprep.subr.mxu1 %v637_v48  ;;  %3105 = vmatpush1.msra.mxu0 %v124_v49  ;;  %v445_v48 = vld [vmem:[#allocation5 + $0xc38] sm:$0xff] }
 0x1ca   :  { %3176 = vmatpush1.msra.mxu1 %v636_v50  ;;  %3106 = vmatprep.subr.mxu0 %v109_v51  ;;  %v957_v49 = vld [vmem:[#allocation5 + $0x1c38] sm:$0xff]  ;;  %v2369_v50 = vpop.f32.mrf.mxu1  ;;  %v444_v51 = vld [vmem:[#allocation5 + $0xc30] sm:$0xff] }
 0x1cb   :  { %3177 = vmatprep.subr.mxu1 %v621_v53  ;;  %3107 = vmatpush1.msra.mxu0 %v108_v54  ;;  %v956_v53 = vld [vmem:[#allocation5 + $0x1c30] sm:$0xff]  ;;  %v2113_v54 = vrot.slane %v2102_v43, %v2112_v39 }
 0x1cc   :  { %3178 = vmatpush1.msra.mxu1 %v620_v55  ;;  %3108 = vmatprep.subr.mxu0 %v93_v56  ;;  %v2116_v55 = vsub.s32 2, %v4742_v41  ;;  %v429_v56 = vld [vmem:[#allocation5 + $0xbb8] sm:$0xff] }
 0x1cd   :  { %3179 = vmatprep.subr.mxu1 %v605_v57  ;;  %3109 = vmatpush1.msra.mxu0 %v92_v58  ;;  %v941_v57 = vld [vmem:[#allocation5 + $0x1bb8] sm:$0xff]  ;;  %v4810_v58 = vpop.f32.mrf.mxu1 }
 0x1ce   :  { %3180 = vmatpush1.msra.mxu1 %v604_v59  ;;  %3110 = vmatprep.subr.mxu0 %v77_v60  ;;  %v2440_v59 = vpop.f32.mrf.mxu0  ;;  %v428_v60 = vld [vmem:[#allocation5 + $0xbb0] sm:$0xff] }
 0x1cf   :  { %3181 = vmatprep.subr.mxu1 %v589_v61  ;;  %3111 = vmatpush1.msra.mxu0 %v76_v63  ;;  %v940_v61 = vld [vmem:[#allocation5 + $0x1bb0] sm:$0xff]  ;;  %v2109_v63 = vrot.slane %v2102_v43, %v2108_v47 }
 0x1d0   :  { %3182 = vmatpush1.msra.mxu1 %v588_v0  ;;  %3112 = vmatprep.subr.mxu0 %v61_v1  ;;  %v2120_v0 = vsub.s32 3, %v4742_v41  ;;  %v413_v1 = vld [vmem:[#allocation5 + $0xb38] sm:$0xff] }
 0x1d1   :  { %3183 = vmatprep.subr.mxu1 %v573_v2  ;;  %3113 = vmatpush1.msra.mxu0 %v60_v4  ;;  %v925_v2 = vld [vmem:[#allocation5 + $0x1b38] sm:$0xff]  ;;  %v2580_v4 = vpop.f32.mrf.mxu0 }
 0x1d2   :  { %3184 = vmatpush1.msra.mxu1 %v572_v5  ;;  %3114 = vmatprep.subr.mxu0 %v557_v6  ;;  %v412_v5 = vld [vmem:[#allocation5 + $0xb30] sm:$0xff] }
 0x1d3   :  { %3185 = vmatprep.subr.mxu1 %v1069_v7  ;;  %3115 = vmatpush2.msra.mxu0 %v556_v9  ;;  %v924_v6 = vld [vmem:[#allocation5 + $0x1b30] sm:$0xff]  ;;  %v2299_v7 = vadd.f32 %v2298_v36, %v2113_v54  ;;  %v2117_v9 = vrot.slane %v2102_v43, %v2116_v55 }
 0x1d4   :  { %3186 = vmatpush2.msra.mxu1 %v1068_v10  ;;  %3116 = vmatprep.subr.mxu0 %v541_v12  ;;  %v397_v10 = vld [vmem:[#allocation5 + $0xab8] sm:$0xff] }
 0x1d5   :  { %3187 = vmatprep.subr.mxu1 %v1053_v13  ;;  %3117 = vmatpush2.msra.mxu0 %v540_v14  ;;  %v909_v12 = vld [vmem:[#allocation5 + $0x1ab8] sm:$0xff]  ;;  %v2511_v13 = vpop.f32.mrf.mxu1  ;;  %v396_v14 = vld [vmem:[#allocation5 + $0xab0] sm:$0xff] }
 0x1d6   :  { %3188 = vmatpush2.msra.mxu1 %v1052_v15  ;;  %3118 = vmatprep.subr.mxu0 %v525_v17  ;;  %v908_v15 = vld [vmem:[#allocation5 + $0x1ab0] sm:$0xff]  ;;  %v2297_v17 = vadd.f32 %v4799_v24, %v2109_v63 }
 0x1d7   :  { %3189 = vmatprep.subr.mxu1 %v1037_v18  ;;  %3119 = vmatpush2.msra.mxu0 %v524_v19  ;;  %v2121_v18 = vrot.slane %v2102_v43, %v2120_v0  ;;  %v381_v19 = vld [vmem:[#allocation5 + $0xa38] sm:$0xff]  ;;  %v364_v24 = vld [vmem:[#allocation5 + $0x9b0] sm:$0xff] }
 0x1d8   :  { %3190 = vmatpush2.msra.mxu1 %v1036_v20  ;;  %3120 = vmatprep.subr.mxu0 %v509_v22  ;;  %v893_v20 = vld [vmem:[#allocation5 + $0x1a38] sm:$0xff]  ;;  %v2651_v22 = vpop.f32.mrf.mxu1  ;;  %v348_v43 = vld [vmem:[#allocation5 + $0x930] sm:$0xff] }
 0x1d9   :  { %3191 = vmatprep.subr.mxu1 %v1021_v23  ;;  %3121 = vmatpush2.msra.mxu0 %v508_v25  ;;  %v2582_v23 = vpop.f32.mrf.mxu0  ;;  %v380_v25 = vld [vmem:[#allocation5 + $0xa30] sm:$0xff] }
 0x1da   :  { %3192 = vmatpush2.msra.mxu1 %v1020_v27  ;;  %3122 = vmatprep.subr.mxu0 %v493_v28  ;;  %v892_v27 = vld [vmem:[#allocation5 + $0x1a30] sm:$0xff]  ;;  %v2370_v28 = vadd.f32 %v2369_v50, %v2299_v7  ;;  %v845_v50 = vld [vmem:[#allocation5 + $0x18b8] sm:$0xff] }
 0x1db   :  { %3193 = vmatprep.subr.mxu1 %v1005_v30  ;;  %3123 = vmatpush2.msra.mxu0 %v492_v31  ;;  %v2581_v30 = vadd.f32 %v2580_v4, %v2117_v9  ;;  %v365_v31 = vld [vmem:[#allocation5 + $0x9b8] sm:$0xff] }
 0x1dc   :  { %3194 = vmatpush2.msra.mxu1 %v1004_v32  ;;  %3124 = vmatprep.subr.mxu0 %v477_v33  ;;  %v877_v32 = vld [vmem:[#allocation5 + $0x19b8] sm:$0xff]  ;;  %v876_v33 = vld [vmem:[#allocation5 + $0x19b0] sm:$0xff]  ;;  %v2441_v36 = vadd.f32 %v2440_v59, %v2370_v28 }
 0x1dd   :  { %3195 = vmatprep.subr.mxu1 %v989_v34  ;;  %3125 = vmatpush2.msra.mxu0 %v476_v37  ;;  %v2368_v34 = vadd.f32 %v4801_v35, %v2297_v17  ;;  %v2583_v37 = vadd.f32 %v2582_v23, %v2121_v18  ;;  %v332_v35 = vld [vmem:[#allocation5 + $0x8b0] sm:$0xff]  ;;  %v829_v59 = vld [vmem:[#allocation5 + $0x1838] sm:$0xff] }
 0x1de   :  { %3196 = vmatpush2.msra.mxu1 %v988_v38  ;;  %3126 = vmatprep.subr.mxu0 %v461_v40  ;;  %v349_v38 = vld [vmem:[#allocation5 + $0x938] sm:$0xff]  ;;  %v2512_v54 = vadd.f32 %v2511_v13, %v2441_v36  ;;  %v1324_v13 = vld [vmem:[#allocation5 + $0x27b0] sm:$0xff] }
 0x1df   :  { %3197 = vmatprep.subr.mxu1 %v973_v42  ;;  %3127 = vmatpush2.msra.mxu0 %v460_v45  ;;  %v861_v40 = vld [vmem:[#allocation5 + $0x1938] sm:$0xff]  ;;  %v2653_v42 = vpop.f32.mrf.mxu1  ;;  %v860_v45 = vld [vmem:[#allocation5 + $0x1930] sm:$0xff] }
 0x1e0   :  { %3198 = vmatpush2.msra.mxu1 %v972_v46  ;;  %3128 = vmatprep.subr.mxu0 %v445_v48  ;;  %v2439_v46 = vadd.f32 %v4804_v44, %v2368_v34  ;;  %v2652_v48 = vadd.f32 %v2651_v22, %v2581_v30  ;;  %v316_v44 = vld [vmem:[#allocation5 + $0x830] sm:$0xff]  ;;  %v1837_v9 = vld [vmem:[#allocation5 + $0x37b8] sm:$0xff] }
 0x1e1   :  { %3199 = vmatprep.subr.mxu1 %v957_v49  ;;  %3129 = vmatpush2.msra.mxu0 %v444_v51  ;;  %v333_v49 = vld [vmem:[#allocation5 + $0x8b8] sm:$0xff]  ;;  %v844_v51 = vld [vmem:[#allocation5 + $0x18b0] sm:$0xff] }
 0x1e2   :  { %3200 = vmatpush2.msra.mxu1 %v956_v53  ;;  %3130 = vmatprep.subr.mxu0 %v429_v56  ;;  %v2654_v56 = vadd.f32 %v2653_v42, %v2583_v37  ;;  %v1308_v18 = vld [vmem:[#allocation5 + $0x2730] sm:$0xff]  ;;  %v1293_v23 = vld [vmem:[#allocation5 + $0x26b8] sm:$0xff] }
 0x1e3   :  { %3201 = vmatprep.subr.mxu1 %v941_v57  ;;  %3131 = vmatpush2.msra.mxu0 %v428_v60  ;;  %v317_v57 = vld [vmem:[#allocation5 + $0x838] sm:$0xff]  ;;  %v1804_v28 = vld [vmem:[#allocation5 + $0x36b0] sm:$0xff] }
 0x1e4   :  { %3202 = vmatpush2.msra.mxu1 %v940_v61  ;;  %3132 = vmatprep.subr.mxu0 %v413_v1  ;;  %v2510_v1 = vadd.f32 %v4810_v58, %v2439_v46  ;;  %v1836_v58 = vld [vmem:[#allocation5 + $0x37b0] sm:$0xff]  ;;  %v1261_v34 = vld [vmem:[#allocation5 + $0x25b8] sm:$0xff] }
 0x1e5   :  { %3203 = vmatprep.subr.mxu1 %v925_v2  ;;  %3133 = vmatpush2.msra.mxu0 %v412_v5  ;;  %v828_v2 = vld [vmem:[#allocation5 + $0x1830] sm:$0xff]  ;;  %v1325_v5 = vld [vmem:[#allocation5 + $0x27b8] sm:$0xff] }
 0x1e6   :  { %3204 = vmatpush2.msra.mxu1 %v924_v6  ;;  %3134 = vmatprep.subr.mxu0 %v397_v10  ;;  %v4518_v7 = vcombine.low %v2510_v1, %v2512_v54  ;;  %v1773_v36 = vld [vmem:[#allocation5 + $0x35b8] sm:$0xff]  ;;  %v1260_v37 = vld [vmem:[#allocation5 + $0x25b0] sm:$0xff] }
 0x1e7   :  { %3205 = vmatprep.subr.mxu1 %v909_v12  ;;  %3135 = vmatpush2.msra.mxu0 %v396_v14  ;;  %v1309_v14 = vld [vmem:[#allocation5 + $0x2738] sm:$0xff]  ;;  %v1724_v54 = vld [vmem:[#allocation5 + $0x3430] sm:$0xff] }
 0x1e8   :  { %3206 = vmatpush2.msra.mxu1 %v908_v15  ;;  %3136 = vmatprep.subr.mxu0 %v381_v19  ;;  %v1821_v15 = vld [vmem:[#allocation5 + $0x3738] sm:$0xff]  ;;  %v1820_v19 = vld [vmem:[#allocation5 + $0x3730] sm:$0xff] }
 0x1e9   :  { %3207 = vmatprep.subr.mxu1 %v893_v20  ;;  %3137 = vmatpush2.msra.mxu0 %v380_v25  ;;  %v4526_v20 = vrot.slane %v4518_v7, %v4745_v52  ;;  %v1805_v25 = vld [vmem:[#allocation5 + $0x36b8] sm:$0xff]  ;;  %v1692_v1 = vld [vmem:[#allocation5 + $0x3330] sm:$0xff] }
 0x1ea   :  { %3208 = vmatpush2.msra.mxu1 %v892_v27  ;;  %3138 = vmatprep.subr.mxu0 %v365_v31  ;;  %v1292_v27 = vld [vmem:[#allocation5 + $0x26b0] sm:$0xff]  ;;  %v1277_v31 = vld [vmem:[#allocation5 + $0x2638] sm:$0xff] }
 0x1eb   :  { %3209 = vmatprep.subr.mxu1 %v877_v32  ;;  %3139 = vmatpush2.msra.mxu0 %v364_v24  ;;  %v1789_v32 = vld [vmem:[#allocation5 + $0x3638] sm:$0xff]  ;;  %v1276_v24 = vld [vmem:[#allocation5 + $0x2630] sm:$0xff] }
 0x1ec   :  { %3210 = vmatpush2.msra.mxu1 %v876_v33  ;;  %3140 = vmatprep.subr.mxu0 %v349_v38  ;;  %v1788_v33 = vld [vmem:[#allocation5 + $0x3630] sm:$0xff]  ;;  %v1757_v42 = vld [vmem:[#allocation5 + $0x3538] sm:$0xff] }
 0x1ed   :  { %3211 = vmatprep.subr.mxu1 %v861_v40  ;;  %v2722_v53 = vpop.f32.mrf.mxu0  ;;  %3141 = vmatpush2.msra.mxu0 %v348_v43  ;;  %v1772_v38 = vld [vmem:[#allocation5 + $0x35b0] sm:$0xff]  ;;  %v1245_v40 = vld [vmem:[#allocation5 + $0x2538] sm:$0xff] }
 0x1ee   :  { %3212 = vmatpush2.msra.mxu1 %v860_v45  ;;  %v2723_v60 = vadd.f32 %v2722_v53, %v2652_v48  ;;  %3142 = vmatprep.subr.mxu0 %v333_v49  ;;  %v1244_v43 = vld [vmem:[#allocation5 + $0x2530] sm:$0xff]  ;;  %v1229_v46 = vld [vmem:[#allocation5 + $0x24b8] sm:$0xff] }
 0x1ef   :  { %3213 = vmatprep.subr.mxu1 %v845_v50  ;;  %v2793_v61 = vpop.f32.mrf.mxu1  ;;  %v2724_v63 = vpop.f32.mrf.mxu0  ;;  %3143 = vmatpush2.msra.mxu0 %v332_v35  ;;  %v1756_v45 = vld [vmem:[#allocation5 + $0x3530] sm:$0xff]  ;;  %v1741_v48 = vld [vmem:[#allocation5 + $0x34b8] sm:$0xff] }
 0x1f0   :  { %3214 = vmatpush2.msra.mxu1 %v844_v51  ;;  %v2725_v4 = vadd.f32 %v2724_v63, %v2654_v56  ;;  %3144 = vmatprep.subr.mxu0 %v317_v57  ;;  %v2794_v10 = vadd.f32 %v2793_v61, %v2723_v60  ;;  %v1228_v49 = vld [vmem:[#allocation5 + $0x24b0] sm:$0xff]  ;;  %v1213_v35 = vld [vmem:[#allocation5 + $0x2438] sm:$0xff] }
 0x1f1   :  { %3215 = vmatprep.subr.mxu1 %v829_v59  ;;  %v2795_v6 = vpop.f32.mrf.mxu1  ;;  %3145 = vmatpush2.msra.mxu0 %v316_v44  ;;  %v1740_v50 = vld [vmem:[#allocation5 + $0x34b0] sm:$0xff]  ;;  %v1725_v51 = vld [vmem:[#allocation5 + $0x3438] sm:$0xff] }
 0x1f2   :  { %3146 = vmatprep.mubr.f32.mxu0 %v4755_v8  ;;  %v2796_v12 = vadd.f32 %v2795_v6, %v2725_v4  ;;  %3216 = vmatpush2.msra.mxu1 %v828_v2  ;;  %v1212_v53 = vld [vmem:[#allocation5 + $0x2430] sm:$0xff]  ;;  %v1197_v56 = vld [vmem:[#allocation5 + $0x23b8] sm:$0xff] }
 0x1f3   :  { %3147 = vmatmul.mubr.f32.vlgmr.msra.gmra.mxu0 %v4748_v62  ;;  %3217 = vmatprep.mubr.f32.mxu1 %v4759_v11  ;;  %v1709_v57 = vld [vmem:[#allocation5 + $0x33b8] sm:$0xff]  ;;  %v1196_v59 = vld [vmem:[#allocation5 + $0x23b0] sm:$0xff] }
 0x1f4   :  { %3224 = vmatprep.subr.mxu0 %v1325_v5  ;;  %v4519_v17 = vcombine.low %v2794_v10, %v2796_v12  ;;  %3295 = vmatprep.subr.mxu1 %v1837_v9  ;;  %v1708_v60 = vld [vmem:[#allocation5 + $0x33b0] sm:$0xff]  ;;  %v1181_v44 = vld [vmem:[#allocation5 + $0x2338] sm:$0xff] }
 0x1f5   :  { %3218 = vmatmul.mubr.f32.vlgmr.msra.gmra.mxu1 %v4751_v3  ;;  %3225 = vmatpush1.msra.mxu0 %v1324_v13  ;;  %v1693_v61 = vld [vmem:[#allocation5 + $0x3338] sm:$0xff]  ;;  %v1180_v63 = vld [vmem:[#allocation5 + $0x2330] sm:$0xff] }
 0x1f6   :  { %3296 = vmatpush1.msra.mxu1 %v1836_v58  ;;  %v4533_v22 = vrot.slane %v4519_v17, %v4745_v52  ;;  %3226 = vmatprep.subr.mxu0 %v1309_v14  ;;  %v1165_v2 = vld [vmem:[#allocation5 + $0x22b8] sm:$0xff]  ;;  %v1164_v5 = vld [vmem:[#allocation5 + $0x22b0] sm:$0xff] }
 0x1f7   :  { %3297 = vmatprep.subr.mxu1 %v1821_v15  ;;  %3227 = vmatpush1.msra.mxu0 %v1308_v18  ;;  %v1677_v4 = vld [vmem:[#allocation5 + $0x32b8] sm:$0xff]  ;;  %v1676_v6 = vld [vmem:[#allocation5 + $0x32b0] sm:$0xff] }
 0x1f8   :  { %v4534_v30 = vcombine.low %v4526_v20, %v4533_v22  ;;  %3298 = vmatpush1.msra.mxu1 %v1820_v19  ;;  %3228 = vmatprep.subr.mxu0 %v1293_v23  ;;  %v1149_v7 = vld [vmem:[#allocation5 + $0x2238] sm:$0xff]  ;;  %v1148_v10 = vld [vmem:[#allocation5 + $0x2230] sm:$0xff] }
 0x1f9   :  { %3299 = vmatprep.subr.mxu1 %v1805_v25  ;;  %3229 = vmatpush1.msra.mxu0 %v1292_v27  ;;  %v1661_v9 = vld [vmem:[#allocation5 + $0x3238] sm:$0xff]  ;;  %v1660_v12 = vld [vmem:[#allocation5 + $0x3230] sm:$0xff] }
 0x1fa   :  { %4590 = vst [vmem:[#allocation8] sm:$0xff] %v4534_v30  ;;  %3300 = vmatpush1.msra.mxu1 %v1804_v28  ;;  %3230 = vmatprep.subr.mxu0 %v1277_v31  ;;  %v1133_v13 = vld [vmem:[#allocation5 + $0x21b8] sm:$0xff]  ;;  %v1132_v14 = vld [vmem:[#allocation5 + $0x21b0] sm:$0xff] }
 0x1fb   :  { %3301 = vmatprep.subr.mxu1 %v1789_v32  ;;  %3231 = vmatpush1.msra.mxu0 %v1276_v24  ;;  %v1645_v58 = vld [vmem:[#allocation5 + $0x31b8] sm:$0xff]  ;;  %v1644_v15 = vld [vmem:[#allocation5 + $0x31b0] sm:$0xff] }
 0x1fc   :  { %3302 = vmatpush1.msra.mxu1 %v1788_v33  ;;  %3232 = vmatprep.subr.mxu0 %v1261_v34  ;;  %v1117_v17 = vld [vmem:[#allocation5 + $0x2138] sm:$0xff]  ;;  %v1116_v19 = vld [vmem:[#allocation5 + $0x2130] sm:$0xff] }
 0x1fd   :  { %3303 = vmatprep.subr.mxu1 %v1773_v36  ;;  %3233 = vmatpush1.msra.mxu0 %v1260_v37  ;;  %v1629_v18 = vld [vmem:[#allocation5 + $0x3138] sm:$0xff]  ;;  %v1628_v20 = vld [vmem:[#allocation5 + $0x3130] sm:$0xff] }
 0x1fe   :  { %3304 = vmatpush1.msra.mxu1 %v1772_v38  ;;  %3234 = vmatprep.subr.mxu0 %v1245_v40  ;;  %v1101_v22 = vld [vmem:[#allocation5 + $0x20b8] sm:$0xff]  ;;  %v1100_v25 = vld [vmem:[#allocation5 + $0x20b0] sm:$0xff] }
 0x1ff   :  { %3305 = vmatprep.subr.mxu1 %v1757_v42  ;;  %3235 = vmatpush1.msra.mxu0 %v1244_v43  ;;  %v1613_v23 = vld [vmem:[#allocation5 + $0x30b8] sm:$0xff]  ;;  %v1612_v27 = vld [vmem:[#allocation5 + $0x30b0] sm:$0xff] }
 0x200   :  { %3306 = vmatpush1.msra.mxu1 %v1756_v45  ;;  %3236 = vmatprep.subr.mxu0 %v1229_v46  ;;  %v1085_v28 = vld [vmem:[#allocation5 + $0x2038] sm:$0xff]  ;;  %v1084_v31 = vld [vmem:[#allocation5 + $0x2030] sm:$0xff] }
 0x201   :  { %3307 = vmatprep.subr.mxu1 %v1741_v48  ;;  %3237 = vmatpush1.msra.mxu0 %v1228_v49  ;;  %v1597_v30 = vld [vmem:[#allocation5 + $0x3038] sm:$0xff]  ;;  %v1596_v32 = vld [vmem:[#allocation5 + $0x3030] sm:$0xff] }
 0x202   :  { %3308 = vmatpush1.msra.mxu1 %v1740_v50  ;;  %3238 = vmatprep.subr.mxu0 %v1213_v35  ;;  %v1581_v24 = vld [vmem:[#allocation5 + $0x2fb8] sm:$0xff]  ;;  %v1580_v34 = vld [vmem:[#allocation5 + $0x2fb0] sm:$0xff] }
 0x203   :  { %3309 = vmatprep.subr.mxu1 %v1725_v51  ;;  %3239 = vmatpush1.msra.mxu0 %v1212_v53  ;;  %v2093_v33 = vld [vmem:[#allocation5 + $0x3fb8] sm:$0xff]  ;;  %v2092_v36 = vld [vmem:[#allocation5 + $0x3fb0] sm:$0xff] }
 0x204   :  { %3310 = vmatpush1.msra.mxu1 %v1724_v54  ;;  %3240 = vmatprep.subr.mxu0 %v1197_v56  ;;  %v1565_v37 = vld [vmem:[#allocation5 + $0x2f38] sm:$0xff]  ;;  %v1564_v40 = vld [vmem:[#allocation5 + $0x2f30] sm:$0xff] }
 0x205   :  { %3311 = vmatprep.subr.mxu1 %v1709_v57  ;;  %3241 = vmatpush1.msra.mxu0 %v1196_v59  ;;  %v2077_v38 = vld [vmem:[#allocation5 + $0x3f38] sm:$0xff]  ;;  %v2076_v42 = vld [vmem:[#allocation5 + $0x3f30] sm:$0xff] }
 0x206   :  { %3312 = vmatpush1.msra.mxu1 %v1708_v60  ;;  %3242 = vmatprep.subr.mxu0 %v1181_v44  ;;  %v1549_v43 = vld [vmem:[#allocation5 + $0x2eb8] sm:$0xff]  ;;  %v1548_v46 = vld [vmem:[#allocation5 + $0x2eb0] sm:$0xff] }
 0x207   :  { %3313 = vmatprep.subr.mxu1 %v1693_v61  ;;  %3243 = vmatpush1.msra.mxu0 %v1180_v63  ;;  %v2061_v45 = vld [vmem:[#allocation5 + $0x3eb8] sm:$0xff]  ;;  %v2060_v48 = vld [vmem:[#allocation5 + $0x3eb0] sm:$0xff] }
 0x208   :  { %3314 = vmatpush1.msra.mxu1 %v1692_v1  ;;  %3244 = vmatprep.subr.mxu0 %v1165_v2  ;;  %v1533_v49 = vld [vmem:[#allocation5 + $0x2e38] sm:$0xff]  ;;  %v1532_v35 = vld [vmem:[#allocation5 + $0x2e30] sm:$0xff] }
 0x209   :  { %3315 = vmatprep.subr.mxu1 %v1677_v4  ;;  %3245 = vmatpush1.msra.mxu0 %v1164_v5  ;;  %v2045_v50 = vld [vmem:[#allocation5 + $0x3e38] sm:$0xff]  ;;  %v2044_v51 = vld [vmem:[#allocation5 + $0x3e30] sm:$0xff] }
 0x20a   :  { %3316 = vmatpush1.msra.mxu1 %v1676_v6  ;;  %3246 = vmatprep.subr.mxu0 %v1149_v7  ;;  %v1517_v53 = vld [vmem:[#allocation5 + $0x2db8] sm:$0xff]  ;;  %v1516_v56 = vld [vmem:[#allocation5 + $0x2db0] sm:$0xff] }
 0x20b   :  { %3317 = vmatprep.subr.mxu1 %v1661_v9  ;;  %3247 = vmatpush1.msra.mxu0 %v1148_v10  ;;  %v2029_v54 = vld [vmem:[#allocation5 + $0x3db8] sm:$0xff]  ;;  %v2028_v57 = vld [vmem:[#allocation5 + $0x3db0] sm:$0xff] }
 0x20c   :  { %3318 = vmatpush1.msra.mxu1 %v1660_v12  ;;  %3248 = vmatprep.subr.mxu0 %v1133_v13  ;;  %v1501_v59 = vld [vmem:[#allocation5 + $0x2d38] sm:$0xff]  ;;  %v1500_v44 = vld [vmem:[#allocation5 + $0x2d30] sm:$0xff] }
 0x20d   :  { %3319 = vmatprep.subr.mxu1 %v1645_v58  ;;  %3249 = vmatpush1.msra.mxu0 %v1132_v14  ;;  %v2013_v60 = vld [vmem:[#allocation5 + $0x3d38] sm:$0xff]  ;;  %v2012_v61 = vld [vmem:[#allocation5 + $0x3d30] sm:$0xff] }
 0x20e   :  { %3320 = vmatpush1.msra.mxu1 %v1644_v15  ;;  %3250 = vmatprep.subr.mxu0 %v1117_v17  ;;  %v1485_v63 = vld [vmem:[#allocation5 + $0x2cb8] sm:$0xff]  ;;  %v1484_v2 = vld [vmem:[#allocation5 + $0x2cb0] sm:$0xff] }
 0x20f   :  { %3321 = vmatprep.subr.mxu1 %v1629_v18  ;;  %3251 = vmatpush1.msra.mxu0 %v1116_v19  ;;  %v1997_v1 = vld [vmem:[#allocation5 + $0x3cb8] sm:$0xff]  ;;  %v1996_v4 = vld [vmem:[#allocation5 + $0x3cb0] sm:$0xff] }
 0x210   :  { %3322 = vmatpush1.msra.mxu1 %v1628_v20  ;;  %3252 = vmatprep.subr.mxu0 %v1101_v22  ;;  %v1469_v5 = vld [vmem:[#allocation5 + $0x2c38] sm:$0xff]  ;;  %v1468_v7 = vld [vmem:[#allocation5 + $0x2c30] sm:$0xff] }
 0x211   :  { %3323 = vmatprep.subr.mxu1 %v1613_v23  ;;  %3253 = vmatpush1.msra.mxu0 %v1100_v25  ;;  %v1981_v6 = vld [vmem:[#allocation5 + $0x3c38] sm:$0xff]  ;;  %v1980_v9 = vld [vmem:[#allocation5 + $0x3c30] sm:$0xff] }
 0x212   :  { %3324 = vmatpush1.msra.mxu1 %v1612_v27  ;;  %3254 = vmatprep.subr.mxu0 %v1085_v28  ;;  %v1453_v10 = vld [vmem:[#allocation5 + $0x2bb8] sm:$0xff]  ;;  %v1452_v13 = vld [vmem:[#allocation5 + $0x2bb0] sm:$0xff] }
 0x213   :  { %3325 = vmatprep.subr.mxu1 %v1597_v30  ;;  %3255 = vmatpush1.msra.mxu0 %v1084_v31  ;;  %v1965_v12 = vld [vmem:[#allocation5 + $0x3bb8] sm:$0xff]  ;;  %v1964_v58 = vld [vmem:[#allocation5 + $0x3bb0] sm:$0xff] }
 0x214   :  { %3326 = vmatpush1.msra.mxu1 %v1596_v32  ;;  %3256 = vmatprep.subr.mxu0 %v1581_v24  ;;  %v1437_v14 = vld [vmem:[#allocation5 + $0x2b38] sm:$0xff]  ;;  %v1436_v17 = vld [vmem:[#allocation5 + $0x2b30] sm:$0xff] }
 0x215   :  { %3327 = vmatprep.subr.mxu1 %v2093_v33  ;;  %3257 = vmatpush2.msra.mxu0 %v1580_v34  ;;  %v1949_v15 = vld [vmem:[#allocation5 + $0x3b38] sm:$0xff]  ;;  %v1948_v18 = vld [vmem:[#allocation5 + $0x3b30] sm:$0xff] }
 0x216   :  { %3328 = vmatpush2.msra.mxu1 %v2092_v36  ;;  %3258 = vmatprep.subr.mxu0 %v1565_v37  ;;  %v1421_v19 = vld [vmem:[#allocation5 + $0x2ab8] sm:$0xff]  ;;  %v1420_v22 = vld [vmem:[#allocation5 + $0x2ab0] sm:$0xff] }
 0x217   :  { %3329 = vmatprep.subr.mxu1 %v2077_v38  ;;  %3259 = vmatpush2.msra.mxu0 %v1564_v40  ;;  %v1933_v20 = vld [vmem:[#allocation5 + $0x3ab8] sm:$0xff]  ;;  %v1932_v23 = vld [vmem:[#allocation5 + $0x3ab0] sm:$0xff] }
 0x218   :  { %3330 = vmatpush2.msra.mxu1 %v2076_v42  ;;  %3260 = vmatprep.subr.mxu0 %v1549_v43  ;;  %v1405_v25 = vld [vmem:[#allocation5 + $0x2a38] sm:$0xff]  ;;  %v1404_v28 = vld [vmem:[#allocation5 + $0x2a30] sm:$0xff] }
 0x219   :  { %3331 = vmatprep.subr.mxu1 %v2061_v45  ;;  %3261 = vmatpush2.msra.mxu0 %v1548_v46  ;;  %v1917_v27 = vld [vmem:[#allocation5 + $0x3a38] sm:$0xff]  ;;  %v1916_v30 = vld [vmem:[#allocation5 + $0x3a30] sm:$0xff] }
 0x21a   :  { %3332 = vmatpush2.msra.mxu1 %v2060_v48  ;;  %3262 = vmatprep.subr.mxu0 %v1533_v49  ;;  %v1389_v31 = vld [vmem:[#allocation5 + $0x29b8] sm:$0xff]  ;;  %v1388_v24 = vld [vmem:[#allocation5 + $0x29b0] sm:$0xff] }
 0x21b   :  { %3333 = vmatprep.subr.mxu1 %v2045_v50  ;;  %3263 = vmatpush2.msra.mxu0 %v1532_v35  ;;  %v1901_v32 = vld [vmem:[#allocation5 + $0x39b8] sm:$0xff]  ;;  %v1900_v33 = vld [vmem:[#allocation5 + $0x39b0] sm:$0xff]  ;;  %v303_v35 = vld [vmem:[#allocation5 + $0x7c8] sm:$0xff] }
 0x21c   :  { %3334 = vmatpush2.msra.mxu1 %v2044_v51  ;;  %3264 = vmatprep.subr.mxu0 %v1517_v53  ;;  %v1373_v34 = vld [vmem:[#allocation5 + $0x2938] sm:$0xff]  ;;  %v1372_v37 = vld [vmem:[#allocation5 + $0x2930] sm:$0xff]  ;;  %v815_v51 = vld [vmem:[#allocation5 + $0x17c8] sm:$0xff] }
 0x21d   :  { %3335 = vmatprep.subr.mxu1 %v2029_v54  ;;  %3265 = vmatpush2.msra.mxu0 %v1516_v56  ;;  %v1885_v36 = vld [vmem:[#allocation5 + $0x3938] sm:$0xff]  ;;  %v1884_v38 = vld [vmem:[#allocation5 + $0x3930] sm:$0xff]  ;;  %v302_v53 = vld [vmem:[#allocation5 + $0x7c0] sm:$0xff] }
 0x21e   :  { %3336 = vmatpush2.msra.mxu1 %v2028_v57  ;;  %3266 = vmatprep.subr.mxu0 %v1501_v59  ;;  %v1357_v40 = vld [vmem:[#allocation5 + $0x28b8] sm:$0xff]  ;;  %v1356_v43 = vld [vmem:[#allocation5 + $0x28b0] sm:$0xff]  ;;  %v814_v54 = vld [vmem:[#allocation5 + $0x17c0] sm:$0xff] }
 0x21f   :  { %3337 = vmatprep.subr.mxu1 %v2013_v60  ;;  %3267 = vmatpush2.msra.mxu0 %v1500_v44  ;;  %v1869_v42 = vld [vmem:[#allocation5 + $0x38b8] sm:$0xff]  ;;  %v1868_v45 = vld [vmem:[#allocation5 + $0x38b0] sm:$0xff]  ;;  %v287_v56 = vld [vmem:[#allocation5 + $0x748] sm:$0xff] }
 0x220   :  { %3338 = vmatpush2.msra.mxu1 %v2012_v61  ;;  %3268 = vmatprep.subr.mxu0 %v1485_v63  ;;  %v1341_v46 = vld [vmem:[#allocation5 + $0x2838] sm:$0xff]  ;;  %v1340_v49 = vld [vmem:[#allocation5 + $0x2830] sm:$0xff]  ;;  %v799_v57 = vld [vmem:[#allocation5 + $0x1748] sm:$0xff] }
 0x221   :  { %3339 = vmatprep.subr.mxu1 %v1997_v1  ;;  %3269 = vmatpush2.msra.mxu0 %v1484_v2  ;;  %v1853_v48 = vld [vmem:[#allocation5 + $0x3838] sm:$0xff]  ;;  %v1852_v50 = vld [vmem:[#allocation5 + $0x3830] sm:$0xff]  ;;  %v286_v59 = vld [vmem:[#allocation5 + $0x740] sm:$0xff] }
 0x222   :  { %3340 = vmatpush2.msra.mxu1 %v1996_v4  ;;  %3270 = vmatprep.subr.mxu0 %v1469_v5  ;;  %v798_v60 = vld [vmem:[#allocation5 + $0x1740] sm:$0xff]  ;;  %v271_v44 = vld [vmem:[#allocation5 + $0x6c8] sm:$0xff] }
 0x223   :  { %3341 = vmatprep.subr.mxu1 %v1981_v6  ;;  %3271 = vmatpush2.msra.mxu0 %v1468_v7  ;;  %v783_v61 = vld [vmem:[#allocation5 + $0x16c8] sm:$0xff]  ;;  %v270_v63 = vld [vmem:[#allocation5 + $0x6c0] sm:$0xff] }
 0x224   :  { %3342 = vmatpush2.msra.mxu1 %v1980_v9  ;;  %3272 = vmatprep.subr.mxu0 %v1453_v10  ;;  %v782_v1 = vld [vmem:[#allocation5 + $0x16c0] sm:$0xff]  ;;  %v255_v2 = vld [vmem:[#allocation5 + $0x648] sm:$0xff] }
 0x225   :  { %3343 = vmatprep.subr.mxu1 %v1965_v12  ;;  %3273 = vmatpush2.msra.mxu0 %v1452_v13  ;;  %v767_v4 = vld [vmem:[#allocation5 + $0x1648] sm:$0xff]  ;;  %v254_v5 = vld [vmem:[#allocation5 + $0x640] sm:$0xff] }
 0x226   :  { %3344 = vmatpush2.msra.mxu1 %v1964_v58  ;;  %3274 = vmatprep.subr.mxu0 %v1437_v14  ;;  %v766_v6 = vld [vmem:[#allocation5 + $0x1640] sm:$0xff]  ;;  %v239_v7 = vld [vmem:[#allocation5 + $0x5c8] sm:$0xff] }
 0x227   :  { %3345 = vmatprep.subr.mxu1 %v1949_v15  ;;  %3275 = vmatpush2.msra.mxu0 %v1436_v17  ;;  %v751_v9 = vld [vmem:[#allocation5 + $0x15c8] sm:$0xff]  ;;  %v238_v10 = vld [vmem:[#allocation5 + $0x5c0] sm:$0xff] }
 0x228   :  { %3346 = vmatpush2.msra.mxu1 %v1948_v18  ;;  %3276 = vmatprep.subr.mxu0 %v1421_v19  ;;  %v750_v12 = vld [vmem:[#allocation5 + $0x15c0] sm:$0xff]  ;;  %v223_v13 = vld [vmem:[#allocation5 + $0x548] sm:$0xff] }
 0x229   :  { %3347 = vmatprep.subr.mxu1 %v1933_v20  ;;  %3277 = vmatpush2.msra.mxu0 %v1420_v22  ;;  %v735_v58 = vld [vmem:[#allocation5 + $0x1548] sm:$0xff]  ;;  %v222_v14 = vld [vmem:[#allocation5 + $0x540] sm:$0xff] }
 0x22a   :  { %3348 = vmatpush2.msra.mxu1 %v1932_v23  ;;  %3278 = vmatprep.subr.mxu0 %v1405_v25  ;;  %v734_v15 = vld [vmem:[#allocation5 + $0x1540] sm:$0xff]  ;;  %v207_v17 = vld [vmem:[#allocation5 + $0x4c8] sm:$0xff] }
 0x22b   :  { %3349 = vmatprep.subr.mxu1 %v1917_v27  ;;  %3279 = vmatpush2.msra.mxu0 %v1404_v28  ;;  %v719_v18 = vld [vmem:[#allocation5 + $0x14c8] sm:$0xff]  ;;  %v206_v19 = vld [vmem:[#allocation5 + $0x4c0] sm:$0xff] }
 0x22c   :  { %3350 = vmatpush2.msra.mxu1 %v1916_v30  ;;  %3280 = vmatprep.subr.mxu0 %v1389_v31  ;;  %v718_v20 = vld [vmem:[#allocation5 + $0x14c0] sm:$0xff]  ;;  %v191_v22 = vld [vmem:[#allocation5 + $0x448] sm:$0xff] }
 0x22d   :  { %3351 = vmatprep.subr.mxu1 %v1901_v32  ;;  %3281 = vmatpush2.msra.mxu0 %v1388_v24  ;;  %v703_v23 = vld [vmem:[#allocation5 + $0x1448] sm:$0xff]  ;;  %v190_v25 = vld [vmem:[#allocation5 + $0x440] sm:$0xff] }
 0x22e   :  { %3352 = vmatpush2.msra.mxu1 %v1900_v33  ;;  %3282 = vmatprep.subr.mxu0 %v1373_v34  ;;  %v702_v27 = vld [vmem:[#allocation5 + $0x1440] sm:$0xff]  ;;  %v175_v28 = vld [vmem:[#allocation5 + $0x3c8] sm:$0xff] }
 0x22f   :  { %3353 = vmatprep.subr.mxu1 %v1885_v36  ;;  %3283 = vmatpush2.msra.mxu0 %v1372_v37  ;;  %v687_v30 = vld [vmem:[#allocation5 + $0x13c8] sm:$0xff]  ;;  %v174_v31 = vld [vmem:[#allocation5 + $0x3c0] sm:$0xff] }
 0x230   :  { %3354 = vmatpush2.msra.mxu1 %v1884_v38  ;;  %3284 = vmatprep.subr.mxu0 %v1357_v40  ;;  %v686_v32 = vld [vmem:[#allocation5 + $0x13c0] sm:$0xff]  ;;  %v159_v24 = vld [vmem:[#allocation5 + $0x348] sm:$0xff] }
 0x231   :  { %3355 = vmatprep.subr.mxu1 %v1869_v42  ;;  %3285 = vmatpush2.msra.mxu0 %v1356_v43  ;;  %v671_v33 = vld [vmem:[#allocation5 + $0x1348] sm:$0xff]  ;;  %v158_v34 = vld [vmem:[#allocation5 + $0x340] sm:$0xff] }
 0x232   :  { %3356 = vmatpush2.msra.mxu1 %v1868_v45  ;;  %3286 = vmatprep.subr.mxu0 %v1341_v46  ;;  %v670_v36 = vld [vmem:[#allocation5 + $0x1340] sm:$0xff]  ;;  %v143_v37 = vld [vmem:[#allocation5 + $0x2c8] sm:$0xff] }
 0x233   :  { %3357 = vmatprep.subr.mxu1 %v1853_v48  ;;  %3287 = vmatpush2.msra.mxu0 %v1340_v49  ;;  %v655_v38 = vld [vmem:[#allocation5 + $0x12c8] sm:$0xff]  ;;  %v142_v40 = vld [vmem:[#allocation5 + $0x2c0] sm:$0xff] }
 0x234   :  { %3288 = vmatprep.mubr.f32.mxu0 %v4773_v26  ;;  %3358 = vmatpush2.msra.mxu1 %v1852_v50  ;;  %v654_v42 = vld [vmem:[#allocation5 + $0x12c0] sm:$0xff]  ;;  %v127_v43 = vld [vmem:[#allocation5 + $0x248] sm:$0xff] }
 0x235   :  { %3289 = vmatmul.mubr.f32.vlgmr.msra.gmra.mxu0 %v4766_v16  ;;  %3359 = vmatprep.mubr.f32.mxu1 %v4777_v29  ;;  %v639_v45 = vld [vmem:[#allocation5 + $0x1248] sm:$0xff]  ;;  %v126_v46 = vld [vmem:[#allocation5 + $0x240] sm:$0xff] }
 0x236   :  { %3366 = vmatprep.subr.mxu0 %v303_v35  ;;  %3437 = vmatprep.subr.mxu1 %v815_v51  ;;  %v638_v48 = vld [vmem:[#allocation5 + $0x1240] sm:$0xff]  ;;  %v111_v49 = vld [vmem:[#allocation5 + $0x1c8] sm:$0xff] }
 0x237   :  { %3360 = vmatmul.mubr.f32.vlgmr.msra.gmra.mxu1 %v4769_v21  ;;  %3367 = vmatpush1.msra.mxu0 %v302_v53  ;;  %v623_v50 = vld [vmem:[#allocation5 + $0x11c8] sm:$0xff]  ;;  %v110_v35 = vld [vmem:[#allocation5 + $0x1c0] sm:$0xff] }
 0x238   :  { %3438 = vmatpush1.msra.mxu1 %v814_v54  ;;  %3368 = vmatprep.subr.mxu0 %v287_v56  ;;  %v622_v51 = vld [vmem:[#allocation5 + $0x11c0] sm:$0xff]  ;;  %v95_v53 = vld [vmem:[#allocation5 + $0x148] sm:$0xff] }
 0x239   :  { %3439 = vmatprep.subr.mxu1 %v799_v57  ;;  %3369 = vmatpush1.msra.mxu0 %v286_v59  ;;  %v607_v54 = vld [vmem:[#allocation5 + $0x1148] sm:$0xff]  ;;  %v94_v56 = vld [vmem:[#allocation5 + $0x140] sm:$0xff] }
 0x23a   :  { %3440 = vmatpush1.msra.mxu1 %v798_v60  ;;  %3370 = vmatprep.subr.mxu0 %v271_v44  ;;  %v606_v57 = vld [vmem:[#allocation5 + $0x1140] sm:$0xff]  ;;  %v79_v59 = vld [vmem:[#allocation5 + $0xc8] sm:$0xff] }
 0x23b   :  { %3441 = vmatprep.subr.mxu1 %v783_v61  ;;  %3371 = vmatpush1.msra.mxu0 %v270_v63  ;;  %v591_v60 = vld [vmem:[#allocation5 + $0x10c8] sm:$0xff]  ;;  %v78_v44 = vld [vmem:[#allocation5 + $0xc0] sm:$0xff] }
 0x23c   :  { %3442 = vmatpush1.msra.mxu1 %v782_v1  ;;  %3372 = vmatprep.subr.mxu0 %v255_v2  ;;  %v590_v61 = vld [vmem:[#allocation5 + $0x10c0] sm:$0xff]  ;;  %v63_v63 = vld [vmem:[#allocation5 + $0x48] sm:$0xff] }
 0x23d   :  { %3443 = vmatprep.subr.mxu1 %v767_v4  ;;  %3373 = vmatpush1.msra.mxu0 %v254_v5  ;;  %v575_v1 = vld [vmem:[#allocation5 + $0x1048] sm:$0xff]  ;;  %v62_v2 = vld [vmem:[#allocation5 + $0x40] sm:$0xff] }
 0x23e   :  { %3444 = vmatpush1.msra.mxu1 %v766_v6  ;;  %3374 = vmatprep.subr.mxu0 %v239_v7  ;;  %v574_v4 = vld [vmem:[#allocation5 + $0x1040] sm:$0xff]  ;;  %v559_v5 = vld [vmem:[#allocation5 + $0xfc8] sm:$0xff] }
 0x23f   :  { %3445 = vmatprep.subr.mxu1 %v751_v9  ;;  %3375 = vmatpush1.msra.mxu0 %v238_v10  ;;  %v1071_v6 = vld [vmem:[#allocation5 + $0x1fc8] sm:$0xff]  ;;  %v558_v7 = vld [vmem:[#allocation5 + $0xfc0] sm:$0xff] }
 0x240   :  { %3446 = vmatpush1.msra.mxu1 %v750_v12  ;;  %3376 = vmatprep.subr.mxu0 %v223_v13  ;;  %v1070_v9 = vld [vmem:[#allocation5 + $0x1fc0] sm:$0xff]  ;;  %v543_v10 = vld [vmem:[#allocation5 + $0xf48] sm:$0xff] }
 0x241   :  { %3447 = vmatprep.subr.mxu1 %v735_v58  ;;  %3377 = vmatpush1.msra.mxu0 %v222_v14  ;;  %v1055_v12 = vld [vmem:[#allocation5 + $0x1f48] sm:$0xff]  ;;  %v542_v13 = vld [vmem:[#allocation5 + $0xf40] sm:$0xff] }
 0x242   :  { %3448 = vmatpush1.msra.mxu1 %v734_v15  ;;  %3378 = vmatprep.subr.mxu0 %v207_v17  ;;  %v1054_v58 = vld [vmem:[#allocation5 + $0x1f40] sm:$0xff]  ;;  %v527_v14 = vld [vmem:[#allocation5 + $0xec8] sm:$0xff] }
 0x243   :  { %3449 = vmatprep.subr.mxu1 %v719_v18  ;;  %3379 = vmatpush1.msra.mxu0 %v206_v19  ;;  %v1039_v15 = vld [vmem:[#allocation5 + $0x1ec8] sm:$0xff]  ;;  %v526_v17 = vld [vmem:[#allocation5 + $0xec0] sm:$0xff] }
 0x244   :  { %3450 = vmatpush1.msra.mxu1 %v718_v20  ;;  %3380 = vmatprep.subr.mxu0 %v191_v22  ;;  %v1038_v18 = vld [vmem:[#allocation5 + $0x1ec0] sm:$0xff]  ;;  %v511_v19 = vld [vmem:[#allocation5 + $0xe48] sm:$0xff] }
 0x245   :  { %3451 = vmatprep.subr.mxu1 %v703_v23  ;;  %3381 = vmatpush1.msra.mxu0 %v190_v25  ;;  %v1023_v20 = vld [vmem:[#allocation5 + $0x1e48] sm:$0xff]  ;;  %v510_v22 = vld [vmem:[#allocation5 + $0xe40] sm:$0xff] }
 0x246   :  { %3452 = vmatpush1.msra.mxu1 %v702_v27  ;;  %3382 = vmatprep.subr.mxu0 %v175_v28  ;;  %v1022_v23 = vld [vmem:[#allocation5 + $0x1e40] sm:$0xff]  ;;  %v495_v25 = vld [vmem:[#allocation5 + $0xdc8] sm:$0xff] }
 0x247   :  { %3453 = vmatprep.subr.mxu1 %v687_v30  ;;  %3383 = vmatpush1.msra.mxu0 %v174_v31  ;;  %v1007_v27 = vld [vmem:[#allocation5 + $0x1dc8] sm:$0xff]  ;;  %v494_v28 = vld [vmem:[#allocation5 + $0xdc0] sm:$0xff] }
 0x248   :  { %3454 = vmatpush1.msra.mxu1 %v686_v32  ;;  %3384 = vmatprep.subr.mxu0 %v159_v24  ;;  %v1006_v30 = vld [vmem:[#allocation5 + $0x1dc0] sm:$0xff]  ;;  %v479_v31 = vld [vmem:[#allocation5 + $0xd48] sm:$0xff] }
 0x249   :  { %3455 = vmatprep.subr.mxu1 %v671_v33  ;;  %3385 = vmatpush1.msra.mxu0 %v158_v34  ;;  %v991_v32 = vld [vmem:[#allocation5 + $0x1d48] sm:$0xff]  ;;  %v478_v24 = vld [vmem:[#allocation5 + $0xd40] sm:$0xff] }
 0x24a   :  { %3456 = vmatpush1.msra.mxu1 %v670_v36  ;;  %3386 = vmatprep.subr.mxu0 %v143_v37  ;;  %v990_v33 = vld [vmem:[#allocation5 + $0x1d40] sm:$0xff]  ;;  %v463_v34 = vld [vmem:[#allocation5 + $0xcc8] sm:$0xff] }
 0x24b   :  { %3457 = vmatprep.subr.mxu1 %v655_v38  ;;  %3387 = vmatpush1.msra.mxu0 %v142_v40  ;;  %v975_v36 = vld [vmem:[#allocation5 + $0x1cc8] sm:$0xff]  ;;  %v462_v37 = vld [vmem:[#allocation5 + $0xcc0] sm:$0xff] }
 0x24c   :  { %3458 = vmatpush1.msra.mxu1 %v654_v42  ;;  %3388 = vmatprep.subr.mxu0 %v127_v43  ;;  %v974_v38 = vld [vmem:[#allocation5 + $0x1cc0] sm:$0xff]  ;;  %v447_v40 = vld [vmem:[#allocation5 + $0xc48] sm:$0xff] }
 0x24d   :  { %3459 = vmatprep.subr.mxu1 %v639_v45  ;;  %3389 = vmatpush1.msra.mxu0 %v126_v46  ;;  %v959_v42 = vld [vmem:[#allocation5 + $0x1c48] sm:$0xff]  ;;  %v446_v43 = vld [vmem:[#allocation5 + $0xc40] sm:$0xff] }
 0x24e   :  { %3460 = vmatpush1.msra.mxu1 %v638_v48  ;;  %3390 = vmatprep.subr.mxu0 %v111_v49  ;;  %v958_v45 = vld [vmem:[#allocation5 + $0x1c40] sm:$0xff]  ;;  %v431_v46 = vld [vmem:[#allocation5 + $0xbc8] sm:$0xff] }
 0x24f   :  { %3461 = vmatprep.subr.mxu1 %v623_v50  ;;  %3391 = vmatpush1.msra.mxu0 %v110_v35  ;;  %v943_v48 = vld [vmem:[#allocation5 + $0x1bc8] sm:$0xff]  ;;  %v430_v49 = vld [vmem:[#allocation5 + $0xbc0] sm:$0xff] }
 0x250   :  { %3462 = vmatpush1.msra.mxu1 %v622_v51  ;;  %3392 = vmatprep.subr.mxu0 %v95_v53  ;;  %v942_v50 = vld [vmem:[#allocation5 + $0x1bc0] sm:$0xff]  ;;  %v415_v35 = vld [vmem:[#allocation5 + $0xb48] sm:$0xff] }
 0x251   :  { %3463 = vmatprep.subr.mxu1 %v607_v54  ;;  %3393 = vmatpush1.msra.mxu0 %v94_v56  ;;  %v927_v51 = vld [vmem:[#allocation5 + $0x1b48] sm:$0xff]  ;;  %v414_v53 = vld [vmem:[#allocation5 + $0xb40] sm:$0xff] }
 0x252   :  { %3464 = vmatpush1.msra.mxu1 %v606_v57  ;;  %3394 = vmatprep.subr.mxu0 %v79_v59  ;;  %v926_v54 = vld [vmem:[#allocation5 + $0x1b40] sm:$0xff]  ;;  %v399_v56 = vld [vmem:[#allocation5 + $0xac8] sm:$0xff] }
 0x253   :  { %3465 = vmatprep.subr.mxu1 %v591_v60  ;;  %3395 = vmatpush1.msra.mxu0 %v78_v44  ;;  %v911_v57 = vld [vmem:[#allocation5 + $0x1ac8] sm:$0xff]  ;;  %v398_v59 = vld [vmem:[#allocation5 + $0xac0] sm:$0xff] }
 0x254   :  { %3466 = vmatpush1.msra.mxu1 %v590_v61  ;;  %3396 = vmatprep.subr.mxu0 %v63_v63  ;;  %v910_v60 = vld [vmem:[#allocation5 + $0x1ac0] sm:$0xff]  ;;  %v383_v44 = vld [vmem:[#allocation5 + $0xa48] sm:$0xff] }
 0x255   :  { %3467 = vmatprep.subr.mxu1 %v575_v1  ;;  %3397 = vmatpush1.msra.mxu0 %v62_v2  ;;  %v895_v61 = vld [vmem:[#allocation5 + $0x1a48] sm:$0xff]  ;;  %v382_v63 = vld [vmem:[#allocation5 + $0xa40] sm:$0xff] }
 0x256   :  { %3468 = vmatpush1.msra.mxu1 %v574_v4  ;;  %3398 = vmatprep.subr.mxu0 %v559_v5  ;;  %v894_v1 = vld [vmem:[#allocation5 + $0x1a40] sm:$0xff]  ;;  %v367_v2 = vld [vmem:[#allocation5 + $0x9c8] sm:$0xff] }
 0x257   :  { %3469 = vmatprep.subr.mxu1 %v1071_v6  ;;  %3399 = vmatpush2.msra.mxu0 %v558_v7  ;;  %v879_v4 = vld [vmem:[#allocation5 + $0x19c8] sm:$0xff]  ;;  %v366_v5 = vld [vmem:[#allocation5 + $0x9c0] sm:$0xff] }
 0x258   :  { %3470 = vmatpush2.msra.mxu1 %v1070_v9  ;;  %3400 = vmatprep.subr.mxu0 %v543_v10  ;;  %v878_v6 = vld [vmem:[#allocation5 + $0x19c0] sm:$0xff]  ;;  %v351_v7 = vld [vmem:[#allocation5 + $0x948] sm:$0xff] }
 0x259   :  { %3471 = vmatprep.subr.mxu1 %v1055_v12  ;;  %3401 = vmatpush2.msra.mxu0 %v542_v13  ;;  %v863_v9 = vld [vmem:[#allocation5 + $0x1948] sm:$0xff]  ;;  %v350_v10 = vld [vmem:[#allocation5 + $0x940] sm:$0xff] }
 0x25a   :  { %3472 = vmatpush2.msra.mxu1 %v1054_v58  ;;  %3402 = vmatprep.subr.mxu0 %v527_v14  ;;  %v862_v12 = vld [vmem:[#allocation5 + $0x1940] sm:$0xff]  ;;  %v335_v13 = vld [vmem:[#allocation5 + $0x8c8] sm:$0xff] }
 0x25b   :  { %3473 = vmatprep.subr.mxu1 %v1039_v15  ;;  %3403 = vmatpush2.msra.mxu0 %v526_v17  ;;  %v847_v58 = vld [vmem:[#allocation5 + $0x18c8] sm:$0xff]  ;;  %v334_v14 = vld [vmem:[#allocation5 + $0x8c0] sm:$0xff] }
 0x25c   :  { %3474 = vmatpush2.msra.mxu1 %v1038_v18  ;;  %3404 = vmatprep.subr.mxu0 %v511_v19  ;;  %v846_v15 = vld [vmem:[#allocation5 + $0x18c0] sm:$0xff]  ;;  %v319_v17 = vld [vmem:[#allocation5 + $0x848] sm:$0xff] }
 0x25d   :  { %3475 = vmatprep.subr.mxu1 %v1023_v20  ;;  %3405 = vmatpush2.msra.mxu0 %v510_v22  ;;  %v831_v18 = vld [vmem:[#allocation5 + $0x1848] sm:$0xff]  ;;  %v318_v19 = vld [vmem:[#allocation5 + $0x840] sm:$0xff] }
 0x25e   :  { %3476 = vmatpush2.msra.mxu1 %v1022_v23  ;;  %3406 = vmatprep.subr.mxu0 %v495_v25  ;;  %v830_v20 = vld [vmem:[#allocation5 + $0x1840] sm:$0xff]  ;;  %v1327_v22 = vld [vmem:[#allocation5 + $0x27c8] sm:$0xff] }
 0x25f   :  { %3477 = vmatprep.subr.mxu1 %v1007_v27  ;;  %3407 = vmatpush2.msra.mxu0 %v494_v28  ;;  %v1839_v23 = vld [vmem:[#allocation5 + $0x37c8] sm:$0xff]  ;;  %v1326_v25 = vld [vmem:[#allocation5 + $0x27c0] sm:$0xff] }
 0x260   :  { %3478 = vmatpush2.msra.mxu1 %v1006_v30  ;;  %3408 = vmatprep.subr.mxu0 %v479_v31  ;;  %v1838_v27 = vld [vmem:[#allocation5 + $0x37c0] sm:$0xff]  ;;  %v1311_v28 = vld [vmem:[#allocation5 + $0x2748] sm:$0xff] }
 0x261   :  { %3479 = vmatprep.subr.mxu1 %v991_v32  ;;  %3409 = vmatpush2.msra.mxu0 %v478_v24  ;;  %v1823_v30 = vld [vmem:[#allocation5 + $0x3748] sm:$0xff]  ;;  %v1310_v31 = vld [vmem:[#allocation5 + $0x2740] sm:$0xff] }
 0x262   :  { %3480 = vmatpush2.msra.mxu1 %v990_v33  ;;  %3410 = vmatprep.subr.mxu0 %v463_v34  ;;  %v1822_v32 = vld [vmem:[#allocation5 + $0x3740] sm:$0xff]  ;;  %v1295_v24 = vld [vmem:[#allocation5 + $0x26c8] sm:$0xff] }
 0x263   :  { %3481 = vmatprep.subr.mxu1 %v975_v36  ;;  %3411 = vmatpush2.msra.mxu0 %v462_v37  ;;  %v1807_v33 = vld [vmem:[#allocation5 + $0x36c8] sm:$0xff]  ;;  %v1294_v34 = vld [vmem:[#allocation5 + $0x26c0] sm:$0xff] }
 0x264   :  { %3482 = vmatpush2.msra.mxu1 %v974_v38  ;;  %3412 = vmatprep.subr.mxu0 %v447_v40  ;;  %v1806_v36 = vld [vmem:[#allocation5 + $0x36c0] sm:$0xff]  ;;  %v1279_v37 = vld [vmem:[#allocation5 + $0x2648] sm:$0xff] }
 0x265   :  { %3483 = vmatprep.subr.mxu1 %v959_v42  ;;  %3413 = vmatpush2.msra.mxu0 %v446_v43  ;;  %v1791_v38 = vld [vmem:[#allocation5 + $0x3648] sm:$0xff]  ;;  %v1278_v40 = vld [vmem:[#allocation5 + $0x2640] sm:$0xff] }
 0x266   :  { %3484 = vmatpush2.msra.mxu1 %v958_v45  ;;  %3414 = vmatprep.subr.mxu0 %v431_v46  ;;  %v1790_v42 = vld [vmem:[#allocation5 + $0x3640] sm:$0xff]  ;;  %v1263_v43 = vld [vmem:[#allocation5 + $0x25c8] sm:$0xff] }
 0x267   :  { %3485 = vmatprep.subr.mxu1 %v943_v48  ;;  %3415 = vmatpush2.msra.mxu0 %v430_v49  ;;  %v1775_v45 = vld [vmem:[#allocation5 + $0x35c8] sm:$0xff]  ;;  %v1262_v46 = vld [vmem:[#allocation5 + $0x25c0] sm:$0xff] }
 0x268   :  { %3486 = vmatpush2.msra.mxu1 %v942_v50  ;;  %3416 = vmatprep.subr.mxu0 %v415_v35  ;;  %v1774_v48 = vld [vmem:[#allocation5 + $0x35c0] sm:$0xff]  ;;  %v1247_v49 = vld [vmem:[#allocation5 + $0x2548] sm:$0xff] }
 0x269   :  { %3487 = vmatprep.subr.mxu1 %v927_v51  ;;  %3417 = vmatpush2.msra.mxu0 %v414_v53  ;;  %v1759_v50 = vld [vmem:[#allocation5 + $0x3548] sm:$0xff]  ;;  %v1246_v35 = vld [vmem:[#allocation5 + $0x2540] sm:$0xff] }
 0x26a   :  { %3488 = vmatpush2.msra.mxu1 %v926_v54  ;;  %3418 = vmatprep.subr.mxu0 %v399_v56  ;;  %v1758_v51 = vld [vmem:[#allocation5 + $0x3540] sm:$0xff]  ;;  %v1231_v53 = vld [vmem:[#allocation5 + $0x24c8] sm:$0xff] }
 0x26b   :  { %3489 = vmatprep.subr.mxu1 %v911_v57  ;;  %3419 = vmatpush2.msra.mxu0 %v398_v59  ;;  %v1743_v54 = vld [vmem:[#allocation5 + $0x34c8] sm:$0xff]  ;;  %v1230_v56 = vld [vmem:[#allocation5 + $0x24c0] sm:$0xff] }
 0x26c   :  { %3490 = vmatpush2.msra.mxu1 %v910_v60  ;;  %3420 = vmatprep.subr.mxu0 %v383_v44  ;;  %v1742_v57 = vld [vmem:[#allocation5 + $0x34c0] sm:$0xff]  ;;  %v1215_v59 = vld [vmem:[#allocation5 + $0x2448] sm:$0xff] }
 0x26d   :  { %3491 = vmatprep.subr.mxu1 %v895_v61  ;;  %3421 = vmatpush2.msra.mxu0 %v382_v63  ;;  %v1727_v60 = vld [vmem:[#allocation5 + $0x3448] sm:$0xff]  ;;  %v1214_v44 = vld [vmem:[#allocation5 + $0x2440] sm:$0xff] }
 0x26e   :  { %3492 = vmatpush2.msra.mxu1 %v894_v1  ;;  %3422 = vmatprep.subr.mxu0 %v367_v2  ;;  %v1726_v61 = vld [vmem:[#allocation5 + $0x3440] sm:$0xff]  ;;  %v1199_v63 = vld [vmem:[#allocation5 + $0x23c8] sm:$0xff] }
 0x26f   :  { %3493 = vmatprep.subr.mxu1 %v879_v4  ;;  %3423 = vmatpush2.msra.mxu0 %v366_v5  ;;  %v1711_v1 = vld [vmem:[#allocation5 + $0x33c8] sm:$0xff]  ;;  %v1198_v2 = vld [vmem:[#allocation5 + $0x23c0] sm:$0xff] }
 0x270   :  { %3494 = vmatpush2.msra.mxu1 %v878_v6  ;;  %3424 = vmatprep.subr.mxu0 %v351_v7  ;;  %v1710_v4 = vld [vmem:[#allocation5 + $0x33c0] sm:$0xff]  ;;  %v1183_v5 = vld [vmem:[#allocation5 + $0x2348] sm:$0xff] }
 0x271   :  { %3495 = vmatprep.subr.mxu1 %v863_v9  ;;  %3425 = vmatpush2.msra.mxu0 %v350_v10  ;;  %v1695_v6 = vld [vmem:[#allocation5 + $0x3348] sm:$0xff]  ;;  %v1182_v7 = vld [vmem:[#allocation5 + $0x2340] sm:$0xff] }
 0x272   :  { %3496 = vmatpush2.msra.mxu1 %v862_v12  ;;  %3426 = vmatprep.subr.mxu0 %v335_v13  ;;  %v1694_v9 = vld [vmem:[#allocation5 + $0x3340] sm:$0xff]  ;;  %v1167_v10 = vld [vmem:[#allocation5 + $0x22c8] sm:$0xff] }
 0x273   :  { %3497 = vmatprep.subr.mxu1 %v847_v58  ;;  %3427 = vmatpush2.msra.mxu0 %v334_v14  ;;  %v1679_v12 = vld [vmem:[#allocation5 + $0x32c8] sm:$0xff]  ;;  %v1166_v13 = vld [vmem:[#allocation5 + $0x22c0] sm:$0xff] }
 0x274   :  { %3498 = vmatpush2.msra.mxu1 %v846_v15  ;;  %3428 = vmatprep.subr.mxu0 %v319_v17  ;;  %v1678_v58 = vld [vmem:[#allocation5 + $0x32c0] sm:$0xff]  ;;  %v1151_v14 = vld [vmem:[#allocation5 + $0x2248] sm:$0xff] }
 0x275   :  { %3499 = vmatprep.subr.mxu1 %v831_v18  ;;  %3429 = vmatpush2.msra.mxu0 %v318_v19  ;;  %v1663_v15 = vld [vmem:[#allocation5 + $0x3248] sm:$0xff]  ;;  %v1150_v17 = vld [vmem:[#allocation5 + $0x2240] sm:$0xff] }
 0x276   :  { %3430 = vmatprep.mubr.f32.mxu0 %v4755_v8  ;;  %3500 = vmatpush2.msra.mxu1 %v830_v20  ;;  %v1662_v18 = vld [vmem:[#allocation5 + $0x3240] sm:$0xff]  ;;  %v1135_v19 = vld [vmem:[#allocation5 + $0x21c8] sm:$0xff] }
 0x277   :  { %3431 = vmatmul.mubr.f32.vlgmr.msra.gmra.mxu0 %v4748_v62  ;;  %3501 = vmatprep.mubr.f32.mxu1 %v4759_v11  ;;  %v1647_v20 = vld [vmem:[#allocation5 + $0x31c8] sm:$0xff] }
 0x278   :  { %3508 = vmatprep.subr.mxu0 %v1327_v22  ;;  %3579 = vmatprep.subr.mxu1 %v1839_v23  ;;  %v1134_v22 = vld [vmem:[#allocation5 + $0x21c0] sm:$0xff] }
 0x279   :  { %3502 = vmatmul.mubr.f32.vlgmr.msra.gmra.mxu1 %v4751_v3  ;;  %3509 = vmatpush1.msra.mxu0 %v1326_v25  ;;  %v1646_v23 = vld [vmem:[#allocation5 + $0x31c0] sm:$0xff]  ;;  %v1119_v25 = vld [vmem:[#allocation5 + $0x2148] sm:$0xff] }
 0x27a   :  { %3580 = vmatpush1.msra.mxu1 %v1838_v27  ;;  %3510 = vmatprep.subr.mxu0 %v1311_v28  ;;  %v1631_v27 = vld [vmem:[#allocation5 + $0x3148] sm:$0xff]  ;;  %v1118_v28 = vld [vmem:[#allocation5 + $0x2140] sm:$0xff] }
 0x27b   :  { %3581 = vmatprep.subr.mxu1 %v1823_v30  ;;  %3511 = vmatpush1.msra.mxu0 %v1310_v31  ;;  %v1630_v30 = vld [vmem:[#allocation5 + $0x3140] sm:$0xff]  ;;  %v1103_v31 = vld [vmem:[#allocation5 + $0x20c8] sm:$0xff] }
 0x27c   :  { %3582 = vmatpush1.msra.mxu1 %v1822_v32  ;;  %3512 = vmatprep.subr.mxu0 %v1295_v24  ;;  %v1615_v32 = vld [vmem:[#allocation5 + $0x30c8] sm:$0xff]  ;;  %v1102_v24 = vld [vmem:[#allocation5 + $0x20c0] sm:$0xff] }
 0x27d   :  { %3583 = vmatprep.subr.mxu1 %v1807_v33  ;;  %3513 = vmatpush1.msra.mxu0 %v1294_v34  ;;  %v1614_v33 = vld [vmem:[#allocation5 + $0x30c0] sm:$0xff]  ;;  %v1087_v34 = vld [vmem:[#allocation5 + $0x2048] sm:$0xff] }
 0x27e   :  { %3584 = vmatpush1.msra.mxu1 %v1806_v36  ;;  %3514 = vmatprep.subr.mxu0 %v1279_v37  ;;  %v1599_v36 = vld [vmem:[#allocation5 + $0x3048] sm:$0xff]  ;;  %v1086_v37 = vld [vmem:[#allocation5 + $0x2040] sm:$0xff] }
 0x27f   :  { %3585 = vmatprep.subr.mxu1 %v1791_v38  ;;  %3515 = vmatpush1.msra.mxu0 %v1278_v40  ;;  %v1598_v38 = vld [vmem:[#allocation5 + $0x3040] sm:$0xff]  ;;  %v1583_v40 = vld [vmem:[#allocation5 + $0x2fc8] sm:$0xff] }
 0x280   :  { %3586 = vmatpush1.msra.mxu1 %v1790_v42  ;;  %3516 = vmatprep.subr.mxu0 %v1263_v43  ;;  %v2095_v42 = vld [vmem:[#allocation5 + $0x3fc8] sm:$0xff]  ;;  %v1582_v43 = vld [vmem:[#allocation5 + $0x2fc0] sm:$0xff] }
 0x281   :  { %3587 = vmatprep.subr.mxu1 %v1775_v45  ;;  %3517 = vmatpush1.msra.mxu0 %v1262_v46  ;;  %v2094_v45 = vld [vmem:[#allocation5 + $0x3fc0] sm:$0xff]  ;;  %v1567_v46 = vld [vmem:[#allocation5 + $0x2f48] sm:$0xff] }
 0x282   :  { %3588 = vmatpush1.msra.mxu1 %v1774_v48  ;;  %3518 = vmatprep.subr.mxu0 %v1247_v49  ;;  %v2079_v48 = vld [vmem:[#allocation5 + $0x3f48] sm:$0xff]  ;;  %v1566_v49 = vld [vmem:[#allocation5 + $0x2f40] sm:$0xff] }
 0x283   :  { %3589 = vmatprep.subr.mxu1 %v1759_v50  ;;  %3519 = vmatpush1.msra.mxu0 %v1246_v35  ;;  %v2078_v50 = vld [vmem:[#allocation5 + $0x3f40] sm:$0xff]  ;;  %v1551_v35 = vld [vmem:[#allocation5 + $0x2ec8] sm:$0xff] }
 0x284   :  { %3590 = vmatpush1.msra.mxu1 %v1758_v51  ;;  %3520 = vmatprep.subr.mxu0 %v1231_v53  ;;  %v2063_v51 = vld [vmem:[#allocation5 + $0x3ec8] sm:$0xff]  ;;  %v1550_v53 = vld [vmem:[#allocation5 + $0x2ec0] sm:$0xff] }
 0x285   :  { %3591 = vmatprep.subr.mxu1 %v1743_v54  ;;  %3521 = vmatpush1.msra.mxu0 %v1230_v56  ;;  %v2062_v54 = vld [vmem:[#allocation5 + $0x3ec0] sm:$0xff]  ;;  %v1535_v56 = vld [vmem:[#allocation5 + $0x2e48] sm:$0xff] }
 0x286   :  { %3592 = vmatpush1.msra.mxu1 %v1742_v57  ;;  %3522 = vmatprep.subr.mxu0 %v1215_v59  ;;  %v2047_v57 = vld [vmem:[#allocation5 + $0x3e48] sm:$0xff]  ;;  %v1534_v59 = vld [vmem:[#allocation5 + $0x2e40] sm:$0xff] }
 0x287   :  { %3593 = vmatprep.subr.mxu1 %v1727_v60  ;;  %3523 = vmatpush1.msra.mxu0 %v1214_v44  ;;  %v2046_v60 = vld [vmem:[#allocation5 + $0x3e40] sm:$0xff]  ;;  %v1519_v44 = vld [vmem:[#allocation5 + $0x2dc8] sm:$0xff] }
 0x288   :  { %3594 = vmatpush1.msra.mxu1 %v1726_v61  ;;  %3524 = vmatprep.subr.mxu0 %v1199_v63  ;;  %v2031_v61 = vld [vmem:[#allocation5 + $0x3dc8] sm:$0xff]  ;;  %v1518_v63 = vld [vmem:[#allocation5 + $0x2dc0] sm:$0xff] }
 0x289   :  { %3595 = vmatprep.subr.mxu1 %v1711_v1  ;;  %3525 = vmatpush1.msra.mxu0 %v1198_v2  ;;  %v2030_v1 = vld [vmem:[#allocation5 + $0x3dc0] sm:$0xff]  ;;  %v1503_v2 = vld [vmem:[#allocation5 + $0x2d48] sm:$0xff] }
 0x28a   :  { %3596 = vmatpush1.msra.mxu1 %v1710_v4  ;;  %3526 = vmatprep.subr.mxu0 %v1183_v5  ;;  %v2015_v4 = vld [vmem:[#allocation5 + $0x3d48] sm:$0xff]  ;;  %v1502_v5 = vld [vmem:[#allocation5 + $0x2d40] sm:$0xff] }
 0x28b   :  { %3597 = vmatprep.subr.mxu1 %v1695_v6  ;;  %3527 = vmatpush1.msra.mxu0 %v1182_v7  ;;  %v2014_v6 = vld [vmem:[#allocation5 + $0x3d40] sm:$0xff]  ;;  %v1487_v7 = vld [vmem:[#allocation5 + $0x2cc8] sm:$0xff] }
 0x28c   :  { %3598 = vmatpush1.msra.mxu1 %v1694_v9  ;;  %3528 = vmatprep.subr.mxu0 %v1167_v10  ;;  %v1999_v9 = vld [vmem:[#allocation5 + $0x3cc8] sm:$0xff]  ;;  %v1486_v10 = vld [vmem:[#allocation5 + $0x2cc0] sm:$0xff] }
 0x28d   :  { %3599 = vmatprep.subr.mxu1 %v1679_v12  ;;  %3529 = vmatpush1.msra.mxu0 %v1166_v13  ;;  %v1998_v12 = vld [vmem:[#allocation5 + $0x3cc0] sm:$0xff]  ;;  %v1471_v13 = vld [vmem:[#allocation5 + $0x2c48] sm:$0xff] }
 0x28e   :  { %3600 = vmatpush1.msra.mxu1 %v1678_v58  ;;  %3530 = vmatprep.subr.mxu0 %v1151_v14  ;;  %v1983_v58 = vld [vmem:[#allocation5 + $0x3c48] sm:$0xff]  ;;  %v1470_v14 = vld [vmem:[#allocation5 + $0x2c40] sm:$0xff] }
 0x28f   :  { %3601 = vmatprep.subr.mxu1 %v1663_v15  ;;  %3531 = vmatpush1.msra.mxu0 %v1150_v17  ;;  %v1982_v15 = vld [vmem:[#allocation5 + $0x3c40] sm:$0xff]  ;;  %v1455_v17 = vld [vmem:[#allocation5 + $0x2bc8] sm:$0xff] }
 0x290   :  { %3602 = vmatpush1.msra.mxu1 %v1662_v18  ;;  %3532 = vmatprep.subr.mxu0 %v1135_v19  ;;  %v1967_v18 = vld [vmem:[#allocation5 + $0x3bc8] sm:$0xff]  ;;  %v1454_v19 = vld [vmem:[#allocation5 + $0x2bc0] sm:$0xff] }
 0x291   :  { %3603 = vmatprep.subr.mxu1 %v1647_v20  ;;  %3533 = vmatpush1.msra.mxu0 %v1134_v22  ;;  %v1966_v20 = vld [vmem:[#allocation5 + $0x3bc0] sm:$0xff]  ;;  %v1439_v22 = vld [vmem:[#allocation5 + $0x2b48] sm:$0xff] }
 0x292   :  { %3604 = vmatpush1.msra.mxu1 %v1646_v23  ;;  %3534 = vmatprep.subr.mxu0 %v1119_v25  ;;  %v1951_v23 = vld [vmem:[#allocation5 + $0x3b48] sm:$0xff]  ;;  %v1438_v25 = vld [vmem:[#allocation5 + $0x2b40] sm:$0xff] }
 0x293   :  { %3605 = vmatprep.subr.mxu1 %v1631_v27  ;;  %3535 = vmatpush1.msra.mxu0 %v1118_v28  ;;  %v1950_v27 = vld [vmem:[#allocation5 + $0x3b40] sm:$0xff]  ;;  %v1423_v28 = vld [vmem:[#allocation5 + $0x2ac8] sm:$0xff] }
 0x294   :  { %3606 = vmatpush1.msra.mxu1 %v1630_v30  ;;  %3536 = vmatprep.subr.mxu0 %v1103_v31  ;;  %v1935_v30 = vld [vmem:[#allocation5 + $0x3ac8] sm:$0xff]  ;;  %v1422_v31 = vld [vmem:[#allocation5 + $0x2ac0] sm:$0xff] }
 0x295   :  { %3607 = vmatprep.subr.mxu1 %v1615_v32  ;;  %3537 = vmatpush1.msra.mxu0 %v1102_v24  ;;  %v1934_v32 = vld [vmem:[#allocation5 + $0x3ac0] sm:$0xff]  ;;  %v1407_v24 = vld [vmem:[#allocation5 + $0x2a48] sm:$0xff] }
 0x296   :  { %3608 = vmatpush1.msra.mxu1 %v1614_v33  ;;  %3538 = vmatprep.subr.mxu0 %v1087_v34  ;;  %v1919_v33 = vld [vmem:[#allocation5 + $0x3a48] sm:$0xff]  ;;  %v1406_v34 = vld [vmem:[#allocation5 + $0x2a40] sm:$0xff] }
 0x297   :  { %3609 = vmatprep.subr.mxu1 %v1599_v36  ;;  %3539 = vmatpush1.msra.mxu0 %v1086_v37  ;;  %v1918_v36 = vld [vmem:[#allocation5 + $0x3a40] sm:$0xff]  ;;  %v1391_v37 = vld [vmem:[#allocation5 + $0x29c8] sm:$0xff] }
 0x298   :  { %3610 = vmatpush1.msra.mxu1 %v1598_v38  ;;  %3540 = vmatprep.subr.mxu0 %v1583_v40  ;;  %v1903_v38 = vld [vmem:[#allocation5 + $0x39c8] sm:$0xff]  ;;  %v1390_v40 = vld [vmem:[#allocation5 + $0x29c0] sm:$0xff] }
 0x299   :  { %3611 = vmatprep.subr.mxu1 %v2095_v42  ;;  %3541 = vmatpush2.msra.mxu0 %v1582_v43  ;;  %v1902_v42 = vld [vmem:[#allocation5 + $0x39c0] sm:$0xff]  ;;  %v1375_v43 = vld [vmem:[#allocation5 + $0x2948] sm:$0xff] }
 0x29a   :  { %3612 = vmatpush2.msra.mxu1 %v2094_v45  ;;  %3542 = vmatprep.subr.mxu0 %v1567_v46  ;;  %v1887_v45 = vld [vmem:[#allocation5 + $0x3948] sm:$0xff]  ;;  %v1374_v46 = vld [vmem:[#allocation5 + $0x2940] sm:$0xff] }
 0x29b   :  { %3613 = vmatprep.subr.mxu1 %v2079_v48  ;;  %3543 = vmatpush2.msra.mxu0 %v1566_v49  ;;  %v1886_v48 = vld [vmem:[#allocation5 + $0x3940] sm:$0xff]  ;;  %v1359_v49 = vld [vmem:[#allocation5 + $0x28c8] sm:$0xff] }
 0x29c   :  { %3614 = vmatpush2.msra.mxu1 %v2078_v50  ;;  %3544 = vmatprep.subr.mxu0 %v1551_v35  ;;  %v1871_v50 = vld [vmem:[#allocation5 + $0x38c8] sm:$0xff]  ;;  %v1358_v35 = vld [vmem:[#allocation5 + $0x28c0] sm:$0xff] }
 0x29d   :  { %3615 = vmatprep.subr.mxu1 %v2063_v51  ;;  %3545 = vmatpush2.msra.mxu0 %v1550_v53  ;;  %v1870_v51 = vld [vmem:[#allocation5 + $0x38c0] sm:$0xff]  ;;  %v1343_v53 = vld [vmem:[#allocation5 + $0x2848] sm:$0xff] }
 0x29e   :  { %3616 = vmatpush2.msra.mxu1 %v2062_v54  ;;  %3546 = vmatprep.subr.mxu0 %v1535_v56  ;;  %v1855_v54 = vld [vmem:[#allocation5 + $0x3848] sm:$0xff]  ;;  %v1342_v56 = vld [vmem:[#allocation5 + $0x2840] sm:$0xff] }
 0x29f   :  { %3617 = vmatprep.subr.mxu1 %v2047_v57  ;;  %3547 = vmatpush2.msra.mxu0 %v1534_v59  ;;  %v1854_v57 = vld [vmem:[#allocation5 + $0x3840] sm:$0xff]  ;;  %v305_v59 = vld [vmem:[#allocation5 + $0x7d8] sm:$0xff] }
 0x2a0   :  { %3618 = vmatpush2.msra.mxu1 %v2046_v60  ;;  %3548 = vmatprep.subr.mxu0 %v1519_v44  ;;  %v817_v60 = vld [vmem:[#allocation5 + $0x17d8] sm:$0xff]  ;;  %v304_v44 = vld [vmem:[#allocation5 + $0x7d0] sm:$0xff] }
 0x2a1   :  { %3619 = vmatprep.subr.mxu1 %v2031_v61  ;;  %3549 = vmatpush2.msra.mxu0 %v1518_v63  ;;  %v816_v61 = vld [vmem:[#allocation5 + $0x17d0] sm:$0xff]  ;;  %v289_v63 = vld [vmem:[#allocation5 + $0x758] sm:$0xff] }
 0x2a2   :  { %3620 = vmatpush2.msra.mxu1 %v2030_v1  ;;  %3550 = vmatprep.subr.mxu0 %v1503_v2  ;;  %v801_v1 = vld [vmem:[#allocation5 + $0x1758] sm:$0xff]  ;;  %v288_v2 = vld [vmem:[#allocation5 + $0x750] sm:$0xff] }
 0x2a3   :  { %3621 = vmatprep.subr.mxu1 %v2015_v4  ;;  %3551 = vmatpush2.msra.mxu0 %v1502_v5  ;;  %v800_v4 = vld [vmem:[#allocation5 + $0x1750] sm:$0xff]  ;;  %v273_v5 = vld [vmem:[#allocation5 + $0x6d8] sm:$0xff] }
 0x2a4   :  { %3622 = vmatpush2.msra.mxu1 %v2014_v6  ;;  %3552 = vmatprep.subr.mxu0 %v1487_v7  ;;  %v785_v6 = vld [vmem:[#allocation5 + $0x16d8] sm:$0xff]  ;;  %v272_v7 = vld [vmem:[#allocation5 + $0x6d0] sm:$0xff] }
 0x2a5   :  { %3623 = vmatprep.subr.mxu1 %v1999_v9  ;;  %3553 = vmatpush2.msra.mxu0 %v1486_v10  ;;  %v784_v9 = vld [vmem:[#allocation5 + $0x16d0] sm:$0xff]  ;;  %v257_v10 = vld [vmem:[#allocation5 + $0x658] sm:$0xff] }
 0x2a6   :  { %3624 = vmatpush2.msra.mxu1 %v1998_v12  ;;  %3554 = vmatprep.subr.mxu0 %v1471_v13  ;;  %v769_v12 = vld [vmem:[#allocation5 + $0x1658] sm:$0xff]  ;;  %v256_v13 = vld [vmem:[#allocation5 + $0x650] sm:$0xff] }
 0x2a7   :  { %3625 = vmatprep.subr.mxu1 %v1983_v58  ;;  %3555 = vmatpush2.msra.mxu0 %v1470_v14  ;;  %v768_v58 = vld [vmem:[#allocation5 + $0x1650] sm:$0xff]  ;;  %v241_v14 = vld [vmem:[#allocation5 + $0x5d8] sm:$0xff] }
 0x2a8   :  { %3626 = vmatpush2.msra.mxu1 %v1982_v15  ;;  %3556 = vmatprep.subr.mxu0 %v1455_v17  ;;  %v753_v15 = vld [vmem:[#allocation5 + $0x15d8] sm:$0xff]  ;;  %v240_v17 = vld [vmem:[#allocation5 + $0x5d0] sm:$0xff] }
 0x2a9   :  { %3627 = vmatprep.subr.mxu1 %v1967_v18  ;;  %3557 = vmatpush2.msra.mxu0 %v1454_v19  ;;  %v752_v18 = vld [vmem:[#allocation5 + $0x15d0] sm:$0xff]  ;;  %v225_v19 = vld [vmem:[#allocation5 + $0x558] sm:$0xff] }
 0x2aa   :  { %3628 = vmatpush2.msra.mxu1 %v1966_v20  ;;  %3558 = vmatprep.subr.mxu0 %v1439_v22  ;;  %v737_v20 = vld [vmem:[#allocation5 + $0x1558] sm:$0xff]  ;;  %v224_v22 = vld [vmem:[#allocation5 + $0x550] sm:$0xff] }
 0x2ab   :  { %3629 = vmatprep.subr.mxu1 %v1951_v23  ;;  %3559 = vmatpush2.msra.mxu0 %v1438_v25  ;;  %v736_v23 = vld [vmem:[#allocation5 + $0x1550] sm:$0xff]  ;;  %v209_v25 = vld [vmem:[#allocation5 + $0x4d8] sm:$0xff] }
 0x2ac   :  { %3630 = vmatpush2.msra.mxu1 %v1950_v27  ;;  %3560 = vmatprep.subr.mxu0 %v1423_v28  ;;  %v721_v27 = vld [vmem:[#allocation5 + $0x14d8] sm:$0xff]  ;;  %v208_v28 = vld [vmem:[#allocation5 + $0x4d0] sm:$0xff] }
 0x2ad   :  { %3631 = vmatprep.subr.mxu1 %v1935_v30  ;;  %3561 = vmatpush2.msra.mxu0 %v1422_v31  ;;  %v720_v30 = vld [vmem:[#allocation5 + $0x14d0] sm:$0xff]  ;;  %v193_v31 = vld [vmem:[#allocation5 + $0x458] sm:$0xff] }
 0x2ae   :  { %3632 = vmatpush2.msra.mxu1 %v1934_v32  ;;  %3562 = vmatprep.subr.mxu0 %v1407_v24  ;;  %v705_v32 = vld [vmem:[#allocation5 + $0x1458] sm:$0xff]  ;;  %v192_v24 = vld [vmem:[#allocation5 + $0x450] sm:$0xff] }
 0x2af   :  { %3633 = vmatprep.subr.mxu1 %v1919_v33  ;;  %3563 = vmatpush2.msra.mxu0 %v1406_v34  ;;  %v704_v33 = vld [vmem:[#allocation5 + $0x1450] sm:$0xff]  ;;  %v177_v34 = vld [vmem:[#allocation5 + $0x3d8] sm:$0xff] }
 0x2b0   :  { %3634 = vmatpush2.msra.mxu1 %v1918_v36  ;;  %3564 = vmatprep.subr.mxu0 %v1391_v37  ;;  %v689_v36 = vld [vmem:[#allocation5 + $0x13d8] sm:$0xff]  ;;  %v176_v37 = vld [vmem:[#allocation5 + $0x3d0] sm:$0xff] }
 0x2b1   :  { %3635 = vmatprep.subr.mxu1 %v1903_v38  ;;  %3565 = vmatpush2.msra.mxu0 %v1390_v40  ;;  %v688_v38 = vld [vmem:[#allocation5 + $0x13d0] sm:$0xff]  ;;  %v161_v40 = vld [vmem:[#allocation5 + $0x358] sm:$0xff] }
 0x2b2   :  { %3636 = vmatpush2.msra.mxu1 %v1902_v42  ;;  %3566 = vmatprep.subr.mxu0 %v1375_v43  ;;  %v673_v42 = vld [vmem:[#allocation5 + $0x1358] sm:$0xff]  ;;  %v160_v43 = vld [vmem:[#allocation5 + $0x350] sm:$0xff] }
 0x2b3   :  { %3637 = vmatprep.subr.mxu1 %v1887_v45  ;;  %3567 = vmatpush2.msra.mxu0 %v1374_v46  ;;  %v672_v45 = vld [vmem:[#allocation5 + $0x1350] sm:$0xff]  ;;  %v145_v46 = vld [vmem:[#allocation5 + $0x2d8] sm:$0xff] }
 0x2b4   :  { %3638 = vmatpush2.msra.mxu1 %v1886_v48  ;;  %3568 = vmatprep.subr.mxu0 %v1359_v49  ;;  %v657_v48 = vld [vmem:[#allocation5 + $0x12d8] sm:$0xff]  ;;  %v144_v49 = vld [vmem:[#allocation5 + $0x2d0] sm:$0xff] }
 0x2b5   :  { %3639 = vmatprep.subr.mxu1 %v1871_v50  ;;  %3569 = vmatpush2.msra.mxu0 %v1358_v35  ;;  %v656_v50 = vld [vmem:[#allocation5 + $0x12d0] sm:$0xff]  ;;  %v129_v35 = vld [vmem:[#allocation5 + $0x258] sm:$0xff] }
 0x2b6   :  { %3640 = vmatpush2.msra.mxu1 %v1870_v51  ;;  %3570 = vmatprep.subr.mxu0 %v1343_v53  ;;  %v641_v51 = vld [vmem:[#allocation5 + $0x1258] sm:$0xff]  ;;  %v128_v53 = vld [vmem:[#allocation5 + $0x250] sm:$0xff] }
 0x2b7   :  { %3641 = vmatprep.subr.mxu1 %v1855_v54  ;;  %3571 = vmatpush2.msra.mxu0 %v1342_v56  ;;  %v640_v54 = vld [vmem:[#allocation5 + $0x1250] sm:$0xff]  ;;  %v113_v56 = vld [vmem:[#allocation5 + $0x1d8] sm:$0xff] }
 0x2b8   :  { %3572 = vmatprep.mubr.f32.mxu0 %v4773_v26  ;;  %3642 = vmatpush2.msra.mxu1 %v1854_v57  ;;  %v625_v57 = vld [vmem:[#allocation5 + $0x11d8] sm:$0xff] }
 0x2b9   :  { %3573 = vmatmul.mubr.f32.vlgmr.msra.gmra.mxu0 %v4766_v16  ;;  %3643 = vmatprep.mubr.f32.mxu1 %v4777_v29 }
 0x2ba   :  { %3650 = vmatprep.subr.mxu0 %v305_v59  ;;  %3721 = vmatprep.subr.mxu1 %v817_v60  ;;  %v112_v59 = vld [vmem:[#allocation5 + $0x1d0] sm:$0xff] }
 0x2bb   :  { %3644 = vmatmul.mubr.f32.vlgmr.msra.gmra.mxu1 %v4769_v21  ;;  %3651 = vmatpush1.msra.mxu0 %v304_v44  ;;  %v624_v60 = vld [vmem:[#allocation5 + $0x11d0] sm:$0xff]  ;;  %v97_v44 = vld [vmem:[#allocation5 + $0x158] sm:$0xff] }
 0x2bc   :  { %3722 = vmatpush1.msra.mxu1 %v816_v61  ;;  %3652 = vmatprep.subr.mxu0 %v289_v63  ;;  %v609_v61 = vld [vmem:[#allocation5 + $0x1158] sm:$0xff]  ;;  %v96_v63 = vld [vmem:[#allocation5 + $0x150] sm:$0xff] }
 0x2bd   :  { %3723 = vmatprep.subr.mxu1 %v801_v1  ;;  %3653 = vmatpush1.msra.mxu0 %v288_v2  ;;  %v608_v1 = vld [vmem:[#allocation5 + $0x1150] sm:$0xff]  ;;  %v81_v2 = vld [vmem:[#allocation5 + $0xd8] sm:$0xff] }
 0x2be   :  { %3724 = vmatpush1.msra.mxu1 %v800_v4  ;;  %3654 = vmatprep.subr.mxu0 %v273_v5  ;;  %v593_v4 = vld [vmem:[#allocation5 + $0x10d8] sm:$0xff]  ;;  %v80_v5 = vld [vmem:[#allocation5 + $0xd0] sm:$0xff] }
 0x2bf   :  { %3725 = vmatprep.subr.mxu1 %v785_v6  ;;  %3655 = vmatpush1.msra.mxu0 %v272_v7  ;;  %v592_v6 = vld [vmem:[#allocation5 + $0x10d0] sm:$0xff]  ;;  %v65_v7 = vld [vmem:[#allocation5 + $0x58] sm:$0xff] }
 0x2c0   :  { %3726 = vmatpush1.msra.mxu1 %v784_v9  ;;  %3656 = vmatprep.subr.mxu0 %v257_v10  ;;  %v577_v9 = vld [vmem:[#allocation5 + $0x1058] sm:$0xff]  ;;  %v64_v10 = vld [vmem:[#allocation5 + $0x50] sm:$0xff] }
 0x2c1   :  { %3727 = vmatprep.subr.mxu1 %v769_v12  ;;  %3657 = vmatpush1.msra.mxu0 %v256_v13  ;;  %v576_v12 = vld [vmem:[#allocation5 + $0x1050] sm:$0xff]  ;;  %v561_v13 = vld [vmem:[#allocation5 + $0xfd8] sm:$0xff] }
 0x2c2   :  { %3728 = vmatpush1.msra.mxu1 %v768_v58  ;;  %3658 = vmatprep.subr.mxu0 %v241_v14  ;;  %v1073_v58 = vld [vmem:[#allocation5 + $0x1fd8] sm:$0xff]  ;;  %v560_v14 = vld [vmem:[#allocation5 + $0xfd0] sm:$0xff] }
 0x2c3   :  { %3729 = vmatprep.subr.mxu1 %v753_v15  ;;  %3659 = vmatpush1.msra.mxu0 %v240_v17  ;;  %v1072_v15 = vld [vmem:[#allocation5 + $0x1fd0] sm:$0xff]  ;;  %v545_v17 = vld [vmem:[#allocation5 + $0xf58] sm:$0xff] }
 0x2c4   :  { %3730 = vmatpush1.msra.mxu1 %v752_v18  ;;  %3660 = vmatprep.subr.mxu0 %v225_v19  ;;  %v1057_v18 = vld [vmem:[#allocation5 + $0x1f58] sm:$0xff]  ;;  %v544_v19 = vld [vmem:[#allocation5 + $0xf50] sm:$0xff] }
 0x2c5   :  { %3731 = vmatprep.subr.mxu1 %v737_v20  ;;  %3661 = vmatpush1.msra.mxu0 %v224_v22  ;;  %v1056_v20 = vld [vmem:[#allocation5 + $0x1f50] sm:$0xff]  ;;  %v529_v22 = vld [vmem:[#allocation5 + $0xed8] sm:$0xff] }
 0x2c6   :  { %3732 = vmatpush1.msra.mxu1 %v736_v23  ;;  %3662 = vmatprep.subr.mxu0 %v209_v25  ;;  %v1041_v23 = vld [vmem:[#allocation5 + $0x1ed8] sm:$0xff]  ;;  %v528_v25 = vld [vmem:[#allocation5 + $0xed0] sm:$0xff] }
 0x2c7   :  { %3733 = vmatprep.subr.mxu1 %v721_v27  ;;  %3663 = vmatpush1.msra.mxu0 %v208_v28  ;;  %v1040_v27 = vld [vmem:[#allocation5 + $0x1ed0] sm:$0xff]  ;;  %v513_v28 = vld [vmem:[#allocation5 + $0xe58] sm:$0xff] }
 0x2c8   :  { %3734 = vmatpush1.msra.mxu1 %v720_v30  ;;  %3664 = vmatprep.subr.mxu0 %v193_v31  ;;  %v1025_v30 = vld [vmem:[#allocation5 + $0x1e58] sm:$0xff]  ;;  %v4841_v31 = vpop.f32.mrf.mxu0 }
 0x2c9   :  { %3735 = vmatprep.subr.mxu1 %v705_v32  ;;  %3665 = vmatpush1.msra.mxu0 %v192_v24  ;;  %v512_v32 = vld [vmem:[#allocation5 + $0xe50] sm:$0xff] }
 0x2ca   :  { %3736 = vmatpush1.msra.mxu1 %v704_v33  ;;  %3666 = vmatprep.subr.mxu0 %v177_v34  ;;  %v1024_v24 = vld [vmem:[#allocation5 + $0x1e50] sm:$0xff]  ;;  %v497_v33 = vld [vmem:[#allocation5 + $0xdd8] sm:$0xff] }
 0x2cb   :  { %3737 = vmatprep.subr.mxu1 %v689_v36  ;;  %3667 = vmatpush1.msra.mxu0 %v176_v37  ;;  %v1009_v34 = vld [vmem:[#allocation5 + $0x1dd8] sm:$0xff]  ;;  %v496_v36 = vld [vmem:[#allocation5 + $0xdd0] sm:$0xff] }
 0x2cc   :  { %3738 = vmatpush1.msra.mxu1 %v688_v38  ;;  %3668 = vmatprep.subr.mxu0 %v161_v40  ;;  %v1008_v37 = vld [vmem:[#allocation5 + $0x1dd0] sm:$0xff]  ;;  %v481_v38 = vld [vmem:[#allocation5 + $0xd58] sm:$0xff] }
 0x2cd   :  { %3739 = vmatprep.subr.mxu1 %v673_v42  ;;  %3669 = vmatpush1.msra.mxu0 %v160_v43  ;;  %v993_v40 = vld [vmem:[#allocation5 + $0x1d58] sm:$0xff]  ;;  %v4843_v42 = vpop.f32.mrf.mxu1  ;;  %v2866_v43 = vpop.f32.mrf.mxu0 }
 0x2ce   :  { %3740 = vmatpush1.msra.mxu1 %v672_v45  ;;  %3670 = vmatprep.subr.mxu0 %v145_v46  ;;  %v480_v45 = vld [vmem:[#allocation5 + $0xd50] sm:$0xff] }
 0x2cf   :  { %3741 = vmatprep.subr.mxu1 %v657_v48  ;;  %3671 = vmatpush1.msra.mxu0 %v144_v49  ;;  %v992_v46 = vld [vmem:[#allocation5 + $0x1d50] sm:$0xff]  ;;  %v2128_v48 = vsub.s32 5, %v4742_v41  ;;  %v465_v49 = vld [vmem:[#allocation5 + $0xcd8] sm:$0xff] }
 0x2d0   :  { %3742 = vmatpush1.msra.mxu1 %v656_v50  ;;  %3672 = vmatprep.subr.mxu0 %v129_v35  ;;  %v977_v50 = vld [vmem:[#allocation5 + $0x1cd8] sm:$0xff]  ;;  %v4846_v35 = vpop.f32.mrf.mxu0 }
 0x2d1   :  { %3743 = vmatprep.subr.mxu1 %v641_v51  ;;  %3673 = vmatpush1.msra.mxu0 %v128_v53  ;;  %v464_v51 = vld [vmem:[#allocation5 + $0xcd0] sm:$0xff] }
 0x2d2   :  { %3744 = vmatpush1.msra.mxu1 %v640_v54  ;;  %3674 = vmatprep.subr.mxu0 %v113_v56  ;;  %v976_v53 = vld [vmem:[#allocation5 + $0x1cd0] sm:$0xff]  ;;  %v2124_v54 = vsub.s32 4, %v4742_v41  ;;  %v449_v56 = vld [vmem:[#allocation5 + $0xc58] sm:$0xff] }
 0x2d3   :  { %3745 = vmatprep.subr.mxu1 %v625_v57  ;;  %3675 = vmatpush1.msra.mxu0 %v112_v59  ;;  %v961_v57 = vld [vmem:[#allocation5 + $0x1c58] sm:$0xff]  ;;  %v2937_v59 = vpop.f32.mrf.mxu1 }
 0x2d4   :  { %3746 = vmatpush1.msra.mxu1 %v624_v60  ;;  %3676 = vmatprep.subr.mxu0 %v97_v44  ;;  %v448_v60 = vld [vmem:[#allocation5 + $0xc50] sm:$0xff] }
 0x2d5   :  { %3747 = vmatprep.subr.mxu1 %v609_v61  ;;  %3677 = vmatpush1.msra.mxu0 %v96_v63  ;;  %v960_v44 = vld [vmem:[#allocation5 + $0x1c50] sm:$0xff]  ;;  %v4619_v61 = vld [vmem:[#allocation7] sm:$0xff] }
 0x2d6   :  { %3748 = vmatpush1.msra.mxu1 %v608_v1  ;;  %3678 = vmatprep.subr.mxu0 %v81_v2  ;;  %v2129_v63 = vrot.slane %v4619_v61, %v2128_v48  ;;  %v2132_v1 = vsub.s32 6, %v4742_v41  ;;  %v433_v2 = vld [vmem:[#allocation5 + $0xbd8] sm:$0xff] }
 0x2d7   :  { %3749 = vmatprep.subr.mxu1 %v593_v4  ;;  %3679 = vmatpush1.msra.mxu0 %v80_v5  ;;  %v945_v4 = vld [vmem:[#allocation5 + $0x1bd8] sm:$0xff]  ;;  %v4852_v5 = vpop.f32.mrf.mxu1 }
 0x2d8   :  { %3750 = vmatpush1.msra.mxu1 %v592_v6  ;;  %3680 = vmatprep.subr.mxu0 %v65_v7  ;;  %v3008_v6 = vpop.f32.mrf.mxu0  ;;  %v432_v7 = vld [vmem:[#allocation5 + $0xbd0] sm:$0xff] }
 0x2d9   :  { %3751 = vmatprep.subr.mxu1 %v577_v9  ;;  %3681 = vmatpush1.msra.mxu0 %v64_v10  ;;  %v944_v9 = vld [vmem:[#allocation5 + $0x1bd0] sm:$0xff]  ;;  %v2125_v10 = vrot.slane %v4619_v61, %v2124_v54 }
 0x2da   :  { %3752 = vmatpush1.msra.mxu1 %v576_v12  ;;  %3682 = vmatprep.subr.mxu0 %v561_v13  ;;  %v2136_v12 = vsub.s32 7, %v4742_v41  ;;  %v417_v13 = vld [vmem:[#allocation5 + $0xb58] sm:$0xff] }
 0x2db   :  { %3753 = vmatprep.subr.mxu1 %v1073_v58  ;;  %3683 = vmatpush2.msra.mxu0 %v560_v14  ;;  %v929_v58 = vld [vmem:[#allocation5 + $0x1b58] sm:$0xff]  ;;  %v3148_v14 = vpop.f32.mrf.mxu0 }
 0x2dc   :  { %3754 = vmatpush2.msra.mxu1 %v1072_v15  ;;  %3684 = vmatprep.subr.mxu0 %v545_v17  ;;  %v416_v15 = vld [vmem:[#allocation5 + $0xb50] sm:$0xff] }
 0x2dd   :  { %3755 = vmatprep.subr.mxu1 %v1057_v18  ;;  %3685 = vmatpush2.msra.mxu0 %v544_v19  ;;  %v928_v17 = vld [vmem:[#allocation5 + $0x1b50] sm:$0xff]  ;;  %v2867_v18 = vadd.f32 %v2866_v43, %v2129_v63  ;;  %v2133_v19 = vrot.slane %v4619_v61, %v2132_v1  ;;  %v369_v43 = vld [vmem:[#allocation5 + $0x9d8] sm:$0xff] }
 0x2de   :  { %3756 = vmatpush2.msra.mxu1 %v1056_v20  ;;  %3686 = vmatprep.subr.mxu0 %v529_v22  ;;  %v401_v20 = vld [vmem:[#allocation5 + $0xad8] sm:$0xff] }
 0x2df   :  { %3757 = vmatprep.subr.mxu1 %v1041_v23  ;;  %3687 = vmatpush2.msra.mxu0 %v528_v25  ;;  %v913_v22 = vld [vmem:[#allocation5 + $0x1ad8] sm:$0xff]  ;;  %v3079_v23 = vpop.f32.mrf.mxu1  ;;  %v400_v25 = vld [vmem:[#allocation5 + $0xad0] sm:$0xff] }
 0x2e0   :  { %3758 = vmatpush2.msra.mxu1 %v1040_v27  ;;  %3688 = vmatprep.subr.mxu0 %v513_v28  ;;  %v912_v27 = vld [vmem:[#allocation5 + $0x1ad0] sm:$0xff]  ;;  %v2865_v28 = vadd.f32 %v4841_v31, %v2125_v10  ;;  %v337_v63 = vld [vmem:[#allocation5 + $0x8d8] sm:$0xff] }
 0x2e1   :  { %3759 = vmatprep.subr.mxu1 %v1025_v30  ;;  %3689 = vmatpush2.msra.mxu0 %v512_v32  ;;  %v2137_v30 = vrot.slane %v4619_v61, %v2136_v12  ;;  %v385_v32 = vld [vmem:[#allocation5 + $0xa58] sm:$0xff]  ;;  %v368_v31 = vld [vmem:[#allocation5 + $0x9d0] sm:$0xff] }
 0x2e2   :  { %3760 = vmatpush2.msra.mxu1 %v1024_v24  ;;  %3690 = vmatprep.subr.mxu0 %v497_v33  ;;  %v897_v24 = vld [vmem:[#allocation5 + $0x1a58] sm:$0xff]  ;;  %v3219_v33 = vpop.f32.mrf.mxu1 }
 0x2e3   :  { %3761 = vmatprep.subr.mxu1 %v1009_v34  ;;  %3691 = vmatpush2.msra.mxu0 %v496_v36  ;;  %v3150_v34 = vpop.f32.mrf.mxu0  ;;  %v384_v36 = vld [vmem:[#allocation5 + $0xa50] sm:$0xff]  ;;  %v321_v10 = vld [vmem:[#allocation5 + $0x858] sm:$0xff] }
 0x2e4   :  { %3762 = vmatpush2.msra.mxu1 %v1008_v37  ;;  %3692 = vmatprep.subr.mxu0 %v481_v38  ;;  %v896_v37 = vld [vmem:[#allocation5 + $0x1a50] sm:$0xff]  ;;  %v2938_v38 = vadd.f32 %v2937_v59, %v2867_v18 }
 0x2e5   :  { %3763 = vmatprep.subr.mxu1 %v993_v40  ;;  %3693 = vmatpush2.msra.mxu0 %v480_v45  ;;  %v3149_v40 = vadd.f32 %v3148_v14, %v2133_v19  ;;  %v881_v45 = vld [vmem:[#allocation5 + $0x19d8] sm:$0xff]  ;;  %v352_v59 = vld [vmem:[#allocation5 + $0x950] sm:$0xff] }
 0x2e6   :  { %3764 = vmatpush2.msra.mxu1 %v992_v46  ;;  %3694 = vmatprep.subr.mxu0 %v465_v49  ;;  %v880_v46 = vld [vmem:[#allocation5 + $0x19d0] sm:$0xff]  ;;  %v2936_v49 = vadd.f32 %v4843_v42, %v2865_v28 }
 0x2e7   :  { %3765 = vmatprep.subr.mxu1 %v977_v50  ;;  %3695 = vmatpush2.msra.mxu0 %v464_v51  ;;  %v3009_v50 = vadd.f32 %v3008_v6, %v2938_v38  ;;  %v3151_v51 = vadd.f32 %v3150_v34, %v2137_v30  ;;  %v3220_v61 = vadd.f32 %v3219_v33, %v3149_v40  ;;  %v336_v42 = vld [vmem:[#allocation5 + $0x8d0] sm:$0xff]  ;;  %v1297_v40 = vld [vmem:[#allocation5 + $0x26d8] sm:$0xff] }
 0x2e8   :  { %3766 = vmatpush2.msra.mxu1 %v976_v53  ;;  %3696 = vmatprep.subr.mxu0 %v449_v56  ;;  %v353_v53 = vld [vmem:[#allocation5 + $0x958] sm:$0xff]  ;;  %v832_v18 = vld [vmem:[#allocation5 + $0x1850] sm:$0xff] }
 0x2e9   :  { %3767 = vmatprep.subr.mxu1 %v961_v57  ;;  %3697 = vmatpush2.msra.mxu0 %v448_v60  ;;  %v865_v56 = vld [vmem:[#allocation5 + $0x1958] sm:$0xff]  ;;  %v3221_v57 = vpop.f32.mrf.mxu1  ;;  %v864_v60 = vld [vmem:[#allocation5 + $0x1950] sm:$0xff] }
 0x2ea   :  { %3768 = vmatpush2.msra.mxu1 %v960_v44  ;;  %3698 = vmatprep.subr.mxu0 %v433_v2  ;;  %v3007_v44 = vadd.f32 %v4846_v35, %v2936_v49  ;;  %v849_v2 = vld [vmem:[#allocation5 + $0x18d8] sm:$0xff]  ;;  %v320_v35 = vld [vmem:[#allocation5 + $0x850] sm:$0xff] }
 0x2eb   :  { %3769 = vmatprep.subr.mxu1 %v945_v4  ;;  %3699 = vmatpush2.msra.mxu0 %v432_v7  ;;  %v848_v4 = vld [vmem:[#allocation5 + $0x18d0] sm:$0xff]  ;;  %v3080_v7 = vadd.f32 %v3079_v23, %v3009_v50  ;;  %v1281_v49 = vld [vmem:[#allocation5 + $0x2658] sm:$0xff] }
 0x2ec   :  { %3770 = vmatpush2.msra.mxu1 %v944_v9  ;;  %3700 = vmatprep.subr.mxu0 %v417_v13  ;;  %v3222_v9 = vadd.f32 %v3221_v57, %v3151_v51  ;;  %v833_v13 = vld [vmem:[#allocation5 + $0x1858] sm:$0xff]  ;;  %v1328_v30 = vld [vmem:[#allocation5 + $0x27d0] sm:$0xff] }
 0x2ed   :  { %3771 = vmatprep.subr.mxu1 %v929_v58  ;;  %3701 = vmatpush2.msra.mxu0 %v416_v15  ;;  %v1312_v34 = vld [vmem:[#allocation5 + $0x2750] sm:$0xff]  ;;  %v1793_v50 = vld [vmem:[#allocation5 + $0x3658] sm:$0xff] }
 0x2ee   :  { %3772 = vmatpush2.msra.mxu1 %v928_v17  ;;  %3702 = vmatprep.subr.mxu0 %v401_v20  ;;  %v3078_v17 = vadd.f32 %v4852_v5, %v3007_v44  ;;  %v1329_v20 = vld [vmem:[#allocation5 + $0x27d8] sm:$0xff]  ;;  %v1840_v5 = vld [vmem:[#allocation5 + $0x37d0] sm:$0xff] }
 0x2ef   :  { %3773 = vmatprep.subr.mxu1 %v913_v22  ;;  %3703 = vmatpush2.msra.mxu0 %v400_v25  ;;  %v1841_v25 = vld [vmem:[#allocation5 + $0x37d8] sm:$0xff]  ;;  %v1280_v51 = vld [vmem:[#allocation5 + $0x2650] sm:$0xff] }
 0x2f0   :  { %3774 = vmatpush2.msra.mxu1 %v912_v27  ;;  %3704 = vmatprep.subr.mxu0 %v385_v32  ;;  %v4535_v23 = vcombine.low %v3078_v17, %v3080_v7  ;;  %v1313_v32 = vld [vmem:[#allocation5 + $0x2758] sm:$0xff]  ;;  %v1744_v7 = vld [vmem:[#allocation5 + $0x34d0] sm:$0xff] }
 0x2f1   :  { %3775 = vmatprep.subr.mxu1 %v897_v24  ;;  %3705 = vmatpush2.msra.mxu0 %v384_v36  ;;  %v1825_v24 = vld [vmem:[#allocation5 + $0x3758] sm:$0xff]  ;;  %v1824_v36 = vld [vmem:[#allocation5 + $0x3750] sm:$0xff] }
 0x2f2   :  { %3776 = vmatpush2.msra.mxu1 %v896_v37  ;;  %3706 = vmatprep.subr.mxu0 %v369_v43  ;;  %v4543_v37 = vrot.slane %v4535_v23, %v4745_v52  ;;  %v1809_v43 = vld [vmem:[#allocation5 + $0x36d8] sm:$0xff]  ;;  %v1712_v17 = vld [vmem:[#allocation5 + $0x33d0] sm:$0xff] }
 0x2f3   :  { %3777 = vmatprep.subr.mxu1 %v881_v45  ;;  %3707 = vmatpush2.msra.mxu0 %v368_v31  ;;  %v1296_v45 = vld [vmem:[#allocation5 + $0x26d0] sm:$0xff]  ;;  %v1777_v57 = vld [vmem:[#allocation5 + $0x35d8] sm:$0xff] }
 0x2f4   :  { %3778 = vmatpush2.msra.mxu1 %v880_v46  ;;  %3708 = vmatprep.subr.mxu0 %v353_v53  ;;  %v1808_v31 = vld [vmem:[#allocation5 + $0x36d0] sm:$0xff]  ;;  %v1249_v44 = vld [vmem:[#allocation5 + $0x2558] sm:$0xff] }
 0x2f5   :  { %3779 = vmatprep.subr.mxu1 %v865_v56  ;;  %v3290_v6 = vpop.f32.mrf.mxu0  ;;  %3709 = vmatpush2.msra.mxu0 %v352_v59  ;;  %v1792_v53 = vld [vmem:[#allocation5 + $0x3650] sm:$0xff]  ;;  %v1265_v56 = vld [vmem:[#allocation5 + $0x25d8] sm:$0xff] }
 0x2f6   :  { %3780 = vmatpush2.msra.mxu1 %v864_v60  ;;  %v3291_v58 = vadd.f32 %v3290_v6, %v3220_v61  ;;  %3710 = vmatprep.subr.mxu0 %v337_v63  ;;  %v1264_v59 = vld [vmem:[#allocation5 + $0x25d0] sm:$0xff]  ;;  %v1761_v61 = vld [vmem:[#allocation5 + $0x3558] sm:$0xff] }
 0x2f7   :  { %3781 = vmatprep.subr.mxu1 %v849_v2  ;;  %v3361_v14 = vpop.f32.mrf.mxu1  ;;  %v3292_v15 = vpop.f32.mrf.mxu0  ;;  %3711 = vmatpush2.msra.mxu0 %v336_v42  ;;  %v1776_v60 = vld [vmem:[#allocation5 + $0x35d0] sm:$0xff]  ;;  %v1233_v42 = vld [vmem:[#allocation5 + $0x24d8] sm:$0xff] }
 0x2f8   :  { %3782 = vmatpush2.msra.mxu1 %v848_v4  ;;  %v3293_v19 = vadd.f32 %v3292_v15, %v3222_v9  ;;  %3712 = vmatprep.subr.mxu0 %v321_v10  ;;  %v3362_v27 = vadd.f32 %v3361_v14, %v3291_v58  ;;  %v1248_v63 = vld [vmem:[#allocation5 + $0x2550] sm:$0xff]  ;;  %v1745_v4 = vld [vmem:[#allocation5 + $0x34d8] sm:$0xff] }
 0x2f9   :  { %3783 = vmatprep.subr.mxu1 %v833_v13  ;;  %v3363_v22 = vpop.f32.mrf.mxu1  ;;  %3713 = vmatpush2.msra.mxu0 %v320_v35  ;;  %v1760_v2 = vld [vmem:[#allocation5 + $0x3550] sm:$0xff]  ;;  %v1217_v9 = vld [vmem:[#allocation5 + $0x2458] sm:$0xff] }
 0x2fa   :  { %3714 = vmatprep.mubr.f32.mxu0 %v4755_v8  ;;  %v3364_v28 = vadd.f32 %v3363_v22, %v3293_v19  ;;  %3784 = vmatpush2.msra.mxu1 %v832_v18  ;;  %v1232_v6 = vld [vmem:[#allocation5 + $0x24d0] sm:$0xff]  ;;  %v1729_v10 = vld [vmem:[#allocation5 + $0x3458] sm:$0xff] }
 0x2fb   :  { %3715 = vmatmul.mubr.f32.vlgmr.msra.gmra.mxu0 %v4748_v62  ;;  %3785 = vmatprep.mubr.f32.mxu1 %v4759_v11  ;;  %v1216_v13 = vld [vmem:[#allocation5 + $0x2450] sm:$0xff]  ;;  %v1201_v35 = vld [vmem:[#allocation5 + $0x23d8] sm:$0xff] }
 0x2fc   :  { %3792 = vmatprep.subr.mxu0 %v1329_v20  ;;  %v4536_v33 = vcombine.low %v3362_v27, %v3364_v28  ;;  %3863 = vmatprep.subr.mxu1 %v1841_v25  ;;  %v1728_v58 = vld [vmem:[#allocation5 + $0x3450] sm:$0xff]  ;;  %v1713_v14 = vld [vmem:[#allocation5 + $0x33d8] sm:$0xff] }
 0x2fd   :  { %3786 = vmatmul.mubr.f32.vlgmr.msra.gmra.mxu1 %v4751_v3  ;;  %3793 = vmatpush1.msra.mxu0 %v1328_v30  ;;  %v1200_v15 = vld [vmem:[#allocation5 + $0x23d0] sm:$0xff]  ;;  %v1185_v18 = vld [vmem:[#allocation5 + $0x2358] sm:$0xff] }
 0x2fe   :  { %3864 = vmatpush1.msra.mxu1 %v1840_v5  ;;  %v4550_v38 = vrot.slane %v4536_v33, %v4745_v52  ;;  %3794 = vmatprep.subr.mxu0 %v1313_v32  ;;  %v1697_v19 = vld [vmem:[#allocation5 + $0x3358] sm:$0xff]  ;;  %v1184_v20 = vld [vmem:[#allocation5 + $0x2350] sm:$0xff] }
 0x2ff   :  { %3865 = vmatprep.subr.mxu1 %v1825_v24  ;;  %3795 = vmatpush1.msra.mxu0 %v1312_v34  ;;  %v1696_v22 = vld [vmem:[#allocation5 + $0x3350] sm:$0xff]  ;;  %v1169_v23 = vld [vmem:[#allocation5 + $0x22d8] sm:$0xff] }
 0x300   :  { %v4551_v46 = vcombine.low %v4543_v37, %v4550_v38  ;;  %3866 = vmatpush1.msra.mxu1 %v1824_v36  ;;  %3796 = vmatprep.subr.mxu0 %v1297_v40  ;;  %v1681_v25 = vld [vmem:[#allocation5 + $0x32d8] sm:$0xff]  ;;  %v1168_v27 = vld [vmem:[#allocation5 + $0x22d0] sm:$0xff] }
 0x301   :  { %3867 = vmatprep.subr.mxu1 %v1809_v43  ;;  %3797 = vmatpush1.msra.mxu0 %v1296_v45  ;;  %v1680_v28 = vld [vmem:[#allocation5 + $0x32d0] sm:$0xff]  ;;  %v1153_v30 = vld [vmem:[#allocation5 + $0x2258] sm:$0xff] }
 0x302   :  { %4591 = vst [vmem:[#allocation8 + $0x8] sm:$0xff] %v4551_v46  ;;  %3868 = vmatpush1.msra.mxu1 %v1808_v31  ;;  %3798 = vmatprep.subr.mxu0 %v1281_v49  ;;  %v1665_v5 = vld [vmem:[#allocation5 + $0x3258] sm:$0xff]  ;;  %v1152_v32 = vld [vmem:[#allocation5 + $0x2250] sm:$0xff] }
 0x303   :  { %3869 = vmatprep.subr.mxu1 %v1793_v50  ;;  %3799 = vmatpush1.msra.mxu0 %v1280_v51  ;;  %v1664_v24 = vld [vmem:[#allocation5 + $0x3250] sm:$0xff]  ;;  %v1137_v33 = vld [vmem:[#allocation5 + $0x21d8] sm:$0xff] }
 0x304   :  { %3870 = vmatpush1.msra.mxu1 %v1792_v53  ;;  %3800 = vmatprep.subr.mxu0 %v1265_v56  ;;  %v1649_v34 = vld [vmem:[#allocation5 + $0x31d8] sm:$0xff]  ;;  %v1136_v36 = vld [vmem:[#allocation5 + $0x21d0] sm:$0xff] }
 0x305   :  { %3871 = vmatprep.subr.mxu1 %v1777_v57  ;;  %3801 = vmatpush1.msra.mxu0 %v1264_v59  ;;  %v1648_v37 = vld [vmem:[#allocation5 + $0x31d0] sm:$0xff]  ;;  %v1121_v38 = vld [vmem:[#allocation5 + $0x2158] sm:$0xff] }
 0x306   :  { %3872 = vmatpush1.msra.mxu1 %v1776_v60  ;;  %3802 = vmatprep.subr.mxu0 %v1249_v44  ;;  %v1633_v40 = vld [vmem:[#allocation5 + $0x3158] sm:$0xff]  ;;  %v1120_v43 = vld [vmem:[#allocation5 + $0x2150] sm:$0xff] }
 0x307   :  { %3873 = vmatprep.subr.mxu1 %v1761_v61  ;;  %3803 = vmatpush1.msra.mxu0 %v1248_v63  ;;  %v1632_v45 = vld [vmem:[#allocation5 + $0x3150] sm:$0xff]  ;;  %v1105_v31 = vld [vmem:[#allocation5 + $0x20d8] sm:$0xff] }
 0x308   :  { %3874 = vmatpush1.msra.mxu1 %v1760_v2  ;;  %3804 = vmatprep.subr.mxu0 %v1233_v42  ;;  %v1617_v46 = vld [vmem:[#allocation5 + $0x30d8] sm:$0xff]  ;;  %v1104_v49 = vld [vmem:[#allocation5 + $0x20d0] sm:$0xff] }
 0x309   :  { %3875 = vmatprep.subr.mxu1 %v1745_v4  ;;  %3805 = vmatpush1.msra.mxu0 %v1232_v6  ;;  %v1616_v50 = vld [vmem:[#allocation5 + $0x30d0] sm:$0xff]  ;;  %v1089_v51 = vld [vmem:[#allocation5 + $0x2058] sm:$0xff] }
 0x30a   :  { %3876 = vmatpush1.msra.mxu1 %v1744_v7  ;;  %3806 = vmatprep.subr.mxu0 %v1217_v9  ;;  %v1601_v53 = vld [vmem:[#allocation5 + $0x3058] sm:$0xff]  ;;  %v1088_v56 = vld [vmem:[#allocation5 + $0x2050] sm:$0xff] }
 0x30b   :  { %3877 = vmatprep.subr.mxu1 %v1729_v10  ;;  %3807 = vmatpush1.msra.mxu0 %v1216_v13  ;;  %v1600_v57 = vld [vmem:[#allocation5 + $0x3050] sm:$0xff]  ;;  %v1585_v59 = vld [vmem:[#allocation5 + $0x2fd8] sm:$0xff] }
 0x30c   :  { %3878 = vmatpush1.msra.mxu1 %v1728_v58  ;;  %3808 = vmatprep.subr.mxu0 %v1201_v35  ;;  %v2097_v60 = vld [vmem:[#allocation5 + $0x3fd8] sm:$0xff]  ;;  %v1584_v44 = vld [vmem:[#allocation5 + $0x2fd0] sm:$0xff] }
 0x30d   :  { %3879 = vmatprep.subr.mxu1 %v1713_v14  ;;  %3809 = vmatpush1.msra.mxu0 %v1200_v15  ;;  %v2096_v61 = vld [vmem:[#allocation5 + $0x3fd0] sm:$0xff]  ;;  %v1569_v63 = vld [vmem:[#allocation5 + $0x2f58] sm:$0xff] }
 0x30e   :  { %3880 = vmatpush1.msra.mxu1 %v1712_v17  ;;  %3810 = vmatprep.subr.mxu0 %v1185_v18  ;;  %v2081_v2 = vld [vmem:[#allocation5 + $0x3f58] sm:$0xff]  ;;  %v1568_v42 = vld [vmem:[#allocation5 + $0x2f50] sm:$0xff] }
 0x30f   :  { %3881 = vmatprep.subr.mxu1 %v1697_v19  ;;  %3811 = vmatpush1.msra.mxu0 %v1184_v20  ;;  %v2080_v4 = vld [vmem:[#allocation5 + $0x3f50] sm:$0xff]  ;;  %v1553_v6 = vld [vmem:[#allocation5 + $0x2ed8] sm:$0xff] }
 0x310   :  { %3882 = vmatpush1.msra.mxu1 %v1696_v22  ;;  %3812 = vmatprep.subr.mxu0 %v1169_v23  ;;  %v2065_v7 = vld [vmem:[#allocation5 + $0x3ed8] sm:$0xff]  ;;  %v1552_v9 = vld [vmem:[#allocation5 + $0x2ed0] sm:$0xff] }
 0x311   :  { %3883 = vmatprep.subr.mxu1 %v1681_v25  ;;  %3813 = vmatpush1.msra.mxu0 %v1168_v27  ;;  %v2064_v10 = vld [vmem:[#allocation5 + $0x3ed0] sm:$0xff]  ;;  %v1537_v13 = vld [vmem:[#allocation5 + $0x2e58] sm:$0xff] }
 0x312   :  { %3884 = vmatpush1.msra.mxu1 %v1680_v28  ;;  %3814 = vmatprep.subr.mxu0 %v1153_v30  ;;  %v2049_v58 = vld [vmem:[#allocation5 + $0x3e58] sm:$0xff]  ;;  %v1536_v35 = vld [vmem:[#allocation5 + $0x2e50] sm:$0xff] }
 0x313   :  { %3885 = vmatprep.subr.mxu1 %v1665_v5  ;;  %3815 = vmatpush1.msra.mxu0 %v1152_v32  ;;  %v2048_v14 = vld [vmem:[#allocation5 + $0x3e50] sm:$0xff]  ;;  %v1521_v15 = vld [vmem:[#allocation5 + $0x2dd8] sm:$0xff] }
 0x314   :  { %3886 = vmatpush1.msra.mxu1 %v1664_v24  ;;  %3816 = vmatprep.subr.mxu0 %v1137_v33  ;;  %v2033_v17 = vld [vmem:[#allocation5 + $0x3dd8] sm:$0xff]  ;;  %v1520_v18 = vld [vmem:[#allocation5 + $0x2dd0] sm:$0xff] }
 0x315   :  { %3887 = vmatprep.subr.mxu1 %v1649_v34  ;;  %3817 = vmatpush1.msra.mxu0 %v1136_v36  ;;  %v2032_v19 = vld [vmem:[#allocation5 + $0x3dd0] sm:$0xff]  ;;  %v1505_v20 = vld [vmem:[#allocation5 + $0x2d58] sm:$0xff] }
 0x316   :  { %3888 = vmatpush1.msra.mxu1 %v1648_v37  ;;  %3818 = vmatprep.subr.mxu0 %v1121_v38  ;;  %v2017_v22 = vld [vmem:[#allocation5 + $0x3d58] sm:$0xff]  ;;  %v1504_v23 = vld [vmem:[#allocation5 + $0x2d50] sm:$0xff] }
 0x317   :  { %3889 = vmatprep.subr.mxu1 %v1633_v40  ;;  %3819 = vmatpush1.msra.mxu0 %v1120_v43  ;;  %v2016_v25 = vld [vmem:[#allocation5 + $0x3d50] sm:$0xff]  ;;  %v1489_v27 = vld [vmem:[#allocation5 + $0x2cd8] sm:$0xff] }
 0x318   :  { %3890 = vmatpush1.msra.mxu1 %v1632_v45  ;;  %3820 = vmatprep.subr.mxu0 %v1105_v31  ;;  %v2001_v28 = vld [vmem:[#allocation5 + $0x3cd8] sm:$0xff]  ;;  %v1488_v30 = vld [vmem:[#allocation5 + $0x2cd0] sm:$0xff] }
 0x319   :  { %3891 = vmatprep.subr.mxu1 %v1617_v46  ;;  %3821 = vmatpush1.msra.mxu0 %v1104_v49  ;;  %v2000_v5 = vld [vmem:[#allocation5 + $0x3cd0] sm:$0xff]  ;;  %v1473_v32 = vld [vmem:[#allocation5 + $0x2c58] sm:$0xff] }
 0x31a   :  { %3892 = vmatpush1.msra.mxu1 %v1616_v50  ;;  %3822 = vmatprep.subr.mxu0 %v1089_v51  ;;  %v1985_v24 = vld [vmem:[#allocation5 + $0x3c58] sm:$0xff]  ;;  %v1472_v33 = vld [vmem:[#allocation5 + $0x2c50] sm:$0xff] }
 0x31b   :  { %3893 = vmatprep.subr.mxu1 %v1601_v53  ;;  %3823 = vmatpush1.msra.mxu0 %v1088_v56  ;;  %v1984_v34 = vld [vmem:[#allocation5 + $0x3c50] sm:$0xff]  ;;  %v1457_v36 = vld [vmem:[#allocation5 + $0x2bd8] sm:$0xff] }
 0x31c   :  { %3894 = vmatpush1.msra.mxu1 %v1600_v57  ;;  %3824 = vmatprep.subr.mxu0 %v1585_v59  ;;  %v1969_v37 = vld [vmem:[#allocation5 + $0x3bd8] sm:$0xff]  ;;  %v1456_v38 = vld [vmem:[#allocation5 + $0x2bd0] sm:$0xff] }
 0x31d   :  { %3895 = vmatprep.subr.mxu1 %v2097_v60  ;;  %3825 = vmatpush2.msra.mxu0 %v1584_v44  ;;  %v1968_v40 = vld [vmem:[#allocation5 + $0x3bd0] sm:$0xff]  ;;  %v1441_v43 = vld [vmem:[#allocation5 + $0x2b58] sm:$0xff] }
 0x31e   :  { %3896 = vmatpush2.msra.mxu1 %v2096_v61  ;;  %3826 = vmatprep.subr.mxu0 %v1569_v63  ;;  %v1953_v45 = vld [vmem:[#allocation5 + $0x3b58] sm:$0xff]  ;;  %v1440_v31 = vld [vmem:[#allocation5 + $0x2b50] sm:$0xff] }
 0x31f   :  { %3897 = vmatprep.subr.mxu1 %v2081_v2  ;;  %3827 = vmatpush2.msra.mxu0 %v1568_v42  ;;  %v1952_v46 = vld [vmem:[#allocation5 + $0x3b50] sm:$0xff]  ;;  %v1425_v49 = vld [vmem:[#allocation5 + $0x2ad8] sm:$0xff] }
 0x320   :  { %3898 = vmatpush2.msra.mxu1 %v2080_v4  ;;  %3828 = vmatprep.subr.mxu0 %v1553_v6  ;;  %v1937_v50 = vld [vmem:[#allocation5 + $0x3ad8] sm:$0xff]  ;;  %v1424_v51 = vld [vmem:[#allocation5 + $0x2ad0] sm:$0xff] }
 0x321   :  { %3899 = vmatprep.subr.mxu1 %v2065_v7  ;;  %3829 = vmatpush2.msra.mxu0 %v1552_v9  ;;  %v1936_v53 = vld [vmem:[#allocation5 + $0x3ad0] sm:$0xff]  ;;  %v1409_v56 = vld [vmem:[#allocation5 + $0x2a58] sm:$0xff] }
 0x322   :  { %3900 = vmatpush2.msra.mxu1 %v2064_v10  ;;  %3830 = vmatprep.subr.mxu0 %v1537_v13  ;;  %v1921_v57 = vld [vmem:[#allocation5 + $0x3a58] sm:$0xff]  ;;  %v1408_v59 = vld [vmem:[#allocation5 + $0x2a50] sm:$0xff] }
 0x323   :  { %3901 = vmatprep.subr.mxu1 %v2049_v58  ;;  %3831 = vmatpush2.msra.mxu0 %v1536_v35  ;;  %v1920_v60 = vld [vmem:[#allocation5 + $0x3a50] sm:$0xff]  ;;  %v1393_v44 = vld [vmem:[#allocation5 + $0x29d8] sm:$0xff] }
 0x324   :  { %3902 = vmatpush2.msra.mxu1 %v2048_v14  ;;  %3832 = vmatprep.subr.mxu0 %v1521_v15  ;;  %v1905_v61 = vld [vmem:[#allocation5 + $0x39d8] sm:$0xff]  ;;  %v1392_v63 = vld [vmem:[#allocation5 + $0x29d0] sm:$0xff] }
 0x325   :  { %3903 = vmatprep.subr.mxu1 %v2033_v17  ;;  %3833 = vmatpush2.msra.mxu0 %v1520_v18  ;;  %v1904_v2 = vld [vmem:[#allocation5 + $0x39d0] sm:$0xff]  ;;  %v1377_v42 = vld [vmem:[#allocation5 + $0x2958] sm:$0xff]  ;;  %v307_v18 = vld [vmem:[#allocation5 + $0x7e8] sm:$0xff] }
 0x326   :  { %3904 = vmatpush2.msra.mxu1 %v2032_v19  ;;  %3834 = vmatprep.subr.mxu0 %v1505_v20  ;;  %v1889_v4 = vld [vmem:[#allocation5 + $0x3958] sm:$0xff]  ;;  %v1376_v6 = vld [vmem:[#allocation5 + $0x2950] sm:$0xff]  ;;  %v819_v19 = vld [vmem:[#allocation5 + $0x17e8] sm:$0xff] }
 0x327   :  { %3905 = vmatprep.subr.mxu1 %v2017_v22  ;;  %3835 = vmatpush2.msra.mxu0 %v1504_v23  ;;  %v1888_v7 = vld [vmem:[#allocation5 + $0x3950] sm:$0xff]  ;;  %v1361_v9 = vld [vmem:[#allocation5 + $0x28d8] sm:$0xff]  ;;  %v306_v20 = vld [vmem:[#allocation5 + $0x7e0] sm:$0xff] }
 0x328   :  { %3906 = vmatpush2.msra.mxu1 %v2016_v25  ;;  %3836 = vmatprep.subr.mxu0 %v1489_v27  ;;  %v1873_v10 = vld [vmem:[#allocation5 + $0x38d8] sm:$0xff]  ;;  %v1360_v13 = vld [vmem:[#allocation5 + $0x28d0] sm:$0xff]  ;;  %v818_v22 = vld [vmem:[#allocation5 + $0x17e0] sm:$0xff] }
 0x329   :  { %3907 = vmatprep.subr.mxu1 %v2001_v28  ;;  %3837 = vmatpush2.msra.mxu0 %v1488_v30  ;;  %v1872_v58 = vld [vmem:[#allocation5 + $0x38d0] sm:$0xff]  ;;  %v1345_v35 = vld [vmem:[#allocation5 + $0x2858] sm:$0xff]  ;;  %v291_v23 = vld [vmem:[#allocation5 + $0x768] sm:$0xff] }
 0x32a   :  { %3908 = vmatpush2.msra.mxu1 %v2000_v5  ;;  %3838 = vmatprep.subr.mxu0 %v1473_v32  ;;  %v1857_v14 = vld [vmem:[#allocation5 + $0x3858] sm:$0xff]  ;;  %v1344_v15 = vld [vmem:[#allocation5 + $0x2850] sm:$0xff]  ;;  %v803_v25 = vld [vmem:[#allocation5 + $0x1768] sm:$0xff] }
 0x32b   :  { %3909 = vmatprep.subr.mxu1 %v1985_v24  ;;  %3839 = vmatpush2.msra.mxu0 %v1472_v33  ;;  %v1856_v17 = vld [vmem:[#allocation5 + $0x3850] sm:$0xff]  ;;  %v290_v27 = vld [vmem:[#allocation5 + $0x760] sm:$0xff]  ;;  %v275_v30 = vld [vmem:[#allocation5 + $0x6e8] sm:$0xff] }
 0x32c   :  { %3910 = vmatpush2.msra.mxu1 %v1984_v34  ;;  %3840 = vmatprep.subr.mxu0 %v1457_v36  ;;  %v802_v28 = vld [vmem:[#allocation5 + $0x1760] sm:$0xff]  ;;  %v787_v5 = vld [vmem:[#allocation5 + $0x16e8] sm:$0xff] }
 0x32d   :  { %3911 = vmatprep.subr.mxu1 %v1969_v37  ;;  %3841 = vmatpush2.msra.mxu0 %v1456_v38  ;;  %v274_v32 = vld [vmem:[#allocation5 + $0x6e0] sm:$0xff]  ;;  %v259_v33 = vld [vmem:[#allocation5 + $0x668] sm:$0xff] }
 0x32e   :  { %3912 = vmatpush2.msra.mxu1 %v1968_v40  ;;  %3842 = vmatprep.subr.mxu0 %v1441_v43  ;;  %v786_v24 = vld [vmem:[#allocation5 + $0x16e0] sm:$0xff]  ;;  %v771_v34 = vld [vmem:[#allocation5 + $0x1668] sm:$0xff] }
 0x32f   :  { %3913 = vmatprep.subr.mxu1 %v1953_v45  ;;  %3843 = vmatpush2.msra.mxu0 %v1440_v31  ;;  %v258_v36 = vld [vmem:[#allocation5 + $0x660] sm:$0xff]  ;;  %v243_v38 = vld [vmem:[#allocation5 + $0x5e8] sm:$0xff] }
 0x330   :  { %3914 = vmatpush2.msra.mxu1 %v1952_v46  ;;  %3844 = vmatprep.subr.mxu0 %v1425_v49  ;;  %v770_v37 = vld [vmem:[#allocation5 + $0x1660] sm:$0xff]  ;;  %v755_v40 = vld [vmem:[#allocation5 + $0x15e8] sm:$0xff] }
 0x331   :  { %3915 = vmatprep.subr.mxu1 %v1937_v50  ;;  %3845 = vmatpush2.msra.mxu0 %v1424_v51  ;;  %v242_v43 = vld [vmem:[#allocation5 + $0x5e0] sm:$0xff]  ;;  %v227_v31 = vld [vmem:[#allocation5 + $0x568] sm:$0xff] }
 0x332   :  { %3916 = vmatpush2.msra.mxu1 %v1936_v53  ;;  %3846 = vmatprep.subr.mxu0 %v1409_v56  ;;  %v754_v45 = vld [vmem:[#allocation5 + $0x15e0] sm:$0xff]  ;;  %v739_v46 = vld [vmem:[#allocation5 + $0x1568] sm:$0xff] }
 0x333   :  { %3917 = vmatprep.subr.mxu1 %v1921_v57  ;;  %3847 = vmatpush2.msra.mxu0 %v1408_v59  ;;  %v226_v49 = vld [vmem:[#allocation5 + $0x560] sm:$0xff]  ;;  %v211_v51 = vld [vmem:[#allocation5 + $0x4e8] sm:$0xff] }
 0x334   :  { %3918 = vmatpush2.msra.mxu1 %v1920_v60  ;;  %3848 = vmatprep.subr.mxu0 %v1393_v44  ;;  %v738_v50 = vld [vmem:[#allocation5 + $0x1560] sm:$0xff]  ;;  %v723_v53 = vld [vmem:[#allocation5 + $0x14e8] sm:$0xff] }
 0x335   :  { %3919 = vmatprep.subr.mxu1 %v1905_v61  ;;  %3849 = vmatpush2.msra.mxu0 %v1392_v63  ;;  %v210_v56 = vld [vmem:[#allocation5 + $0x4e0] sm:$0xff]  ;;  %v195_v59 = vld [vmem:[#allocation5 + $0x468] sm:$0xff] }
 0x336   :  { %3920 = vmatpush2.msra.mxu1 %v1904_v2  ;;  %3850 = vmatprep.subr.mxu0 %v1377_v42  ;;  %v722_v57 = vld [vmem:[#allocation5 + $0x14e0] sm:$0xff]  ;;  %v707_v60 = vld [vmem:[#allocation5 + $0x1468] sm:$0xff] }
 0x337   :  { %3921 = vmatprep.subr.mxu1 %v1889_v4  ;;  %3851 = vmatpush2.msra.mxu0 %v1376_v6  ;;  %v194_v44 = vld [vmem:[#allocation5 + $0x460] sm:$0xff]  ;;  %v179_v63 = vld [vmem:[#allocation5 + $0x3e8] sm:$0xff] }
 0x338   :  { %3922 = vmatpush2.msra.mxu1 %v1888_v7  ;;  %3852 = vmatprep.subr.mxu0 %v1361_v9  ;;  %v706_v61 = vld [vmem:[#allocation5 + $0x1460] sm:$0xff]  ;;  %v691_v2 = vld [vmem:[#allocation5 + $0x13e8] sm:$0xff] }
 0x339   :  { %3923 = vmatprep.subr.mxu1 %v1873_v10  ;;  %3853 = vmatpush2.msra.mxu0 %v1360_v13  ;;  %v178_v42 = vld [vmem:[#allocation5 + $0x3e0] sm:$0xff]  ;;  %v163_v6 = vld [vmem:[#allocation5 + $0x368] sm:$0xff] }
 0x33a   :  { %3924 = vmatpush2.msra.mxu1 %v1872_v58  ;;  %3854 = vmatprep.subr.mxu0 %v1345_v35  ;;  %v690_v4 = vld [vmem:[#allocation5 + $0x13e0] sm:$0xff]  ;;  %v675_v7 = vld [vmem:[#allocation5 + $0x1368] sm:$0xff] }
 0x33b   :  { %3925 = vmatprep.subr.mxu1 %v1857_v14  ;;  %3855 = vmatpush2.msra.mxu0 %v1344_v15  ;;  %v162_v9 = vld [vmem:[#allocation5 + $0x360] sm:$0xff]  ;;  %v147_v13 = vld [vmem:[#allocation5 + $0x2e8] sm:$0xff] }
 0x33c   :  { %3856 = vmatprep.mubr.f32.mxu0 %v4773_v26  ;;  %3926 = vmatpush2.msra.mxu1 %v1856_v17  ;;  %v674_v10 = vld [vmem:[#allocation5 + $0x1360] sm:$0xff]  ;;  %v659_v58 = vld [vmem:[#allocation5 + $0x12e8] sm:$0xff] }
 0x33d   :  { %3857 = vmatmul.mubr.f32.vlgmr.msra.gmra.mxu0 %v4766_v16  ;;  %3927 = vmatprep.mubr.f32.mxu1 %v4777_v29  ;;  %v146_v35 = vld [vmem:[#allocation5 + $0x2e0] sm:$0xff]  ;;  %v131_v15 = vld [vmem:[#allocation5 + $0x268] sm:$0xff] }
 0x33e   :  { %3934 = vmatprep.subr.mxu0 %v307_v18  ;;  %4005 = vmatprep.subr.mxu1 %v819_v19  ;;  %v658_v14 = vld [vmem:[#allocation5 + $0x12e0] sm:$0xff]  ;;  %v643_v17 = vld [vmem:[#allocation5 + $0x1268] sm:$0xff] }
 0x33f   :  { %3928 = vmatmul.mubr.f32.vlgmr.msra.gmra.mxu1 %v4769_v21  ;;  %3935 = vmatpush1.msra.mxu0 %v306_v20  ;;  %v130_v18 = vld [vmem:[#allocation5 + $0x260] sm:$0xff]  ;;  %v115_v20 = vld [vmem:[#allocation5 + $0x1e8] sm:$0xff] }
 0x340   :  { %4006 = vmatpush1.msra.mxu1 %v818_v22  ;;  %3936 = vmatprep.subr.mxu0 %v291_v23  ;;  %v642_v19 = vld [vmem:[#allocation5 + $0x1260] sm:$0xff]  ;;  %v627_v22 = vld [vmem:[#allocation5 + $0x11e8] sm:$0xff] }
 0x341   :  { %4007 = vmatprep.subr.mxu1 %v803_v25  ;;  %3937 = vmatpush1.msra.mxu0 %v290_v27  ;;  %v114_v23 = vld [vmem:[#allocation5 + $0x1e0] sm:$0xff]  ;;  %v99_v27 = vld [vmem:[#allocation5 + $0x168] sm:$0xff] }
 0x342   :  { %4008 = vmatpush1.msra.mxu1 %v802_v28  ;;  %3938 = vmatprep.subr.mxu0 %v275_v30  ;;  %v626_v25 = vld [vmem:[#allocation5 + $0x11e0] sm:$0xff]  ;;  %v611_v28 = vld [vmem:[#allocation5 + $0x1168] sm:$0xff] }
 0x343   :  { %4009 = vmatprep.subr.mxu1 %v787_v5  ;;  %3939 = vmatpush1.msra.mxu0 %v274_v32  ;;  %v98_v30 = vld [vmem:[#allocation5 + $0x160] sm:$0xff]  ;;  %v83_v32 = vld [vmem:[#allocation5 + $0xe8] sm:$0xff] }
 0x344   :  { %4010 = vmatpush1.msra.mxu1 %v786_v24  ;;  %3940 = vmatprep.subr.mxu0 %v259_v33  ;;  %v610_v5 = vld [vmem:[#allocation5 + $0x1160] sm:$0xff]  ;;  %v595_v24 = vld [vmem:[#allocation5 + $0x10e8] sm:$0xff] }
 0x345   :  { %4011 = vmatprep.subr.mxu1 %v771_v34  ;;  %3941 = vmatpush1.msra.mxu0 %v258_v36  ;;  %v82_v33 = vld [vmem:[#allocation5 + $0xe0] sm:$0xff]  ;;  %v67_v36 = vld [vmem:[#allocation5 + $0x68] sm:$0xff] }
 0x346   :  { %4012 = vmatpush1.msra.mxu1 %v770_v37  ;;  %3942 = vmatprep.subr.mxu0 %v243_v38  ;;  %v594_v34 = vld [vmem:[#allocation5 + $0x10e0] sm:$0xff]  ;;  %v579_v37 = vld [vmem:[#allocation5 + $0x1068] sm:$0xff] }
 0x347   :  { %4013 = vmatprep.subr.mxu1 %v755_v40  ;;  %3943 = vmatpush1.msra.mxu0 %v242_v43  ;;  %v66_v38 = vld [vmem:[#allocation5 + $0x60] sm:$0xff]  ;;  %v563_v43 = vld [vmem:[#allocation5 + $0xfe8] sm:$0xff] }
 0x348   :  { %4014 = vmatpush1.msra.mxu1 %v754_v45  ;;  %3944 = vmatprep.subr.mxu0 %v227_v31  ;;  %v578_v40 = vld [vmem:[#allocation5 + $0x1060] sm:$0xff]  ;;  %v1075_v45 = vld [vmem:[#allocation5 + $0x1fe8] sm:$0xff] }
 0x349   :  { %4015 = vmatprep.subr.mxu1 %v739_v46  ;;  %3945 = vmatpush1.msra.mxu0 %v226_v49  ;;  %v562_v31 = vld [vmem:[#allocation5 + $0xfe0] sm:$0xff]  ;;  %v547_v49 = vld [vmem:[#allocation5 + $0xf68] sm:$0xff] }
 0x34a   :  { %4016 = vmatpush1.msra.mxu1 %v738_v50  ;;  %3946 = vmatprep.subr.mxu0 %v211_v51  ;;  %v1074_v46 = vld [vmem:[#allocation5 + $0x1fe0] sm:$0xff]  ;;  %v1059_v50 = vld [vmem:[#allocation5 + $0x1f68] sm:$0xff] }
 0x34b   :  { %4017 = vmatprep.subr.mxu1 %v723_v53  ;;  %3947 = vmatpush1.msra.mxu0 %v210_v56  ;;  %v546_v51 = vld [vmem:[#allocation5 + $0xf60] sm:$0xff]  ;;  %v531_v56 = vld [vmem:[#allocation5 + $0xee8] sm:$0xff] }
 0x34c   :  { %4018 = vmatpush1.msra.mxu1 %v722_v57  ;;  %3948 = vmatprep.subr.mxu0 %v195_v59  ;;  %v1058_v53 = vld [vmem:[#allocation5 + $0x1f60] sm:$0xff]  ;;  %v1043_v57 = vld [vmem:[#allocation5 + $0x1ee8] sm:$0xff] }
 0x34d   :  { %4019 = vmatprep.subr.mxu1 %v707_v60  ;;  %3949 = vmatpush1.msra.mxu0 %v194_v44  ;;  %v530_v59 = vld [vmem:[#allocation5 + $0xee0] sm:$0xff]  ;;  %v515_v44 = vld [vmem:[#allocation5 + $0xe68] sm:$0xff] }
 0x34e   :  { %4020 = vmatpush1.msra.mxu1 %v706_v61  ;;  %3950 = vmatprep.subr.mxu0 %v179_v63  ;;  %v1042_v60 = vld [vmem:[#allocation5 + $0x1ee0] sm:$0xff]  ;;  %v1027_v61 = vld [vmem:[#allocation5 + $0x1e68] sm:$0xff] }
 0x34f   :  { %4021 = vmatprep.subr.mxu1 %v691_v2  ;;  %3951 = vmatpush1.msra.mxu0 %v178_v42  ;;  %v514_v63 = vld [vmem:[#allocation5 + $0xe60] sm:$0xff]  ;;  %v499_v42 = vld [vmem:[#allocation5 + $0xde8] sm:$0xff] }
 0x350   :  { %4022 = vmatpush1.msra.mxu1 %v690_v4  ;;  %3952 = vmatprep.subr.mxu0 %v163_v6  ;;  %v1026_v2 = vld [vmem:[#allocation5 + $0x1e60] sm:$0xff]  ;;  %v1011_v4 = vld [vmem:[#allocation5 + $0x1de8] sm:$0xff] }
 0x351   :  { %4023 = vmatprep.subr.mxu1 %v675_v7  ;;  %3953 = vmatpush1.msra.mxu0 %v162_v9  ;;  %v498_v6 = vld [vmem:[#allocation5 + $0xde0] sm:$0xff]  ;;  %v483_v9 = vld [vmem:[#allocation5 + $0xd68] sm:$0xff] }
 0x352   :  { %4024 = vmatpush1.msra.mxu1 %v674_v10  ;;  %3954 = vmatprep.subr.mxu0 %v147_v13  ;;  %v1010_v7 = vld [vmem:[#allocation5 + $0x1de0] sm:$0xff]  ;;  %v995_v10 = vld [vmem:[#allocation5 + $0x1d68] sm:$0xff] }
 0x353   :  { %4025 = vmatprep.subr.mxu1 %v659_v58  ;;  %3955 = vmatpush1.msra.mxu0 %v146_v35  ;;  %v482_v13 = vld [vmem:[#allocation5 + $0xd60] sm:$0xff]  ;;  %v467_v35 = vld [vmem:[#allocation5 + $0xce8] sm:$0xff] }
 0x354   :  { %4026 = vmatpush1.msra.mxu1 %v658_v14  ;;  %3956 = vmatprep.subr.mxu0 %v131_v15  ;;  %v994_v58 = vld [vmem:[#allocation5 + $0x1d60] sm:$0xff]  ;;  %v979_v14 = vld [vmem:[#allocation5 + $0x1ce8] sm:$0xff] }
 0x355   :  { %4027 = vmatprep.subr.mxu1 %v643_v17  ;;  %3957 = vmatpush1.msra.mxu0 %v130_v18  ;;  %v466_v15 = vld [vmem:[#allocation5 + $0xce0] sm:$0xff]  ;;  %v451_v18 = vld [vmem:[#allocation5 + $0xc68] sm:$0xff] }
 0x356   :  { %4028 = vmatpush1.msra.mxu1 %v642_v19  ;;  %3958 = vmatprep.subr.mxu0 %v115_v20  ;;  %v978_v17 = vld [vmem:[#allocation5 + $0x1ce0] sm:$0xff]  ;;  %v963_v19 = vld [vmem:[#allocation5 + $0x1c68] sm:$0xff] }
 0x357   :  { %4029 = vmatprep.subr.mxu1 %v627_v22  ;;  %3959 = vmatpush1.msra.mxu0 %v114_v23  ;;  %v450_v20 = vld [vmem:[#allocation5 + $0xc60] sm:$0xff]  ;;  %v435_v23 = vld [vmem:[#allocation5 + $0xbe8] sm:$0xff] }
 0x358   :  { %4030 = vmatpush1.msra.mxu1 %v626_v25  ;;  %3960 = vmatprep.subr.mxu0 %v99_v27  ;;  %v962_v22 = vld [vmem:[#allocation5 + $0x1c60] sm:$0xff]  ;;  %v947_v25 = vld [vmem:[#allocation5 + $0x1be8] sm:$0xff] }
 0x359   :  { %4031 = vmatprep.subr.mxu1 %v611_v28  ;;  %3961 = vmatpush1.msra.mxu0 %v98_v30  ;;  %v434_v27 = vld [vmem:[#allocation5 + $0xbe0] sm:$0xff]  ;;  %v419_v30 = vld [vmem:[#allocation5 + $0xb68] sm:$0xff] }
 0x35a   :  { %4032 = vmatpush1.msra.mxu1 %v610_v5  ;;  %3962 = vmatprep.subr.mxu0 %v83_v32  ;;  %v946_v28 = vld [vmem:[#allocation5 + $0x1be0] sm:$0xff]  ;;  %v931_v5 = vld [vmem:[#allocation5 + $0x1b68] sm:$0xff] }
 0x35b   :  { %4033 = vmatprep.subr.mxu1 %v595_v24  ;;  %3963 = vmatpush1.msra.mxu0 %v82_v33  ;;  %v418_v32 = vld [vmem:[#allocation5 + $0xb60] sm:$0xff]  ;;  %v403_v33 = vld [vmem:[#allocation5 + $0xae8] sm:$0xff] }
 0x35c   :  { %4034 = vmatpush1.msra.mxu1 %v594_v34  ;;  %3964 = vmatprep.subr.mxu0 %v67_v36  ;;  %v930_v24 = vld [vmem:[#allocation5 + $0x1b60] sm:$0xff]  ;;  %v915_v34 = vld [vmem:[#allocation5 + $0x1ae8] sm:$0xff] }
 0x35d   :  { %4035 = vmatprep.subr.mxu1 %v579_v37  ;;  %3965 = vmatpush1.msra.mxu0 %v66_v38  ;;  %v402_v36 = vld [vmem:[#allocation5 + $0xae0] sm:$0xff]  ;;  %v387_v38 = vld [vmem:[#allocation5 + $0xa68] sm:$0xff] }
 0x35e   :  { %4036 = vmatpush1.msra.mxu1 %v578_v40  ;;  %3966 = vmatprep.subr.mxu0 %v563_v43  ;;  %v914_v37 = vld [vmem:[#allocation5 + $0x1ae0] sm:$0xff]  ;;  %v899_v40 = vld [vmem:[#allocation5 + $0x1a68] sm:$0xff] }
 0x35f   :  { %4037 = vmatprep.subr.mxu1 %v1075_v45  ;;  %3967 = vmatpush2.msra.mxu0 %v562_v31  ;;  %v386_v43 = vld [vmem:[#allocation5 + $0xa60] sm:$0xff]  ;;  %v371_v31 = vld [vmem:[#allocation5 + $0x9e8] sm:$0xff] }
 0x360   :  { %4038 = vmatpush2.msra.mxu1 %v1074_v46  ;;  %3968 = vmatprep.subr.mxu0 %v547_v49  ;;  %v898_v45 = vld [vmem:[#allocation5 + $0x1a60] sm:$0xff]  ;;  %v883_v46 = vld [vmem:[#allocation5 + $0x19e8] sm:$0xff] }
 0x361   :  { %4039 = vmatprep.subr.mxu1 %v1059_v50  ;;  %3969 = vmatpush2.msra.mxu0 %v546_v51  ;;  %v370_v49 = vld [vmem:[#allocation5 + $0x9e0] sm:$0xff]  ;;  %v355_v51 = vld [vmem:[#allocation5 + $0x968] sm:$0xff] }
 0x362   :  { %4040 = vmatpush2.msra.mxu1 %v1058_v53  ;;  %3970 = vmatprep.subr.mxu0 %v531_v56  ;;  %v882_v50 = vld [vmem:[#allocation5 + $0x19e0] sm:$0xff]  ;;  %v867_v53 = vld [vmem:[#allocation5 + $0x1968] sm:$0xff] }
 0x363   :  { %4041 = vmatprep.subr.mxu1 %v1043_v57  ;;  %3971 = vmatpush2.msra.mxu0 %v530_v59  ;;  %v354_v56 = vld [vmem:[#allocation5 + $0x960] sm:$0xff]  ;;  %v339_v59 = vld [vmem:[#allocation5 + $0x8e8] sm:$0xff] }
 0x364   :  { %4042 = vmatpush2.msra.mxu1 %v1042_v60  ;;  %3972 = vmatprep.subr.mxu0 %v515_v44  ;;  %v866_v57 = vld [vmem:[#allocation5 + $0x1960] sm:$0xff]  ;;  %v851_v60 = vld [vmem:[#allocation5 + $0x18e8] sm:$0xff] }
 0x365   :  { %4043 = vmatprep.subr.mxu1 %v1027_v61  ;;  %3973 = vmatpush2.msra.mxu0 %v514_v63  ;;  %v338_v44 = vld [vmem:[#allocation5 + $0x8e0] sm:$0xff]  ;;  %v323_v63 = vld [vmem:[#allocation5 + $0x868] sm:$0xff] }
 0x366   :  { %4044 = vmatpush2.msra.mxu1 %v1026_v2  ;;  %3974 = vmatprep.subr.mxu0 %v499_v42  ;;  %v850_v61 = vld [vmem:[#allocation5 + $0x18e0] sm:$0xff]  ;;  %v835_v2 = vld [vmem:[#allocation5 + $0x1868] sm:$0xff] }
 0x367   :  { %4045 = vmatprep.subr.mxu1 %v1011_v4  ;;  %3975 = vmatpush2.msra.mxu0 %v498_v6  ;;  %v322_v42 = vld [vmem:[#allocation5 + $0x860] sm:$0xff]  ;;  %v1331_v6 = vld [vmem:[#allocation5 + $0x27e8] sm:$0xff] }
 0x368   :  { %4046 = vmatpush2.msra.mxu1 %v1010_v7  ;;  %3976 = vmatprep.subr.mxu0 %v483_v9  ;;  %v834_v4 = vld [vmem:[#allocation5 + $0x1860] sm:$0xff]  ;;  %v1843_v7 = vld [vmem:[#allocation5 + $0x37e8] sm:$0xff] }
 0x369   :  { %4047 = vmatprep.subr.mxu1 %v995_v10  ;;  %3977 = vmatpush2.msra.mxu0 %v482_v13  ;;  %v1330_v9 = vld [vmem:[#allocation5 + $0x27e0] sm:$0xff]  ;;  %v1315_v13 = vld [vmem:[#allocation5 + $0x2768] sm:$0xff] }
 0x36a   :  { %4048 = vmatpush2.msra.mxu1 %v994_v58  ;;  %3978 = vmatprep.subr.mxu0 %v467_v35  ;;  %v1842_v10 = vld [vmem:[#allocation5 + $0x37e0] sm:$0xff]  ;;  %v1827_v58 = vld [vmem:[#allocation5 + $0x3768] sm:$0xff] }
 0x36b   :  { %4049 = vmatprep.subr.mxu1 %v979_v14  ;;  %3979 = vmatpush2.msra.mxu0 %v466_v15  ;;  %v1314_v35 = vld [vmem:[#allocation5 + $0x2760] sm:$0xff]  ;;  %v1299_v15 = vld [vmem:[#allocation5 + $0x26e8] sm:$0xff] }
 0x36c   :  { %4050 = vmatpush2.msra.mxu1 %v978_v17  ;;  %3980 = vmatprep.subr.mxu0 %v451_v18  ;;  %v1826_v14 = vld [vmem:[#allocation5 + $0x3760] sm:$0xff]  ;;  %v1811_v17 = vld [vmem:[#allocation5 + $0x36e8] sm:$0xff] }
 0x36d   :  { %4051 = vmatprep.subr.mxu1 %v963_v19  ;;  %3981 = vmatpush2.msra.mxu0 %v450_v20  ;;  %v1298_v18 = vld [vmem:[#allocation5 + $0x26e0] sm:$0xff]  ;;  %v1283_v20 = vld [vmem:[#allocation5 + $0x2668] sm:$0xff] }
 0x36e   :  { %4052 = vmatpush2.msra.mxu1 %v962_v22  ;;  %3982 = vmatprep.subr.mxu0 %v435_v23  ;;  %v1810_v19 = vld [vmem:[#allocation5 + $0x36e0] sm:$0xff]  ;;  %v1795_v22 = vld [vmem:[#allocation5 + $0x3668] sm:$0xff] }
 0x36f   :  { %4053 = vmatprep.subr.mxu1 %v947_v25  ;;  %3983 = vmatpush2.msra.mxu0 %v434_v27  ;;  %v1282_v23 = vld [vmem:[#allocation5 + $0x2660] sm:$0xff]  ;;  %v1267_v27 = vld [vmem:[#allocation5 + $0x25e8] sm:$0xff] }
 0x370   :  { %4054 = vmatpush2.msra.mxu1 %v946_v28  ;;  %3984 = vmatprep.subr.mxu0 %v419_v30  ;;  %v1794_v25 = vld [vmem:[#allocation5 + $0x3660] sm:$0xff]  ;;  %v1779_v28 = vld [vmem:[#allocation5 + $0x35e8] sm:$0xff] }
 0x371   :  { %4055 = vmatprep.subr.mxu1 %v931_v5  ;;  %3985 = vmatpush2.msra.mxu0 %v418_v32  ;;  %v1266_v30 = vld [vmem:[#allocation5 + $0x25e0] sm:$0xff]  ;;  %v1251_v32 = vld [vmem:[#allocation5 + $0x2568] sm:$0xff] }
 0x372   :  { %4056 = vmatpush2.msra.mxu1 %v930_v24  ;;  %3986 = vmatprep.subr.mxu0 %v403_v33  ;;  %v1778_v5 = vld [vmem:[#allocation5 + $0x35e0] sm:$0xff]  ;;  %v1763_v24 = vld [vmem:[#allocation5 + $0x3568] sm:$0xff] }
 0x373   :  { %4057 = vmatprep.subr.mxu1 %v915_v34  ;;  %3987 = vmatpush2.msra.mxu0 %v402_v36  ;;  %v1250_v33 = vld [vmem:[#allocation5 + $0x2560] sm:$0xff]  ;;  %v1235_v36 = vld [vmem:[#allocation5 + $0x24e8] sm:$0xff] }
 0x374   :  { %4058 = vmatpush2.msra.mxu1 %v914_v37  ;;  %3988 = vmatprep.subr.mxu0 %v387_v38  ;;  %v1762_v34 = vld [vmem:[#allocation5 + $0x3560] sm:$0xff]  ;;  %v1747_v37 = vld [vmem:[#allocation5 + $0x34e8] sm:$0xff] }
 0x375   :  { %4059 = vmatprep.subr.mxu1 %v899_v40  ;;  %3989 = vmatpush2.msra.mxu0 %v386_v43  ;;  %v1234_v38 = vld [vmem:[#allocation5 + $0x24e0] sm:$0xff]  ;;  %v1219_v43 = vld [vmem:[#allocation5 + $0x2468] sm:$0xff] }
 0x376   :  { %4060 = vmatpush2.msra.mxu1 %v898_v45  ;;  %3990 = vmatprep.subr.mxu0 %v371_v31  ;;  %v1746_v40 = vld [vmem:[#allocation5 + $0x34e0] sm:$0xff]  ;;  %v1731_v45 = vld [vmem:[#allocation5 + $0x3468] sm:$0xff] }
 0x377   :  { %4061 = vmatprep.subr.mxu1 %v883_v46  ;;  %3991 = vmatpush2.msra.mxu0 %v370_v49  ;;  %v1218_v31 = vld [vmem:[#allocation5 + $0x2460] sm:$0xff]  ;;  %v1203_v49 = vld [vmem:[#allocation5 + $0x23e8] sm:$0xff] }
 0x378   :  { %4062 = vmatpush2.msra.mxu1 %v882_v50  ;;  %3992 = vmatprep.subr.mxu0 %v355_v51  ;;  %v1730_v46 = vld [vmem:[#allocation5 + $0x3460] sm:$0xff]  ;;  %v1715_v50 = vld [vmem:[#allocation5 + $0x33e8] sm:$0xff] }
 0x379   :  { %4063 = vmatprep.subr.mxu1 %v867_v53  ;;  %3993 = vmatpush2.msra.mxu0 %v354_v56  ;;  %v1202_v51 = vld [vmem:[#allocation5 + $0x23e0] sm:$0xff]  ;;  %v1187_v56 = vld [vmem:[#allocation5 + $0x2368] sm:$0xff] }
 0x37a   :  { %4064 = vmatpush2.msra.mxu1 %v866_v57  ;;  %3994 = vmatprep.subr.mxu0 %v339_v59  ;;  %v1714_v53 = vld [vmem:[#allocation5 + $0x33e0] sm:$0xff]  ;;  %v1699_v57 = vld [vmem:[#allocation5 + $0x3368] sm:$0xff] }
 0x37b   :  { %4065 = vmatprep.subr.mxu1 %v851_v60  ;;  %3995 = vmatpush2.msra.mxu0 %v338_v44  ;;  %v1186_v59 = vld [vmem:[#allocation5 + $0x2360] sm:$0xff]  ;;  %v1171_v44 = vld [vmem:[#allocation5 + $0x22e8] sm:$0xff] }
 0x37c   :  { %4066 = vmatpush2.msra.mxu1 %v850_v61  ;;  %3996 = vmatprep.subr.mxu0 %v323_v63  ;;  %v1698_v60 = vld [vmem:[#allocation5 + $0x3360] sm:$0xff]  ;;  %v1683_v61 = vld [vmem:[#allocation5 + $0x32e8] sm:$0xff] }
 0x37d   :  { %4067 = vmatprep.subr.mxu1 %v835_v2  ;;  %3997 = vmatpush2.msra.mxu0 %v322_v42  ;;  %v1170_v63 = vld [vmem:[#allocation5 + $0x22e0] sm:$0xff]  ;;  %v1155_v42 = vld [vmem:[#allocation5 + $0x2268] sm:$0xff] }
 0x37e   :  { %3998 = vmatprep.mubr.f32.mxu0 %v4755_v8  ;;  %4068 = vmatpush2.msra.mxu1 %v834_v4  ;;  %v1682_v2 = vld [vmem:[#allocation5 + $0x32e0] sm:$0xff]  ;;  %v1667_v4 = vld [vmem:[#allocation5 + $0x3268] sm:$0xff] }
 0x37f   :  { %3999 = vmatmul.mubr.f32.vlgmr.msra.gmra.mxu0 %v4748_v62  ;;  %4069 = vmatprep.mubr.f32.mxu1 %v4759_v11 }
 0x380   :  { %4076 = vmatprep.subr.mxu0 %v1331_v6  ;;  %4147 = vmatprep.subr.mxu1 %v1843_v7  ;;  %v1154_v6 = vld [vmem:[#allocation5 + $0x2260] sm:$0xff] }
 0x381   :  { %4070 = vmatmul.mubr.f32.vlgmr.msra.gmra.mxu1 %v4751_v3  ;;  %4077 = vmatpush1.msra.mxu0 %v1330_v9  ;;  %v1666_v7 = vld [vmem:[#allocation5 + $0x3260] sm:$0xff]  ;;  %v1139_v9 = vld [vmem:[#allocation5 + $0x21e8] sm:$0xff] }
 0x382   :  { %4148 = vmatpush1.msra.mxu1 %v1842_v10  ;;  %4078 = vmatprep.subr.mxu0 %v1315_v13  ;;  %v1651_v10 = vld [vmem:[#allocation5 + $0x31e8] sm:$0xff]  ;;  %v1138_v13 = vld [vmem:[#allocation5 + $0x21e0] sm:$0xff] }
 0x383   :  { %4149 = vmatprep.subr.mxu1 %v1827_v58  ;;  %4079 = vmatpush1.msra.mxu0 %v1314_v35  ;;  %v1650_v58 = vld [vmem:[#allocation5 + $0x31e0] sm:$0xff]  ;;  %v1123_v35 = vld [vmem:[#allocation5 + $0x2168] sm:$0xff] }
 0x384   :  { %4150 = vmatpush1.msra.mxu1 %v1826_v14  ;;  %4080 = vmatprep.subr.mxu0 %v1299_v15  ;;  %v1635_v14 = vld [vmem:[#allocation5 + $0x3168] sm:$0xff]  ;;  %v1122_v15 = vld [vmem:[#allocation5 + $0x2160] sm:$0xff] }
 0x385   :  { %4151 = vmatprep.subr.mxu1 %v1811_v17  ;;  %4081 = vmatpush1.msra.mxu0 %v1298_v18  ;;  %v1634_v17 = vld [vmem:[#allocation5 + $0x3160] sm:$0xff]  ;;  %v1107_v18 = vld [vmem:[#allocation5 + $0x20e8] sm:$0xff] }
 0x386   :  { %4152 = vmatpush1.msra.mxu1 %v1810_v19  ;;  %4082 = vmatprep.subr.mxu0 %v1283_v20  ;;  %v1619_v19 = vld [vmem:[#allocation5 + $0x30e8] sm:$0xff]  ;;  %v1106_v20 = vld [vmem:[#allocation5 + $0x20e0] sm:$0xff] }
 0x387   :  { %4153 = vmatprep.subr.mxu1 %v1795_v22  ;;  %4083 = vmatpush1.msra.mxu0 %v1282_v23  ;;  %v1618_v22 = vld [vmem:[#allocation5 + $0x30e0] sm:$0xff]  ;;  %v1091_v23 = vld [vmem:[#allocation5 + $0x2068] sm:$0xff] }
 0x388   :  { %4154 = vmatpush1.msra.mxu1 %v1794_v25  ;;  %4084 = vmatprep.subr.mxu0 %v1267_v27  ;;  %v1603_v25 = vld [vmem:[#allocation5 + $0x3068] sm:$0xff]  ;;  %v1090_v27 = vld [vmem:[#allocation5 + $0x2060] sm:$0xff] }
 0x389   :  { %4155 = vmatprep.subr.mxu1 %v1779_v28  ;;  %4085 = vmatpush1.msra.mxu0 %v1266_v30  ;;  %v1602_v28 = vld [vmem:[#allocation5 + $0x3060] sm:$0xff]  ;;  %v1587_v30 = vld [vmem:[#allocation5 + $0x2fe8] sm:$0xff] }
 0x38a   :  { %4156 = vmatpush1.msra.mxu1 %v1778_v5  ;;  %4086 = vmatprep.subr.mxu0 %v1251_v32  ;;  %v2099_v5 = vld [vmem:[#allocation5 + $0x3fe8] sm:$0xff]  ;;  %v1586_v32 = vld [vmem:[#allocation5 + $0x2fe0] sm:$0xff] }
 0x38b   :  { %4157 = vmatprep.subr.mxu1 %v1763_v24  ;;  %4087 = vmatpush1.msra.mxu0 %v1250_v33  ;;  %v2098_v24 = vld [vmem:[#allocation5 + $0x3fe0] sm:$0xff]  ;;  %v1571_v33 = vld [vmem:[#allocation5 + $0x2f68] sm:$0xff] }
 0x38c   :  { %4158 = vmatpush1.msra.mxu1 %v1762_v34  ;;  %4088 = vmatprep.subr.mxu0 %v1235_v36  ;;  %v2083_v34 = vld [vmem:[#allocation5 + $0x3f68] sm:$0xff]  ;;  %v1570_v36 = vld [vmem:[#allocation5 + $0x2f60] sm:$0xff] }
 0x38d   :  { %4159 = vmatprep.subr.mxu1 %v1747_v37  ;;  %4089 = vmatpush1.msra.mxu0 %v1234_v38  ;;  %v2082_v37 = vld [vmem:[#allocation5 + $0x3f60] sm:$0xff]  ;;  %v1555_v38 = vld [vmem:[#allocation5 + $0x2ee8] sm:$0xff] }
 0x38e   :  { %4160 = vmatpush1.msra.mxu1 %v1746_v40  ;;  %4090 = vmatprep.subr.mxu0 %v1219_v43  ;;  %v2067_v40 = vld [vmem:[#allocation5 + $0x3ee8] sm:$0xff]  ;;  %v1554_v43 = vld [vmem:[#allocation5 + $0x2ee0] sm:$0xff] }
 0x38f   :  { %4161 = vmatprep.subr.mxu1 %v1731_v45  ;;  %4091 = vmatpush1.msra.mxu0 %v1218_v31  ;;  %v2066_v45 = vld [vmem:[#allocation5 + $0x3ee0] sm:$0xff]  ;;  %v1539_v31 = vld [vmem:[#allocation5 + $0x2e68] sm:$0xff] }
 0x390   :  { %4162 = vmatpush1.msra.mxu1 %v1730_v46  ;;  %4092 = vmatprep.subr.mxu0 %v1203_v49  ;;  %v2051_v46 = vld [vmem:[#allocation5 + $0x3e68] sm:$0xff]  ;;  %v1538_v49 = vld [vmem:[#allocation5 + $0x2e60] sm:$0xff] }
 0x391   :  { %4163 = vmatprep.subr.mxu1 %v1715_v50  ;;  %4093 = vmatpush1.msra.mxu0 %v1202_v51  ;;  %v2050_v50 = vld [vmem:[#allocation5 + $0x3e60] sm:$0xff]  ;;  %v1523_v51 = vld [vmem:[#allocation5 + $0x2de8] sm:$0xff] }
 0x392   :  { %4164 = vmatpush1.msra.mxu1 %v1714_v53  ;;  %4094 = vmatprep.subr.mxu0 %v1187_v56  ;;  %v2035_v53 = vld [vmem:[#allocation5 + $0x3de8] sm:$0xff]  ;;  %v1522_v56 = vld [vmem:[#allocation5 + $0x2de0] sm:$0xff] }
 0x393   :  { %4165 = vmatprep.subr.mxu1 %v1699_v57  ;;  %4095 = vmatpush1.msra.mxu0 %v1186_v59  ;;  %v2034_v57 = vld [vmem:[#allocation5 + $0x3de0] sm:$0xff]  ;;  %v1507_v59 = vld [vmem:[#allocation5 + $0x2d68] sm:$0xff] }
 0x394   :  { %4166 = vmatpush1.msra.mxu1 %v1698_v60  ;;  %4096 = vmatprep.subr.mxu0 %v1171_v44  ;;  %v2019_v60 = vld [vmem:[#allocation5 + $0x3d68] sm:$0xff]  ;;  %v1506_v44 = vld [vmem:[#allocation5 + $0x2d60] sm:$0xff] }
 0x395   :  { %4167 = vmatprep.subr.mxu1 %v1683_v61  ;;  %4097 = vmatpush1.msra.mxu0 %v1170_v63  ;;  %v2018_v61 = vld [vmem:[#allocation5 + $0x3d60] sm:$0xff]  ;;  %v1491_v63 = vld [vmem:[#allocation5 + $0x2ce8] sm:$0xff] }
 0x396   :  { %4168 = vmatpush1.msra.mxu1 %v1682_v2  ;;  %4098 = vmatprep.subr.mxu0 %v1155_v42  ;;  %v2003_v2 = vld [vmem:[#allocation5 + $0x3ce8] sm:$0xff]  ;;  %v1490_v42 = vld [vmem:[#allocation5 + $0x2ce0] sm:$0xff] }
 0x397   :  { %4169 = vmatprep.subr.mxu1 %v1667_v4  ;;  %4099 = vmatpush1.msra.mxu0 %v1154_v6  ;;  %v2002_v4 = vld [vmem:[#allocation5 + $0x3ce0] sm:$0xff]  ;;  %v1475_v6 = vld [vmem:[#allocation5 + $0x2c68] sm:$0xff] }
 0x398   :  { %4170 = vmatpush1.msra.mxu1 %v1666_v7  ;;  %4100 = vmatprep.subr.mxu0 %v1139_v9  ;;  %v1987_v7 = vld [vmem:[#allocation5 + $0x3c68] sm:$0xff]  ;;  %v1474_v9 = vld [vmem:[#allocation5 + $0x2c60] sm:$0xff] }
 0x399   :  { %4171 = vmatprep.subr.mxu1 %v1651_v10  ;;  %4101 = vmatpush1.msra.mxu0 %v1138_v13  ;;  %v1986_v10 = vld [vmem:[#allocation5 + $0x3c60] sm:$0xff]  ;;  %v1459_v13 = vld [vmem:[#allocation5 + $0x2be8] sm:$0xff] }
 0x39a   :  { %4172 = vmatpush1.msra.mxu1 %v1650_v58  ;;  %4102 = vmatprep.subr.mxu0 %v1123_v35  ;;  %v1971_v58 = vld [vmem:[#allocation5 + $0x3be8] sm:$0xff]  ;;  %v1458_v35 = vld [vmem:[#allocation5 + $0x2be0] sm:$0xff] }
 0x39b   :  { %4173 = vmatprep.subr.mxu1 %v1635_v14  ;;  %4103 = vmatpush1.msra.mxu0 %v1122_v15  ;;  %v1970_v14 = vld [vmem:[#allocation5 + $0x3be0] sm:$0xff]  ;;  %v1443_v15 = vld [vmem:[#allocation5 + $0x2b68] sm:$0xff] }
 0x39c   :  { %4174 = vmatpush1.msra.mxu1 %v1634_v17  ;;  %4104 = vmatprep.subr.mxu0 %v1107_v18  ;;  %v1955_v17 = vld [vmem:[#allocation5 + $0x3b68] sm:$0xff]  ;;  %v1442_v18 = vld [vmem:[#allocation5 + $0x2b60] sm:$0xff] }
 0x39d   :  { %4175 = vmatprep.subr.mxu1 %v1619_v19  ;;  %4105 = vmatpush1.msra.mxu0 %v1106_v20  ;;  %v1954_v19 = vld [vmem:[#allocation5 + $0x3b60] sm:$0xff]  ;;  %v1427_v20 = vld [vmem:[#allocation5 + $0x2ae8] sm:$0xff] }
 0x39e   :  { %4176 = vmatpush1.msra.mxu1 %v1618_v22  ;;  %4106 = vmatprep.subr.mxu0 %v1091_v23  ;;  %v1939_v22 = vld [vmem:[#allocation5 + $0x3ae8] sm:$0xff]  ;;  %v1426_v23 = vld [vmem:[#allocation5 + $0x2ae0] sm:$0xff] }
 0x39f   :  { %4177 = vmatprep.subr.mxu1 %v1603_v25  ;;  %4107 = vmatpush1.msra.mxu0 %v1090_v27  ;;  %v1938_v25 = vld [vmem:[#allocation5 + $0x3ae0] sm:$0xff]  ;;  %v1411_v27 = vld [vmem:[#allocation5 + $0x2a68] sm:$0xff] }
 0x3a0   :  { %4178 = vmatpush1.msra.mxu1 %v1602_v28  ;;  %4108 = vmatprep.subr.mxu0 %v1587_v30  ;;  %v1923_v28 = vld [vmem:[#allocation5 + $0x3a68] sm:$0xff]  ;;  %v1410_v30 = vld [vmem:[#allocation5 + $0x2a60] sm:$0xff] }
 0x3a1   :  { %4179 = vmatprep.subr.mxu1 %v2099_v5  ;;  %4109 = vmatpush2.msra.mxu0 %v1586_v32  ;;  %v1922_v5 = vld [vmem:[#allocation5 + $0x3a60] sm:$0xff]  ;;  %v1395_v32 = vld [vmem:[#allocation5 + $0x29e8] sm:$0xff] }
 0x3a2   :  { %4180 = vmatpush2.msra.mxu1 %v2098_v24  ;;  %4110 = vmatprep.subr.mxu0 %v1571_v33  ;;  %v1907_v24 = vld [vmem:[#allocation5 + $0x39e8] sm:$0xff]  ;;  %v1394_v33 = vld [vmem:[#allocation5 + $0x29e0] sm:$0xff] }
 0x3a3   :  { %4181 = vmatprep.subr.mxu1 %v2083_v34  ;;  %4111 = vmatpush2.msra.mxu0 %v1570_v36  ;;  %v1906_v34 = vld [vmem:[#allocation5 + $0x39e0] sm:$0xff]  ;;  %v1379_v36 = vld [vmem:[#allocation5 + $0x2968] sm:$0xff] }
 0x3a4   :  { %4182 = vmatpush2.msra.mxu1 %v2082_v37  ;;  %4112 = vmatprep.subr.mxu0 %v1555_v38  ;;  %v1891_v37 = vld [vmem:[#allocation5 + $0x3968] sm:$0xff]  ;;  %v1378_v38 = vld [vmem:[#allocation5 + $0x2960] sm:$0xff] }
 0x3a5   :  { %4183 = vmatprep.subr.mxu1 %v2067_v40  ;;  %4113 = vmatpush2.msra.mxu0 %v1554_v43  ;;  %v1890_v40 = vld [vmem:[#allocation5 + $0x3960] sm:$0xff]  ;;  %v1363_v43 = vld [vmem:[#allocation5 + $0x28e8] sm:$0xff] }
 0x3a6   :  { %4184 = vmatpush2.msra.mxu1 %v2066_v45  ;;  %4114 = vmatprep.subr.mxu0 %v1539_v31  ;;  %v1875_v45 = vld [vmem:[#allocation5 + $0x38e8] sm:$0xff]  ;;  %v1362_v31 = vld [vmem:[#allocation5 + $0x28e0] sm:$0xff] }
 0x3a7   :  { %4185 = vmatprep.subr.mxu1 %v2051_v46  ;;  %4115 = vmatpush2.msra.mxu0 %v1538_v49  ;;  %v1874_v46 = vld [vmem:[#allocation5 + $0x38e0] sm:$0xff]  ;;  %v1347_v49 = vld [vmem:[#allocation5 + $0x2868] sm:$0xff] }
 0x3a8   :  { %4186 = vmatpush2.msra.mxu1 %v2050_v50  ;;  %4116 = vmatprep.subr.mxu0 %v1523_v51  ;;  %v1859_v50 = vld [vmem:[#allocation5 + $0x3868] sm:$0xff]  ;;  %v1346_v51 = vld [vmem:[#allocation5 + $0x2860] sm:$0xff] }
 0x3a9   :  { %4187 = vmatprep.subr.mxu1 %v2035_v53  ;;  %4117 = vmatpush2.msra.mxu0 %v1522_v56  ;;  %v1858_v53 = vld [vmem:[#allocation5 + $0x3860] sm:$0xff]  ;;  %v309_v56 = vld [vmem:[#allocation5 + $0x7f8] sm:$0xff] }
 0x3aa   :  { %4188 = vmatpush2.msra.mxu1 %v2034_v57  ;;  %4118 = vmatprep.subr.mxu0 %v1507_v59  ;;  %v821_v57 = vld [vmem:[#allocation5 + $0x17f8] sm:$0xff]  ;;  %v308_v59 = vld [vmem:[#allocation5 + $0x7f0] sm:$0xff] }
 0x3ab   :  { %4189 = vmatprep.subr.mxu1 %v2019_v60  ;;  %4119 = vmatpush2.msra.mxu0 %v1506_v44  ;;  %v820_v60 = vld [vmem:[#allocation5 + $0x17f0] sm:$0xff]  ;;  %v293_v44 = vld [vmem:[#allocation5 + $0x778] sm:$0xff] }
 0x3ac   :  { %4190 = vmatpush2.msra.mxu1 %v2018_v61  ;;  %4120 = vmatprep.subr.mxu0 %v1491_v63  ;;  %v805_v61 = vld [vmem:[#allocation5 + $0x1778] sm:$0xff]  ;;  %v292_v63 = vld [vmem:[#allocation5 + $0x770] sm:$0xff] }
 0x3ad   :  { %4191 = vmatprep.subr.mxu1 %v2003_v2  ;;  %4121 = vmatpush2.msra.mxu0 %v1490_v42  ;;  %v804_v2 = vld [vmem:[#allocation5 + $0x1770] sm:$0xff]  ;;  %v277_v42 = vld [vmem:[#allocation5 + $0x6f8] sm:$0xff] }
 0x3ae   :  { %4192 = vmatpush2.msra.mxu1 %v2002_v4  ;;  %4122 = vmatprep.subr.mxu0 %v1475_v6  ;;  %v789_v4 = vld [vmem:[#allocation5 + $0x16f8] sm:$0xff]  ;;  %v276_v6 = vld [vmem:[#allocation5 + $0x6f0] sm:$0xff] }
 0x3af   :  { %4193 = vmatprep.subr.mxu1 %v1987_v7  ;;  %4123 = vmatpush2.msra.mxu0 %v1474_v9  ;;  %v788_v7 = vld [vmem:[#allocation5 + $0x16f0] sm:$0xff]  ;;  %v261_v9 = vld [vmem:[#allocation5 + $0x678] sm:$0xff] }
 0x3b0   :  { %4194 = vmatpush2.msra.mxu1 %v1986_v10  ;;  %4124 = vmatprep.subr.mxu0 %v1459_v13  ;;  %v773_v10 = vld [vmem:[#allocation5 + $0x1678] sm:$0xff]  ;;  %v260_v13 = vld [vmem:[#allocation5 + $0x670] sm:$0xff] }
 0x3b1   :  { %4195 = vmatprep.subr.mxu1 %v1971_v58  ;;  %4125 = vmatpush2.msra.mxu0 %v1458_v35  ;;  %v772_v58 = vld [vmem:[#allocation5 + $0x1670] sm:$0xff]  ;;  %v245_v35 = vld [vmem:[#allocation5 + $0x5f8] sm:$0xff] }
 0x3b2   :  { %4196 = vmatpush2.msra.mxu1 %v1970_v14  ;;  %4126 = vmatprep.subr.mxu0 %v1443_v15  ;;  %v757_v14 = vld [vmem:[#allocation5 + $0x15f8] sm:$0xff]  ;;  %v244_v15 = vld [vmem:[#allocation5 + $0x5f0] sm:$0xff] }
 0x3b3   :  { %4197 = vmatprep.subr.mxu1 %v1955_v17  ;;  %4127 = vmatpush2.msra.mxu0 %v1442_v18  ;;  %v756_v17 = vld [vmem:[#allocation5 + $0x15f0] sm:$0xff]  ;;  %v229_v18 = vld [vmem:[#allocation5 + $0x578] sm:$0xff] }
 0x3b4   :  { %4198 = vmatpush2.msra.mxu1 %v1954_v19  ;;  %4128 = vmatprep.subr.mxu0 %v1427_v20  ;;  %v741_v19 = vld [vmem:[#allocation5 + $0x1578] sm:$0xff]  ;;  %v228_v20 = vld [vmem:[#allocation5 + $0x570] sm:$0xff] }
 0x3b5   :  { %4199 = vmatprep.subr.mxu1 %v1939_v22  ;;  %4129 = vmatpush2.msra.mxu0 %v1426_v23  ;;  %v740_v22 = vld [vmem:[#allocation5 + $0x1570] sm:$0xff]  ;;  %v213_v23 = vld [vmem:[#allocation5 + $0x4f8] sm:$0xff] }
 0x3b6   :  { %4200 = vmatpush2.msra.mxu1 %v1938_v25  ;;  %4130 = vmatprep.subr.mxu0 %v1411_v27  ;;  %v725_v25 = vld [vmem:[#allocation5 + $0x14f8] sm:$0xff]  ;;  %v212_v27 = vld [vmem:[#allocation5 + $0x4f0] sm:$0xff] }
 0x3b7   :  { %4201 = vmatprep.subr.mxu1 %v1923_v28  ;;  %4131 = vmatpush2.msra.mxu0 %v1410_v30  ;;  %v724_v28 = vld [vmem:[#allocation5 + $0x14f0] sm:$0xff]  ;;  %v197_v30 = vld [vmem:[#allocation5 + $0x478] sm:$0xff] }
 0x3b8   :  { %4202 = vmatpush2.msra.mxu1 %v1922_v5  ;;  %4132 = vmatprep.subr.mxu0 %v1395_v32  ;;  %v709_v5 = vld [vmem:[#allocation5 + $0x1478] sm:$0xff]  ;;  %v196_v32 = vld [vmem:[#allocation5 + $0x470] sm:$0xff] }
 0x3b9   :  { %4203 = vmatprep.subr.mxu1 %v1907_v24  ;;  %4133 = vmatpush2.msra.mxu0 %v1394_v33  ;;  %v708_v24 = vld [vmem:[#allocation5 + $0x1470] sm:$0xff]  ;;  %v181_v33 = vld [vmem:[#allocation5 + $0x3f8] sm:$0xff] }
 0x3ba   :  { %4204 = vmatpush2.msra.mxu1 %v1906_v34  ;;  %4134 = vmatprep.subr.mxu0 %v1379_v36  ;;  %v693_v34 = vld [vmem:[#allocation5 + $0x13f8] sm:$0xff]  ;;  %v180_v36 = vld [vmem:[#allocation5 + $0x3f0] sm:$0xff] }
 0x3bb   :  { %4205 = vmatprep.subr.mxu1 %v1891_v37  ;;  %4135 = vmatpush2.msra.mxu0 %v1378_v38  ;;  %v692_v37 = vld [vmem:[#allocation5 + $0x13f0] sm:$0xff]  ;;  %v165_v38 = vld [vmem:[#allocation5 + $0x378] sm:$0xff] }
 0x3bc   :  { %4206 = vmatpush2.msra.mxu1 %v1890_v40  ;;  %4136 = vmatprep.subr.mxu0 %v1363_v43  ;;  %v677_v40 = vld [vmem:[#allocation5 + $0x1378] sm:$0xff]  ;;  %v164_v43 = vld [vmem:[#allocation5 + $0x370] sm:$0xff] }
 0x3bd   :  { %4207 = vmatprep.subr.mxu1 %v1875_v45  ;;  %4137 = vmatpush2.msra.mxu0 %v1362_v31  ;;  %v676_v45 = vld [vmem:[#allocation5 + $0x1370] sm:$0xff]  ;;  %v149_v31 = vld [vmem:[#allocation5 + $0x2f8] sm:$0xff] }
 0x3be   :  { %4208 = vmatpush2.msra.mxu1 %v1874_v46  ;;  %4138 = vmatprep.subr.mxu0 %v1347_v49  ;;  %v661_v46 = vld [vmem:[#allocation5 + $0x12f8] sm:$0xff]  ;;  %v148_v49 = vld [vmem:[#allocation5 + $0x2f0] sm:$0xff] }
 0x3bf   :  { %4209 = vmatprep.subr.mxu1 %v1859_v50  ;;  %4139 = vmatpush2.msra.mxu0 %v1346_v51  ;;  %v660_v50 = vld [vmem:[#allocation5 + $0x12f0] sm:$0xff]  ;;  %v133_v51 = vld [vmem:[#allocation5 + $0x278] sm:$0xff] }
 0x3c0   :  { %4140 = vmatprep.mubr.f32.mxu0 %v4773_v26  ;;  %4210 = vmatpush2.msra.mxu1 %v1858_v53  ;;  %v645_v53 = vld [vmem:[#allocation5 + $0x1278] sm:$0xff] }
 0x3c1   :  { %4141 = vmatmul.mubr.f32.vlgmr.msra.gmra.mxu0 %v4766_v16  ;;  %4211 = vmatprep.mubr.f32.mxu1 %v4777_v29 }
 0x3c2   :  { %4218 = vmatprep.subr.mxu0 %v309_v56  ;;  %4289 = vmatprep.subr.mxu1 %v821_v57  ;;  %v132_v56 = vld [vmem:[#allocation5 + $0x270] sm:$0xff] }
 0x3c3   :  { %4212 = vmatmul.mubr.f32.vlgmr.msra.gmra.mxu1 %v4769_v21  ;;  %4219 = vmatpush1.msra.mxu0 %v308_v59  ;;  %v644_v57 = vld [vmem:[#allocation5 + $0x1270] sm:$0xff]  ;;  %v117_v59 = vld [vmem:[#allocation5 + $0x1f8] sm:$0xff] }
 0x3c4   :  { %4290 = vmatpush1.msra.mxu1 %v820_v60  ;;  %4220 = vmatprep.subr.mxu0 %v293_v44  ;;  %v629_v60 = vld [vmem:[#allocation5 + $0x11f8] sm:$0xff]  ;;  %v116_v44 = vld [vmem:[#allocation5 + $0x1f0] sm:$0xff] }
 0x3c5   :  { %4291 = vmatprep.subr.mxu1 %v805_v61  ;;  %4221 = vmatpush1.msra.mxu0 %v292_v63  ;;  %v628_v61 = vld [vmem:[#allocation5 + $0x11f0] sm:$0xff]  ;;  %v101_v63 = vld [vmem:[#allocation5 + $0x178] sm:$0xff] }
 0x3c6   :  { %4292 = vmatpush1.msra.mxu1 %v804_v2  ;;  %4222 = vmatprep.subr.mxu0 %v277_v42  ;;  %v613_v2 = vld [vmem:[#allocation5 + $0x1178] sm:$0xff]  ;;  %v100_v42 = vld [vmem:[#allocation5 + $0x170] sm:$0xff] }
 0x3c7   :  { %4293 = vmatprep.subr.mxu1 %v789_v4  ;;  %4223 = vmatpush1.msra.mxu0 %v276_v6  ;;  %v612_v4 = vld [vmem:[#allocation5 + $0x1170] sm:$0xff]  ;;  %v85_v6 = vld [vmem:[#allocation5 + $0xf8] sm:$0xff] }
 0x3c8   :  { %4294 = vmatpush1.msra.mxu1 %v788_v7  ;;  %4224 = vmatprep.subr.mxu0 %v261_v9  ;;  %v597_v7 = vld [vmem:[#allocation5 + $0x10f8] sm:$0xff]  ;;  %v84_v9 = vld [vmem:[#allocation5 + $0xf0] sm:$0xff] }
 0x3c9   :  { %4295 = vmatprep.subr.mxu1 %v773_v10  ;;  %4225 = vmatpush1.msra.mxu0 %v260_v13  ;;  %v596_v10 = vld [vmem:[#allocation5 + $0x10f0] sm:$0xff]  ;;  %v69_v13 = vld [vmem:[#allocation5 + $0x78] sm:$0xff] }
 0x3ca   :  { %4296 = vmatpush1.msra.mxu1 %v772_v58  ;;  %4226 = vmatprep.subr.mxu0 %v245_v35  ;;  %v581_v58 = vld [vmem:[#allocation5 + $0x1078] sm:$0xff]  ;;  %v68_v35 = vld [vmem:[#allocation5 + $0x70] sm:$0xff] }
 0x3cb   :  { %4297 = vmatprep.subr.mxu1 %v757_v14  ;;  %4227 = vmatpush1.msra.mxu0 %v244_v15  ;;  %v580_v14 = vld [vmem:[#allocation5 + $0x1070] sm:$0xff]  ;;  %v565_v15 = vld [vmem:[#allocation5 + $0xff8] sm:$0xff] }
 0x3cc   :  { %4298 = vmatpush1.msra.mxu1 %v756_v17  ;;  %4228 = vmatprep.subr.mxu0 %v229_v18  ;;  %v1077_v17 = vld [vmem:[#allocation5 + $0x1ff8] sm:$0xff]  ;;  %v564_v18 = vld [vmem:[#allocation5 + $0xff0] sm:$0xff] }
 0x3cd   :  { %4299 = vmatprep.subr.mxu1 %v741_v19  ;;  %4229 = vmatpush1.msra.mxu0 %v228_v20  ;;  %v1076_v19 = vld [vmem:[#allocation5 + $0x1ff0] sm:$0xff]  ;;  %v549_v20 = vld [vmem:[#allocation5 + $0xf78] sm:$0xff] }
 0x3ce   :  { %4300 = vmatpush1.msra.mxu1 %v740_v22  ;;  %4230 = vmatprep.subr.mxu0 %v213_v23  ;;  %v1061_v22 = vld [vmem:[#allocation5 + $0x1f78] sm:$0xff]  ;;  %v548_v23 = vld [vmem:[#allocation5 + $0xf70] sm:$0xff] }
 0x3cf   :  { %4301 = vmatprep.subr.mxu1 %v725_v25  ;;  %4231 = vmatpush1.msra.mxu0 %v212_v27  ;;  %v1060_v25 = vld [vmem:[#allocation5 + $0x1f70] sm:$0xff]  ;;  %v533_v27 = vld [vmem:[#allocation5 + $0xef8] sm:$0xff] }
 0x3d0   :  { %4302 = vmatpush1.msra.mxu1 %v724_v28  ;;  %4232 = vmatprep.subr.mxu0 %v197_v30  ;;  %v1045_v28 = vld [vmem:[#allocation5 + $0x1ef8] sm:$0xff]  ;;  %v532_v30 = vld [vmem:[#allocation5 + $0xef0] sm:$0xff] }
 0x3d1   :  { %4303 = vmatprep.subr.mxu1 %v709_v5  ;;  %4233 = vmatpush1.msra.mxu0 %v196_v32  ;;  %v1044_v5 = vld [vmem:[#allocation5 + $0x1ef0] sm:$0xff]  ;;  %v517_v32 = vld [vmem:[#allocation5 + $0xe78] sm:$0xff] }
 0x3d2   :  { %4304 = vmatpush1.msra.mxu1 %v708_v24  ;;  %4234 = vmatprep.subr.mxu0 %v181_v33  ;;  %v1029_v24 = vld [vmem:[#allocation5 + $0x1e78] sm:$0xff]  ;;  %v4883_v33 = vpop.f32.mrf.mxu0 }
 0x3d3   :  { %4305 = vmatprep.subr.mxu1 %v693_v34  ;;  %4235 = vmatpush1.msra.mxu0 %v180_v36  ;;  %v516_v34 = vld [vmem:[#allocation5 + $0xe70] sm:$0xff] }
 0x3d4   :  { %4306 = vmatpush1.msra.mxu1 %v692_v37  ;;  %4236 = vmatprep.subr.mxu0 %v165_v38  ;;  %v1028_v36 = vld [vmem:[#allocation5 + $0x1e70] sm:$0xff]  ;;  %v501_v37 = vld [vmem:[#allocation5 + $0xdf8] sm:$0xff] }
 0x3d5   :  { %4307 = vmatprep.subr.mxu1 %v677_v40  ;;  %4237 = vmatpush1.msra.mxu0 %v164_v43  ;;  %v1013_v38 = vld [vmem:[#allocation5 + $0x1df8] sm:$0xff]  ;;  %v500_v40 = vld [vmem:[#allocation5 + $0xdf0] sm:$0xff] }
 0x3d6   :  { %4308 = vmatpush1.msra.mxu1 %v676_v45  ;;  %4238 = vmatprep.subr.mxu0 %v149_v31  ;;  %v1012_v43 = vld [vmem:[#allocation5 + $0x1df0] sm:$0xff]  ;;  %v485_v45 = vld [vmem:[#allocation5 + $0xd78] sm:$0xff] }
 0x3d7   :  { %4309 = vmatprep.subr.mxu1 %v661_v46  ;;  %4239 = vmatpush1.msra.mxu0 %v148_v49  ;;  %v997_v31 = vld [vmem:[#allocation5 + $0x1d78] sm:$0xff]  ;;  %v4885_v46 = vpop.f32.mrf.mxu1  ;;  %v3434_v49 = vpop.f32.mrf.mxu0 }
 0x3d8   :  { %4310 = vmatpush1.msra.mxu1 %v660_v50  ;;  %4240 = vmatprep.subr.mxu0 %v133_v51  ;;  %v484_v50 = vld [vmem:[#allocation5 + $0xd70] sm:$0xff] }
 0x3d9   :  { %4311 = vmatprep.subr.mxu1 %v645_v53  ;;  %4241 = vmatpush1.msra.mxu0 %v132_v56  ;;  %v996_v51 = vld [vmem:[#allocation5 + $0x1d70] sm:$0xff]  ;;  %v469_v53 = vld [vmem:[#allocation5 + $0xcf8] sm:$0xff] }
 0x3da   :  { %4312 = vmatpush1.msra.mxu1 %v644_v57  ;;  %4242 = vmatprep.subr.mxu0 %v117_v59  ;;  %v981_v56 = vld [vmem:[#allocation5 + $0x1cf8] sm:$0xff]  ;;  %v4887_v57 = vld [vmem:[#allocation7 + $0x8] sm:$0xff]  ;;  %v4889_v59 = vpop.f32.mrf.mxu0 }
 0x3db   :  { %4313 = vmatprep.subr.mxu1 %v629_v60  ;;  %4243 = vmatpush1.msra.mxu0 %v116_v44  ;;  %v468_v60 = vld [vmem:[#allocation5 + $0xcf0] sm:$0xff] }
 0x3dc   :  { %4314 = vmatpush1.msra.mxu1 %v628_v61  ;;  %4244 = vmatprep.subr.mxu0 %v101_v63  ;;  %v980_v44 = vld [vmem:[#allocation5 + $0x1cf0] sm:$0xff]  ;;  %v453_v61 = vld [vmem:[#allocation5 + $0xc78] sm:$0xff] }
 0x3dd   :  { %4315 = vmatprep.subr.mxu1 %v613_v2  ;;  %4245 = vmatpush1.msra.mxu0 %v100_v42  ;;  %v965_v63 = vld [vmem:[#allocation5 + $0x1c78] sm:$0xff]  ;;  %v3505_v2 = vpop.f32.mrf.mxu1  ;;  %v452_v42 = vld [vmem:[#allocation5 + $0xc70] sm:$0xff] }
 0x3de   :  { %4316 = vmatpush1.msra.mxu1 %v612_v4  ;;  %4246 = vmatprep.subr.mxu0 %v85_v6  ;;  %v964_v4 = vld [vmem:[#allocation5 + $0x1c70] sm:$0xff]  ;;  %v2145_v6 = vrot.slane %v4887_v57, %v2112_v39 }
 0x3df   :  { %4317 = vmatprep.subr.mxu1 %v597_v7  ;;  %4247 = vmatpush1.msra.mxu0 %v84_v9  ;;  %v437_v7 = vld [vmem:[#allocation5 + $0xbf8] sm:$0xff] }
 0x3e0   :  { %4318 = vmatpush1.msra.mxu1 %v596_v10  ;;  %4248 = vmatprep.subr.mxu0 %v69_v13  ;;  %v949_v9 = vld [vmem:[#allocation5 + $0x1bf8] sm:$0xff]  ;;  %v4894_v10 = vpop.f32.mrf.mxu1  ;;  %v3576_v13 = vpop.f32.mrf.mxu0 }
 0x3e1   :  { %4319 = vmatprep.subr.mxu1 %v581_v58  ;;  %4249 = vmatpush1.msra.mxu0 %v68_v35  ;;  %v436_v58 = vld [vmem:[#allocation5 + $0xbf0] sm:$0xff] }
 0x3e2   :  { %4320 = vmatpush1.msra.mxu1 %v580_v14  ;;  %4250 = vmatprep.subr.mxu0 %v565_v15  ;;  %v948_v35 = vld [vmem:[#allocation5 + $0x1bf0] sm:$0xff]  ;;  %v2141_v14 = vrot.slane %v4887_v57, %v2108_v47  ;;  %v421_v15 = vld [vmem:[#allocation5 + $0xb78] sm:$0xff]  ;;  %v3716_v39 = vpop.f32.mrf.mxu0 }
 0x3e3   :  { %4321 = vmatprep.subr.mxu1 %v1077_v17  ;;  %4251 = vmatpush2.msra.mxu0 %v564_v18  ;;  %v933_v17 = vld [vmem:[#allocation5 + $0x1b78] sm:$0xff]  ;;  %v420_v18 = vld [vmem:[#allocation5 + $0xb70] sm:$0xff] }
 0x3e4   :  { %4322 = vmatpush2.msra.mxu1 %v1076_v19  ;;  %4252 = vmatprep.subr.mxu0 %v549_v20  ;;  %v932_v19 = vld [vmem:[#allocation5 + $0x1b70] sm:$0xff]  ;;  %v3435_v20 = vadd.f32 %v3434_v49, %v2145_v6 }
 0x3e5   :  { %4323 = vmatprep.subr.mxu1 %v1061_v22  ;;  %4253 = vmatpush2.msra.mxu0 %v548_v23  ;;  %v2149_v22 = vrot.slane %v4887_v57, %v2116_v55  ;;  %v405_v23 = vld [vmem:[#allocation5 + $0xaf8] sm:$0xff]  ;;  %v404_v47 = vld [vmem:[#allocation5 + $0xaf0] sm:$0xff] }
 0x3e6   :  { %4324 = vmatpush2.msra.mxu1 %v1060_v25  ;;  %4254 = vmatprep.subr.mxu0 %v533_v27  ;;  %v917_v25 = vld [vmem:[#allocation5 + $0x1af8] sm:$0xff]  ;;  %v3647_v27 = vpop.f32.mrf.mxu1 }
 0x3e7   :  { %4325 = vmatprep.subr.mxu1 %v1045_v28  ;;  %4255 = vmatpush2.msra.mxu0 %v532_v30  ;;  %v916_v28 = vld [vmem:[#allocation5 + $0x1af0] sm:$0xff]  ;;  %v3433_v30 = vadd.f32 %v4883_v33, %v2141_v14  ;;  %v885_v33 = vld [vmem:[#allocation5 + $0x19f8] sm:$0xff] }
 0x3e8   :  { %4326 = vmatpush2.msra.mxu1 %v1044_v5  ;;  %4256 = vmatprep.subr.mxu0 %v517_v32  ;;  %v2153_v5 = vrot.slane %v4887_v57, %v2120_v0  ;;  %v389_v32 = vld [vmem:[#allocation5 + $0xa78] sm:$0xff]  ;;  %v3787_v55 = vpop.f32.mrf.mxu1  ;;  %v884_v0 = vld [vmem:[#allocation5 + $0x19f0] sm:$0xff] }
 0x3e9   :  { %4327 = vmatprep.subr.mxu1 %v1029_v24  ;;  %4257 = vmatpush2.msra.mxu0 %v516_v34  ;;  %v901_v24 = vld [vmem:[#allocation5 + $0x1a78] sm:$0xff]  ;;  %v3718_v34 = vpop.f32.mrf.mxu0 }
 0x3ea   :  { %4328 = vmatpush2.msra.mxu1 %v1028_v36  ;;  %4258 = vmatprep.subr.mxu0 %v501_v37  ;;  %v388_v36 = vld [vmem:[#allocation5 + $0xa70] sm:$0xff] }
 0x3eb   :  { %4329 = vmatprep.subr.mxu1 %v1013_v38  ;;  %4259 = vmatpush2.msra.mxu0 %v500_v40  ;;  %v900_v37 = vld [vmem:[#allocation5 + $0x1a70] sm:$0xff]  ;;  %v3506_v38 = vadd.f32 %v3505_v2, %v3435_v20  ;;  %v3717_v40 = vadd.f32 %v3716_v39, %v2149_v22  ;;  %v341_v2 = vld [vmem:[#allocation5 + $0x8f8] sm:$0xff] }
 0x3ec   :  { %4330 = vmatpush2.msra.mxu1 %v1012_v43  ;;  %4260 = vmatprep.subr.mxu0 %v485_v45  ;;  %v373_v43 = vld [vmem:[#allocation5 + $0x9f8] sm:$0xff]  ;;  %v372_v45 = vld [vmem:[#allocation5 + $0x9f0] sm:$0xff] }
 0x3ed   :  { %4331 = vmatprep.subr.mxu1 %v997_v31  ;;  %4261 = vmatpush2.msra.mxu0 %v484_v50  ;;  %v3504_v31 = vadd.f32 %v4885_v46, %v3433_v30  ;;  %v3577_v49 = vadd.f32 %v3576_v13, %v3506_v38  ;;  %v3719_v50 = vadd.f32 %v3718_v34, %v2153_v5  ;;  %v340_v46 = vld [vmem:[#allocation5 + $0x8f0] sm:$0xff]  ;;  %v325_v13 = vld [vmem:[#allocation5 + $0x878] sm:$0xff] }
 0x3ee   :  { %4332 = vmatpush2.msra.mxu1 %v996_v51  ;;  %4262 = vmatprep.subr.mxu0 %v469_v53  ;;  %v357_v51 = vld [vmem:[#allocation5 + $0x978] sm:$0xff]  ;;  %v836_v39 = vld [vmem:[#allocation5 + $0x1870] sm:$0xff] }
 0x3ef   :  { %4333 = vmatprep.subr.mxu1 %v981_v56  ;;  %4263 = vmatpush2.msra.mxu0 %v468_v60  ;;  %v869_v53 = vld [vmem:[#allocation5 + $0x1978] sm:$0xff]  ;;  %v3789_v56 = vpop.f32.mrf.mxu1  ;;  %v356_v60 = vld [vmem:[#allocation5 + $0x970] sm:$0xff] }
 0x3f0   :  { %4334 = vmatpush2.msra.mxu1 %v980_v44  ;;  %4264 = vmatprep.subr.mxu0 %v453_v61  ;;  %v868_v44 = vld [vmem:[#allocation5 + $0x1970] sm:$0xff]  ;;  %v3575_v61 = vadd.f32 %v4889_v59, %v3504_v31  ;;  %v1829_v30 = vld [vmem:[#allocation5 + $0x3778] sm:$0xff] }
 0x3f1   :  { %4335 = vmatprep.subr.mxu1 %v965_v63  ;;  %4265 = vmatpush2.msra.mxu0 %v452_v42  ;;  %v3788_v63 = vadd.f32 %v3787_v55, %v3717_v40  ;;  %v853_v42 = vld [vmem:[#allocation5 + $0x18f8] sm:$0xff]  ;;  %v324_v59 = vld [vmem:[#allocation5 + $0x870] sm:$0xff] }
 0x3f2   :  { %4336 = vmatpush2.msra.mxu1 %v964_v4  ;;  %4266 = vmatprep.subr.mxu0 %v437_v7  ;;  %v852_v4 = vld [vmem:[#allocation5 + $0x18f0] sm:$0xff]  ;;  %v3648_v7 = vadd.f32 %v3647_v27, %v3577_v49  ;;  %v1813_v34 = vld [vmem:[#allocation5 + $0x36f8] sm:$0xff] }
 0x3f3   :  { %4337 = vmatprep.subr.mxu1 %v949_v9  ;;  %4267 = vmatpush2.msra.mxu0 %v436_v58  ;;  %v3790_v9 = vadd.f32 %v3789_v56, %v3719_v50  ;;  %v837_v58 = vld [vmem:[#allocation5 + $0x1878] sm:$0xff]  ;;  %v1780_v31 = vld [vmem:[#allocation5 + $0x35f0] sm:$0xff] }
 0x3f4   :  { %4338 = vmatpush2.msra.mxu1 %v948_v35  ;;  %4268 = vmatprep.subr.mxu0 %v421_v15  ;;  %v1285_v38 = vld [vmem:[#allocation5 + $0x2678] sm:$0xff] }
 0x3f5   :  { %4339 = vmatprep.subr.mxu1 %v933_v17  ;;  %4269 = vmatpush2.msra.mxu0 %v420_v18  ;;  %v3646_v17 = vadd.f32 %v4894_v10, %v3575_v61  ;;  %v1844_v10 = vld [vmem:[#allocation5 + $0x37f0] sm:$0xff]  ;;  %v1797_v40 = vld [vmem:[#allocation5 + $0x3678] sm:$0xff] }
 0x3f6   :  { %4340 = vmatpush2.msra.mxu1 %v932_v19  ;;  %4270 = vmatprep.subr.mxu0 %v405_v23  ;;  %v1333_v19 = vld [vmem:[#allocation5 + $0x27f8] sm:$0xff]  ;;  %v1748_v61 = vld [vmem:[#allocation5 + $0x34f0] sm:$0xff] }
 0x3f7   :  { %4341 = vmatprep.subr.mxu1 %v917_v25  ;;  %4271 = vmatpush2.msra.mxu0 %v404_v47  ;;  %v4552_v22 = vcombine.low %v3646_v17, %v3648_v7  ;;  %v1845_v23 = vld [vmem:[#allocation5 + $0x37f8] sm:$0xff]  ;;  %v1332_v47 = vld [vmem:[#allocation5 + $0x27f0] sm:$0xff] }
 0x3f8   :  { %4342 = vmatpush2.msra.mxu1 %v916_v28  ;;  %4272 = vmatprep.subr.mxu0 %v389_v32  ;;  %v1317_v28 = vld [vmem:[#allocation5 + $0x2778] sm:$0xff]  ;;  %v1316_v32 = vld [vmem:[#allocation5 + $0x2770] sm:$0xff] }
 0x3f9   :  { %4343 = vmatprep.subr.mxu1 %v901_v24  ;;  %4273 = vmatpush2.msra.mxu0 %v388_v36  ;;  %v1828_v24 = vld [vmem:[#allocation5 + $0x3770] sm:$0xff]  ;;  %v1253_v49 = vld [vmem:[#allocation5 + $0x2578] sm:$0xff] }
 0x3fa   :  { %4344 = vmatpush2.msra.mxu1 %v900_v37  ;;  %4274 = vmatprep.subr.mxu0 %v373_v43  ;;  %v1812_v36 = vld [vmem:[#allocation5 + $0x36f0] sm:$0xff]  ;;  %v1765_v50 = vld [vmem:[#allocation5 + $0x3578] sm:$0xff] }
 0x3fb   :  { %4345 = vmatprep.subr.mxu1 %v885_v33  ;;  %4275 = vmatpush2.msra.mxu0 %v372_v45  ;;  %v1796_v43 = vld [vmem:[#allocation5 + $0x3670] sm:$0xff]  ;;  %v1269_v33 = vld [vmem:[#allocation5 + $0x25f8] sm:$0xff] }
 0x3fc   :  { %4346 = vmatpush2.msra.mxu1 %v884_v0  ;;  %4276 = vmatprep.subr.mxu0 %v357_v51  ;;  %v1781_v45 = vld [vmem:[#allocation5 + $0x35f8] sm:$0xff]  ;;  %v1268_v0 = vld [vmem:[#allocation5 + $0x25f0] sm:$0xff] }
 0x3fd   :  { %4347 = vmatprep.subr.mxu1 %v869_v53  ;;  %v3858_v6 = vpop.f32.mrf.mxu0  ;;  %4277 = vmatpush2.msra.mxu0 %v356_v60  ;;  %v1252_v51 = vld [vmem:[#allocation5 + $0x2570] sm:$0xff]  ;;  %v1237_v56 = vld [vmem:[#allocation5 + $0x24f8] sm:$0xff] }
 0x3fe   :  { %4348 = vmatpush2.msra.mxu1 %v868_v44  ;;  %v3859_v35 = vadd.f32 %v3858_v6, %v3788_v63  ;;  %4278 = vmatprep.subr.mxu0 %v341_v2  ;;  %v1764_v53 = vld [vmem:[#allocation5 + $0x3570] sm:$0xff]  ;;  %v1749_v60 = vld [vmem:[#allocation5 + $0x34f8] sm:$0xff] }
 0x3ff   :  { %4349 = vmatprep.subr.mxu1 %v853_v42  ;;  %v3929_v14 = vpop.f32.mrf.mxu1  ;;  %v3860_v15 = vpop.f32.mrf.mxu0  ;;  %4279 = vmatpush2.msra.mxu0 %v340_v46  ;;  %v1236_v44 = vld [vmem:[#allocation5 + $0x24f0] sm:$0xff]  ;;  %v1221_v63 = vld [vmem:[#allocation5 + $0x2478] sm:$0xff] }
 0x400   :  { %4350 = vmatpush2.msra.mxu1 %v852_v4  ;;  %v3861_v18 = vadd.f32 %v3860_v15, %v3790_v9  ;;  %4280 = vmatprep.subr.mxu0 %v325_v13  ;;  %v3930_v25 = vadd.f32 %v3929_v14, %v3859_v35  ;;  %v1733_v2 = vld [vmem:[#allocation5 + $0x3478] sm:$0xff]  ;;  %v1220_v42 = vld [vmem:[#allocation5 + $0x2470] sm:$0xff] }
 0x401   :  { %4351 = vmatprep.subr.mxu1 %v837_v58  ;;  %v3931_v20 = vpop.f32.mrf.mxu1  ;;  %4281 = vmatpush2.msra.mxu0 %v324_v59  ;;  %v1732_v46 = vld [vmem:[#allocation5 + $0x3470] sm:$0xff]  ;;  %v1205_v4 = vld [vmem:[#allocation5 + $0x23f8] sm:$0xff] }
 0x402   :  { %4282 = vmatprep.mubr.f32.mxu0 %v4755_v8  ;;  %v3932_v27 = vadd.f32 %v3931_v20, %v3861_v18  ;;  %4352 = vmatpush2.msra.mxu1 %v836_v39  ;;  %v4560_v8 = vrot.slane %v4552_v22, %v4745_v52  ;;  %v1717_v6 = vld [vmem:[#allocation5 + $0x33f8] sm:$0xff]  ;;  %v1204_v7 = vld [vmem:[#allocation5 + $0x23f0] sm:$0xff] }
 0x403   :  { %4283 = vmatmul.mubr.f32.vlgmr.msra.gmra.mxu0 %v4748_v62  ;;  %4353 = vmatprep.mubr.f32.mxu1 %v4759_v11  ;;  %v1301_v62 = vld [vmem:[#allocation5 + $0x26f8] sm:$0xff]  ;;  %v1300_v11 = vld [vmem:[#allocation5 + $0x26f0] sm:$0xff] }
 0x404   :  { %4360 = vmatprep.subr.mxu0 %v1333_v19  ;;  %v4553_v5 = vcombine.low %v3930_v25, %v3932_v27  ;;  %4431 = vmatprep.subr.mxu1 %v1845_v23  ;;  %v1716_v9 = vld [vmem:[#allocation5 + $0x33f0] sm:$0xff]  ;;  %v1189_v13 = vld [vmem:[#allocation5 + $0x2378] sm:$0xff] }
 0x405   :  { %4354 = vmatmul.mubr.f32.vlgmr.msra.gmra.mxu1 %v4751_v3  ;;  %4361 = vmatpush1.msra.mxu0 %v1332_v47  ;;  %v1284_v3 = vld [vmem:[#allocation5 + $0x2670] sm:$0xff]  ;;  %v1701_v58 = vld [vmem:[#allocation5 + $0x3378] sm:$0xff] }
 0x406   :  { %4432 = vmatpush1.msra.mxu1 %v1844_v10  ;;  %v4567_v55 = vrot.slane %v4553_v5, %v4745_v52  ;;  %4362 = vmatprep.subr.mxu0 %v1317_v28  ;;  %v1188_v35 = vld [vmem:[#allocation5 + $0x2370] sm:$0xff]  ;;  %v1173_v14 = vld [vmem:[#allocation5 + $0x22f8] sm:$0xff] }
 0x407   :  { %4433 = vmatprep.subr.mxu1 %v1829_v30  ;;  %4363 = vmatpush1.msra.mxu0 %v1316_v32  ;;  %v1700_v59 = vld [vmem:[#allocation5 + $0x3370] sm:$0xff]  ;;  %v1685_v15 = vld [vmem:[#allocation5 + $0x32f8] sm:$0xff] }
 0x408   :  { %v4568_v37 = vcombine.low %v4560_v8, %v4567_v55  ;;  %4434 = vmatpush1.msra.mxu1 %v1828_v24  ;;  %4364 = vmatprep.subr.mxu0 %v1301_v62  ;;  %v1172_v17 = vld [vmem:[#allocation5 + $0x22f0] sm:$0xff]  ;;  %v1157_v18 = vld [vmem:[#allocation5 + $0x2278] sm:$0xff] }
 0x409   :  { %4435 = vmatprep.subr.mxu1 %v1813_v34  ;;  %4365 = vmatpush1.msra.mxu0 %v1300_v11  ;;  %v1684_v39 = vld [vmem:[#allocation5 + $0x32f0] sm:$0xff]  ;;  %v1669_v19 = vld [vmem:[#allocation5 + $0x3278] sm:$0xff] }
 0x40a   :  { %4592 = vst [vmem:[#allocation8 + $0x10] sm:$0xff] %v4568_v37  ;;  %4436 = vmatpush1.msra.mxu1 %v1812_v36  ;;  %4366 = vmatprep.subr.mxu0 %v1285_v38  ;;  %v1156_v20 = vld [vmem:[#allocation5 + $0x2270] sm:$0xff]  ;;  %v1141_v23 = vld [vmem:[#allocation5 + $0x21f8] sm:$0xff] }
 0x40b   :  { %4437 = vmatprep.subr.mxu1 %v1797_v40  ;;  %4367 = vmatpush1.msra.mxu0 %v1284_v3  ;;  %v1668_v22 = vld [vmem:[#allocation5 + $0x3270] sm:$0xff]  ;;  %v1653_v25 = vld [vmem:[#allocation5 + $0x31f8] sm:$0xff] }
 0x40c   :  { %4438 = vmatpush1.msra.mxu1 %v1796_v43  ;;  %4368 = vmatprep.subr.mxu0 %v1269_v33  ;;  %v1140_v27 = vld [vmem:[#allocation5 + $0x21f0] sm:$0xff]  ;;  %v1125_v10 = vld [vmem:[#allocation5 + $0x2178] sm:$0xff] }
 0x40d   :  { %4439 = vmatprep.subr.mxu1 %v1781_v45  ;;  %4369 = vmatpush1.msra.mxu0 %v1268_v0  ;;  %v1652_v47 = vld [vmem:[#allocation5 + $0x31f0] sm:$0xff]  ;;  %v1637_v28 = vld [vmem:[#allocation5 + $0x3178] sm:$0xff] }
 0x40e   :  { %4440 = vmatpush1.msra.mxu1 %v1780_v31  ;;  %4370 = vmatprep.subr.mxu0 %v1253_v49  ;;  %v1124_v30 = vld [vmem:[#allocation5 + $0x2170] sm:$0xff]  ;;  %v1109_v32 = vld [vmem:[#allocation5 + $0x20f8] sm:$0xff] }
 0x40f   :  { %4441 = vmatprep.subr.mxu1 %v1765_v50  ;;  %4371 = vmatpush1.msra.mxu0 %v1252_v51  ;;  %v1636_v5 = vld [vmem:[#allocation5 + $0x3170] sm:$0xff]  ;;  %v1621_v24 = vld [vmem:[#allocation5 + $0x30f8] sm:$0xff] }
 0x410   :  { %4442 = vmatpush1.msra.mxu1 %v1764_v53  ;;  %4372 = vmatprep.subr.mxu0 %v1237_v56  ;;  %v1108_v8 = vld [vmem:[#allocation5 + $0x20f0] sm:$0xff]  ;;  %v1093_v62 = vld [vmem:[#allocation5 + $0x2078] sm:$0xff] }
 0x411   :  { %4443 = vmatprep.subr.mxu1 %v1749_v60  ;;  %4373 = vmatpush1.msra.mxu0 %v1236_v44  ;;  %v1620_v55 = vld [vmem:[#allocation5 + $0x30f0] sm:$0xff]  ;;  %v1605_v34 = vld [vmem:[#allocation5 + $0x3078] sm:$0xff] }
 0x412   :  { %4444 = vmatpush1.msra.mxu1 %v1748_v61  ;;  %4374 = vmatprep.subr.mxu0 %v1221_v63  ;;  %v1092_v11 = vld [vmem:[#allocation5 + $0x2070] sm:$0xff]  ;;  %v1589_v37 = vld [vmem:[#allocation5 + $0x2ff8] sm:$0xff] }
 0x413   :  { %4445 = vmatprep.subr.mxu1 %v1733_v2  ;;  %4375 = vmatpush1.msra.mxu0 %v1220_v42  ;;  %v1604_v36 = vld [vmem:[#allocation5 + $0x3070] sm:$0xff]  ;;  %v2101_v38 = vld [vmem:[#allocation5 + $0x3ff8] sm:$0xff] }
 0x414   :  { %4446 = vmatpush1.msra.mxu1 %v1732_v46  ;;  %4376 = vmatprep.subr.mxu0 %v1205_v4  ;;  %v1588_v40 = vld [vmem:[#allocation5 + $0x2ff0] sm:$0xff]  ;;  %v1573_v43 = vld [vmem:[#allocation5 + $0x2f78] sm:$0xff] }
 0x415   :  { %4447 = vmatprep.subr.mxu1 %v1717_v6  ;;  %4377 = vmatpush1.msra.mxu0 %v1204_v7  ;;  %v2100_v3 = vld [vmem:[#allocation5 + $0x3ff0] sm:$0xff]  ;;  %v2085_v33 = vld [vmem:[#allocation5 + $0x3f78] sm:$0xff] }
 0x416   :  { %4448 = vmatpush1.msra.mxu1 %v1716_v9  ;;  %4378 = vmatprep.subr.mxu0 %v1189_v13  ;;  %v1572_v45 = vld [vmem:[#allocation5 + $0x2f70] sm:$0xff]  ;;  %v1557_v31 = vld [vmem:[#allocation5 + $0x2ef8] sm:$0xff] }
 0x417   :  { %4449 = vmatprep.subr.mxu1 %v1701_v58  ;;  %4379 = vmatpush1.msra.mxu0 %v1188_v35  ;;  %v2084_v0 = vld [vmem:[#allocation5 + $0x3f70] sm:$0xff]  ;;  %v2069_v49 = vld [vmem:[#allocation5 + $0x3ef8] sm:$0xff] }
 0x418   :  { %4450 = vmatpush1.msra.mxu1 %v1700_v59  ;;  %4380 = vmatprep.subr.mxu0 %v1173_v14  ;;  %v1556_v50 = vld [vmem:[#allocation5 + $0x2ef0] sm:$0xff]  ;;  %v1541_v53 = vld [vmem:[#allocation5 + $0x2e78] sm:$0xff] }
 0x419   :  { %4451 = vmatprep.subr.mxu1 %v1685_v15  ;;  %4381 = vmatpush1.msra.mxu0 %v1172_v17  ;;  %v2068_v51 = vld [vmem:[#allocation5 + $0x3ef0] sm:$0xff]  ;;  %v2053_v56 = vld [vmem:[#allocation5 + $0x3e78] sm:$0xff] }
 0x41a   :  { %4452 = vmatpush1.msra.mxu1 %v1684_v39  ;;  %4382 = vmatprep.subr.mxu0 %v1157_v18  ;;  %v1540_v60 = vld [vmem:[#allocation5 + $0x2e70] sm:$0xff]  ;;  %v1525_v61 = vld [vmem:[#allocation5 + $0x2df8] sm:$0xff] }
 0x41b   :  { %4453 = vmatprep.subr.mxu1 %v1669_v19  ;;  %4383 = vmatpush1.msra.mxu0 %v1156_v20  ;;  %v2052_v44 = vld [vmem:[#allocation5 + $0x3e70] sm:$0xff]  ;;  %v2037_v63 = vld [vmem:[#allocation5 + $0x3df8] sm:$0xff] }
 0x41c   :  { %4454 = vmatpush1.msra.mxu1 %v1668_v22  ;;  %4384 = vmatprep.subr.mxu0 %v1141_v23  ;;  %v1524_v2 = vld [vmem:[#allocation5 + $0x2df0] sm:$0xff]  ;;  %v1509_v46 = vld [vmem:[#allocation5 + $0x2d78] sm:$0xff] }
 0x41d   :  { %4455 = vmatprep.subr.mxu1 %v1653_v25  ;;  %4385 = vmatpush1.msra.mxu0 %v1140_v27  ;;  %v2036_v42 = vld [vmem:[#allocation5 + $0x3df0] sm:$0xff]  ;;  %v2021_v4 = vld [vmem:[#allocation5 + $0x3d78] sm:$0xff] }
 0x41e   :  { %4456 = vmatpush1.msra.mxu1 %v1652_v47  ;;  %4386 = vmatprep.subr.mxu0 %v1125_v10  ;;  %v1508_v6 = vld [vmem:[#allocation5 + $0x2d70] sm:$0xff]  ;;  %v1493_v9 = vld [vmem:[#allocation5 + $0x2cf8] sm:$0xff] }
 0x41f   :  { %4457 = vmatprep.subr.mxu1 %v1637_v28  ;;  %4387 = vmatpush1.msra.mxu0 %v1124_v30  ;;  %v2020_v7 = vld [vmem:[#allocation5 + $0x3d70] sm:$0xff]  ;;  %v2005_v13 = vld [vmem:[#allocation5 + $0x3cf8] sm:$0xff] }
 0x420   :  { %4458 = vmatpush1.msra.mxu1 %v1636_v5  ;;  %4388 = vmatprep.subr.mxu0 %v1109_v32  ;;  %v1492_v58 = vld [vmem:[#allocation5 + $0x2cf0] sm:$0xff]  ;;  %v1477_v59 = vld [vmem:[#allocation5 + $0x2c78] sm:$0xff] }
 0x421   :  { %4459 = vmatprep.subr.mxu1 %v1621_v24  ;;  %4389 = vmatpush1.msra.mxu0 %v1108_v8  ;;  %v2004_v35 = vld [vmem:[#allocation5 + $0x3cf0] sm:$0xff]  ;;  %v1989_v14 = vld [vmem:[#allocation5 + $0x3c78] sm:$0xff] }
 0x422   :  { %4460 = vmatpush1.msra.mxu1 %v1620_v55  ;;  %4390 = vmatprep.subr.mxu0 %v1093_v62  ;;  %v1476_v15 = vld [vmem:[#allocation5 + $0x2c70] sm:$0xff]  ;;  %v1461_v39 = vld [vmem:[#allocation5 + $0x2bf8] sm:$0xff] }
 0x423   :  { %4461 = vmatprep.subr.mxu1 %v1605_v34  ;;  %4391 = vmatpush1.msra.mxu0 %v1092_v11  ;;  %v1988_v17 = vld [vmem:[#allocation5 + $0x3c70] sm:$0xff]  ;;  %v1973_v18 = vld [vmem:[#allocation5 + $0x3bf8] sm:$0xff] }
 0x424   :  { %4462 = vmatpush1.msra.mxu1 %v1604_v36  ;;  %4392 = vmatprep.subr.mxu0 %v1589_v37  ;;  %v1460_v19 = vld [vmem:[#allocation5 + $0x2bf0] sm:$0xff]  ;;  %v1445_v22 = vld [vmem:[#allocation5 + $0x2b78] sm:$0xff] }
 0x425   :  { %4463 = vmatprep.subr.mxu1 %v2101_v38  ;;  %4393 = vmatpush2.msra.mxu0 %v1588_v40  ;;  %v1972_v20 = vld [vmem:[#allocation5 + $0x3bf0] sm:$0xff]  ;;  %v1957_v23 = vld [vmem:[#allocation5 + $0x3b78] sm:$0xff] }
 0x426   :  { %4464 = vmatpush2.msra.mxu1 %v2100_v3  ;;  %4394 = vmatprep.subr.mxu0 %v1573_v43  ;;  %v1444_v25 = vld [vmem:[#allocation5 + $0x2b70] sm:$0xff]  ;;  %v1429_v47 = vld [vmem:[#allocation5 + $0x2af8] sm:$0xff] }
 0x427   :  { %4465 = vmatprep.subr.mxu1 %v2085_v33  ;;  %4395 = vmatpush2.msra.mxu0 %v1572_v45  ;;  %v1956_v27 = vld [vmem:[#allocation5 + $0x3b70] sm:$0xff]  ;;  %v1941_v10 = vld [vmem:[#allocation5 + $0x3af8] sm:$0xff] }
 0x428   :  { %4466 = vmatpush2.msra.mxu1 %v2084_v0  ;;  %4396 = vmatprep.subr.mxu0 %v1557_v31  ;;  %v1428_v28 = vld [vmem:[#allocation5 + $0x2af0] sm:$0xff]  ;;  %v1413_v5 = vld [vmem:[#allocation5 + $0x2a78] sm:$0xff] }
 0x429   :  { %4467 = vmatprep.subr.mxu1 %v2069_v49  ;;  %4397 = vmatpush2.msra.mxu0 %v1556_v50  ;;  %v1940_v30 = vld [vmem:[#allocation5 + $0x3af0] sm:$0xff]  ;;  %v1925_v32 = vld [vmem:[#allocation5 + $0x3a78] sm:$0xff] }
 0x42a   :  { %4468 = vmatpush2.msra.mxu1 %v2068_v51  ;;  %4398 = vmatprep.subr.mxu0 %v1541_v53  ;;  %v1412_v24 = vld [vmem:[#allocation5 + $0x2a70] sm:$0xff]  ;;  %v1397_v55 = vld [vmem:[#allocation5 + $0x29f8] sm:$0xff] }
 0x42b   :  { %4469 = vmatprep.subr.mxu1 %v2053_v56  ;;  %4399 = vmatpush2.msra.mxu0 %v1540_v60  ;;  %v1924_v8 = vld [vmem:[#allocation5 + $0x3a70] sm:$0xff]  ;;  %v1909_v62 = vld [vmem:[#allocation5 + $0x39f8] sm:$0xff] }
 0x42c   :  { %4470 = vmatpush2.msra.mxu1 %v2052_v44  ;;  %4400 = vmatprep.subr.mxu0 %v1525_v61  ;;  %v1396_v34 = vld [vmem:[#allocation5 + $0x29f0] sm:$0xff]  ;;  %v1381_v36 = vld [vmem:[#allocation5 + $0x2978] sm:$0xff]  ;;  %v2161_v61 = vrot.slane %v4887_v57, %v2128_v48 }
 0x42d   :  { %4471 = vmatprep.subr.mxu1 %v2037_v63  ;;  %4401 = vmatpush2.msra.mxu0 %v1524_v2  ;;  %v1908_v11 = vld [vmem:[#allocation5 + $0x39f0] sm:$0xff]  ;;  %v1893_v37 = vld [vmem:[#allocation5 + $0x3978] sm:$0xff] }
 0x42e   :  { %4472 = vmatpush2.msra.mxu1 %v2036_v42  ;;  %4402 = vmatprep.subr.mxu0 %v1509_v46  ;;  %v1380_v38 = vld [vmem:[#allocation5 + $0x2970] sm:$0xff]  ;;  %v1365_v3 = vld [vmem:[#allocation5 + $0x28f8] sm:$0xff] }
 0x42f   :  { %4473 = vmatprep.subr.mxu1 %v2021_v4  ;;  %4403 = vmatpush2.msra.mxu0 %v1508_v6  ;;  %v1892_v40 = vld [vmem:[#allocation5 + $0x3970] sm:$0xff]  ;;  %v1877_v43 = vld [vmem:[#allocation5 + $0x38f8] sm:$0xff]  ;;  %v2169_v4 = vrot.slane %v4887_v57, %v2136_v12 }
 0x430   :  { %4474 = vmatpush2.msra.mxu1 %v2020_v7  ;;  %4404 = vmatprep.subr.mxu0 %v1493_v9  ;;  %v1364_v33 = vld [vmem:[#allocation5 + $0x28f0] sm:$0xff]  ;;  %v1349_v0 = vld [vmem:[#allocation5 + $0x2878] sm:$0xff] }
 0x431   :  { %4475 = vmatprep.subr.mxu1 %v2005_v13  ;;  %4405 = vmatpush2.msra.mxu0 %v1492_v58  ;;  %v1876_v45 = vld [vmem:[#allocation5 + $0x38f0] sm:$0xff]  ;;  %v1861_v31 = vld [vmem:[#allocation5 + $0x3878] sm:$0xff] }
 0x432   :  { %4476 = vmatpush2.msra.mxu1 %v2004_v35  ;;  %4406 = vmatprep.subr.mxu0 %v1477_v59  ;;  %v1348_v49 = vld [vmem:[#allocation5 + $0x2870] sm:$0xff] }
 0x433   :  { %4477 = vmatprep.subr.mxu1 %v1989_v14  ;;  %4407 = vmatpush2.msra.mxu0 %v1476_v15  ;;  %v1860_v50 = vld [vmem:[#allocation5 + $0x3870] sm:$0xff] }
 0x434   :  { %4478 = vmatpush2.msra.mxu1 %v1988_v17  ;;  %4408 = vmatprep.subr.mxu0 %v1461_v39 }
 0x435   :  { %4479 = vmatprep.subr.mxu1 %v1973_v18  ;;  %4409 = vmatpush2.msra.mxu0 %v1460_v19 }
 0x436   :  { %4480 = vmatpush2.msra.mxu1 %v1972_v20  ;;  %4410 = vmatprep.subr.mxu0 %v1445_v22 }
 0x437   :  { %4481 = vmatprep.subr.mxu1 %v1957_v23  ;;  %4411 = vmatpush2.msra.mxu0 %v1444_v25 }
 0x438   :  { %4482 = vmatpush2.msra.mxu1 %v1956_v27  ;;  %4412 = vmatprep.subr.mxu0 %v1429_v47 }
 0x439   :  { %4483 = vmatprep.subr.mxu1 %v1941_v10  ;;  %4413 = vmatpush2.msra.mxu0 %v1428_v28 }
 0x43a   :  { %4484 = vmatpush2.msra.mxu1 %v1940_v30  ;;  %4414 = vmatprep.subr.mxu0 %v1413_v5 }
 0x43b   :  { %4485 = vmatprep.subr.mxu1 %v1925_v32  ;;  %4415 = vmatpush2.msra.mxu0 %v1412_v24 }
 0x43c   :  { %4486 = vmatpush2.msra.mxu1 %v1924_v8  ;;  %4416 = vmatprep.subr.mxu0 %v1397_v55 }
 0x43d   :  { %4487 = vmatprep.subr.mxu1 %v1909_v62  ;;  %4417 = vmatpush2.msra.mxu0 %v1396_v34 }
 0x43e   :  { %4488 = vmatpush2.msra.mxu1 %v1908_v11  ;;  %4418 = vmatprep.subr.mxu0 %v1381_v36 }
 0x43f   :  { %4489 = vmatprep.subr.mxu1 %v1893_v37  ;;  %4419 = vmatpush2.msra.mxu0 %v1380_v38  ;;  %v4000_v51 = vpop.f32.mrf.mxu0 }
 0x440   :  { %4490 = vmatpush2.msra.mxu1 %v1892_v40  ;;  %4420 = vmatprep.subr.mxu0 %v1365_v3 }
 0x441   :  { %4491 = vmatprep.subr.mxu1 %v1877_v43  ;;  %4421 = vmatpush2.msra.mxu0 %v1364_v33  ;;  %v4071_v53 = vpop.f32.mrf.mxu1  ;;  %v4002_v56 = vpop.f32.mrf.mxu0 }
 0x442   :  { %4492 = vmatpush2.msra.mxu1 %v1876_v45  ;;  %4422 = vmatprep.subr.mxu0 %v1349_v0  ;;  %v4003_v42 = vadd.f32 %v4002_v56, %v2161_v61 }
 0x443   :  { %4493 = vmatprep.subr.mxu1 %v1861_v31  ;;  %4423 = vmatpush2.msra.mxu0 %v1348_v49  ;;  %v4073_v44 = vpop.f32.mrf.mxu1 }
 0x444   :  { %4424 = vmatprep.mubr.f32.mxu0 %v4773_v26  ;;  %4494 = vmatpush2.msra.mxu1 %v1860_v50  ;;  %v2157_v26 = vrot.slane %v4887_v57, %v2124_v54  ;;  %v4074_v7 = vadd.f32 %v4073_v44, %v4003_v42 }
 0x445   :  { %4495 = vmatprep.mubr.f32.mxu1 %v4777_v29  ;;  %4425 = vmatmul.mubr.f32.vlgmr.msra.gmra.mxu0 %v4766_v16  ;;  %v2165_v16 = vrot.slane %v4887_v57, %v2132_v1 }
 0x446   :  { %4496 = vmatmul.mubr.f32.vlgmr.msra.gmra.mxu1 %v4769_v21  ;;  %v4001_v46 = vadd.f32 %v4000_v51, %v2157_v26 }
 0x448   :  { %v4072_v13 = vadd.f32 %v4071_v53, %v4001_v46 }
 0x481   :  { %v4142_v60 = vpop.f32.mrf.mxu0 }
 0x482   :  { %v4143_v59 = vadd.f32 %v4142_v60, %v4072_v13 }
 0x483   :  { %v4213_v63 = vpop.f32.mrf.mxu1  ;;  %v4144_v2 = vpop.f32.mrf.mxu0 }
 0x484   :  { %v4145_v58 = vadd.f32 %v4144_v2, %v4074_v7  ;;  %v4214_v20 = vadd.f32 %v4213_v63, %v4143_v59 }
 0x485   :  { %v4215_v21 = vpop.f32.mrf.mxu1 }
 0x486   :  { %v4216_v39 = vadd.f32 %v4215_v21, %v4145_v58 }
 0x488   :  { %v4569_v12 = vcombine.low %v4214_v20, %v4216_v39 }
 0x48a   :  { %v4577_v27 = vrot.slane %v4569_v12, %v4745_v52 }
 0x4c3   :  { %v4284_v29 = vpop.f32.mrf.mxu0 }
 0x4c4   :  { %v4285_v9 = vadd.f32 %v4284_v29, %v2165_v16 }
 0x4c5   :  { %v4355_v6 = vpop.f32.mrf.mxu1  ;;  %v4286_v48 = vpop.f32.mrf.mxu0 }
 0x4c6   :  { %v4287_v35 = vadd.f32 %v4286_v48, %v2169_v4  ;;  %v4356_v14 = vadd.f32 %v4355_v6, %v4285_v9 }
 0x4c7   :  { %v4357_v54 = vpop.f32.mrf.mxu1 }
 0x4c8   :  { %v4358_v1 = vadd.f32 %v4357_v54, %v4287_v35 }
 0x505   :  { %v4426_v15 = vpop.f32.mrf.mxu0 }
 0x506   :  { %v4497_v17 = vpop.f32.mrf.mxu1  ;;  %v4427_v18 = vadd.f32 %v4426_v15, %v4356_v14 }
 0x507   :  { %v4428_v19 = vpop.f32.mrf.mxu0 }
 0x508   :  { %v4429_v41 = vadd.f32 %v4428_v19, %v4358_v1  ;;  %v4499_v22 = vpop.f32.mrf.mxu1  ;;  %v4498_v57 = vadd.f32 %v4497_v17, %v4427_v18 }
 0x50a   :  { %v4500_v23 = vadd.f32 %v4499_v22, %v4429_v41 }
 0x50c   :  { %v4570_v25 = vcombine.low %v4498_v57, %v4500_v23 }
 0x50e   :  { %v4584_v47 = vrot.slane %v4570_v25, %v4745_v52 }
 0x510   :  { %v4585_v10 = vcombine.low %v4577_v27, %v4584_v47 }
 0x512   :  { %4593 = vst [vmem:[#allocation8 + $0x18] sm:$0xff] %v4585_v10 }
 0x513   :  { %4691 = shalt.err (!%p4688_p5)
}
 0x514   :  { %4603 = dma.vmem_to_hbm [thread:$0]  %s4601_s2, 512, %s4939_s3, [#allocation4]  }
 0x515   :  { %4704 = dma.done.wait [#allocation4], 512  }
 0x516   :  { %4705 = vsyncadd [#allocation4], 4294966784 }
 0x517   :  { %4607 = vsyncpa [#allocation3], 1 }
 0x518   :  { %4608 = vsyncpa [#allocation6], 1 }
 0x519   :  { %4609 = vsyncpa [#allocation4], 1 }

</bundles_post_ra>
